<compile_context>
chip_gen: v5e
topology: v5e:2x2
jax: 0.10.0
libtpu: 0.0.40
codegen_flags: <defaults>
</compile_context>

<pallas_src>
import numpy as np
import jax
import jax.numpy as jnp
from jax.experimental import pallas as pl
from jax.experimental.pallas import tpu as pltpu


# ---------------------------------------------------------------------------
# Pallas kernel: fused conv_last (3x3 conv + folded BN + ReLU + 1x1 conv)
# + log-softmax over the class axis, tiled over pixel rows.
# ---------------------------------------------------------------------------
def ppm_head_kernel(x_ref, w3_ref, b3_ref, w4_ref, b4_ref, out_ref):
    # x_ref   : (1, TH, W+2, 3*Ctot) bf16  zero-padded features; the three
    #                                      vertical taps are stacked on the
    #                                      channel (K) axis.
    # w3_ref  : (3, 3*Ctot, D)       bf16  per horizontal tap, vertical taps
    #                                      stacked on K (BN pre-folded).
    # b3_ref  : (1, D)               f32   folded BN shift
    # w4_ref  : (D, NC)              f32   final 1x1 conv weight
    # b4_ref  : (1, NC)              f32   final 1x1 conv bias
    # out_ref : (1, NC, TH*W)        f32   log-probs, class-major (lane-dense)
    _, th, wp2, c3 = x_ref.shape
    w = wp2 - 2
    tm = th * w

    # 3x3 conv as 3 horizontal taps of a K=3*Ctot matmul (vertical taps are
    # pre-stacked on the contraction axis).  f32 accumulation on the MXU.
    acc = jnp.dot(x_ref[0, :, 0:w, :].reshape(tm, c3), w3_ref[0],
                  preferred_element_type=jnp.float32)
    for c in range(1, 3):
        xs = x_ref[0, :, c:c + w, :].reshape(tm, c3)        # in-VMEM width shift
        acc = acc + jnp.dot(xs, w3_ref[c],
                            preferred_element_type=jnp.float32)

    # BatchNorm folded into (w3, b3); ReLU.  Dropout2d(0.1) is identity in
    # eval mode.  TODO(synk): training-mode channel dropout not implemented.
    h = jnp.maximum(acc + b3_ref[...], 0.0)

    # Final 1x1 conv -> class logits (tiny matmul, kept in f32).
    logits = jnp.dot(h, w4_ref[...],
                     preferred_element_type=jnp.float32) + b4_ref[...]

    # Numerically stable log-softmax over the class axis.
    m = jnp.max(logits, axis=-1, keepdims=True)
    shifted = logits - m
    lse = jnp.log(jnp.sum(jnp.exp(shifted), axis=-1, keepdims=True))
    logp = shifted - lse                                    # (TM, NC)

    # Class-major store: lane axis = TM pixels -> dense vst, NCHW-ready.
    out_ref[0, :, :] = jnp.transpose(logp)


def ppm_head_pallas(x_stack, w3s, b3, w4, b4, *, tile_rows,
                    vmem_limit_bytes=64 * 1024 * 1024):
    n, h, wp2, c3 = x_stack.shape
    w = wp2 - 2
    d = w3s.shape[2]
    nc = w4.shape[1]
    assert h % tile_rows == 0, "H must be divisible by tile_rows"
    tm = tile_rows * w
    assert tm % 128 == 0 or tm == h * w, "output lane tile must be 128-aligned"

    x_spec = pl.BlockSpec((1, tile_rows, wp2, c3), lambda i, j: (i, j, 0, 0))
    rep = lambda shape: pl.BlockSpec(shape, lambda i, j: tuple(0 for _ in shape))

    return pl.pallas_call(
        ppm_head_kernel,
        out_shape=jax.ShapeDtypeStruct((n, nc, h * w), jnp.float32),
        grid_spec=pltpu.PrefetchScalarGridSpec(
            num_scalar_prefetch=0,
            grid=(n, h // tile_rows),          # (image, row-tile): independent
            in_specs=[x_spec,
                      rep((3, c3, d)),         # resident, constant index map
                      rep((1, d)),
                      rep((d, nc)),
                      rep((1, nc))],
            out_specs=pl.BlockSpec((1, nc, tm), lambda i, j: (i, 0, j)),
        ),
        compiler_params=pltpu.CompilerParams(
            dimension_semantics=("parallel", "parallel"),
            vmem_limit_bytes=vmem_limit_bytes),
    )(x_stack, w3s, b3, w4, b4)


def _pick_tile_rows(h, w, c3, d, nc, vmem_limit_bytes, tm_target=2048):
    """Largest row-tile whose VMEM working set fits the budget and whose
    flattened pixel count keeps the output lane axis 128-aligned."""
    budget = vmem_limit_bytes // 2

    def est(tr):
        tm = tr * w
        return (2 * tr * (w + 2) * c3 * 2            # input block, 2 buffers, bf16
                + 2 * nc * tm * 4                    # output block, 2 buffers, f32
                + 2 * (3 * c3 * d * 2 + d * nc * 4 + d * 4 + nc * 4)   # weights
                + 3 * tm * c3 * 2                    # in-kernel width-slice copies
                + 3 * tm * d * 4 + tm * nc * 4)      # acc / hidden / logits

    valid = [tr for tr in range(1, h + 1)
             if h % tr == 0 and ((tr * w) % 128 == 0 or tr == h)]
    fitting = [tr for tr in valid if est(tr) <= budget and tr * w <= tm_target]
    return max(fitting) if fitting else min(valid)


# ---------------------------------------------------------------------------
# Plain-JAX glue: pyramid branches + BN folding + channel-stacked padded view.
# ---------------------------------------------------------------------------
def _adaptive_pool_matrix(out_size, in_size):
    """(out, in) averaging matrix matching nn.AdaptiveAvgPool2d bin rules."""
    p = np.zeros((out_size, in_size), np.float32)
    for i in range(out_size):
        start = (i * in_size) // out_size
        end = -((-(i + 1) * in_size) // out_size)    # ceil((i+1)*in/out)
        p[i, start:end] = 1.0 / (end - start)
    return p


def _bilinear_matrix(out_size, in_size):
    """(out, in) weights matching F.interpolate(bilinear, align_corners=False)."""
    u = np.zeros((out_size, in_size), np.float32)
    scale = in_size / out_size
    for o in range(out_size):
        src = max((o + 0.5) * scale - 0.5, 0.0)
        i0 = min(int(np.floor(src)), in_size - 1)
        lam = src - i0
        i1 = min(i0 + 1, in_size - 1)
        u[o, i0] += 1.0 - lam
        u[o, i1] += lam
    return u


def _fold_bn(bn, eps=1e-5):
    scale = bn["gamma"] / jnp.sqrt(bn["var"] + eps)
    shift = bn["beta"] - bn["mean"] * scale
    return scale, shift


def _prepare_head_inputs(conv_out, params, pool_scales):
    conv5 = conv_out[-1]                                    # (N, fc_dim, H, W)
    _, _, h, w = conv5.shape
    x = jnp.transpose(conv5, (0, 2, 3, 1)).astype(jnp.float32)    # NHWC

    # PPM pyramid branches (tiny: <= 6x6 spatial), eval-mode BN folded.
    feats = [x]
    for s, br in zip(pool_scales, params["ppm"]):
        ph = jnp.asarray(_adaptive_pool_matrix(s, h))
        pw = jnp.asarray(_adaptive_pool_matrix(s, w))
        pooled = jnp.einsum('ph,qw,nhwc->npqc', ph, pw, x)
        scale, shift = _fold_bn(br["bn"])
        y = jnp.maximum(
            jnp.einsum('npqc,cd->npqd', pooled, br["w"] * scale[None, :]) + shift,
            0.0)
        uh = jnp.asarray(_bilinear_matrix(h, s))
        uw = jnp.asarray(_bilinear_matrix(w, s))
        feats.append(jnp.einsum('hp,wq,npqd->nhwd', uh, uw, y))

    # Concat + zero pad; stack the three vertical taps on the channel axis so
    # the kernel only needs in-VMEM horizontal shifts.
    xc = jnp.concatenate(feats, axis=-1).astype(jnp.bfloat16)     # (N,H,W,Ctot)
    xp = jnp.pad(xc, ((0, 0), (1, 1), (1, 1), (0, 0)))            # (N,H+2,W+2,C)
    # x_stack[n, i, j, r*C + k] = xp[n, i + r, j, k]
    x_stack = jnp.concatenate([xp[:, 0:h], xp[:, 1:h + 1], xp[:, 2:h + 2]],
                              axis=-1)                            # (N,H,W+2,3C)

    # Fold conv_last BatchNorm into the 3x3 conv weights; stack the vertical
    # taps on the contraction axis to match x_stack:
    #   w3s[c, r*C + k, d] = w3[r, c, k, d]
    scale2, shift2 = _fold_bn(params["bn2"])
    w3 = (params["w3"] * scale2[None, None, None, :]).astype(jnp.bfloat16)
    w3s = jnp.concatenate([w3[0], w3[1], w3[2]], axis=1)          # (3, 3C, D)
    b3 = shift2.reshape(1, -1).astype(jnp.float32)
    w4 = params["w4"].astype(jnp.float32)
    b4 = params["b4"].reshape(1, -1).astype(jnp.float32)

    kernel_inputs = (x_stack, w3s, b3, w4, b4)
    ref_inputs = (xp, w3, b3, w4, b4)         # unstacked, for independent check
    return kernel_inputs, ref_inputs


def ppm_forward(conv_out, params, *, pool_scales=(1, 2, 3, 6),
                seg_size=None, use_softmax=False, tile_rows=None,
                vmem_limit_bytes=64 * 1024 * 1024):
    """PPM.forward on the default branch: returns log_softmax(x, dim=1), NCHW."""
    # TODO(synk): use_softmax/segSize inference branch (bilinear resize to
    # segSize followed by softmax(dim=1)) is not implemented.
    del seg_size, use_softmax
    conv5 = conv_out[-1]
    n, _, h, w = conv5.shape
    (x_stack, w3s, b3, w4, b4), _ = _prepare_head_inputs(conv_out, params,
                                                         pool_scales)
    if tile_rows is None:
        tile_rows = _pick_tile_rows(h, w, x_stack.shape[-1], w3s.shape[-1],
                                    w4.shape[1], vmem_limit_bytes)
    logp = ppm_head_pallas(x_stack, w3s, b3, w4, b4, tile_rows=tile_rows,
                           vmem_limit_bytes=vmem_limit_bytes)     # (N, NC, H*W)
    nc = w4.shape[1]
    return logp.reshape(n, nc, h, w)


# ---------------------------------------------------------------------------
# Pure-JAX reference for the fused head, computed from the UNSTACKED padded
# map (independently verifies the channel-stacking used by the kernel).
# ---------------------------------------------------------------------------
def ppm_head_reference(xp, w3, b3, w4, b4):
    n, hp2, wp2, _ = xp.shape
    h, w = hp2 - 2, wp2 - 2
    d = w3.shape[3]
    acc = jnp.zeros((n, h, w, d), jnp.float32)
    for r in range(3):
        for c in range(3):
            acc = acc + jnp.einsum(
                'nhwc,cd->nhwd',
                xp[:, r:r + h, c:c + w, :].astype(jnp.float32),
                w3[r, c].astype(jnp.float32))
    hid = jnp.maximum(acc + b3[0], 0.0)
    logits = jnp.einsum('nhwd,dk->nhwk', hid, w4) + b4[0]
    logp = jax.nn.log_softmax(logits, axis=-1)
    return jnp.transpose(logp, (0, 3, 1, 2))                 # (N, NC, H, W)


# ---------------------------------------------------------------------------
# Deterministic parameter init (scaled-down PPM: fc_dim=128, D=64, 16 classes).
# ---------------------------------------------------------------------------
def init_ppm_params(key, fc_dim, red_dim, num_class, pool_scales):
    keys = iter(jax.random.split(key, 8 * len(pool_scales) + 8))

    def bn_init(dim):
        return {
            "gamma": 1.0 + 0.1 * jax.random.normal(next(keys), (dim,), jnp.float32),
            "beta": 0.1 * jax.random.normal(next(keys), (dim,), jnp.float32),
            "mean": 0.1 * jax.random.normal(next(keys), (dim,), jnp.float32),
            "var": 0.5 + jax.random.uniform(next(keys), (dim,), jnp.float32),
        }

    ppm = []
    for _ in pool_scales:
        ppm.append({
            "w": jax.random.normal(next(keys), (fc_dim, red_dim), jnp.float32)
                 / np.sqrt(fc_dim),
            "bn": bn_init(red_dim),
        })
    ctot = fc_dim + len(pool_scales) * red_dim
    return {
        "ppm": ppm,
        "w3": jax.random.normal(next(keys), (3, 3, ctot, red_dim), jnp.float32)
              / np.sqrt(9 * ctot),
        "bn2": bn_init(red_dim),
        "w4": jax.random.normal(next(keys), (red_dim, num_class), jnp.float32)
              / np.sqrt(red_dim),
        "b4": 0.01 * jax.random.normal(next(keys), (num_class,), jnp.float32),
    }


if __name__ == "__main__":
    key = jax.random.PRNGKey(0)
    k_feat, k_par = jax.random.split(key)

    N, FC_DIM, H, W = 2, 128, 16, 16      # conv5 feature map (NCHW)
    RED_DIM = 64                          # the "512" reduction dim, scaled down
    NUM_CLASS = 16                        # the "150" class count, scaled down
    POOL_SCALES = (1, 2, 3, 6)

    conv5 = jax.random.normal(k_feat, (N, FC_DIM, H, W), jnp.float32)
    conv_out = [conv5]                    # PPM only uses conv_out[-1]
    params = init_ppm_params(k_par, FC_DIM, RED_DIM, NUM_CLASS, POOL_SCALES)

    logp = ppm_forward(conv_out, params, pool_scales=POOL_SCALES)
    jax.block_until_ready(logp)

    assert logp.shape == (N, NUM_CLASS, H, W)
    lp = np.asarray(logp, dtype=np.float32)
    assert np.all(np.isfinite(lp))
    # log_softmax normalization: exp sums to 1 over the class dim
    assert np.allclose(np.exp(lp).sum(axis=1), 1.0, atol=1e-4)

    # Cross-check the fused head against a plain-JAX reference computed from
    # the unstacked padded map (same bf16-cast inputs, f32 accumulation).
    _, ref_in = _prepare_head_inputs(conv_out, params, POOL_SCALES)
    ref = np.asarray(ppm_head_reference(*ref_in), dtype=np.float32)
    assert np.allclose(lp, ref, atol=2e-2), float(np.max(np.abs(lp - ref)))

    print("KERNEL_OK")
</pallas_src>

<mosaic_0001>
module attributes {stable_mosaic.version = 11 : i64} {
  func.func @ppm_head_kernel(%arg0: i32, %arg1: i32, %arg2: memref<1x16x18x1152xbf16, #tpu.memory_space<vmem>>, %arg3: memref<3x1152x64xbf16, #tpu.memory_space<vmem>>, %arg4: memref<1x64xf32, #tpu.memory_space<vmem>>, %arg5: memref<64x16xf32, #tpu.memory_space<vmem>>, %arg6: memref<1x16xf32, #tpu.memory_space<vmem>>, %arg7: memref<1x16x256xf32, #tpu.memory_space<vmem>>) attributes {dimension_semantics = [#tpu.dimension_semantics<parallel>, #tpu.dimension_semantics<parallel>], iteration_bounds = array<i64: 2, 1>, scalar_prefetch = 0 : i64, scratch_operands = 0 : i64, tpu.core_type = #tpu.core_type<tc>, window_params = [{transform_indices = @transform_0, window_bounds = array<i64: 1, 16, 18, 1152>}, {pipeline_mode = #tpu.pipeline_mode<synchronous>, transform_indices = @transform_1, window_bounds = array<i64: 3, 1152, 64>}, {pipeline_mode = #tpu.pipeline_mode<synchronous>, transform_indices = @transform_2, window_bounds = array<i64: 1, 64>}, {pipeline_mode = #tpu.pipeline_mode<synchronous>, transform_indices = @transform_3, window_bounds = array<i64: 64, 16>}, {pipeline_mode = #tpu.pipeline_mode<synchronous>, transform_indices = @transform_4, window_bounds = array<i64: 1, 16>}, {transform_indices = @transform_5, window_bounds = array<i64: 1, 16, 256>}]} {
    %c0 = arith.constant 0 : index
    %c0_0 = arith.constant 0 : index
    %c0_1 = arith.constant 0 : index
    %c0_2 = arith.constant 0 : index
    %0 = vector.load %arg2[%c0, %c0_0, %c0_1, %c0_2] : memref<1x16x18x1152xbf16, #tpu.memory_space<vmem>>, vector<1x16x16x1152xbf16>
    %1 = vector.shape_cast %0 : vector<1x16x16x1152xbf16> to vector<16x16x1152xbf16>
    %2 = vector.shape_cast %1 : vector<16x16x1152xbf16> to vector<256x1152xbf16>
    %c0_3 = arith.constant 0 : index
    %c0_4 = arith.constant 0 : index
    %c0_5 = arith.constant 0 : index
    %3 = vector.load %arg3[%c0_3, %c0_4, %c0_5] : memref<3x1152x64xbf16, #tpu.memory_space<vmem>>, vector<1x1152x64xbf16>
    %4 = vector.shape_cast %3 : vector<1x1152x64xbf16> to vector<1152x64xbf16>
    %cst = arith.constant dense<0.000000e+00> : vector<256x64xf32>
    %5 = tpu.matmul %2, %4, %cst {dimension_numbers = #tpu.dot_dimension_numbers<[1], [0], [0], [1], [0, 0, 1, 1], [], []>} : vector<256x1152xbf16>, vector<1152x64xbf16>, vector<256x64xf32> -> vector<256x64xf32>
    %c0_6 = arith.constant 0 : index
    %c0_7 = arith.constant 0 : index
    %c1 = arith.constant 1 : index
    %c0_8 = arith.constant 0 : index
    %6 = vector.load %arg2[%c0_6, %c0_7, %c1, %c0_8] : memref<1x16x18x1152xbf16, #tpu.memory_space<vmem>>, vector<1x16x16x1152xbf16>
    %7 = vector.shape_cast %6 : vector<1x16x16x1152xbf16> to vector<16x16x1152xbf16>
    %8 = vector.shape_cast %7 : vector<16x16x1152xbf16> to vector<256x1152xbf16>
    %c1_9 = arith.constant 1 : index
    %c0_10 = arith.constant 0 : index
    %c0_11 = arith.constant 0 : index
    %9 = vector.load %arg3[%c1_9, %c0_10, %c0_11] : memref<3x1152x64xbf16, #tpu.memory_space<vmem>>, vector<1x1152x64xbf16>
    %10 = vector.shape_cast %9 : vector<1x1152x64xbf16> to vector<1152x64xbf16>
    %cst_12 = arith.constant dense<0.000000e+00> : vector<256x64xf32>
    %11 = tpu.matmul %8, %10, %cst_12 {dimension_numbers = #tpu.dot_dimension_numbers<[1], [0], [0], [1], [0, 0, 1, 1], [], []>} : vector<256x1152xbf16>, vector<1152x64xbf16>, vector<256x64xf32> -> vector<256x64xf32>
    %12 = arith.addf %5, %11 : vector<256x64xf32>
    %c0_13 = arith.constant 0 : index
    %c0_14 = arith.constant 0 : index
    %c2 = arith.constant 2 : index
    %c0_15 = arith.constant 0 : index
    %13 = vector.load %arg2[%c0_13, %c0_14, %c2, %c0_15] : memref<1x16x18x1152xbf16, #tpu.memory_space<vmem>>, vector<1x16x16x1152xbf16>
    %14 = vector.shape_cast %13 : vector<1x16x16x1152xbf16> to vector<16x16x1152xbf16>
    %15 = vector.shape_cast %14 : vector<16x16x1152xbf16> to vector<256x1152xbf16>
    %c2_16 = arith.constant 2 : index
    %c0_17 = arith.constant 0 : index
    %c0_18 = arith.constant 0 : index
    %16 = vector.load %arg3[%c2_16, %c0_17, %c0_18] : memref<3x1152x64xbf16, #tpu.memory_space<vmem>>, vector<1x1152x64xbf16>
    %17 = vector.shape_cast %16 : vector<1x1152x64xbf16> to vector<1152x64xbf16>
    %cst_19 = arith.constant dense<0.000000e+00> : vector<256x64xf32>
    %18 = tpu.matmul %15, %17, %cst_19 {dimension_numbers = #tpu.dot_dimension_numbers<[1], [0], [0], [1], [0, 0, 1, 1], [], []>} : vector<256x1152xbf16>, vector<1152x64xbf16>, vector<256x64xf32> -> vector<256x64xf32>
    %19 = arith.addf %12, %18 : vector<256x64xf32>
    %c0_20 = arith.constant 0 : index
    %c0_21 = arith.constant 0 : index
    %20 = vector.load %arg4[%c0_20, %c0_21] : memref<1x64xf32, #tpu.memory_space<vmem>>, vector<1x64xf32>
    %21 = vector.broadcast %20 : vector<1x64xf32> to vector<256x64xf32>
    %22 = arith.addf %19, %21 : vector<256x64xf32>
    %cst_22 = arith.constant 0.000000e+00 : f32
    %23 = vector.broadcast %cst_22 : f32 to vector<256x64xf32>
    %24 = arith.maximumf %22, %23 : vector<256x64xf32>
    %c0_23 = arith.constant 0 : index
    %c0_24 = arith.constant 0 : index
    %25 = vector.load %arg5[%c0_23, %c0_24] : memref<64x16xf32, #tpu.memory_space<vmem>>, vector<64x16xf32>
    %cst_25 = arith.constant dense<0.000000e+00> : vector<256x16xf32>
    %26 = tpu.matmul %24, %25, %cst_25 {dimension_numbers = #tpu.dot_dimension_numbers<[1], [0], [0], [1], [0, 0, 1, 1], [], []>} : vector<256x64xf32>, vector<64x16xf32>, vector<256x16xf32> -> vector<256x16xf32>
    %c0_26 = arith.constant 0 : index
    %c0_27 = arith.constant 0 : index
    %27 = vector.load %arg6[%c0_26, %c0_27] : memref<1x16xf32, #tpu.memory_space<vmem>>, vector<1x16xf32>
    %28 = vector.broadcast %27 : vector<1x16xf32> to vector<256x16xf32>
    %29 = arith.addf %26, %28 : vector<256x16xf32>
    %cst_28 = arith.constant dense<0xFF800000> : vector<256xf32>
    %30 = vector.multi_reduction <maximumf>, %29, %cst_28 [1] : vector<256x16xf32> to vector<256xf32>
    %31 = vector.shape_cast %30 : vector<256xf32> to vector<256x1xf32>
    %32 = vector.broadcast %31 : vector<256x1xf32> to vector<256x16xf32>
    %33 = arith.subf %29, %32 : vector<256x16xf32>
    %34 = math.exp %33 : vector<256x16xf32>
    %cst_29 = arith.constant dense<0.000000e+00> : vector<256xf32>
    %35 = vector.multi_reduction <add>, %34, %cst_29 [1] : vector<256x16xf32> to vector<256xf32>
    %36 = vector.shape_cast %35 : vector<256xf32> to vector<256x1xf32>
    %37 = math.log %36 : vector<256x1xf32>
    %38 = vector.broadcast %37 : vector<256x1xf32> to vector<256x16xf32>
    %39 = arith.subf %33, %38 : vector<256x16xf32>
    %40 = tpu.transpose %39, [1, 0] : vector<256x16xf32> -> vector<16x256xf32>
    %c0_30 = arith.constant 0 : index
    %c0_31 = arith.constant 0 : index
    %c0_32 = arith.constant 0 : index
    %41 = vector.load %arg7[%c0_30, %c0_31, %c0_32] : memref<1x16x256xf32, #tpu.memory_space<vmem>>, vector<1x16x256xf32>
    %42 = vector.shape_cast %41 : vector<1x16x256xf32> to vector<16x256xf32>
    %43 = vector.shape_cast %40 : vector<16x256xf32> to vector<1x16x256xf32>
    tpu.vector_store %arg7[%c0_30, %c0_31, %c0_32], %43 {strides = array<i32>} : memref<1x16x256xf32, #tpu.memory_space<vmem>>, vector<1x16x256xf32>,
    return
  }
  func.func @transform_0(%arg0: i32, %arg1: i32) -> (i32, i32, i32, i32) {
    %c0_i32 = arith.constant 0 : i32
    %c0_i32_0 = arith.constant 0 : i32
    %c0_i32_1 = arith.constant 0 : i32
    return %arg0, %arg1, %c0_i32, %c0_i32_0 : i32, i32, i32, i32
  }
  func.func @transform_1(%arg0: i32, %arg1: i32) -> (i32, i32, i32) {
    %c0_i32 = arith.constant 0 : i32
    %c0_i32_0 = arith.constant 0 : i32
    %c0_i32_1 = arith.constant 0 : i32
    %c0_i32_2 = arith.constant 0 : i32
    return %c0_i32, %c0_i32_0, %c0_i32_1 : i32, i32, i32
  }
  func.func @transform_2(%arg0: i32, %arg1: i32) -> (i32, i32) {
    %c0_i32 = arith.constant 0 : i32
    %c0_i32_0 = arith.constant 0 : i32
    %c0_i32_1 = arith.constant 0 : i32
    return %c0_i32, %c0_i32_0 : i32, i32
  }
  func.func @transform_3(%arg0: i32, %arg1: i32) -> (i32, i32) {
    %c0_i32 = arith.constant 0 : i32
    %c0_i32_0 = arith.constant 0 : i32
    %c0_i32_1 = arith.constant 0 : i32
    return %c0_i32, %c0_i32_0 : i32, i32
  }
  func.func @transform_4(%arg0: i32, %arg1: i32) -> (i32, i32) {
    %c0_i32 = arith.constant 0 : i32
    %c0_i32_0 = arith.constant 0 : i32
    %c0_i32_1 = arith.constant 0 : i32
    return %c0_i32, %c0_i32_0 : i32, i32
  }
  func.func @transform_5(%arg0: i32, %arg1: i32) -> (i32, i32, i32) {
    %c0_i32 = arith.constant 0 : i32
    %c0_i32_0 = arith.constant 0 : i32
    return %arg0, %c0_i32, %arg1 : i32, i32, i32
  }
}

</mosaic_0001>

<bundles_post_ra>
// kernel: tpu_custom_call.1
= control target key start
LH: loop header
LB: loop body
LE: loop exit
PB: predicated region body
PF: predicated region fallthrough
CT: control target
= control target key end

     0   :  { %10 = vsyncpa [#allocation3], 0  ;;  %s16218_s0 = inlined_call_operand.vmem [shape: bf16[2,16,18,1152], index: 0, kind: input, shape index: {}]   ;;  %s16219_s1 = inlined_call_operand.vmem [shape: bf16[3,1152,64], index: 1, kind: input, shape index: {}]   ;;  %s16220_s2 = inlined_call_operand.vmem [shape: f32[1,64], index: 2, kind: input, shape index: {}]   ;;  %s16221_s3 = inlined_call_operand.vmem [shape: f32[64,16], index: 3, kind: input, shape index: {}]   ;;  %s16222_s4 = inlined_call_operand.vmem [shape: f32[1,16], index: 4, kind: input, shape index: {}]   ;;  %s16223_s5 = inlined_call_operand.hbm [shape: f32[2,16,256], index: 5, kind: output, shape index: {}]  }
   0x1   :  { %12 = vsyncpa [#allocation3 + $0x1], 0  ;;  %s12793_s18 = smov 0   ;;  %s12795_s19 = smov 0  }
   0x2   :  { %s12797_s20 = smov 0   ;;  %s12799_s21 = smov 0  }
   0x3   :  { %s12801_s22 = smov 0   ;;  %s12803_s23 = smov 0  }
   0x4 LB: > { %s10119_s24 = sadd.s32 4294967295, %s12759_s23   ;;  %s10120_s25 = sadd.s32 4294967294, %s12759_s23   ;;  %s12759_s23 = sphi %s12803_s23, %s18_s23   ;;  %s12755_s22 = sphi %s12801_s22, %s16310_s22   ;;  %s12751_s21 = sphi %s12799_s21, %s16309_s21   ;;  %s12747_s20 = sphi %s12797_s20, %s16308_s20   ;;  %s12743_s19 = sphi %s12795_s19, %s16307_s19   ;;  %s12739_s18 = sphi %s12793_s18, %s16306_s18  }
   0x5   : > { %s30_s26 = sadd.s32 1, %s12755_s22  ;;  %s151_s27 = sadd.s32 1, %s12747_s20 }
   0x6   : > { %p32_p0 = scmp.ge.s32.totalorder %s30_s26, 2  ;;  %p161_p1 = scmp.ne.s32.totalorder %s12747_s20, %s12743_s19 }
   0x7   : > { %p162_p2 = scmp.eq.s32.totalorder %s10119_s24, 1  ;;  %p167_p3 = scmp.ne.s32.totalorder %s12743_s19, %s12739_s18 }
   0x8   : > { %s16312_s26 = smov (%p32_p0, %s30_s26), 0  ;;  %p168_p5 = scmp.eq.s32.totalorder %s10120_s25, 1 }
   0x9   : > { %p12833_p4 = por %p162_p2, %p161_p1  ;;  %s146_s29 = ssub.s32 %s12755_s22, %s16312_s26 }
   0xa   : > { %p10123_p6 = scmp.ge.s32.totalorder %s12759_s23, 1  ;;  %p149_p7 = scmp.eq.s32.totalorder %s146_s29, 0 }
   0xb   : > { %p12840_p8 = por %p168_p5, %p167_p3  ;;  %p212_p9 = scmp.lt.s32.totalorder %s12759_s23, 3 }
   0xc   : > { %s12846_s6 = scalar_select %p149_p7, %s12747_s20, %s151_s27  }
   0xd   : > { %p213_p10 = pnand %p10123_p6, %p212_p9 }
   0xf   : > { %216 = sbr.rel (%p213_p10) target bundleno = 2460 (0x99c), region = 40 }
  0x14   : > { %v12194_v0 = vld [vmem:[%s16219_s1 + $0x278] sm:$0xff]  ;;  %p246_p11 = scmp.lt.s32.totalorder %s12751_s21, 1  ;;  %v12193_v4 = vld [vmem:[%s16219_s1 + $0x270] sm:$0xff]  ;;  %v12192_v8 = vld [vmem:[%s16219_s1 + $0x268] sm:$0xff]  ;;  %vm641_vm0 = vsmask.f32 3328 }
  0x15   : > { %v12202_v1 = vld [vmem:[%s16219_s1 + $0x2b8] sm:$0xff]  ;;  %3717 = vmatpush.bf16.msra.mxu0 %v12194_v0  ;;  %v12201_v5 = vld [vmem:[%s16219_s1 + $0x2b0] sm:$0xff]  ;;  %v12200_v9 = vld [vmem:[%s16219_s1 + $0x2a8] sm:$0xff]  ;;  %vm642_vm1 = vsmask.f32 7440  ;;  %vm6727_vm3 = vcmask 1042432  }
  0x16   : > { %v12210_v2 = vld [vmem:[%s16219_s1 + $0x2f8] sm:$0xff]  ;;  %3806 = vmatpush.bf16.msra.mxu1 %v12202_v1  ;;  %s247_s25 = scalar_select %p246_p11, %s12751_s21, 1  ;;  %v12209_v6 = vld [vmem:[%s16219_s1 + $0x2f0] sm:$0xff]  ;;  %v12208_v10 = vld [vmem:[%s16219_s1 + $0x2e8] sm:$0xff]  ;;  %vm6728_vm4 = vcmask 1046532   ;;  %vm9356_vm6 = vcmask 523264  }
  0x17   : > { %v12218_v3 = vld [vmem:[%s16219_s1 + $0x338] sm:$0xff]  ;;  %3895 = vmatpush.bf16.msra.mxu2 %v12210_v2  ;;  %v12217_v7 = vld [vmem:[%s16219_s1 + $0x330] sm:$0xff]  ;;  %v12216_v11 = vld [vmem:[%s16219_s1 + $0x328] sm:$0xff]  ;;  %vm9566_vm7 = vcmask 130048   ;;  %s242_s15 = sand.u32 1, %s12743_s19   ;;  %s12331_s24 = sshll.u32 %s12751_s21, 5 }
  0x18   : > { %3984 = vmatpush.bf16.msra.mxu3 %v12218_v3  ;;  %s12332_s9 = smul.u32 1728, %s247_s25  ;;  %v12191_v12 = vld [vmem:[%s16219_s1 + $0x260] sm:$0xff]  ;;  %v12190_v30 = vld [vmem:[%s16219_s1 + $0x258] sm:$0xff]  ;;  %vm12923_vm2 = vmor %vm641_vm0, %vm642_vm1  ;;  %s10124_s16 = sshll.u32 %s242_s15, 5 }
  0x19   : > { %3718 = vmatpush.bf16.msra.mxu0 %v12193_v4  ;;  %v12199_v13 = vld [vmem:[%s16219_s1 + $0x2a0] sm:$0xff]  ;;  %v12198_v31 = vld [vmem:[%s16219_s1 + $0x298] sm:$0xff]  ;;  %v12189_v49 = vld [vmem:[%s16219_s1 + $0x250] sm:$0xff]  ;;  %s244_s17 = scalar_lea.vmem [#allocation2], %s10124_s16  ;;  %s10033_s7 = scalar_lea.hbm %s16223_s5, %s12331_s24 }
  0x1a   : > { %3807 = vmatpush.bf16.msra.mxu1 %v12201_v5  ;;  %s12889_s27 = scalar_lea.vmem %s16218_s0, %s12332_s9  ;;  %v12207_v14 = vld [vmem:[%s16219_s1 + $0x2e0] sm:$0xff]  ;;  %v12206_v34 = vld [vmem:[%s16219_s1 + $0x2d8] sm:$0xff]  ;;  %v12197_v50 = vld [vmem:[%s16219_s1 + $0x290] sm:$0xff]  ;;  %s10034_s8 = sshll.u32 %s244_s17, 4  ;;  %s10035_s8 = int_to_ptr.vmem [resolvable:$true] %s10034_s8 }
  0x1b   : > { %3896 = vmatpush.bf16.msra.mxu2 %v12209_v6  ;;  %v257_v15 = vld [vmem:[%s12889_s27] sm:$0xff]  ;;  %v561_v18 = vld [vmem:[%s12889_s27 + $0x48] sm:$0x11]  ;;  %v562_v28 = vld [vmem:[%s12889_s27 + $0x50] sm:$0x11]  ;;  %s10036_s10 = sshll.u32 %s10033_s7, 4  ;;  %s10037_s10 = int_to_ptr.hbm [resolvable:$true] %s10036_s10 }
  0x1c   : > { %3985 = vmatpush.bf16.msra.mxu3 %v12217_v7  ;;  %v12215_v16 = vld [vmem:[%s16219_s1 + $0x320] sm:$0xff]  ;;  %v645_v19 = vshrl.u32 %v257_v15, 16  ;;  %v648_v20 = vshll.u32 %v257_v15, 16  ;;  %v720_v23 = vshll.u32 %v561_v18, 16  ;;  %v258_v24 = vld [vmem:[%s12889_s27 + $0x8] sm:$0xff]  ;;  %v12214_v35 = vld [vmem:[%s16219_s1 + $0x318] sm:$0xff] }
  0x1d   : > { %3719 = vmatpush.bf16.msra.mxu0 %v12192_v8  ;;  %v262_v17 = vld [vmem:[%s12889_s27 + $0x24] sm:$0xff]  ;;  %v263_v25 = vld [vmem:[%s12889_s27 + $0x2c] sm:$0xff]  ;;  %v659_v29 = vshrl.u32 %v258_v24, 16  ;;  %v662_v38 = vshll.u32 %v258_v24, 16  ;;  %v730_v44 = vshll.u32 %v562_v28, 16  ;;  %vm14415_vm5 = vmor %vm6727_vm3, %vm6728_vm4  ;;  %s10020_s11 = scalar_lea.sflag [#allocation3], %s242_s15 }
  0x1e   : > { %3808 = vmatpush.bf16.msra.mxu1 %v12200_v9  ;;  %v654_v21 = vshll.u32 %v262_v17, 16  ;;  %v714_v22 = vshrl.u32 %v262_v17, 16  ;;  %v647_v26 = vrot.slane %v645_v19, 4  ;;  %v650_v27 = vrot.slane %v648_v20, 5  ;;  %v267_v48 = vld [vmem:[%s12889_s27 + $0x6c] sm:$0xff]  ;;  %v12203_v28 = vld [vmem:[%s16219_s1 + $0x2c0] sm:$0xff] }
  0x1f   : > { %3897 = vmatpush.bf16.msra.mxu2 %v12208_v10  ;;  %v661_v37 = vrot.slane %v659_v29, 4  ;;  %v668_v39 = vshll.u32 %v263_v25, 16  ;;  %v722_v42 = vrot.slane %v720_v23, 5  ;;  %v724_v43 = vshrl.u32 %v263_v25, 16  ;;  %v12205_v53 = vld [vmem:[%s16219_s1 + $0x2d0] sm:$0xff]  ;;  %v12188_v0 = vld [vmem:[%s16219_s1 + $0x248] sm:$0xff] }
  0x20   : > { %3986 = vmatpush.bf16.msra.mxu3 %v12216_v11  ;;  %v656_v32 = vrot.slane %v654_v21, 5  ;;  %v716_v33 = vrot.slane %v714_v22, 4  ;;  %v651_v36 = vor.u32 %v650_v27, %v647_v26  ;;  %v664_v46 = vrot.slane %v662_v38, 5  ;;  %v12213_v54 = vld [vmem:[%s16219_s1 + $0x310] sm:$0xff]  ;;  %v12196_v1 = vld [vmem:[%s16219_s1 + $0x288] sm:$0xff]  ;;  %v12187_v21 = vld [vmem:[%s16219_s1 + $0x240] sm:$0xff] }
  0x21   : > { %3720 = vmatpush.bf16.msra.mxu0 %v12191_v12  ;;  %v670_v47 = vrot.slane %v668_v39, 5  ;;  %v726_v52 = vrot.slane %v724_v43, 4  ;;  %v732_v57 = vrot.slane %v730_v44, 5  ;;  %v272_v58 = vld [vmem:[%s12889_s27 + $0x90] sm:$0xff]  ;;  %v765_v61 = vshrl.u32 %v267_v48, 16  ;;  %v12204_v5 = vld [vmem:[%s16219_s1 + $0x2c8] sm:$0xff] }
  0x22   : > { %3809 = vmatpush.bf16.msra.mxu1 %v12199_v13  ;;  %v717_v41 = vor.u32 %v716_v33, %v656_v32  ;;  %v652_v45 = vrot.slane %v651_v36, 4  ;;  %v665_v56 = vor.u32 %v664_v46, %v661_v37  ;;  %v768_v62 = vshll.u32 %v267_v48, 16  ;;  %v12212_v6 = vld [vmem:[%s16219_s1 + $0x308] sm:$0xff]  ;;  %v268_v11 = vld [vmem:[%s12889_s27 + $0x74] sm:$0xff]  ;;  %v12195_v22 = vld [vmem:[%s16219_s1 + $0x280] sm:$0xff]  ;;  %s12695_s12 = sshra.s32 %s10037_s10, 4  ;;  %s12696_s12 = int_to_ptr.hbm [resolvable:$true] %s12695_s12 }
  0x23   : > { %3898 = vmatpush.bf16.msra.mxu2 %v12207_v14  ;;  %v727_v60 = vor.u32 %v726_v52, %v670_v47  ;;  %v774_v3 = vshll.u32 %v272_v58, 16  ;;  %v834_v4 = vshrl.u32 %v272_v58, 16  ;;  %v767_v14 = vrot.slane %v765_v61, 4  ;;  %v566_v25 = vld [vmem:[%s12889_s27 + $0xb4] sm:$0x11]  ;;  %v12211_v29 = vld [vmem:[%s16219_s1 + $0x300] sm:$0xff]  ;;  %p12702_p1 = scmp.lt.s32.totalorder %s12696_s12, %s16223_s5 }
  0x24   : > { %3987 = vmatpush.bf16.msra.mxu3 %v12215_v16  ;;  %v718_v51 = vrot.slane %v717_v41, 4  ;;  %v657_v55 = vsel %vm12923_vm2, %v652_v45, %v656_v32  ;;  %v666_v63 = vrot.slane %v665_v56, 4  ;;  %v770_v15 = vrot.slane %v768_v62, 5  ;;  %v273_v16 = vld [vmem:[%s12889_s27 + $0x98] sm:$0xff]  ;;  %v12241_v61 = vld [vmem:[%s16219_s1 + $0x3f0] sm:$0xff]  ;;  %s12701_s13 = scalar_lea.hbm %s16223_s5, 64 }
  0x25   : > { %3721 = vmatpush.bf16.msra.mxu0 %v12190_v30  ;;  %v728_v2 = vrot.slane %v727_v60, 4  ;;  %v2709_v7 = vunpack.c.l.b16 %v657_v55  ;;  %v2710_v9 = vunpack.c.h.b16 %v657_v55  ;;  %v12963_v19 = vrot.slane %v774_v3, 5  ;;  %v12226_v33 = vld [vmem:[%s16219_s1 + $0x378] sm:$0xff]  ;;  %v12225_v62 = vld [vmem:[%s16219_s1 + $0x370] sm:$0xff]  ;;  %v283_v3 = vld [vmem:[%s12889_s27 + $0x104] sm:$0xff] }
  0x26   : > { %3810 = vmatpush.bf16.msra.mxu1 %v12198_v31  ;;  %v723_v59 = vsel %vm12923_vm2, %v718_v51, %v722_v42  ;;  %v671_v10 = vsel %vm12923_vm2, %v666_v63, %v670_v47  ;;  %v836_v20 = vrot.slane %v834_v4, 4  ;;  %v779_v26 = vshrl.u32 %v268_v11, 16  ;;  %v12242_v31 = vld [vmem:[%s16219_s1 + $0x3f8] sm:$0xff] }
  0x27   : > { %3899 = vmatpush.bf16.msra.mxu2 %v12206_v34  ;;  %v2718_v8 = vunpack.c.l.b16 %v723_v59  ;;  %v2719_v12 = vunpack.c.h.b16 %v723_v59  ;;  %v733_v13 = vsel %vm12923_vm2, %v728_v2, %v732_v57  ;;  %v2711_v17 = vunpack.c.l.b16 %v671_v10  ;;  %v277_v48 = vld [vmem:[%s12889_s27 + $0xd8] sm:$0xff]  ;;  %v278_v2 = vld [vmem:[%s12889_s27 + $0xe0] sm:$0xff] }
  0x28   : > { %3988 = vmatpush.bf16.msra.mxu3 %v12214_v35  ;;  %v2712_v18 = vunpack.c.h.b16 %v671_v10  ;;  %v2720_v23 = vunpack.c.l.b16 %v733_v13  ;;  %v2721_v24 = vunpack.c.h.b16 %v733_v13  ;;  %v782_v27 = vshll.u32 %v268_v11, 16  ;;  %v567_v35 = vld [vmem:[%s12889_s27 + $0xbc] sm:$0x11] }
  0x29   : > { %3722 = vmatpush.bf16.msra.mxu0 %v12189_v49  ;;  %v2997_v30 = vpack.c.b16 %v2718_v8, %v2709_v7  ;;  %v788_v32 = vshll.u32 %v273_v16, 16  ;;  %v771_v34 = vor.u32 %v770_v15, %v767_v14  ;;  %v781_v36 = vrot.slane %v779_v26, 4  ;;  %v12234_v49 = vld [vmem:[%s16219_s1 + $0x3b8] sm:$0xff] }
  0x2a   : > { %3811 = vmatpush.bf16.msra.mxu1 %v12197_v50  ;;  %v784_v37 = vrot.slane %v782_v27, 5  ;;  %v844_v38 = vshrl.u32 %v273_v16, 16  ;;  %v2998_v39 = vpack.c.b16 %v2719_v12, %v2710_v9  ;;  %v837_v41 = vor.u32 %v836_v20, %v12963_v19  ;;  %v282_v51 = vld [vmem:[%s12889_s27 + $0xfc] sm:$0xff] }
  0x2b   : > { %3900 = vmatpush.bf16.msra.mxu2 %v12205_v53  ;;  %v840_v42 = vshll.u32 %v566_v25, 16  ;;  %v790_v43 = vrot.slane %v788_v32, 5  ;;  %v2999_v44 = vpack.c.b16 %v2720_v23, %v2711_v17  ;;  %v3000_v45 = vpack.c.b16 %v2721_v24, %v2712_v18  ;;  %v571_v12 = vld [vmem:[%s12889_s27 + $0x120] sm:$0x11]  ;;  %v572_v32 = vld [vmem:[%s12889_s27 + $0x128] sm:$0x11] }
  0x2c   : > { %3989 = vmatpush.bf16.msra.mxu3 %v12213_v54  ;;  %v785_v46 = vor.u32 %v784_v37, %v781_v36  ;;  %v846_v47 = vrot.slane %v844_v38, 4  ;;  %v850_v50 = vshll.u32 %v567_v35, 16  ;;  %v772_v52 = vrot.slane %v771_v34, 4 }
  0x2d   : > { %3723 = vmatpush.bf16.msra.mxu0 %v12188_v0  ;;  %v838_v54 = vrot.slane %v837_v41, 4  ;;  %v842_v55 = vrot.slane %v840_v42, 5  ;;  %v885_v56 = vshrl.u32 %v277_v48, 16  ;;  %v888_v57 = vshll.u32 %v277_v48, 16  ;;  %v293_v48 = vld [vmem:[%s12889_s27 + $0x170] sm:$0xff] }
  0x2e   : > { %3812 = vmatpush.bf16.msra.mxu1 %v12196_v1  ;;  %v847_v53 = vor.u32 %v846_v47, %v790_v43  ;;  %v786_v58 = vrot.slane %v785_v46, 4  ;;  %v894_v59 = vshll.u32 %v282_v51, 16  ;;  %v954_v60 = vshrl.u32 %v282_v51, 16  ;;  %v12233_v1 = vld [vmem:[%s16219_s1 + $0x3b0] sm:$0xff] }
  0x2f   : > { %3901 = vmatpush.bf16.msra.mxu2 %v12204_v5  ;;  %v852_v0 = vrot.slane %v850_v50, 5  ;;  %v777_v4 = vsel %vm12923_vm2, %v772_v52, %v12963_v19  ;;  %v843_v5 = vsel %vm12923_vm2, %v838_v54, %v842_v55  ;;  %v890_v7 = vrot.slane %v888_v57, 5  ;;  %v288_v47 = vld [vmem:[%s12889_s27 + $0x14c] sm:$0xff] }
  0x30   : > { %3990 = vmatpush.bf16.msra.mxu3 %v12212_v6  ;;  %v848_v63 = vrot.slane %v847_v53, 4  ;;  %v887_v6 = vrot.slane %v885_v56, 4  ;;  %v791_v8 = vsel %vm12923_vm2, %v786_v58, %v790_v43  ;;  %v896_v9 = vrot.slane %v894_v59, 5 }
  0x31   : > { %3724 = vmatpush.bf16.msra.mxu0 %v12187_v21  ;;  %v956_v10 = vrot.slane %v954_v60, 4  ;;  %v899_v13 = vshrl.u32 %v278_v2, 16  ;;  %v902_v14 = vshll.u32 %v278_v2, 16  ;;  %v908_v15 = vshll.u32 %v283_v3, 16 }
  0x32   : > { %3813 = vmatpush.bf16.msra.mxu1 %v12195_v22  ;;  %v853_v11 = vsel %vm12923_vm2, %v848_v63, %v852_v0  ;;  %v2727_v16 = vunpack.c.l.b16 %v777_v4  ;;  %v2736_v17 = vunpack.c.l.b16 %v843_v5  ;;  %v2728_v18 = vunpack.c.h.b16 %v777_v4 }
  0x33   : > { %3902 = vmatpush.bf16.msra.mxu2 %v12203_v28  ;;  %v2737_v19 = vunpack.c.h.b16 %v843_v5  ;;  %v2729_v20 = vunpack.c.l.b16 %v791_v8  ;;  %v2730_v21 = vunpack.c.h.b16 %v791_v8  ;;  %v891_v22 = vor.u32 %v890_v7, %v887_v6  ;;  %v576_v7 = vld [vmem:[%s12889_s27 + $0x18c] sm:$0x11] }
  0x34   : > { %3991 = vmatpush.bf16.msra.mxu3 %v12211_v29  ;;  %3725 = vmatmul.bf16.vlgmr.msra.gmra.mxu0 %v2997_v30  ;;  %v964_v23 = vshrl.u32 %v283_v3, 16  ;;  %v2738_v24 = vunpack.c.l.b16 %v853_v11  ;;  %v2739_v25 = vunpack.c.h.b16 %v853_v11  ;;  %v957_v26 = vor.u32 %v956_v10, %v896_v9 }
  0x35   : > { %4073 = vmatpush.bf16.msrb.mxu0 %v12226_v33  ;;  %3814 = vmatmul.bf16.vlgmr.msra.gmra.mxu1 %v2998_v39  ;;  %v960_v27 = vshll.u32 %v571_v12, 16  ;;  %v901_v28 = vrot.slane %v899_v13, 4  ;;  %v904_v29 = vrot.slane %v902_v14, 5  ;;  %v910_v30 = vrot.slane %v908_v15, 5 }
  0x36   : > { %3903 = vmatmul.bf16.vlgmr.msra.gmra.mxu2 %v2999_v44  ;;  %4162 = vmatpush.bf16.msrb.mxu1 %v12234_v49  ;;  %v3006_v33 = vpack.c.b16 %v2736_v17, %v2727_v16  ;;  %v3007_v34 = vpack.c.b16 %v2737_v19, %v2728_v18  ;;  %v3008_v35 = vpack.c.b16 %v2738_v24, %v2729_v20  ;;  %v892_v37 = vrot.slane %v891_v22, 4  ;;  %v287_v44 = vld [vmem:[%s12889_s27 + $0x144] sm:$0xff]  ;;  %v577_v16 = vld [vmem:[%s12889_s27 + $0x194] sm:$0x11] }
  0x37   : > { %4251 = vmatpush.bf16.msrb.mxu2 %v12242_v31  ;;  %3992 = vmatmul.bf16.vlgmr.msra.gmra.mxu3 %v3000_v45  ;;  %v966_v31 = vrot.slane %v964_v23, 4  ;;  %v3009_v36 = vpack.c.b16 %v2739_v25, %v2730_v21  ;;  %v962_v38 = vrot.slane %v960_v27, 5  ;;  %v958_v39 = vrot.slane %v957_v26, 4  ;;  %v292_v45 = vld [vmem:[%s12889_s27 + $0x168] sm:$0xff]  ;;  %v297_v27 = vld [vmem:[%s12889_s27 + $0x1b0] sm:$0xff] }
  0x38   : > { %v905_v41 = vor.u32 %v904_v29, %v901_v28  ;;  %v970_v43 = vshll.u32 %v572_v32, 16  ;;  %v897_v46 = vsel %vm12923_vm2, %v892_v37, %v896_v9  ;;  %v1005_v53 = vshrl.u32 %v287_v44, 16  ;;  %v302_v28 = vld [vmem:[%s12889_s27 + $0x1d4] sm:$0xff] }
  0x39   : > { %4074 = vmatpush.bf16.msrb.mxu0 %v12225_v62  ;;  %v967_v42 = vor.u32 %v966_v31, %v910_v30  ;;  %v963_v49 = vsel %vm12923_vm2, %v958_v39, %v962_v38  ;;  %v1008_v54 = vshll.u32 %v287_v44, 16  ;;  %v1014_v55 = vshll.u32 %v292_v45, 16  ;;  %v12240_v39 = vld [vmem:[%s16219_s1 + $0x3e8] sm:$0xff]  ;;  %v303_v44 = vld [vmem:[%s12889_s27 + $0x1dc] sm:$0xff] }
  0x3a   : > { %4163 = vmatpush.bf16.msrb.mxu1 %v12233_v1  ;;  %v906_v50 = vrot.slane %v905_v41, 4  ;;  %v972_v52 = vrot.slane %v970_v43, 5  ;;  %v1074_v56 = vshrl.u32 %v292_v45, 16  ;;  %v1019_v57 = vshrl.u32 %v288_v47, 16  ;;  %v12224_v41 = vld [vmem:[%s16219_s1 + $0x368] sm:$0xff]  ;;  %v298_v43 = vld [vmem:[%s12889_s27 + $0x1b8] sm:$0xff] }
  0x3b   : > { %4252 = vmatpush.bf16.msrb.mxu2 %v12241_v61  ;;  %v968_v51 = vrot.slane %v967_v42, 4  ;;  %v1022_v58 = vshll.u32 %v288_v47, 16  ;;  %v1028_v59 = vshll.u32 %v293_v48, 16  ;;  %v1084_v60 = vshrl.u32 %v293_v48, 16  ;;  %v12232_v42 = vld [vmem:[%s16219_s1 + $0x3a8] sm:$0xff] }
  0x3c   : > { %v2745_v61 = vunpack.c.l.b16 %v897_v46  ;;  %v2746_v62 = vunpack.c.h.b16 %v897_v46  ;;  %v2754_v63 = vunpack.c.l.b16 %v963_v49  ;;  %v2755_v0 = vunpack.c.h.b16 %v963_v49 }
  0x3d   : > { %v911_v1 = vsel %vm12923_vm2, %v906_v50, %v910_v30  ;;  %v973_v2 = vsel %vm12923_vm2, %v968_v51, %v972_v52  ;;  %v1007_v3 = vrot.slane %v1005_v53, 4  ;;  %v1010_v4 = vrot.slane %v1008_v54, 5  ;;  %4075 = vmatpush.bf16.msrb.mxu0 %v12224_v41  ;;  %v581_v53 = vld [vmem:[%s12889_s27 + $0x1f8] sm:$0x11] }
  0x3e   : > { %v1016_v5 = vrot.slane %v1014_v55, 5  ;;  %v1076_v6 = vrot.slane %v1074_v56, 4  ;;  %v1021_v8 = vrot.slane %v1019_v57, 4  ;;  %v1024_v9 = vrot.slane %v1022_v58, 5  ;;  %4164 = vmatpush.bf16.msrb.mxu1 %v12232_v42 }
  0x3f   : > { %v1030_v10 = vrot.slane %v1028_v59, 5  ;;  %v1086_v11 = vrot.slane %v1084_v60, 4  ;;  %v2747_v12 = vunpack.c.l.b16 %v911_v1  ;;  %v2756_v13 = vunpack.c.l.b16 %v973_v2  ;;  %4253 = vmatpush.bf16.msrb.mxu2 %v12240_v39 }
  0x40   : > { %v2748_v14 = vunpack.c.h.b16 %v911_v1  ;;  %v2757_v15 = vunpack.c.h.b16 %v973_v2  ;;  %v1011_v17 = vor.u32 %v1010_v4, %v1007_v3  ;;  %v1077_v18 = vor.u32 %v1076_v6, %v1016_v5 }
  0x41   : > { %v1080_v19 = vshll.u32 %v576_v7, 16  ;;  %v3015_v20 = vpack.c.b16 %v2754_v63, %v2745_v61  ;;  %v3016_v21 = vpack.c.b16 %v2755_v0, %v2746_v62  ;;  %v1025_v22 = vor.u32 %v1024_v9, %v1021_v8  ;;  %v582_v9 = vld [vmem:[%s12889_s27 + $0x200] sm:$0x11] }
  0x42   : > { %v1087_v23 = vor.u32 %v1086_v11, %v1030_v10  ;;  %v3017_v24 = vpack.c.b16 %v2756_v13, %v2747_v12  ;;  %v3018_v25 = vpack.c.b16 %v2757_v15, %v2748_v14  ;;  %v1090_v26 = vshll.u32 %v577_v16, 16 }
  0x43   : > { %v1012_v29 = vrot.slane %v1011_v17, 4  ;;  %v1078_v30 = vrot.slane %v1077_v18, 4  ;;  %v1082_v31 = vrot.slane %v1080_v19, 5  ;;  %v1026_v32 = vrot.slane %v1025_v22, 4 }
  0x44   : > { %3730 = vmatmul.bf16.gmra.mxu0 %v3006_v33  ;;  %v1088_v33 = vrot.slane %v1087_v23, 4  ;;  %v1134_v37 = vshll.u32 %v302_v28, 16  ;;  %v1194_v38 = vshrl.u32 %v302_v28, 16  ;;  %v1139_v54 = vshrl.u32 %v298_v43, 16  ;;  %v308_v23 = vld [vmem:[%s12889_s27 + $0x224] sm:$0xff] }
  0x45   : > { %3819 = vmatmul.bf16.gmra.mxu1 %v3007_v34  ;;  %v1125_v34 = vshrl.u32 %v297_v27, 16  ;;  %v1017_v45 = vsel %vm12923_vm2, %v1012_v29, %v1016_v5  ;;  %v1083_v46 = vsel %vm12923_vm2, %v1078_v30, %v1082_v31  ;;  %v1031_v47 = vsel %vm12923_vm2, %v1026_v32, %v1030_v10 }
  0x46   : > { %3908 = vmatmul.bf16.gmra.mxu2 %v3008_v35  ;;  %v1128_v35 = vshll.u32 %v297_v27, 16  ;;  %v1136_v51 = vrot.slane %v1134_v37, 5  ;;  %v1196_v52 = vrot.slane %v1194_v38, 4  ;;  %v1142_v55 = vshll.u32 %v298_v43, 16 }
  0x47   : > { %3997 = vmatmul.bf16.gmra.mxu3 %v3009_v36  ;;  %v1092_v36 = vrot.slane %v1090_v26, 5  ;;  %v1127_v48 = vrot.slane %v1125_v34, 4  ;;  %v1148_v56 = vshll.u32 %v303_v44, 16  ;;  %v1204_v57 = vshrl.u32 %v303_v44, 16 }
  0x48   : > { %v1130_v50 = vrot.slane %v1128_v35, 5  ;;  %v2763_v58 = vunpack.c.l.b16 %v1017_v45  ;;  %v2772_v59 = vunpack.c.l.b16 %v1083_v46  ;;  %v2764_v60 = vunpack.c.h.b16 %v1017_v45 }
  0x49   : > { %v1093_v49 = vsel %vm12923_vm2, %v1088_v33, %v1092_v36  ;;  %v2773_v61 = vunpack.c.h.b16 %v1083_v46  ;;  %v2765_v62 = vunpack.c.l.b16 %v1031_v47  ;;  %v2766_v0 = vunpack.c.h.b16 %v1031_v47 }
  0x4a   : > { %v2774_v63 = vunpack.c.l.b16 %v1093_v49  ;;  %v2775_v1 = vunpack.c.h.b16 %v1093_v49  ;;  %v1131_v2 = vor.u32 %v1130_v50, %v1127_v48  ;;  %v1197_v3 = vor.u32 %v1196_v52, %v1136_v51  ;;  %v586_v48 = vld [vmem:[%s12889_s27 + $0x264] sm:$0x11] }
  0x4b   : > { %v1200_v4 = vshll.u32 %v581_v53, 16  ;;  %v1141_v5 = vrot.slane %v1139_v54, 4  ;;  %v1144_v6 = vrot.slane %v1142_v55, 5  ;;  %v1150_v7 = vrot.slane %v1148_v56, 5 }
  0x4c   : > { %v1206_v8 = vrot.slane %v1204_v57, 4  ;;  %v3024_v10 = vpack.c.b16 %v2772_v59, %v2763_v58  ;;  %v3025_v11 = vpack.c.b16 %v2773_v61, %v2764_v60  ;;  %v3026_v12 = vpack.c.b16 %v2774_v63, %v2765_v62  ;;  %v587_v57 = vld [vmem:[%s12889_s27 + $0x26c] sm:$0x11] }
  0x4d   : > { %v3027_v13 = vpack.c.b16 %v2775_v1, %v2766_v0  ;;  %v1132_v14 = vrot.slane %v1131_v2, 4  ;;  %v1202_v15 = vrot.slane %v1200_v4, 5  ;;  %v1198_v16 = vrot.slane %v1197_v3, 4  ;;  %v317_v4 = vld [vmem:[%s12889_s27 + $0x288] sm:$0xff] }
  0x4e   : > { %v1145_v17 = vor.u32 %v1144_v6, %v1141_v5  ;;  %v1207_v18 = vor.u32 %v1206_v8, %v1150_v7  ;;  %v1210_v19 = vshll.u32 %v582_v9, 16  ;;  %v1259_v33 = vshrl.u32 %v308_v23, 16  ;;  %v322_v5 = vld [vmem:[%s12889_s27 + $0x2ac] sm:$0xff] }
  0x4f   : > { %v1137_v22 = vsel %vm12923_vm2, %v1132_v14, %v1136_v51  ;;  %v1262_v34 = vshll.u32 %v308_v23, 16  ;;  %v1320_v61 = vshll.u32 %v586_v48, 16  ;;  %v1330_v1 = vshll.u32 %v587_v57, 16 }
  0x50   : > { %v1146_v26 = vrot.slane %v1145_v17, 4  ;;  %v1208_v27 = vrot.slane %v1207_v18, 4  ;;  %v1212_v28 = vrot.slane %v1210_v19, 5  ;;  %v2781_v37 = vunpack.c.l.b16 %v1137_v22  ;;  %v12223_v17 = vld [vmem:[%s16219_s1 + $0x360] sm:$0xff]  ;;  %v318_v19 = vld [vmem:[%s12889_s27 + $0x290] sm:$0xff] }
  0x51   : > { %v2782_v38 = vunpack.c.h.b16 %v1137_v22  ;;  %v1261_v49 = vrot.slane %v1259_v33, 4  ;;  %v1264_v50 = vrot.slane %v1262_v34, 5  ;;  %v1322_v8 = vrot.slane %v1320_v61, 5  ;;  %v12231_v18 = vld [vmem:[%s16219_s1 + $0x3a0] sm:$0xff]  ;;  %4076 = vmatpush.bf16.msrb.mxu0 %v12223_v17  ;;  %v327_v61 = vld [vmem:[%s12889_s27 + $0x2f4] sm:$0xff] }
  0x52   : > { %v1151_v42 = vsel %vm12923_vm2, %v1146_v26, %v1150_v7  ;;  %v1213_v43 = vsel %vm12923_vm2, %v1208_v27, %v1212_v28  ;;  %v1374_v14 = vshll.u32 %v322_v5, 16  ;;  %4165 = vmatpush.bf16.msrb.mxu1 %v12231_v18 }
  0x53   : > { %v2783_v53 = vunpack.c.l.b16 %v1151_v42  ;;  %v2792_v54 = vunpack.c.l.b16 %v1213_v43  ;;  %v2784_v55 = vunpack.c.h.b16 %v1151_v42  ;;  %v2793_v56 = vunpack.c.h.b16 %v1213_v43 }
  0x54   : > { %3735 = vmatmul.bf16.gmra.mxu0 %v3015_v20  ;;  %v307_v20 = vld [vmem:[%s12889_s27 + $0x21c] sm:$0xff]  ;;  %v1265_v63 = vor.u32 %v1264_v50, %v1261_v49  ;;  %v1376_v27 = vrot.slane %v1374_v14, 5 }
  0x55   : > { %3824 = vmatmul.bf16.gmra.mxu1 %v3016_v21  ;;  %v312_v21 = vld [vmem:[%s12889_s27 + $0x240] sm:$0xff]  ;;  %v1245_v29 = vshrl.u32 %v307_v20, 16  ;;  %v1248_v30 = vshll.u32 %v307_v20, 16  ;;  %v3035_v2 = vpack.c.b16 %v2792_v54, %v2783_v53  ;;  %v3036_v3 = vpack.c.b16 %v2793_v56, %v2784_v55  ;;  %v323_v20 = vld [vmem:[%s12889_s27 + $0x2b4] sm:$0xff] }
  0x56   : > { %3913 = vmatmul.bf16.gmra.mxu2 %v3017_v24  ;;  %v313_v24 = vld [vmem:[%s12889_s27 + $0x248] sm:$0xff]  ;;  %v1254_v31 = vshll.u32 %v312_v21, 16  ;;  %v1314_v32 = vshrl.u32 %v312_v21, 16  ;;  %v1266_v9 = vrot.slane %v1265_v63, 4  ;;  %v1444_v33 = vshrl.u32 %v323_v20, 16 }
  0x57   : > { %4002 = vmatmul.bf16.gmra.mxu3 %v3018_v25  ;;  %v1203_v25 = vsel %vm12923_vm2, %v1198_v16, %v1202_v15  ;;  %v1268_v35 = vshll.u32 %v313_v24, 16  ;;  %v1324_v36 = vshrl.u32 %v313_v24, 16  ;;  %v1247_v44 = vrot.slane %v1245_v29, 4  ;;  %v12239_v16 = vld [vmem:[%s16219_s1 + $0x3e0] sm:$0xff]  ;;  %v591_v29 = vld [vmem:[%s12889_s27 + $0x2d0] sm:$0x11] }
  0x58   : > { %v2790_v39 = vunpack.c.l.b16 %v1203_v25  ;;  %v2791_v41 = vunpack.c.h.b16 %v1203_v25  ;;  %v1250_v45 = vrot.slane %v1248_v30, 5  ;;  %v1256_v46 = vrot.slane %v1254_v31, 5  ;;  %4254 = vmatpush.bf16.msrb.mxu2 %v12239_v16  ;;  %v592_v50 = vld [vmem:[%s12889_s27 + $0x2d8] sm:$0x11] }
  0x59   : > { %v1316_v47 = vrot.slane %v1314_v32, 4  ;;  %v1270_v51 = vrot.slane %v1268_v35, 5  ;;  %v1326_v52 = vrot.slane %v1324_v36, 4  ;;  %v1434_v15 = vshrl.u32 %v322_v5, 16 }
  0x5a   : > { %v3033_v58 = vpack.c.b16 %v2790_v39, %v2781_v37  ;;  %v1251_v59 = vor.u32 %v1250_v45, %v1247_v44  ;;  %v3034_v62 = vpack.c.b16 %v2791_v41, %v2782_v38  ;;  %v1379_v30 = vshrl.u32 %v318_v19, 16 }
  0x5b   : > { %v1317_v60 = vor.u32 %v1316_v47, %v1256_v46  ;;  %v1327_v0 = vor.u32 %v1326_v52, %v1270_v51  ;;  %v1271_v23 = vsel %vm12923_vm2, %v1266_v9, %v1270_v51  ;;  %v1436_v28 = vrot.slane %v1434_v15, 4 }
  0x5c   : > { %v1252_v6 = vrot.slane %v1251_v59, 4  ;;  %v1382_v31 = vshll.u32 %v318_v19, 16  ;;  %v1388_v32 = vshll.u32 %v323_v20, 16  ;;  %v2801_v38 = vunpack.c.l.b16 %v1271_v23 }
  0x5d   : > { %v1318_v7 = vrot.slane %v1317_v60, 4  ;;  %v2802_v41 = vunpack.c.h.b16 %v1271_v23  ;;  %v1437_v44 = vor.u32 %v1436_v28, %v1376_v27  ;;  %v1440_v45 = vshll.u32 %v591_v29, 16 }
  0x5e   : > { %v1257_v21 = vsel %vm12923_vm2, %v1252_v6, %v1256_v46  ;;  %v1381_v46 = vrot.slane %v1379_v30, 4  ;;  %v1384_v47 = vrot.slane %v1382_v31, 5  ;;  %v1390_v48 = vrot.slane %v1388_v32, 5 }
  0x5f   : > { %v1323_v22 = vsel %vm12923_vm2, %v1318_v7, %v1322_v8  ;;  %v2799_v34 = vunpack.c.l.b16 %v1257_v21  ;;  %v2800_v36 = vunpack.c.h.b16 %v1257_v21  ;;  %v1446_v49 = vrot.slane %v1444_v33, 4  ;;  %v597_v33 = vld [vmem:[%s12889_s27 + $0x344] sm:$0x11] }
  0x60   : > { %v2808_v35 = vunpack.c.l.b16 %v1323_v22  ;;  %v2809_v37 = vunpack.c.h.b16 %v1323_v22  ;;  %v1442_v56 = vrot.slane %v1440_v45, 5  ;;  %v1438_v57 = vrot.slane %v1437_v44, 4  ;;  %v337_v45 = vld [vmem:[%s12889_s27 + $0x360] sm:$0xff] }
  0x61   : > { %v1447_v59 = vor.u32 %v1446_v49, %v1390_v48  ;;  %v1450_v60 = vshll.u32 %v592_v50, 16  ;;  %v1485_v6 = vshrl.u32 %v327_v61, 16  ;;  %v1488_v7 = vshll.u32 %v327_v61, 16 }
  0x62   : > { %v3042_v51 = vpack.c.b16 %v2808_v35, %v2799_v34  ;;  %v3043_v52 = vpack.c.b16 %v2809_v37, %v2800_v36 }
  0x63   : > { %v1452_v5 = vrot.slane %v1450_v60, 5  ;;  %v1487_v20 = vrot.slane %v1485_v6, 4  ;;  %v1490_v21 = vrot.slane %v1488_v7, 5  ;;  %v343_v60 = vld [vmem:[%s12889_s27 + $0x38c] sm:$0xff] }
  0x64   : > { %3740 = vmatmul.bf16.gmra.mxu0 %v3024_v10  ;;  %v1328_v10 = vrot.slane %v1327_v0, 4  ;;  %v328_v0 = vld [vmem:[%s12889_s27 + $0x2fc] sm:$0xff]  ;;  %v1628_v7 = vshll.u32 %v343_v60, 16 }
  0x65   : > { %3829 = vmatmul.bf16.gmra.mxu1 %v3025_v11  ;;  %v1332_v11 = vrot.slane %v1330_v1, 5  ;;  %v333_v1 = vld [vmem:[%s12889_s27 + $0x320] sm:$0xff]  ;;  %v1491_v36 = vor.u32 %v1490_v21, %v1487_v20 }
  0x66   : > { %3918 = vmatmul.bf16.gmra.mxu2 %v3026_v12  ;;  %v1365_v12 = vshrl.u32 %v317_v4, 16 }
  0x67   : > { %4007 = vmatmul.bf16.gmra.mxu3 %v3027_v13  ;;  %v1368_v13 = vshll.u32 %v317_v4, 16  ;;  %v1333_v24 = vsel %vm12923_vm2, %v1328_v10, %v1332_v11  ;;  %v1448_v4 = vrot.slane %v1447_v59, 4  ;;  %v1499_v10 = vshrl.u32 %v328_v0, 16  ;;  %v338_v59 = vld [vmem:[%s12889_s27 + $0x368] sm:$0xff] }
  0x68   : > { %v1367_v25 = vrot.slane %v1365_v12, 4  ;;  %v2810_v39 = vunpack.c.l.b16 %v1333_v24  ;;  %v2811_v42 = vunpack.c.h.b16 %v1333_v24  ;;  %v1502_v11 = vshll.u32 %v328_v0, 16  ;;  %v596_v24 = vld [vmem:[%s12889_s27 + $0x33c] sm:$0x11] }
  0x69   : > { %v1370_v26 = vrot.slane %v1368_v13, 5  ;;  %v1508_v12 = vshll.u32 %v333_v1, 16  ;;  %v1564_v13 = vshrl.u32 %v333_v1, 16  ;;  %v1453_v19 = vsel %vm12923_vm2, %v1448_v4, %v1452_v5 }
  0x6a   : > { %v3044_v53 = vpack.c.b16 %v2810_v39, %v2801_v38  ;;  %v3045_v54 = vpack.c.b16 %v2811_v42, %v2802_v41  ;;  %v2828_v30 = vunpack.c.l.b16 %v1453_v19  ;;  %v2829_v32 = vunpack.c.h.b16 %v1453_v19 }
  0x6b   : > { %v1371_v43 = vor.u32 %v1370_v26, %v1367_v25  ;;  %v1501_v25 = vrot.slane %v1499_v10, 4  ;;  %v1504_v26 = vrot.slane %v1502_v11, 5  ;;  %v1566_v28 = vrot.slane %v1564_v13, 4  ;;  %v12230_v13 = vld [vmem:[%s16219_s1 + $0x398] sm:$0xff] }
  0x6c   : > { %v1560_v37 = vshll.u32 %v596_v24, 16  ;;  %v1570_v42 = vshll.u32 %v597_v33, 16  ;;  %v1622_v4 = vshll.u32 %v338_v59, 16  ;;  %4166 = vmatpush.bf16.msrb.mxu1 %v12230_v13  ;;  %v602_v24 = vld [vmem:[%s12889_s27 + $0x3b0] sm:$0x11] }
  0x6d   : > { %v1372_v55 = vrot.slane %v1371_v43, 4  ;;  %v1505_v39 = vor.u32 %v1504_v26, %v1501_v25  ;;  %v1630_v25 = vrot.slane %v1628_v7, 5 }
  0x6e   : > { %v1624_v21 = vrot.slane %v1622_v4, 5 }
  0x6f   : > { %v1377_v63 = vsel %vm12923_vm2, %v1372_v55, %v1376_v27  ;;  %v1510_v27 = vrot.slane %v1508_v12, 5  ;;  %v1506_v50 = vrot.slane %v1505_v39, 4  ;;  %v12238_v55 = vld [vmem:[%s16219_s1 + $0x3d8] sm:$0xff]  ;;  %v601_v12 = vld [vmem:[%s12889_s27 + $0x3a8] sm:$0x11] }
  0x70   : > { %v2817_v14 = vunpack.c.l.b16 %v1377_v63  ;;  %v2818_v16 = vunpack.c.h.b16 %v1377_v63  ;;  %4255 = vmatpush.bf16.msrb.mxu2 %v12238_v55  ;;  %v12250_v39 = vld [vmem:[%s16219_s1 + $0x438] sm:$0xff] }
  0x71   : > { %v1567_v41 = vor.u32 %v1566_v28, %v1510_v27  ;;  %v1511_v63 = vsel %vm12923_vm2, %v1506_v50, %v1510_v27  ;;  %4340 = vmatpush.bf16.msrb.mxu3 %v12250_v39  ;;  %v363_v39 = vld [vmem:[%s12889_s27 + $0x464] sm:$0xff] }
  0x74   : > { %3745 = vmatmul.bf16.gmra.mxu0 %v3033_v58  ;;  %v1385_v58 = vor.u32 %v1384_v47, %v1381_v46  ;;  %v1492_v46 = vrot.slane %v1491_v36, 4  ;;  %v1562_v47 = vrot.slane %v1560_v37, 5 }
  0x75   : > { %3834 = vmatmul.bf16.gmra.mxu1 %v3034_v62  ;;  %v332_v62 = vld [vmem:[%s12889_s27 + $0x318] sm:$0xff] }
  0x76   : > { %3923 = vmatmul.bf16.gmra.mxu2 %v3035_v2  ;;  %v1443_v2 = vsel %vm12923_vm2, %v1438_v57, %v1442_v56  ;;  %v1494_v8 = vshll.u32 %v332_v62, 16  ;;  %v1554_v9 = vshrl.u32 %v332_v62, 16  ;;  %v12222_v56 = vld [vmem:[%s16219_s1 + $0x358] sm:$0xff] }
  0x77   : > { %4012 = vmatmul.bf16.gmra.mxu3 %v3036_v3  ;;  %v1386_v3 = vrot.slane %v1385_v58, 4  ;;  %v2826_v15 = vunpack.c.l.b16 %v1443_v2  ;;  %v2827_v17 = vunpack.c.h.b16 %v1443_v2  ;;  %4077 = vmatpush.bf16.msrb.mxu0 %v12222_v56 }
  0x78   : > { %v1496_v22 = vrot.slane %v1494_v8, 5  ;;  %v1556_v23 = vrot.slane %v1554_v9, 4  ;;  %v1684_v8 = vshrl.u32 %v343_v60, 16 }
  0x79   : > { %v1391_v18 = vsel %vm12923_vm2, %v1386_v3, %v1390_v48  ;;  %v3051_v34 = vpack.c.b16 %v2826_v15, %v2817_v14  ;;  %v3052_v35 = vpack.c.b16 %v2827_v17, %v2818_v16  ;;  %v342_v48 = vld [vmem:[%s12889_s27 + $0x384] sm:$0xff]  ;;  %v1619_v3 = vshrl.u32 %v338_v59, 16 }
  0x7a   : > { %v2819_v29 = vunpack.c.l.b16 %v1391_v18  ;;  %v2820_v31 = vunpack.c.h.b16 %v1391_v18  ;;  %v1557_v38 = vor.u32 %v1556_v23, %v1496_v22  ;;  %v1614_v57 = vshll.u32 %v342_v48, 16 }
  0x7b   : > { %v1674_v58 = vshrl.u32 %v342_v48, 16  ;;  %v1497_v61 = vsel %vm12923_vm2, %v1492_v46, %v1496_v22  ;;  %v2837_v15 = vunpack.c.l.b16 %v1511_v63  ;;  %v2838_v17 = vunpack.c.h.b16 %v1511_v63  ;;  %v353_v46 = vld [vmem:[%s12889_s27 + $0x3f8] sm:$0xff] }
  0x7c   : > { %v3053_v43 = vpack.c.b16 %v2828_v30, %v2819_v29  ;;  %v3054_v44 = vpack.c.b16 %v2829_v32, %v2820_v31  ;;  %v1558_v49 = vrot.slane %v1557_v38, 4  ;;  %v1616_v5 = vrot.slane %v1614_v57, 5  ;;  %v347_v30 = vld [vmem:[%s12889_s27 + $0x3cc] sm:$0xff] }
  0x7d   : > { %v1676_v6 = vrot.slane %v1674_v58, 4  ;;  %v2835_v9 = vunpack.c.l.b16 %v1497_v61  ;;  %v2836_v11 = vunpack.c.h.b16 %v1497_v61  ;;  %v1621_v20 = vrot.slane %v1619_v3, 4  ;;  %v606_v61 = vld [vmem:[%s12889_s27 + $0x414] sm:$0x11] }
  0x7e   : > { %v1563_v62 = vsel %vm12923_vm2, %v1558_v49, %v1562_v47  ;;  %v1680_v23 = vshll.u32 %v601_v12, 16  ;;  %v1686_v26 = vrot.slane %v1684_v8, 4  ;;  %v1748_v56 = vshll.u32 %v353_v46, 16 }
  0x7f   : > { %v2844_v10 = vunpack.c.l.b16 %v1563_v62  ;;  %v2845_v14 = vunpack.c.h.b16 %v1563_v62  ;;  %v1677_v22 = vor.u32 %v1676_v6, %v1616_v5  ;;  %v1625_v33 = vor.u32 %v1624_v21, %v1621_v20 }
  0x80   : > { %v1682_v37 = vrot.slane %v1680_v23, 5  ;;  %v1687_v38 = vor.u32 %v1686_v26, %v1630_v25  ;;  %v1804_v57 = vshrl.u32 %v353_v46, 16  ;;  %v1750_v4 = vrot.slane %v1748_v56, 5 }
  0x81   : > { %v3060_v27 = vpack.c.b16 %v2844_v10, %v2835_v9  ;;  %v3061_v28 = vpack.c.b16 %v2845_v14, %v2836_v11  ;;  %v1678_v36 = vrot.slane %v1677_v22, 4  ;;  %v1626_v48 = vrot.slane %v1625_v33, 4  ;;  %v607_v10 = vld [vmem:[%s12889_s27 + $0x41c] sm:$0x11] }
  0x82   : > { %v1800_v9 = vshll.u32 %v606_v61, 16  ;;  %v357_v33 = vld [vmem:[%s12889_s27 + $0x438] sm:$0xff]  ;;  %v1924_v56 = vshrl.u32 %v363_v39, 16 }
  0x83   : > { %v1683_v50 = vsel %vm12923_vm2, %v1678_v36, %v1682_v37  ;;  %v1631_v63 = vsel %vm12923_vm2, %v1626_v48, %v1630_v25  ;;  %v12237_v36 = vld [vmem:[%s16219_s1 + $0x3d0] sm:$0xff] }
  0x84   : > { %3750 = vmatmul.bf16.gmra.mxu0 %v3042_v51  ;;  %v1568_v51 = vrot.slane %v1567_v41, 4  ;;  %v1725_v41 = vshrl.u32 %v347_v30, 16  ;;  %v2862_v62 = vunpack.c.l.b16 %v1683_v50  ;;  %v2863_v7 = vunpack.c.h.b16 %v1683_v50  ;;  %v12221_v37 = vld [vmem:[%s16219_s1 + $0x350] sm:$0xff]  ;;  %4256 = vmatpush.bf16.msrb.mxu2 %v12237_v36 }
  0x85   : > { %3839 = vmatmul.bf16.gmra.mxu1 %v3043_v52  ;;  %v1572_v52 = vrot.slane %v1570_v42, 5  ;;  %v1728_v42 = vshll.u32 %v347_v30, 16  ;;  %v2855_v11 = vunpack.c.l.b16 %v1631_v63  ;;  %v2856_v13 = vunpack.c.h.b16 %v1631_v63  ;;  %4078 = vmatpush.bf16.msrb.mxu0 %v12221_v37 }
  0x86   : > { %3928 = vmatmul.bf16.gmra.mxu2 %v3044_v53  ;;  %v1605_v53 = vshrl.u32 %v337_v45, 16  ;;  %v1802_v22 = vrot.slane %v1800_v9, 5 }
  0x87   : > { %4017 = vmatmul.bf16.gmra.mxu3 %v3045_v54  ;;  %v1608_v54 = vshll.u32 %v337_v45, 16  ;;  %v1573_v0 = vsel %vm12923_vm2, %v1568_v51, %v1572_v52  ;;  %v1688_v51 = vrot.slane %v1687_v38, 4  ;;  %v1730_v55 = vrot.slane %v1728_v42, 5 }
  0x88   : > { %v1607_v1 = vrot.slane %v1605_v53, 4  ;;  %v2846_v16 = vunpack.c.l.b16 %v1573_v0  ;;  %v2847_v18 = vunpack.c.h.b16 %v1573_v0 }
  0x89   : > { %v1610_v2 = vrot.slane %v1608_v54, 5  ;;  %v1727_v54 = vrot.slane %v1725_v41, 4 }
  0x8a   : > { %v3062_v29 = vpack.c.b16 %v2846_v16, %v2837_v15  ;;  %v3063_v31 = vpack.c.b16 %v2847_v18, %v2838_v17  ;;  %v1810_v18 = vshll.u32 %v607_v10, 16  ;;  %v1926_v10 = vrot.slane %v1924_v56, 4 }
  0x8b   : > { %v1611_v19 = vor.u32 %v1610_v2, %v1607_v1  ;;  %v1731_v2 = vor.u32 %v1730_v55, %v1727_v54  ;;  %v1868_v55 = vshll.u32 %v363_v39, 16 }
  0x8d   : > { %v1612_v32 = vrot.slane %v1611_v19, 4  ;;  %v1732_v15 = vrot.slane %v1731_v2, 4  ;;  %v1870_v9 = vrot.slane %v1868_v55, 5 }
  0x8f   : > { %v1617_v47 = vsel %vm12923_vm2, %v1612_v32, %v1616_v5  ;;  %v1806_v5 = vrot.slane %v1804_v57, 4 }
  0x90   : > { %v2853_v60 = vunpack.c.l.b16 %v1617_v47  ;;  %v2854_v6 = vunpack.c.h.b16 %v1617_v47  ;;  %v1848_v47 = vshll.u32 %v357_v33, 16 }
  0x91   : > { %v1807_v17 = vor.u32 %v1806_v5, %v1750_v4 }
  0x92   : > { %v3069_v19 = vpack.c.b16 %v2862_v62, %v2853_v60  ;;  %v3070_v20 = vpack.c.b16 %v2863_v7, %v2854_v6  ;;  %v611_v6 = vld [vmem:[%s12889_s27 + $0x480] sm:$0x11] }
  0x93   : > { %v1808_v30 = vrot.slane %v1807_v17, 4 }
  0x94   : > { %3755 = vmatmul.bf16.gmra.mxu0 %v3051_v34  ;;  %v1690_v34 = vshll.u32 %v602_v24, 16 }
  0x95   : > { %3844 = vmatmul.bf16.gmra.mxu1 %v3052_v35  ;;  %v352_v35 = vld [vmem:[%s12889_s27 + $0x3f0] sm:$0xff] }
  0x96   : > { %3933 = vmatmul.bf16.gmra.mxu2 %v3053_v43  ;;  %v348_v43 = vld [vmem:[%s12889_s27 + $0x3d4] sm:$0xff]  ;;  %v1794_v45 = vshrl.u32 %v352_v35, 16  ;;  %v1692_v49 = vrot.slane %v1690_v34, 5  ;;  %v362_v34 = vld [vmem:[%s12889_s27 + $0x45c] sm:$0xff] }
  0x97   : > { %4022 = vmatmul.bf16.gmra.mxu3 %v3054_v44  ;;  %v1734_v44 = vshll.u32 %v352_v35, 16  ;;  %v1739_v52 = vshrl.u32 %v348_v43, 16  ;;  %v1742_v53 = vshll.u32 %v348_v43, 16  ;;  %v358_v35 = vld [vmem:[%s12889_s27 + $0x440] sm:$0xff]  ;;  %v1854_v48 = vshll.u32 %v362_v34, 16 }
  0x98   : > { %v1796_v59 = vrot.slane %v1794_v45, 4  ;;  %v1693_v0 = vsel %vm12923_vm2, %v1688_v51, %v1692_v49  ;;  %v1914_v49 = vshrl.u32 %v362_v34, 16  ;;  %v1859_v50 = vshrl.u32 %v358_v35, 16  ;;  %v368_v34 = vld [vmem:[%s12889_s27 + $0x4ac] sm:$0xff] }
  0x99   : > { %v1736_v58 = vrot.slane %v1734_v44, 5  ;;  %v1741_v1 = vrot.slane %v1739_v52, 4  ;;  %v1744_v3 = vrot.slane %v1742_v53, 5  ;;  %v2864_v12 = vunpack.c.l.b16 %v1693_v0 }
  0x9a   : > { %v2865_v14 = vunpack.c.h.b16 %v1693_v0  ;;  %v1845_v44 = vshrl.u32 %v357_v33, 16  ;;  %v1862_v54 = vshll.u32 %v358_v35, 16  ;;  %v1916_v5 = vrot.slane %v1914_v49, 4  ;;  %v12249_v33 = vld [vmem:[%s16219_s1 + $0x430] sm:$0xff] }
  0x9b   : > { %v1797_v8 = vor.u32 %v1796_v59, %v1736_v58  ;;  %v1745_v16 = vor.u32 %v1744_v3, %v1741_v1  ;;  %v3071_v25 = vpack.c.b16 %v2864_v12, %v2855_v11  ;;  %v12229_v1 = vld [vmem:[%s16219_s1 + $0x390] sm:$0xff]  ;;  %v1850_v3 = vrot.slane %v1848_v47, 5  ;;  %v612_v11 = vld [vmem:[%s12889_s27 + $0x488] sm:$0x11]  ;;  %4341 = vmatpush.bf16.msrb.mxu3 %v12249_v33 }
  0x9c   : > { %v3072_v26 = vpack.c.b16 %v2865_v14, %v2856_v13  ;;  %v1847_v2 = vrot.slane %v1845_v44, 4  ;;  %v1861_v7 = vrot.slane %v1859_v50, 4  ;;  %4167 = vmatpush.bf16.msrb.mxu1 %v12229_v1  ;;  %v1979_v47 = vshrl.u32 %v368_v34, 16 }
  0x9d   : > { %v1798_v21 = vrot.slane %v1797_v8, 4  ;;  %v1864_v8 = vrot.slane %v1862_v54, 5 }
  0x9f   : > { %v1803_v32 = vsel %vm12923_vm2, %v1798_v21, %v1802_v22  ;;  %v1920_v21 = vshll.u32 %v611_v6, 16 }
  0xa0   : > { %v2880_v41 = vunpack.c.l.b16 %v1803_v32  ;;  %v2881_v59 = vunpack.c.h.b16 %v1803_v32 }
  0xa1   : > { %v1922_v37 = vrot.slane %v1920_v21, 5 }
  0xa4   : > { %3760 = vmatmul.bf16.gmra.mxu0 %v3060_v27 }
  0xa5   : > { %3849 = vmatmul.bf16.gmra.mxu1 %v3061_v28  ;;  %v1737_v28 = vsel %vm12923_vm2, %v1732_v15, %v1736_v58  ;;  %v367_v15 = vld [vmem:[%s12889_s27 + $0x4a4] sm:$0xff] }
  0xa6   : > { %3938 = vmatmul.bf16.gmra.mxu2 %v3062_v29  ;;  %v1746_v29 = vrot.slane %v1745_v16, 4  ;;  %v2871_v38 = vunpack.c.l.b16 %v1737_v28  ;;  %v2872_v58 = vunpack.c.h.b16 %v1737_v28 }
  0xa7   : > { %4027 = vmatmul.bf16.gmra.mxu3 %v3063_v31  ;;  %v1812_v31 = vrot.slane %v1810_v18, 5 }
  0xa8   : > { %v1751_v42 = vsel %vm12923_vm2, %v1746_v29, %v1750_v4  ;;  %v1856_v4 = vrot.slane %v1854_v48, 5  ;;  %v3078_v12 = vpack.c.b16 %v2880_v41, %v2871_v38  ;;  %v3079_v13 = vpack.c.b16 %v2881_v59, %v2872_v58  ;;  %v372_v29 = vld [vmem:[%s12889_s27 + $0x4c8] sm:$0xff]  ;;  %v373_v38 = vld [vmem:[%s12889_s27 + $0x4d0] sm:$0xff] }
  0xa9   : > { %v1813_v43 = vsel %vm12923_vm2, %v1808_v30, %v1812_v31  ;;  %v2873_v60 = vunpack.c.l.b16 %v1751_v42  ;;  %v2874_v63 = vunpack.c.h.b16 %v1751_v42  ;;  %v1965_v30 = vshrl.u32 %v367_v15, 16 }
  0xaa   : > { %v2882_v62 = vunpack.c.l.b16 %v1813_v43  ;;  %v2883_v0 = vunpack.c.h.b16 %v1813_v43  ;;  %v1968_v31 = vshll.u32 %v367_v15, 16  ;;  %v1974_v43 = vshll.u32 %v372_v29, 16 }
  0xab   : > { %v1967_v44 = vrot.slane %v1965_v30, 4  ;;  %v1982_v48 = vshll.u32 %v368_v34, 16  ;;  %v1988_v49 = vshll.u32 %v373_v38, 16  ;;  %v2044_v50 = vshrl.u32 %v373_v38, 16 }
  0xac   : > { %v3080_v14 = vpack.c.b16 %v2882_v62, %v2873_v60  ;;  %v3081_v18 = vpack.c.b16 %v2883_v0, %v2874_v63  ;;  %v1976_v60 = vrot.slane %v1974_v43, 5  ;;  %v616_v63 = vld [vmem:[%s12889_s27 + $0x4ec] sm:$0x11]  ;;  %v378_v43 = vld [vmem:[%s12889_s27 + $0x518] sm:$0xff] }
  0xad   : > { %v1990_v6 = vrot.slane %v1988_v49, 5 }
  0xb1   : > { %v3726_v23 = vpop.f32.mrf.mxu0 }
  0xb2   : > { %v3815_v24 = vpop.f32.mrf.mxu1 }
  0xb3   : > { %v3816_v27 = vadd.f32 %v3815_v24, %v3726_v23 }
  0xb4   : > { %3765 = vmatmul.bf16.gmra.mxu0 %v3069_v19  ;;  %v1851_v19 = vor.u32 %v1850_v3, %v1847_v2  ;;  %v1981_v2 = vrot.slane %v1979_v47, 4 }
  0xb5   : > { %3854 = vmatmul.bf16.gmra.mxu1 %v3070_v20  ;;  %v1917_v20 = vor.u32 %v1916_v5, %v1856_v4  ;;  %v1984_v5 = vrot.slane %v1982_v48, 5  ;;  %v383_v48 = vld [vmem:[%s12889_s27 + $0x53c] sm:$0xff] }
  0xb6   : > { %3943 = vmatmul.bf16.gmra.mxu2 %v3071_v25  ;;  %v1865_v25 = vor.u32 %v1864_v8, %v1861_v7  ;;  %v1852_v35 = vrot.slane %v1851_v19, 4  ;;  %v2046_v7 = vrot.slane %v2044_v50, 4 }
  0xb7   : > { %4032 = vmatmul.bf16.gmra.mxu3 %v3072_v26  ;;  %v1927_v26 = vor.u32 %v1926_v10, %v1870_v9  ;;  %v1918_v36 = vrot.slane %v1917_v20, 4  ;;  %v1985_v20 = vor.u32 %v1984_v5, %v1981_v2 }
  0xb8   : > { %v1866_v39 = vrot.slane %v1865_v25, 4  ;;  %v2047_v21 = vor.u32 %v2046_v7, %v1990_v6 }
  0xb9   : > { %v3904_v45 = vpop.f32.mrf.mxu2  ;;  %v3728_v52 = vpop.f32.mrf.mxu0  ;;  %v1928_v41 = vrot.slane %v1927_v26, 4  ;;  %v1923_v54 = vsel %vm12923_vm2, %v1918_v36, %v1922_v37  ;;  %v1986_v38 = vrot.slane %v1985_v20, 4 }
  0xba   : > { %v3993_v46 = vpop.f32.mrf.mxu3  ;;  %v3905_v51 = vadd.f32 %v3904_v45, %v3816_v27  ;;  %v3817_v53 = vpop.f32.mrf.mxu1  ;;  %v1930_v27 = vshll.u32 %v612_v11, 16  ;;  %v1970_v45 = vrot.slane %v1968_v31, 5  ;;  %v1871_v58 = vsel %vm12923_vm2, %v1866_v39, %v1870_v9 }
  0xbb   : > { %v3818_v57 = vadd.f32 %v3817_v53, %v3728_v52  ;;  %v1857_v53 = vsel %vm12923_vm2, %v1852_v35, %v1856_v4  ;;  %v617_v4 = vld [vmem:[%s12889_s27 + $0x4f4] sm:$0x11]  ;;  %v2898_v10 = vunpack.c.l.b16 %v1923_v54  ;;  %v2891_v9 = vunpack.c.l.b16 %v1871_v58 }
  0xbc   : > { %v13159_v61 = vadd.f32 %v3993_v46, %v3905_v51  ;;  %v1932_v42 = vrot.slane %v1930_v27, 5  ;;  %v2034_v46 = vshrl.u32 %v372_v29, 16  ;;  %v1971_v0 = vor.u32 %v1970_v45, %v1967_v44  ;;  %v12236_v44 = vld [vmem:[%s16219_s1 + $0x3c8] sm:$0xff] }
  0xbd   : > { %v2889_v8 = vunpack.c.l.b16 %v1857_v53  ;;  %v2890_v11 = vunpack.c.h.b16 %v1857_v53  ;;  %v2048_v39 = vrot.slane %v2047_v21, 4  ;;  %v12220_v45 = vld [vmem:[%s16219_s1 + $0x348] sm:$0xff]  ;;  %v1991_v50 = vsel %vm12923_vm2, %v1986_v38, %v1990_v6  ;;  %4257 = vmatpush.bf16.msrb.mxu2 %v12236_v44  ;;  %v622_v21 = vld [vmem:[%s12889_s27 + $0x560] sm:$0x11] }
  0xbe   : > { %v1933_v59 = vsel %vm12923_vm2, %v1928_v41, %v1932_v42  ;;  %v2036_v1 = vrot.slane %v2034_v46, 4  ;;  %v1972_v19 = vrot.slane %v1971_v0, 4  ;;  %v377_v41 = vld [vmem:[%s12889_s27 + $0x510] sm:$0xff]  ;;  %4079 = vmatpush.bf16.msrb.mxu0 %v12220_v45  ;;  %v2108_v0 = vshll.u32 %v383_v48, 16 }
  0xbf   : > { %v2901_v15 = vunpack.c.h.b16 %v1933_v59  ;;  %v382_v42 = vld [vmem:[%s12889_s27 + $0x534] sm:$0xff]  ;;  %v2909_v6 = vunpack.c.l.b16 %v1991_v50 }
  0xc0   : > { %v1977_v37 = vsel %vm12923_vm2, %v1972_v19, %v1976_v60  ;;  %v2110_v19 = vrot.slane %v2108_v0, 5 }
  0xc1   : > { %v3906_v16 = vpop.f32.mrf.mxu2  ;;  %v3731_v23 = vpop.f32.mrf.mxu0  ;;  %v2907_v47 = vunpack.c.l.b16 %v1977_v37  ;;  %v2908_v49 = vunpack.c.h.b16 %v1977_v37 }
  0xc2   : > { %v3995_v17 = vpop.f32.mrf.mxu3  ;;  %v3907_v22 = vadd.f32 %v3906_v16, %v3818_v57  ;;  %v3820_v24 = vpop.f32.mrf.mxu1  ;;  %v2037_v16 = vor.u32 %v2036_v1, %v1976_v60  ;;  %v2164_v1 = vshrl.u32 %v383_v48, 16 }
  0xc3   : > { %v3821_v28 = vadd.f32 %v3820_v24, %v3731_v23  ;;  %v3087_v24 = vpack.c.b16 %v2898_v10, %v2889_v8  ;;  %v2910_v10 = vunpack.c.h.b16 %v1991_v50 }
  0xc4   : > { %v13168_v32 = vadd.f32 %v3995_v17, %v3907_v22  ;;  %3770 = vmatmul.bf16.gmra.mxu0 %v3078_v12  ;;  %v2899_v12 = vunpack.c.h.b16 %v1923_v54  ;;  %v2040_v17 = vshll.u32 %v616_v63, 16  ;;  %v2038_v33 = vrot.slane %v2037_v16, 4  ;;  %v621_v16 = vld [vmem:[%s12889_s27 + $0x558] sm:$0x11] }
  0xc5   : > { %3859 = vmatmul.bf16.gmra.mxu1 %v3079_v13  ;;  %v2900_v13 = vunpack.c.l.b16 %v1933_v59  ;;  %v2102_v63 = vshll.u32 %v378_v43, 16  ;;  %v2166_v20 = vrot.slane %v2164_v1, 4 }
  0xc6   : > { %3948 = vmatmul.bf16.gmra.mxu2 %v3080_v14  ;;  %v2892_v14 = vunpack.c.h.b16 %v1871_v58  ;;  %v3088_v25 = vpack.c.b16 %v2899_v12, %v2890_v11  ;;  %v2042_v34 = vrot.slane %v2040_v17, 5  ;;  %v2099_v58 = vshrl.u32 %v378_v43, 16  ;;  %v12228_v12 = vld [vmem:[%s16219_s1 + $0x388] sm:$0xff] }
  0xc7   : > { %4037 = vmatmul.bf16.gmra.mxu3 %v3081_v18  ;;  %v2050_v18 = vshll.u32 %v617_v4, 16  ;;  %v3089_v29 = vpack.c.b16 %v2900_v13, %v2891_v9  ;;  %4168 = vmatpush.bf16.msrb.mxu1 %v12228_v12  ;;  %v2167_v38 = vor.u32 %v2166_v20, %v2110_v19 }
  0xc8   : > { %v3090_v30 = vpack.c.b16 %v2901_v15, %v2892_v14  ;;  %v2043_v46 = vsel %vm12923_vm2, %v2038_v33, %v2042_v34  ;;  %v2101_v17 = vrot.slane %v2099_v58, 4 }
  0xc9   : > { %v3909_v51 = vpop.f32.mrf.mxu2  ;;  %v3733_v56 = vpop.f32.mrf.mxu0  ;;  %v2052_v35 = vrot.slane %v2050_v18, 5  ;;  %v2916_v4 = vunpack.c.l.b16 %v2043_v46  ;;  %v2917_v5 = vunpack.c.h.b16 %v2043_v46  ;;  %v2104_v18 = vrot.slane %v2102_v63, 5  ;;  %v12248_v46 = vld [vmem:[%s16219_s1 + $0x428] sm:$0xff] }
  0xca   : > { %v3998_v52 = vpop.f32.mrf.mxu3  ;;  %v3910_v55 = vadd.f32 %v3909_v51, %v3821_v28  ;;  %v3822_v57 = vpop.f32.mrf.mxu1  ;;  %4342 = vmatpush.bf16.msrb.mxu3 %v12248_v46 }
  0xcb   : > { %v3823_v62 = vadd.f32 %v3822_v57, %v3733_v56  ;;  %v2053_v51 = vsel %vm12923_vm2, %v2048_v39, %v2052_v35  ;;  %v2094_v56 = vshll.u32 %v382_v42, 16  ;;  %v2154_v57 = vshrl.u32 %v382_v42, 16  ;;  %v392_v42 = vld [vmem:[%s12889_s27 + $0x5a0] sm:$0xff] }
  0xcc   : > { %v13184_v3 = vadd.f32 %v3998_v52, %v3910_v55  ;;  %v2085_v52 = vshrl.u32 %v377_v41, 16  ;;  %v2088_v55 = vshll.u32 %v377_v41, 16  ;;  %v2918_v8 = vunpack.c.l.b16 %v2053_v51 }
  0xcd   : > { %v2919_v11 = vunpack.c.h.b16 %v2053_v51  ;;  %v2096_v14 = vrot.slane %v2094_v56, 5  ;;  %v2156_v15 = vrot.slane %v2154_v57, 4  ;;  %v2105_v37 = vor.u32 %v2104_v18, %v2101_v17  ;;  %v393_v51 = vld [vmem:[%s12889_s27 + $0x5a8] sm:$0xff] }
  0xce   : > { %v2087_v9 = vrot.slane %v2085_v52, 4  ;;  %v2090_v13 = vrot.slane %v2088_v55, 5  ;;  %v2170_v39 = vshll.u32 %v622_v21, 16  ;;  %v2214_v55 = vshll.u32 %v392_v42, 16 }
  0xcf   : > { %v2106_v52 = vrot.slane %v2105_v37, 4  ;;  %v2274_v58 = vshrl.u32 %v392_v42, 16  ;;  %v2284_v63 = vshrl.u32 %v393_v51, 16 }
  0xd0   : > { %v2216_v12 = vrot.slane %v2214_v55, 5 }
  0xd1   : > { %v3911_v22 = vpop.f32.mrf.mxu2  ;;  %v3736_v27 = vpop.f32.mrf.mxu0 }
  0xd2   : > { %v4000_v23 = vpop.f32.mrf.mxu3  ;;  %v3912_v26 = vadd.f32 %v3911_v22, %v3823_v62  ;;  %v3825_v28 = vpop.f32.mrf.mxu1  ;;  %v3096_v22 = vpack.c.b16 %v2916_v4, %v2907_v47  ;;  %v388_v47 = vld [vmem:[%s12889_s27 + $0x584] sm:$0xff] }
  0xd3   : > { %v3826_v31 = vadd.f32 %v3825_v28, %v3736_v27  ;;  %v3099_v28 = vpack.c.b16 %v2919_v11, %v2910_v10  ;;  %v2111_v10 = vsel %vm12923_vm2, %v2106_v52, %v2110_v19 }
  0xd4   : > { %v13187_v36 = vadd.f32 %v4000_v23, %v3912_v26  ;;  %3775 = vmatmul.bf16.gmra.mxu0 %v3087_v24  ;;  %v3097_v23 = vpack.c.b16 %v2917_v5, %v2908_v49  ;;  %v3098_v24 = vpack.c.b16 %v2918_v8, %v2909_v6  ;;  %v2927_v19 = vunpack.c.l.b16 %v2111_v10 }
  0xd5   : > { %3864 = vmatmul.bf16.gmra.mxu1 %v3088_v25  ;;  %v387_v25 = vld [vmem:[%s12889_s27 + $0x57c] sm:$0xff] }
  0xd6   : > { %3953 = vmatmul.bf16.gmra.mxu2 %v3089_v29  ;;  %v2091_v29 = vor.u32 %v2090_v13, %v2087_v9  ;;  %v2205_v43 = vshrl.u32 %v387_v25, 16  ;;  %v2208_v44 = vshll.u32 %v387_v25, 16  ;;  %v626_v13 = vld [vmem:[%s12889_s27 + $0x5c4] sm:$0x11] }
  0xd7   : > { %4042 = vmatmul.bf16.gmra.mxu3 %v3090_v30  ;;  %v2157_v30 = vor.u32 %v2156_v15, %v2096_v14 }
  0xd8   : > { %v2092_v48 = vrot.slane %v2091_v29, 4  ;;  %v2207_v56 = vrot.slane %v2205_v43, 4  ;;  %v2210_v57 = vrot.slane %v2208_v44, 5 }
  0xd9   : > { %v3914_v53 = vpop.f32.mrf.mxu2  ;;  %v3738_v60 = vpop.f32.mrf.mxu0  ;;  %v2158_v49 = vrot.slane %v2157_v30, 4 }
  0xda   : > { %v4003_v54 = vpop.f32.mrf.mxu3  ;;  %v3915_v59 = vadd.f32 %v3914_v53, %v3826_v31  ;;  %v3827_v62 = vpop.f32.mrf.mxu1  ;;  %v2160_v31 = vshll.u32 %v621_v16, 16  ;;  %v2168_v53 = vrot.slane %v2167_v38, 4  ;;  %v2211_v15 = vor.u32 %v2210_v57, %v2207_v56  ;;  %v397_v57 = vld [vmem:[%s12889_s27 + $0x5e8] sm:$0xff] }
  0xdb   : > { %v3828_v2 = vadd.f32 %v3827_v62, %v3738_v60  ;;  %v2222_v60 = vshll.u32 %v388_v47, 16  ;;  %v2228_v62 = vshll.u32 %v393_v51, 16  ;;  %v2276_v16 = vrot.slane %v2274_v58, 4  ;;  %v402_v58 = vld [vmem:[%s12889_s27 + $0x60c] sm:$0xff] }
  0xdc   : > { %v13207_v7 = vadd.f32 %v4003_v54, %v3915_v59  ;;  %v2162_v50 = vrot.slane %v2160_v31, 5  ;;  %v2172_v54 = vrot.slane %v2170_v39, 5  ;;  %v2219_v59 = vshrl.u32 %v388_v47, 16 }
  0xdd   : > { %v2224_v20 = vrot.slane %v2222_v60, 5  ;;  %v2230_v21 = vrot.slane %v2228_v62, 5  ;;  %v2277_v30 = vor.u32 %v2276_v16, %v2216_v12  ;;  %v2280_v31 = vshll.u32 %v626_v13, 16  ;;  %v12235_v60 = vld [vmem:[%s16219_s1 + $0x3c0] sm:$0xff] }
  0xde   : > { %v2163_v4 = vsel %vm12923_vm2, %v2158_v49, %v2162_v50  ;;  %v2173_v11 = vsel %vm12923_vm2, %v2168_v53, %v2172_v54  ;;  %v2221_v17 = vrot.slane %v2219_v59, 4  ;;  %v398_v59 = vld [vmem:[%s12889_s27 + $0x5f0] sm:$0xff]  ;;  %v12219_v62 = vld [vmem:[%s16219_s1 + $0x340] sm:$0xff]  ;;  %4258 = vmatpush.bf16.msrb.mxu2 %v12235_v60 }
  0xdf   : > { %v2937_v29 = vunpack.c.h.b16 %v2173_v11  ;;  %v2278_v50 = vrot.slane %v2277_v30, 4  ;;  %v2282_v51 = vrot.slane %v2280_v31, 5  ;;  %4080 = vmatpush.bf16.msrb.mxu0 %v12219_v62  ;;  %v2339_v13 = vshrl.u32 %v398_v59, 16 }
  0xe1   : > { %v3916_v26 = vpop.f32.mrf.mxu2  ;;  %v3741_v34 = vpop.f32.mrf.mxu0 }
  0xe2   : > { %v4005_v27 = vpop.f32.mrf.mxu3  ;;  %v3917_v33 = vadd.f32 %v3916_v26, %v3828_v2  ;;  %v3830_v35 = vpop.f32.mrf.mxu1  ;;  %v2097_v2 = vsel %vm12923_vm2, %v2092_v48, %v2096_v14  ;;  %v627_v14 = vld [vmem:[%s12889_s27 + $0x5cc] sm:$0x11]  ;;  %v2935_v26 = vunpack.c.h.b16 %v2163_v4 }
  0xe3   : > { %v3831_v41 = vadd.f32 %v3830_v35, %v3741_v34  ;;  %v2926_v25 = vunpack.c.h.b16 %v2097_v2  ;;  %v2212_v34 = vrot.slane %v2211_v15, 4  ;;  %v2225_v35 = vor.u32 %v2224_v20, %v2221_v17 }
  0xe4   : > { %v13216_v45 = vadd.f32 %v4005_v27, %v3917_v33  ;;  %3780 = vmatmul.bf16.gmra.mxu0 %v3096_v22  ;;  %v2286_v22 = vrot.slane %v2284_v63, 4  ;;  %v2936_v27 = vunpack.c.l.b16 %v2173_v11  ;;  %v2290_v33 = vshll.u32 %v627_v14, 16 }
  0xe5   : > { %3869 = vmatmul.bf16.gmra.mxu1 %v3097_v23  ;;  %v2925_v23 = vunpack.c.l.b16 %v2097_v2  ;;  %v3106_v42 = vpack.c.b16 %v2935_v26, %v2926_v25  ;;  %v2217_v54 = vsel %vm12923_vm2, %v2212_v34, %v2216_v12  ;;  %v2226_v55 = vrot.slane %v2225_v35, 4  ;;  %v631_v35 = vld [vmem:[%s12889_s27 + $0x630] sm:$0x11] }
  0xe6   : > { %3958 = vmatmul.bf16.gmra.mxu2 %v3098_v24  ;;  %v2934_v24 = vunpack.c.l.b16 %v2163_v4  ;;  %v2287_v37 = vor.u32 %v2286_v22, %v2230_v21  ;;  %v3107_v47 = vpack.c.b16 %v2936_v27, %v2927_v19  ;;  %v2292_v52 = vrot.slane %v2290_v33, 5 }
  0xe7   : > { %4047 = vmatmul.bf16.gmra.mxu3 %v3099_v28  ;;  %v2928_v28 = vunpack.c.h.b16 %v2111_v10  ;;  %v2283_v63 = vsel %vm12923_vm2, %v2278_v50, %v2282_v51  ;;  %v2944_v2 = vunpack.c.h.b16 %v2217_v54  ;;  %v2231_v4 = vsel %vm12923_vm2, %v2226_v55, %v2230_v21  ;;  %v12247_v55 = vld [vmem:[%s16219_s1 + $0x420] sm:$0xff] }
  0xe8   : > { %v2288_v56 = vrot.slane %v2287_v37, 4  ;;  %v2328_v11 = vshll.u32 %v397_v57, 16  ;;  %v2334_v12 = vshll.u32 %v402_v58, 16  ;;  %v2342_v14 = vshll.u32 %v398_v59, 16  ;;  %4343 = vmatpush.bf16.msrb.mxu3 %v12247_v55 }
  0xe9   : > { %v3919_v0 = vpop.f32.mrf.mxu2  ;;  %v3743_v6 = vpop.f32.mrf.mxu0  ;;  %v3108_v48 = vpack.c.b16 %v2937_v29, %v2928_v28  ;;  %v2945_v25 = vunpack.c.l.b16 %v2231_v4  ;;  %v2946_v27 = vunpack.c.h.b16 %v2231_v4  ;;  %v12227_v29 = vld [vmem:[%s16219_s1 + $0x380] sm:$0xff]  ;;  %v2341_v37 = vrot.slane %v2339_v13, 4 }
  0xea   : > { %v4008_v1 = vpop.f32.mrf.mxu3  ;;  %v3920_v5 = vadd.f32 %v3919_v0, %v3831_v41  ;;  %v3832_v8 = vpop.f32.mrf.mxu1  ;;  %v3105_v41 = vpack.c.b16 %v2934_v24, %v2925_v23  ;;  %v2943_v0 = vunpack.c.l.b16 %v2217_v54  ;;  %v2952_v23 = vunpack.c.l.b16 %v2283_v63  ;;  %4169 = vmatpush.bf16.msrb.mxu1 %v12227_v29  ;;  %v12245_v29 = vld [vmem:[%s16219_s1 + $0x410] sm:$0xff] }
  0xeb   : > { %v3833_v9 = vadd.f32 %v3832_v8, %v3743_v6  ;;  %v2325_v6 = vshrl.u32 %v397_v57, 16  ;;  %v2953_v24 = vunpack.c.h.b16 %v2283_v63  ;;  %v2330_v31 = vrot.slane %v2328_v11, 5  ;;  %v413_v11 = vld [vmem:[%s12889_s27 + $0x680] sm:$0xff] }
  0xec   : > { %v13232_v18 = vadd.f32 %v4008_v1, %v3920_v5  ;;  %v403_v1 = vld [vmem:[%s12889_s27 + $0x614] sm:$0xff]  ;;  %v2293_v5 = vsel %vm12923_vm2, %v2288_v56, %v2292_v52  ;;  %v2336_v33 = vrot.slane %v2334_v12, 5  ;;  %v2400_v54 = vshll.u32 %v631_v35, 16 }
  0xed   : > { %v2348_v20 = vshll.u32 %v403_v1, 16  ;;  %v2404_v22 = vshrl.u32 %v403_v1, 16  ;;  %v2954_v19 = vunpack.c.l.b16 %v2293_v5  ;;  %v2955_v28 = vunpack.c.h.b16 %v2293_v5  ;;  %v408_v5 = vld [vmem:[%s12889_s27 + $0x65c] sm:$0xff] }
  0xee   : > { %v2327_v30 = vrot.slane %v2325_v6, 4  ;;  %v12246_v12 = vld [vmem:[%s16219_s1 + $0x418] sm:$0xff] }
  0xef   : > { %v3117_v50 = vpack.c.b16 %v2955_v28, %v2946_v27  ;;  %4344 = vmatpush.bf16.msrb.mxu3 %v12246_v12 }
  0xf0   : > { %v2331_v51 = vor.u32 %v2330_v31, %v2327_v30 }
  0xf1   : > { %v3921_v38 = vpop.f32.mrf.mxu2  ;;  %v3746_v44 = vpop.f32.mrf.mxu0 }
  0xf2   : > { %v4010_v39 = vpop.f32.mrf.mxu3  ;;  %v3922_v43 = vadd.f32 %v3921_v38, %v3833_v9  ;;  %v3835_v46 = vpop.f32.mrf.mxu1  ;;  %v2394_v9 = vshrl.u32 %v402_v58, 16  ;;  %v2344_v38 = vrot.slane %v2342_v14, 5  ;;  %v2332_v6 = vrot.slane %v2331_v51, 4 }
  0xf3   : > { %v3836_v49 = vadd.f32 %v3835_v46, %v3746_v44  ;;  %v3115_v44 = vpack.c.b16 %v2953_v24, %v2944_v2  ;;  %v3116_v46 = vpack.c.b16 %v2954_v19, %v2945_v25  ;;  %v2524_v24 = vshrl.u32 %v413_v11, 16  ;;  %4345 = vmatpush.bf16.msrb.mxu3 %v12245_v29  ;;  %v12130_v29 = vld [vmem:[%s16219_s1 + $0x78] sm:$0xff] }
  0xf4   : > { %v13235_v53 = vadd.f32 %v4010_v39, %v3922_v43  ;;  %3785 = vmatmul.bf16.gmra.mxu0 %v3105_v41  ;;  %v2396_v34 = vrot.slane %v2394_v9, 4  ;;  %v2350_v39 = vrot.slane %v2348_v20, 5  ;;  %v2406_v41 = vrot.slane %v2404_v22, 4  ;;  %5775 = vmatpush.bf16.msra.mxu2 %v12130_v29 }
  0xf5   : > { %3874 = vmatmul.bf16.gmra.mxu1 %v3106_v42  ;;  %v632_v42 = vld [vmem:[%s12889_s27 + $0x638] sm:$0x11]  ;;  %v3114_v43 = vpack.c.b16 %v2952_v23, %v2943_v0  ;;  %v2345_v59 = vor.u32 %v2344_v38, %v2341_v37  ;;  %v2459_v22 = vshrl.u32 %v408_v5, 16  ;;  %v2468_v23 = vshll.u32 %v413_v11, 16  ;;  %v12243_v11 = vld [vmem:[%s16219_s1 + $0x400] sm:$0xff] }
  0xf6   : > { %3963 = vmatmul.bf16.gmra.mxu2 %v3107_v47  ;;  %v407_v47 = vld [vmem:[%s12889_s27 + $0x654] sm:$0xff]  ;;  %v2397_v52 = vor.u32 %v2396_v34, %v2336_v33  ;;  %v2407_v60 = vor.u32 %v2406_v41, %v2350_v39  ;;  %v2410_v62 = vshll.u32 %v632_v42, 16  ;;  %v2337_v27 = vsel %vm12923_vm2, %v2332_v6, %v2336_v33  ;;  %v636_v33 = vld [vmem:[%s12889_s27 + $0x69c] sm:$0x11] }
  0xf7   : > { %4052 = vmatmul.bf16.gmra.mxu3 %v3108_v48  ;;  %v412_v0 = vld [vmem:[%s12889_s27 + $0x678] sm:$0xff]  ;;  %v2445_v1 = vshrl.u32 %v407_v47, 16  ;;  %v2448_v2 = vshll.u32 %v407_v47, 16  ;;  %v2346_v9 = vrot.slane %v2345_v59, 4  ;;  %v637_v47 = vld [vmem:[%s12889_s27 + $0x6a4] sm:$0x11]  ;;  %v2961_v51 = vunpack.c.l.b16 %v2337_v27 }
  0xf8   : > { %v2408_v13 = vrot.slane %v2407_v60, 4  ;;  %v2514_v20 = vshrl.u32 %v412_v0, 16 }
  0xf9   : > { %v3924_v8 = vpop.f32.mrf.mxu2  ;;  %v3748_v16 = vpop.f32.mrf.mxu0  ;;  %v2450_v14 = vrot.slane %v2448_v2, 5  ;;  %v2351_v35 = vsel %vm12923_vm2, %v2346_v9, %v2350_v39  ;;  %v12244_v39 = vld [vmem:[%s16219_s1 + $0x408] sm:$0xff] }
  0xfa   : > { %v4013_v10 = vpop.f32.mrf.mxu3  ;;  %v3925_v15 = vadd.f32 %v3924_v8, %v3836_v49  ;;  %v3837_v17 = vpop.f32.mrf.mxu1  ;;  %v2398_v8 = vrot.slane %v2397_v52, 4  ;;  %4346 = vmatpush.bf16.msrb.mxu3 %v12244_v39 }
  0xfb   : > { %v3838_v21 = vadd.f32 %v3837_v17, %v3748_v16  ;;  %v2454_v16 = vshll.u32 %v412_v0, 16  ;;  %v2447_v17 = vrot.slane %v2445_v1, 4 }
  0xfc   : > { %v13255_v26 = vadd.f32 %v4013_v10, %v3925_v15  ;;  %v2402_v10 = vrot.slane %v2400_v54, 5  ;;  %v2412_v15 = vrot.slane %v2410_v62, 5  ;;  %v2962_v54 = vunpack.c.h.b16 %v2337_v27  ;;  %v264_v27 = vld [vmem:[%s12889_s27 + $0x34] sm:$0xff] }
  0xfd   : > { %v2456_v38 = vrot.slane %v2454_v16, 5  ;;  %v2451_v42 = vor.u32 %v2450_v14, %v2447_v17  ;;  %v2520_v62 = vshll.u32 %v636_v33, 16 }
  0xfe   : > { %v2403_v28 = vsel %vm12923_vm2, %v2398_v8, %v2402_v10  ;;  %v2413_v37 = vsel %vm12923_vm2, %v2408_v13, %v2412_v15  ;;  %4347 = vmatpush.bf16.msrb.mxu3 %v12243_v11 }
  0xff   : > { %v2970_v52 = vunpack.c.l.b16 %v2403_v28  ;;  %v2971_v55 = vunpack.c.h.b16 %v2403_v28  ;;  %v2973_v59 = vunpack.c.h.b16 %v2413_v37  ;;  %v2452_v0 = vrot.slane %v2451_v42, 4  ;;  %v260_v28 = vld [vmem:[%s12889_s27 + $0x18] sm:$0xff] }
 0x101   : > { %v3926_v48 = vpop.f32.mrf.mxu2  ;;  %v3751_v57 = vpop.f32.mrf.mxu0  ;;  %v3123_v8 = vpack.c.b16 %v2970_v52, %v2961_v51  ;;  %v3124_v10 = vpack.c.b16 %v2971_v55, %v2962_v54  ;;  %v690_v54 = vshll.u32 %v260_v28, 16 }
 0x102   : > { %v4015_v49 = vpop.f32.mrf.mxu3  ;;  %v3927_v56 = vadd.f32 %v3926_v48, %v3838_v21  ;;  %v3840_v58 = vpop.f32.mrf.mxu1  ;;  %v2462_v21 = vshll.u32 %v408_v5, 16 }
 0x103   : > { %v3841_v63 = vadd.f32 %v3840_v58, %v3751_v57  ;;  %v2972_v57 = vunpack.c.l.b16 %v2413_v37  ;;  %v2964_v58 = vunpack.c.h.b16 %v2351_v35 }
 0x104   : > { %v13267_v4 = vadd.f32 %v4015_v49, %v3927_v56  ;;  %3790 = vmatmul.bf16.gmra.mxu0 %v3114_v43  ;;  %v2516_v43 = vrot.slane %v2514_v20, 4  ;;  %v2464_v48 = vrot.slane %v2462_v21, 5  ;;  %v2470_v49 = vrot.slane %v2468_v23, 5 }
 0x105   : > { %3879 = vmatmul.bf16.gmra.mxu1 %v3115_v44  ;;  %v2461_v44 = vrot.slane %v2459_v22, 4  ;;  %v2963_v56 = vunpack.c.l.b16 %v2351_v35  ;;  %v3126_v16 = vpack.c.b16 %v2973_v59, %v2964_v58  ;;  %v2522_v20 = vrot.slane %v2520_v62, 5  ;;  %v265_v35 = vld [vmem:[%s12889_s27 + $0x3c] sm:$0xff] }
 0x106   : > { %3968 = vmatmul.bf16.gmra.mxu2 %v3116_v46  ;;  %v2517_v60 = vor.u32 %v2516_v43, %v2456_v38  ;;  %v2457_v23 = vsel %vm12923_vm2, %v2452_v0, %v2456_v38  ;;  %v696_v55 = vshll.u32 %v265_v35, 16 }
 0x107   : > { %4057 = vmatmul.bf16.gmra.mxu3 %v3117_v50  ;;  %v2526_v50 = vrot.slane %v2524_v24, 4  ;;  %v2465_v1 = vor.u32 %v2464_v48, %v2461_v44  ;;  %v3125_v15 = vpack.c.b16 %v2972_v57, %v2963_v56  ;;  %v2980_v37 = vunpack.c.h.b16 %v2457_v23 }
 0x108   : > { %v2518_v14 = vrot.slane %v2517_v60, 4  ;;  %v734_v48 = vshrl.u32 %v264_v27, 16  ;;  %v744_v56 = vshrl.u32 %v265_v35, 16 }
 0x109   : > { %v3929_v25 = vpop.f32.mrf.mxu2  ;;  %v3753_v31 = vpop.f32.mrf.mxu0  ;;  %v2527_v2 = vor.u32 %v2526_v50, %v2470_v49  ;;  %v2466_v24 = vrot.slane %v2465_v1, 4  ;;  %v687_v50 = vshrl.u32 %v260_v28, 16  ;;  %v12122_v1 = vld [vmem:[%s16219_s1 + $0x38] sm:$0xff] }
 0x10a   : > { %v4018_v19 = vpop.f32.mrf.mxu3  ;;  %v3930_v30 = vadd.f32 %v3929_v25, %v3841_v63  ;;  %v3842_v34 = vpop.f32.mrf.mxu1  ;;  %v2530_v63 = vshll.u32 %v637_v47, 16  ;;  %v682_v47 = vshll.u32 %v264_v27, 16  ;;  %5686 = vmatpush.bf16.msra.mxu1 %v12122_v1 }
 0x10b   : > { %v3843_v41 = vadd.f32 %v3842_v34, %v3753_v31  ;;  %v2528_v25 = vrot.slane %v2527_v2, 4  ;;  %v2523_v31 = vsel %vm12923_vm2, %v2518_v14, %v2522_v20  ;;  %v2979_v34 = vunpack.c.l.b16 %v2457_v23  ;;  %v269_v20 = vld [vmem:[%s12889_s27 + $0x7c] sm:$0xff] }
 0x10c   : > { %v13286_v46 = vadd.f32 %v4018_v19, %v3930_v30  ;;  %v2532_v22 = vrot.slane %v2530_v63, 5  ;;  %v259_v19 = vld [vmem:[%s12889_s27 + $0x10] sm:$0xff]  ;;  %v12258_v30 = vld [vmem:[%s16219_s1 + $0x478] sm:$0xff]  ;;  %v2471_v38 = vsel %vm12923_vm2, %v2466_v24, %v2470_v49  ;;  %v2988_v57 = vunpack.c.l.b16 %v2523_v31 }
 0x10d   : > { %v673_v33 = vshrl.u32 %v259_v19, 16  ;;  %4429 = vmatpush.bf16.msra.mxu0 %v12258_v30  ;;  %v676_v44 = vshll.u32 %v259_v19, 16  ;;  %v2989_v58 = vunpack.c.h.b16 %v2523_v31  ;;  %v2981_v59 = vunpack.c.l.b16 %v2471_v38 }
 0x10e   : > { %v2982_v63 = vunpack.c.h.b16 %v2471_v38  ;;  %v689_v11 = vrot.slane %v687_v50, 4  ;;  %v275_v50 = vld [vmem:[%s12889_s27 + $0xa8] sm:$0xff] }
 0x10f   : > { %v675_v2 = vrot.slane %v673_v33, 4  ;;  %v796_v33 = vshll.u32 %v269_v20, 16 }
 0x111   : > { %v3931_v5 = vpop.f32.mrf.mxu2  ;;  %v3756_v9 = vpop.f32.mrf.mxu0 }
 0x112   : > { %v4020_v6 = vpop.f32.mrf.mxu3  ;;  %v3932_v12 = vadd.f32 %v3931_v5, %v3843_v41  ;;  %v3845_v13 = vpop.f32.mrf.mxu1  ;;  %v2533_v41 = vsel %vm12923_vm2, %v2528_v25, %v2532_v22  ;;  %v678_v5 = vrot.slane %v676_v44, 5 }
 0x113   : > { %v3846_v17 = vadd.f32 %v3845_v13, %v3756_v9  ;;  %v2990_v62 = vunpack.c.l.b16 %v2533_v41  ;;  %v2991_v0 = vunpack.c.h.b16 %v2533_v41  ;;  %v698_v9 = vrot.slane %v696_v55, 5 }
 0x114   : > { %v13295_v21 = vadd.f32 %v4020_v6, %v3932_v12  ;;  %3795 = vmatmul.bf16.gmra.mxu0 %v3123_v8  ;;  %v684_v6 = vrot.slane %v682_v47, 5  ;;  %v736_v8 = vrot.slane %v734_v48, 4  ;;  %v692_v12 = vrot.slane %v690_v54, 5 }
 0x115   : > { %3884 = vmatmul.bf16.gmra.mxu1 %v3124_v10  ;;  %v563_v10 = vld [vmem:[%s12889_s27 + $0x58] sm:$0x11]  ;;  %v746_v13 = vrot.slane %v744_v56, 4  ;;  %v3134_v14 = vpack.c.b16 %v2990_v62, %v2981_v59  ;;  %v3135_v24 = vpack.c.b16 %v2991_v0, %v2982_v63  ;;  %v679_v25 = vor.u32 %v678_v5, %v675_v2 }
 0x116   : > { %3973 = vmatmul.bf16.gmra.mxu2 %v3125_v15  ;;  %v564_v15 = vld [vmem:[%s12889_s27 + $0x60] sm:$0x11]  ;;  %v737_v19 = vor.u32 %v736_v8, %v684_v6  ;;  %v740_v27 = vshll.u32 %v563_v10, 16  ;;  %v693_v31 = vor.u32 %v692_v12, %v689_v11  ;;  %v798_v56 = vrot.slane %v796_v33, 5 }
 0x117   : > { %4062 = vmatmul.bf16.gmra.mxu3 %v3126_v16  ;;  %v3132_v16 = vpack.c.b16 %v2988_v57, %v2979_v34  ;;  %v747_v35 = vor.u32 %v746_v13, %v698_v9  ;;  %v750_v38 = vshll.u32 %v564_v15, 16  ;;  %v274_v34 = vld [vmem:[%s12889_s27 + $0xa0] sm:$0xff]  ;;  %v680_v44 = vrot.slane %v679_v25, 4 }
 0x118   : > { %v738_v47 = vrot.slane %v737_v19, 4  ;;  %v742_v48 = vrot.slane %v740_v27, 5  ;;  %v802_v54 = vshll.u32 %v274_v34, 16  ;;  %v816_v59 = vshll.u32 %v275_v50, 16 }
 0x119   : > { %v3934_v42 = vpop.f32.mrf.mxu2  ;;  %v3758_v51 = vpop.f32.mrf.mxu0  ;;  %v864_v62 = vshrl.u32 %v275_v50, 16  ;;  %v685_v1 = vsel %vm12923_vm2, %v680_v44, %v684_v6  ;;  %v569_v6 = vld [vmem:[%s12889_s27 + $0xcc] sm:$0x11] }
 0x11a   : > { %v4023_v43 = vpop.f32.mrf.mxu3  ;;  %v3935_v39 = vadd.f32 %v3934_v42, %v3846_v17  ;;  %v3847_v52 = vpop.f32.mrf.mxu1  ;;  %v3133_v17 = vpack.c.b16 %v2989_v58, %v2980_v37  ;;  %v793_v37 = vshrl.u32 %v269_v20, 16  ;;  %v743_v2 = vsel %vm12923_vm2, %v738_v47, %v742_v48 }
 0x11b   : > { %v3848_v49 = vadd.f32 %v3847_v52, %v3758_v51  ;;  %v748_v51 = vrot.slane %v747_v35, 4  ;;  %v752_v52 = vrot.slane %v750_v38, 5  ;;  %v804_v13 = vrot.slane %v802_v54, 5 }
 0x11c   : > { %v13315_v60 = vadd.f32 %v4023_v43, %v3935_v39  ;;  %v270_v43 = vld [vmem:[%s12889_s27 + $0x84] sm:$0xff]  ;;  %v694_v39 = vrot.slane %v693_v31, 4  ;;  %v795_v55 = vrot.slane %v793_v37, 4  ;;  %v866_v25 = vrot.slane %v864_v62, 4 }
 0x11d   : > { %v807_v57 = vshrl.u32 %v270_v43, 16  ;;  %v810_v58 = vshll.u32 %v270_v43, 16  ;;  %v753_v12 = vsel %vm12923_vm2, %v748_v51, %v752_v52  ;;  %v2713_v19 = vunpack.c.l.b16 %v685_v1 }
 0x11e   : > { %v699_v11 = vsel %vm12923_vm2, %v694_v39, %v698_v9  ;;  %v2722_v27 = vunpack.c.l.b16 %v743_v2  ;;  %v2725_v35 = vunpack.c.h.b16 %v753_v12 }
 0x11f   : > { %v809_v20 = vrot.slane %v807_v57, 4  ;;  %v2715_v9 = vunpack.c.l.b16 %v699_v11  ;;  %v2716_v31 = vunpack.c.h.b16 %v699_v11 }
 0x120   : > { %v3001_v48 = vpack.c.b16 %v2722_v27, %v2713_v19 }
 0x121   : > { %v3936_v22 = vpop.f32.mrf.mxu2  ;;  %v3761_v29 = vpop.f32.mrf.mxu0 }
 0x122   : > { %v4025_v23 = vpop.f32.mrf.mxu3  ;;  %v3937_v28 = vadd.f32 %v3936_v22, %v3848_v49  ;;  %v3850_v30 = vpop.f32.mrf.mxu1  ;;  %v854_v49 = vshrl.u32 %v274_v34, 16  ;;  %v870_v34 = vshll.u32 %v569_v6, 16 }
 0x123   : > { %v3851_v41 = vadd.f32 %v3850_v30, %v3761_v29  ;;  %v2723_v29 = vunpack.c.h.b16 %v743_v2  ;;  %v2724_v30 = vunpack.c.l.b16 %v753_v12  ;;  %v284_v2 = vld [vmem:[%s12889_s27 + $0x10c] sm:$0xff] }
 0x124   : > { %v13324_v42 = vadd.f32 %v4025_v23, %v3937_v28  ;;  %3800 = vmatmul.bf16.gmra.mxu0 %v3132_v16  ;;  %v568_v16 = vld [vmem:[%s12889_s27 + $0xc4] sm:$0x11]  ;;  %v812_v23 = vrot.slane %v810_v58, 5  ;;  %v2714_v28 = vunpack.c.h.b16 %v685_v1  ;;  %v872_v58 = vrot.slane %v870_v34, 5 }
 0x125   : > { %3889 = vmatmul.bf16.gmra.mxu1 %v3133_v17  ;;  %v799_v17 = vor.u32 %v798_v56, %v795_v55  ;;  %v3003_v54 = vpack.c.b16 %v2724_v30, %v2715_v9  ;;  %v3004_v55 = vpack.c.b16 %v2725_v35, %v2716_v31  ;;  %v279_v1 = vld [vmem:[%s12889_s27 + $0xe8] sm:$0xff]  ;;  %v974_v19 = vshrl.u32 %v284_v2, 16 }
 0x126   : > { %3978 = vmatmul.bf16.gmra.mxu2 %v3134_v14  ;;  %v856_v14 = vrot.slane %v854_v49, 4  ;;  %v813_v33 = vor.u32 %v812_v23, %v809_v20  ;;  %v3002_v50 = vpack.c.b16 %v2723_v29, %v2714_v28  ;;  %v916_v23 = vshll.u32 %v279_v1, 16 }
 0x127   : > { %4067 = vmatmul.bf16.gmra.mxu3 %v3135_v24  ;;  %v818_v24 = vrot.slane %v816_v59, 5  ;;  %v800_v37 = vrot.slane %v799_v17, 4 }
 0x128   : > { %v857_v38 = vor.u32 %v856_v14, %v804_v13  ;;  %v913_v14 = vshrl.u32 %v279_v1, 16 }
 0x129   : > { %v3939_v63 = vpop.f32.mrf.mxu2  ;;  %v3763_v8 = vpop.f32.mrf.mxu0  ;;  %v867_v43 = vor.u32 %v866_v25, %v818_v24  ;;  %v805_v62 = vsel %vm12923_vm2, %v800_v37, %v804_v13  ;;  %v285_v13 = vld [vmem:[%s12889_s27 + $0x114] sm:$0xff]  ;;  %v922_v25 = vshll.u32 %v284_v2, 16 }
 0x12a   : > { %v4028_v0 = vpop.f32.mrf.mxu3  ;;  %v3940_v5 = vadd.f32 %v3939_v63, %v3851_v41  ;;  %v3852_v10 = vpop.f32.mrf.mxu1  ;;  %v860_v41 = vshll.u32 %v568_v16, 16  ;;  %v858_v49 = vrot.slane %v857_v38, 4  ;;  %v814_v63 = vrot.slane %v813_v33, 4 }
 0x12b   : > { %v3853_v15 = vadd.f32 %v3852_v10, %v3763_v8  ;;  %v12129_v8 = vld [vmem:[%s16219_s1 + $0x70] sm:$0xff]  ;;  %v2731_v12 = vunpack.c.l.b16 %v805_v62  ;;  %v936_v31 = vshll.u32 %v285_v13, 16  ;;  %v984_v35 = vshrl.u32 %v285_v13, 16 }
 0x12c   : > { %v13337_v22 = vadd.f32 %v4028_v0, %v3940_v5  ;;  %v862_v57 = vrot.slane %v860_v41, 5  ;;  %v868_v0 = vrot.slane %v867_v43, 4  ;;  %v280_v5 = vld [vmem:[%s12889_s27 + $0xf0] sm:$0xff]  ;;  %v819_v16 = vsel %vm12923_vm2, %v814_v63, %v818_v24  ;;  %5776 = vmatpush.bf16.msra.mxu2 %v12129_v8 }
 0x12d   : > { %v12257_v10 = vld [vmem:[%s16219_s1 + $0x470] sm:$0xff]  ;;  %v927_v27 = vshrl.u32 %v280_v5, 16  ;;  %v930_v30 = vshll.u32 %v280_v5, 16  ;;  %v2733_v34 = vunpack.c.l.b16 %v819_v16  ;;  %v2734_v43 = vunpack.c.h.b16 %v819_v16 }
 0x12e   : > { %v863_v11 = vsel %vm12923_vm2, %v858_v49, %v862_v57  ;;  %v873_v17 = vsel %vm12923_vm2, %v868_v0, %v872_v58  ;;  %4430 = vmatpush.bf16.msra.mxu0 %v12257_v10  ;;  %v986_v49 = vrot.slane %v984_v35, 4  ;;  %v574_v57 = vld [vmem:[%s12889_s27 + $0x138] sm:$0x11] }
 0x12f   : > { %v2740_v38 = vunpack.c.l.b16 %v863_v11  ;;  %v2741_v41 = vunpack.c.h.b16 %v863_v11  ;;  %v2742_v33 = vunpack.c.l.b16 %v873_v17  ;;  %v289_v0 = vld [vmem:[%s12889_s27 + $0x154] sm:$0xff] }
 0x131   : > { %v3941_v44 = vpop.f32.mrf.mxu2  ;;  %v3766_v51 = vpop.f32.mrf.mxu0  ;;  %v3010_v58 = vpack.c.b16 %v2740_v38, %v2731_v12  ;;  %v3012_v63 = vpack.c.b16 %v2742_v33, %v2733_v34  ;;  %v294_v12 = vld [vmem:[%s12889_s27 + $0x178] sm:$0xff] }
 0x132   : > { %v4030_v47 = vpop.f32.mrf.mxu3  ;;  %v3942_v39 = vadd.f32 %v3941_v44, %v3853_v15  ;;  %v3855_v52 = vpop.f32.mrf.mxu1  ;;  %v2732_v15 = vunpack.c.h.b16 %v805_v62  ;;  %v2743_v44 = vunpack.c.h.b16 %v873_v17  ;;  %v1042_v38 = vshll.u32 %v294_v12, 16 }
 0x133   : > { %v3856_v56 = vadd.f32 %v3855_v52, %v3766_v51  ;;  %v976_v51 = vrot.slane %v974_v19, 4  ;;  %v573_v52 = vld [vmem:[%s12889_s27 + $0x130] sm:$0x11]  ;;  %v1094_v33 = vshrl.u32 %v294_v12, 16 }
 0x134   : > { %v13340_v59 = vadd.f32 %v4030_v47, %v3942_v39  ;;  %4081 = vmatmul.bf16.vlgmr.msrb.gmra.mxu0 %v3001_v48  ;;  %v12121_v47 = vld [vmem:[%s16219_s1 + $0x30] sm:$0xff]  ;;  %v915_v48 = vrot.slane %v913_v14, 4  ;;  %v924_v39 = vrot.slane %v922_v25, 5  ;;  %v3011_v62 = vpack.c.b16 %v2741_v41, %v2732_v15 }
 0x135   : > { %4170 = vmatmul.bf16.vlgmr.msrb.gmra.mxu1 %v3002_v50  ;;  %v918_v50 = vrot.slane %v916_v23, 5  ;;  %v3013_v5 = vpack.c.b16 %v2743_v44, %v2734_v43  ;;  %v980_v11 = vshll.u32 %v573_v52, 16  ;;  %v1033_v15 = vshrl.u32 %v289_v0, 16 }
 0x136   : > { %4259 = vmatmul.bf16.vlgmr.msrb.gmra.mxu2 %v3003_v54  ;;  %v929_v54 = vrot.slane %v927_v27, 4  ;;  %5687 = vmatpush.bf16.msra.mxu1 %v12121_v47  ;;  %v977_v10 = vor.u32 %v976_v51, %v924_v39  ;;  %v1036_v25 = vshll.u32 %v289_v0, 16  ;;  %v290_v27 = vld [vmem:[%s12889_s27 + $0x15c] sm:$0xff] }
 0x137   : > { %4348 = vmatmul.bf16.vlgmr.msrb.gmra.mxu3 %v3004_v55  ;;  %v932_v55 = vrot.slane %v930_v30, 5  ;;  %v919_v8 = vor.u32 %v918_v50, %v915_v48  ;;  %v295_v30 = vld [vmem:[%s12889_s27 + $0x180] sm:$0xff]  ;;  %v1035_v41 = vrot.slane %v1033_v15, 4  ;;  %v1047_v43 = vshrl.u32 %v290_v27, 16 }
 0x138   : > { %v1038_v34 = vrot.slane %v1036_v25, 5  ;;  %v1050_v44 = vshll.u32 %v290_v27, 16  ;;  %v1056_v47 = vshll.u32 %v295_v30, 16  ;;  %v1104_v48 = vshrl.u32 %v295_v30, 16 }
 0x139   : > { %v3944_v20 = vpop.f32.mrf.mxu2  ;;  %v3768_v29 = vpop.f32.mrf.mxu0  ;;  %v933_v14 = vor.u32 %v932_v55, %v929_v54 }
 0x13a   : > { %v4033_v6 = vpop.f32.mrf.mxu3  ;;  %v3945_v28 = vadd.f32 %v3944_v20, %v3856_v56  ;;  %v3857_v9 = vpop.f32.mrf.mxu1  ;;  %v938_v56 = vrot.slane %v936_v31, 5 }
 0x13b   : > { %v3858_v24 = vadd.f32 %v3857_v9, %v3768_v29  ;;  %v978_v29 = vrot.slane %v977_v10, 4  ;;  %v982_v9 = vrot.slane %v980_v11, 5  ;;  %v934_v31 = vrot.slane %v933_v14, 4 }
 0x13c   : > { %v13360_v37 = vadd.f32 %v4033_v6, %v3945_v28  ;;  %v987_v20 = vor.u32 %v986_v49, %v938_v56  ;;  %v990_v6 = vshll.u32 %v574_v57, 16  ;;  %v920_v28 = vrot.slane %v919_v8, 4 }
 0x13d   : > { %v983_v54 = vsel %vm12923_vm2, %v978_v29, %v982_v9  ;;  %v1049_v8 = vrot.slane %v1047_v43, 4  ;;  %v1052_v11 = vrot.slane %v1050_v44, 5 }
 0x13e   : > { %v988_v35 = vrot.slane %v987_v20, 4  ;;  %v925_v52 = vsel %vm12923_vm2, %v920_v28, %v924_v39  ;;  %v579_v39 = vld [vmem:[%s12889_s27 + $0x1a4] sm:$0x11]  ;;  %v2758_v14 = vunpack.c.l.b16 %v983_v54 }
 0x13f   : > { %v2750_v20 = vunpack.c.h.b16 %v925_v52  ;;  %v1110_v28 = vshll.u32 %v579_v39, 16  ;;  %v1053_v9 = vor.u32 %v1052_v11, %v1049_v8 }
 0x141   : > { %v3946_v1 = vpop.f32.mrf.mxu2  ;;  %v3771_v16 = vpop.f32.mrf.mxu0 }
 0x142   : > { %v4035_v2 = vpop.f32.mrf.mxu3  ;;  %v3947_v13 = vadd.f32 %v3946_v1, %v3858_v24  ;;  %v3860_v17 = vpop.f32.mrf.mxu1  ;;  %v992_v24 = vrot.slane %v990_v6, 5  ;;  %v578_v1 = vld [vmem:[%s12889_s27 + $0x19c] sm:$0x11]  ;;  %v2759_v6 = vunpack.c.h.b16 %v983_v54 }
 0x143   : > { %v3861_v23 = vadd.f32 %v3860_v17, %v3771_v16  ;;  %v1106_v16 = vrot.slane %v1104_v48, 4  ;;  %v2749_v17 = vunpack.c.l.b16 %v925_v52  ;;  %v1100_v27 = vshll.u32 %v578_v1, 16  ;;  %v12256_v1 = vld [vmem:[%s16219_s1 + $0x468] sm:$0xff] }
 0x144   : > { %v13369_v19 = vadd.f32 %v4035_v2, %v3947_v13  ;;  %4086 = vmatmul.bf16.gmra.mxu0 %v3010_v58  ;;  %v939_v58 = vsel %vm12923_vm2, %v934_v31, %v938_v56  ;;  %v1039_v2 = vor.u32 %v1038_v34, %v1035_v41  ;;  %v1058_v13 = vrot.slane %v1056_v47, 5 }
 0x145   : > { %4175 = vmatmul.bf16.gmra.mxu1 %v3011_v62  ;;  %v993_v62 = vsel %vm12923_vm2, %v988_v35, %v992_v24  ;;  %v2751_v56 = vunpack.c.l.b16 %v939_v58  ;;  %v2752_v12 = vunpack.c.h.b16 %v939_v58  ;;  %v3019_v24 = vpack.c.b16 %v2758_v14, %v2749_v17  ;;  %v304_v58 = vld [vmem:[%s12889_s27 + $0x1e4] sm:$0xff]  ;;  %4431 = vmatpush.bf16.msra.mxu0 %v12256_v1 }
 0x146   : > { %4264 = vmatmul.bf16.gmra.mxu2 %v3012_v63  ;;  %v1044_v63 = vrot.slane %v1042_v38, 5  ;;  %v2761_v15 = vunpack.c.h.b16 %v993_v62  ;;  %v1040_v29 = vrot.slane %v1039_v2, 4  ;;  %v1107_v30 = vor.u32 %v1106_v16, %v1058_v13 }
 0x147   : > { %4353 = vmatmul.bf16.gmra.mxu3 %v3013_v5  ;;  %v1096_v5 = vrot.slane %v1094_v33, 4  ;;  %v3020_v38 = vpack.c.b16 %v2759_v6, %v2750_v20  ;;  %v1162_v6 = vshll.u32 %v304_v58, 16 }
 0x148   : > { %v3022_v44 = vpack.c.b16 %v2761_v15, %v2752_v12  ;;  %v1045_v54 = vsel %vm12923_vm2, %v1040_v29, %v1044_v63 }
 0x149   : > { %v3949_v50 = vpop.f32.mrf.mxu2  ;;  %v3773_v49 = vpop.f32.mrf.mxu0  ;;  %v1097_v25 = vor.u32 %v1096_v5, %v1044_v63  ;;  %v2767_v2 = vunpack.c.l.b16 %v1045_v54  ;;  %v305_v5 = vld [vmem:[%s12889_s27 + $0x1ec] sm:$0xff]  ;;  %v2768_v8 = vunpack.c.h.b16 %v1045_v54 }
 0x14a   : > { %v4038_v51 = vpop.f32.mrf.mxu3  ;;  %v3950_v55 = vadd.f32 %v3949_v50, %v3861_v23  ;;  %v3862_v57 = vpop.f32.mrf.mxu1  ;;  %v2760_v23 = vunpack.c.l.b16 %v993_v62  ;;  %v1102_v50 = vrot.slane %v1100_v27, 5  ;;  %v300_v62 = vld [vmem:[%s12889_s27 + $0x1c8] sm:$0xff]  ;;  %v1224_v29 = vshrl.u32 %v305_v5, 16 }
 0x14b   : > { %v3863_v0 = vadd.f32 %v3862_v57, %v3773_v49  ;;  %v1098_v48 = vrot.slane %v1097_v25, 4  ;;  %v1108_v49 = vrot.slane %v1107_v30, 4  ;;  %v299_v57 = vld [vmem:[%s12889_s27 + $0x1c0] sm:$0xff]  ;;  %v1170_v27 = vshll.u32 %v300_v62, 16 }
 0x14c   : > { %v13382_v10 = vadd.f32 %v4038_v51, %v3950_v55  ;;  %v3021_v43 = vpack.c.b16 %v2760_v23, %v2751_v56  ;;  %v1112_v51 = vrot.slane %v1110_v28, 5  ;;  %v1054_v55 = vrot.slane %v1053_v9, 4 }
 0x14d   : > { %v1103_v63 = vsel %vm12923_vm2, %v1098_v48, %v1102_v50  ;;  %v1153_v16 = vshrl.u32 %v299_v57, 16  ;;  %v1156_v20 = vshll.u32 %v299_v57, 16  ;;  %v1214_v56 = vshrl.u32 %v304_v58, 16  ;;  %v583_v48 = vld [vmem:[%s12889_s27 + $0x208] sm:$0x11] }
 0x14e   : > { %v1059_v39 = vsel %vm12923_vm2, %v1054_v55, %v1058_v13  ;;  %v1113_v11 = vsel %vm12923_vm2, %v1108_v49, %v1112_v51  ;;  %v1167_v23 = vshrl.u32 %v300_v62, 16  ;;  %v1176_v28 = vshll.u32 %v305_v5, 16  ;;  %v584_v49 = vld [vmem:[%s12889_s27 + $0x210] sm:$0x11] }
 0x14f   : > { %v2776_v9 = vunpack.c.l.b16 %v1103_v63  ;;  %v2777_v30 = vunpack.c.h.b16 %v1103_v63  ;;  %v1172_v51 = vrot.slane %v1170_v27, 5  ;;  %v1226_v55 = vrot.slane %v1224_v29, 4  ;;  %v310_v27 = vld [vmem:[%s12889_s27 + $0x234] sm:$0xff] }
 0x150   : > { %v1169_v50 = vrot.slane %v1167_v23, 4  ;;  %v1178_v54 = vrot.slane %v1176_v28, 5  ;;  %v1230_v23 = vshll.u32 %v584_v49, 16 }
 0x151   : > { %v3951_v31 = vpop.f32.mrf.mxu2  ;;  %v3776_v34 = vpop.f32.mrf.mxu0  ;;  %v3028_v57 = vpack.c.b16 %v2776_v9, %v2767_v2  ;;  %v3029_v58 = vpack.c.b16 %v2777_v30, %v2768_v8  ;;  %v314_v2 = vld [vmem:[%s12889_s27 + $0x250] sm:$0xff]  ;;  %v315_v30 = vld [vmem:[%s12889_s27 + $0x258] sm:$0xff] }
 0x152   : > { %v4040_v35 = vpop.f32.mrf.mxu3  ;;  %v3952_v41 = vadd.f32 %v3951_v31, %v3863_v0  ;;  %v3865_v33 = vpop.f32.mrf.mxu1  ;;  %v12128_v0 = vld [vmem:[%s16219_s1 + $0x68] sm:$0xff]  ;;  %v2769_v31 = vunpack.c.l.b16 %v1059_v39 }
 0x153   : > { %v3866_v47 = vadd.f32 %v3865_v33, %v3776_v34  ;;  %5777 = vmatpush.bf16.msra.mxu2 %v12128_v0  ;;  %v12120_v34 = vld [vmem:[%s16219_s1 + $0x28] sm:$0xff]  ;;  %v1155_v33 = vrot.slane %v1153_v16, 4  ;;  %v1220_v16 = vshll.u32 %v583_v48, 16  ;;  %v1296_v48 = vshll.u32 %v315_v30, 16 }
 0x154   : > { %v13385_v52 = vadd.f32 %v4040_v35, %v3952_v41  ;;  %4091 = vmatmul.bf16.gmra.mxu0 %v3019_v24  ;;  %v2778_v24 = vunpack.c.l.b16 %v1113_v11  ;;  %v2779_v41 = vunpack.c.h.b16 %v1113_v11  ;;  %5688 = vmatpush.bf16.msra.mxu1 %v12120_v34  ;;  %v309_v0 = vld [vmem:[%s12889_s27 + $0x22c] sm:$0xff] }
 0x155   : > { %4180 = vmatmul.bf16.gmra.mxu1 %v3020_v38  ;;  %v2770_v38 = vunpack.c.h.b16 %v1059_v39  ;;  %v1273_v8 = vshrl.u32 %v309_v0, 16  ;;  %v1222_v9 = vrot.slane %v1220_v16, 5 }
 0x156   : > { %4269 = vmatmul.bf16.gmra.mxu2 %v3021_v43  ;;  %v1158_v43 = vrot.slane %v1156_v20, 5  ;;  %v3030_v62 = vpack.c.b16 %v2778_v24, %v2769_v31  ;;  %v1232_v24 = vrot.slane %v1230_v23, 5 }
 0x157   : > { %4358 = vmatmul.bf16.gmra.mxu3 %v3022_v44  ;;  %v1164_v44 = vrot.slane %v1162_v6, 5  ;;  %v3031_v5 = vpack.c.b16 %v2779_v41, %v2770_v38  ;;  %v1173_v6 = vor.u32 %v1172_v51, %v1169_v50  ;;  %v1282_v38 = vshll.u32 %v314_v2, 16 }
 0x158   : > { %v1159_v39 = vor.u32 %v1158_v43, %v1155_v33  ;;  %v1275_v41 = vrot.slane %v1273_v8, 4  ;;  %v1334_v33 = vshrl.u32 %v314_v2, 16  ;;  %v1287_v43 = vshrl.u32 %v310_v27, 16 }
 0x159   : > { %v3954_v17 = vpop.f32.mrf.mxu2  ;;  %v3778_v15 = vpop.f32.mrf.mxu0  ;;  %v1344_v50 = vshrl.u32 %v315_v30, 16 }
 0x15a   : > { %v4043_v14 = vpop.f32.mrf.mxu3  ;;  %v3955_v12 = vadd.f32 %v3954_v17, %v3866_v47  ;;  %v3867_v25 = vpop.f32.mrf.mxu1  ;;  %v1216_v47 = vrot.slane %v1214_v56, 4  ;;  %v1227_v56 = vor.u32 %v1226_v55, %v1178_v54  ;;  %v1160_v28 = vrot.slane %v1159_v39, 4 }
 0x15b   : > { %v3868_v13 = vadd.f32 %v3867_v25, %v3778_v15  ;;  %v1276_v15 = vshll.u32 %v309_v0, 16  ;;  %v1346_v23 = vrot.slane %v1344_v50, 4 }
 0x15c   : > { %v13405_v35 = vadd.f32 %v4043_v14, %v3955_v12  ;;  %v1217_v11 = vor.u32 %v1216_v47, %v1164_v44  ;;  %v1228_v31 = vrot.slane %v1227_v56, 4  ;;  %v1290_v47 = vshll.u32 %v310_v27, 16 }
 0x15d   : > { %v1278_v34 = vrot.slane %v1276_v15, 5  ;;  %v1165_v49 = vsel %vm12923_vm2, %v1160_v28, %v1164_v44  ;;  %v589_v44 = vld [vmem:[%s12889_s27 + $0x27c] sm:$0x11]  ;;  %v1298_v56 = vrot.slane %v1296_v48, 5 }
 0x15e   : > { %v1218_v29 = vrot.slane %v1217_v11, 4  ;;  %v588_v11 = vld [vmem:[%s12889_s27 + $0x274] sm:$0x11]  ;;  %v2786_v8 = vunpack.c.h.b16 %v1165_v49 }
 0x15f   : > { %v1279_v16 = vor.u32 %v1278_v34, %v1275_v41  ;;  %v1340_v30 = vshll.u32 %v588_v11, 16 }
 0x161   : > { %v3956_v1 = vpop.f32.mrf.mxu2  ;;  %v3781_v14 = vpop.f32.mrf.mxu0 }
 0x162   : > { %v4045_v63 = vpop.f32.mrf.mxu3  ;;  %v3957_v17 = vadd.f32 %v3956_v1, %v3868_v13  ;;  %v3870_v20 = vpop.f32.mrf.mxu1  ;;  %v1174_v13 = vrot.slane %v1173_v6, 4  ;;  %v1292_v6 = vrot.slane %v1290_v47, 5 }
 0x163   : > { %v3871_v12 = vadd.f32 %v3870_v20, %v3781_v14  ;;  %v1289_v14 = vrot.slane %v1287_v43, 4 }
 0x164   : > { %v13414_v25 = vadd.f32 %v4045_v63, %v3957_v17  ;;  %4096 = vmatmul.bf16.gmra.mxu0 %v3028_v57  ;;  %v1223_v57 = vsel %vm12923_vm2, %v1218_v29, %v1222_v9  ;;  %v1179_v1 = vsel %vm12923_vm2, %v1174_v13, %v1178_v54  ;;  %v1233_v63 = vsel %vm12923_vm2, %v1228_v31, %v1232_v24 }
 0x165   : > { %4185 = vmatmul.bf16.gmra.mxu1 %v3029_v58  ;;  %v1336_v17 = vrot.slane %v1334_v33, 4  ;;  %v2794_v2 = vunpack.c.l.b16 %v1223_v57  ;;  %v2795_v15 = vunpack.c.h.b16 %v1223_v57  ;;  %v2787_v54 = vunpack.c.l.b16 %v1179_v1 }
 0x166   : > { %4274 = vmatmul.bf16.gmra.mxu2 %v3030_v62  ;;  %v2796_v27 = vunpack.c.l.b16 %v1233_v63  ;;  %v2788_v28 = vunpack.c.h.b16 %v1179_v1  ;;  %v2797_v29 = vunpack.c.h.b16 %v1233_v63  ;;  %v1350_v13 = vshll.u32 %v589_v44, 16  ;;  %v12255_v44 = vld [vmem:[%s16219_s1 + $0x460] sm:$0xff] }
 0x167   : > { %4363 = vmatmul.bf16.gmra.mxu3 %v3031_v5  ;;  %v1284_v5 = vrot.slane %v1282_v38, 5  ;;  %v1280_v31 = vrot.slane %v1279_v16, 4  ;;  %v1293_v24 = vor.u32 %v1292_v6, %v1289_v14  ;;  %v1347_v38 = vor.u32 %v1346_v23, %v1298_v56  ;;  %v324_v16 = vld [vmem:[%s12889_s27 + $0x2bc] sm:$0xff]  ;;  %v325_v23 = vld [vmem:[%s12889_s27 + $0x2c4] sm:$0xff]  ;;  %4432 = vmatpush.bf16.msra.mxu0 %v12255_v44 }
 0x168   : > { %v3038_v43 = vpack.c.b16 %v2795_v15, %v2786_v8  ;;  %v12127_v14 = vld [vmem:[%s16219_s1 + $0x60] sm:$0xff] }
 0x169   : > { %v3959_v51 = vpop.f32.mrf.mxu2  ;;  %v3783_v62 = vpop.f32.mrf.mxu0  ;;  %v1337_v9 = vor.u32 %v1336_v17, %v1284_v5  ;;  %v1285_v1 = vsel %vm12923_vm2, %v1280_v31, %v1284_v5  ;;  %v1294_v63 = vrot.slane %v1293_v24, 4  ;;  %v1348_v11 = vrot.slane %v1347_v38, 4  ;;  %v320_v17 = vld [vmem:[%s12889_s27 + $0x2a0] sm:$0xff]  ;;  %5778 = vmatpush.bf16.msra.mxu2 %v12127_v14  ;;  %v594_v14 = vld [vmem:[%s12889_s27 + $0x2e8] sm:$0x11] }
 0x16a   : > { %v4048_v55 = vpop.f32.mrf.mxu3  ;;  %v3960_v58 = vadd.f32 %v3959_v51, %v3871_v12  ;;  %v3872_v0 = vpop.f32.mrf.mxu1  ;;  %v2785_v12 = vunpack.c.l.b16 %v1165_v49  ;;  %v3039_v51 = vpack.c.b16 %v2796_v27, %v2787_v54  ;;  %v2803_v6 = vunpack.c.l.b16 %v1285_v1 }
 0x16b   : > { %v3873_v39 = vadd.f32 %v3872_v0, %v3783_v62  ;;  %v1338_v57 = vrot.slane %v1337_v9, 4  ;;  %v1352_v62 = vrot.slane %v1350_v13, 5  ;;  %v1454_v9 = vshrl.u32 %v324_v16, 16 }
 0x16c   : > { %v13427_v20 = vadd.f32 %v4048_v55, %v3960_v58  ;;  %v3037_v33 = vpack.c.b16 %v2794_v2, %v2785_v12  ;;  %v3040_v55 = vpack.c.b16 %v2797_v29, %v2788_v28  ;;  %v1342_v58 = vrot.slane %v1340_v30, 5 }
 0x16d   : > { %v2804_v12 = vunpack.c.h.b16 %v1285_v1  ;;  %v1299_v2 = vsel %vm12923_vm2, %v1294_v63, %v1298_v56  ;;  %v1353_v8 = vsel %vm12923_vm2, %v1348_v11, %v1352_v62  ;;  %v1402_v29 = vshll.u32 %v324_v16, 16  ;;  %v593_v63 = vld [vmem:[%s12889_s27 + $0x2e0] sm:$0x11] }
 0x16e   : > { %v1343_v5 = vsel %vm12923_vm2, %v1338_v57, %v1342_v58  ;;  %v1407_v30 = vshrl.u32 %v320_v17, 16  ;;  %v1410_v38 = vshll.u32 %v320_v17, 16  ;;  %v1456_v1 = vrot.slane %v1454_v9, 4 }
 0x16f   : > { %v1404_v62 = vrot.slane %v1402_v29, 5  ;;  %v1460_v29 = vshll.u32 %v593_v63, 16 }
 0x170   : > { %v1409_v11 = vrot.slane %v1407_v30, 4 }
 0x171   : > { %v3961_v41 = vpop.f32.mrf.mxu2  ;;  %v3786_v48 = vpop.f32.mrf.mxu0 }
 0x172   : > { %v4050_v34 = vpop.f32.mrf.mxu3  ;;  %v3962_v47 = vadd.f32 %v3961_v41, %v3873_v39  ;;  %v3875_v50 = vpop.f32.mrf.mxu1  ;;  %v319_v39 = vld [vmem:[%s12889_s27 + $0x298] sm:$0xff]  ;;  %v1416_v41 = vshll.u32 %v325_v23, 16 }
 0x173   : > { %v3876_v49 = vadd.f32 %v3875_v50, %v3786_v48  ;;  %v1393_v15 = vshrl.u32 %v319_v39, 16  ;;  %v1396_v28 = vshll.u32 %v319_v39, 16  ;;  %v2814_v50 = vunpack.c.l.b16 %v1353_v8 }
 0x174   : > { %v13430_v0 = vadd.f32 %v4050_v34, %v3962_v47  ;;  %4101 = vmatmul.bf16.gmra.mxu0 %v3037_v33  ;;  %v1464_v34 = vshrl.u32 %v325_v23, 16  ;;  %v2812_v33 = vunpack.c.l.b16 %v1343_v5  ;;  %v2805_v47 = vunpack.c.l.b16 %v1299_v2 }
 0x175   : > { %4190 = vmatmul.bf16.gmra.mxu1 %v3038_v43  ;;  %v2813_v43 = vunpack.c.h.b16 %v1343_v5  ;;  %v1395_v57 = vrot.slane %v1393_v15, 4  ;;  %v1398_v58 = vrot.slane %v1396_v28, 5  ;;  %v1412_v39 = vrot.slane %v1410_v38, 5 }
 0x176   : > { %4279 = vmatmul.bf16.gmra.mxu2 %v3039_v51  ;;  %v2806_v51 = vunpack.c.h.b16 %v1299_v2  ;;  %v1418_v16 = vrot.slane %v1416_v41, 5  ;;  %v1466_v17 = vrot.slane %v1464_v34, 4  ;;  %v3046_v44 = vpack.c.b16 %v2812_v33, %v2803_v6  ;;  %v329_v2 = vld [vmem:[%s12889_s27 + $0x304] sm:$0xff] }
 0x177   : > { %4368 = vmatmul.bf16.gmra.mxu3 %v3040_v55  ;;  %v2815_v55 = vunpack.c.h.b16 %v1353_v8  ;;  %v3047_v5 = vpack.c.b16 %v2813_v43, %v2804_v12  ;;  %v3048_v23 = vpack.c.b16 %v2814_v50, %v2805_v47  ;;  %v1399_v15 = vor.u32 %v1398_v58, %v1395_v57  ;;  %v334_v6 = vld [vmem:[%s12889_s27 + $0x328] sm:$0xff] }
 0x178   : > { %v1457_v28 = vor.u32 %v1456_v1, %v1404_v62  ;;  %v1470_v38 = vshll.u32 %v594_v14, 16  ;;  %v1513_v12 = vshrl.u32 %v329_v2, 16  ;;  %v1516_v34 = vshll.u32 %v329_v2, 16  ;;  %v330_v43 = vld [vmem:[%s12889_s27 + $0x30c] sm:$0xff] }
 0x179   : > { %v3964_v54 = vpop.f32.mrf.mxu2  ;;  %v3788_v31 = vpop.f32.mrf.mxu0  ;;  %v1400_v47 = vrot.slane %v1399_v15, 4  ;;  %v1522_v58 = vshll.u32 %v334_v6, 16 }
 0x17a   : > { %v4053_v27 = vpop.f32.mrf.mxu3  ;;  %v3965_v13 = vadd.f32 %v3964_v54, %v3876_v49  ;;  %v3877_v24 = vpop.f32.mrf.mxu1  ;;  %v12119_v49 = vld [vmem:[%s16219_s1 + $0x20] sm:$0xff]  ;;  %v1458_v50 = vrot.slane %v1457_v28, 4  ;;  %v1472_v57 = vrot.slane %v1470_v38, 5  ;;  %v1515_v1 = vrot.slane %v1513_v12, 4 }
 0x17b   : > { %v3878_v56 = vadd.f32 %v3877_v24, %v3788_v31  ;;  %5689 = vmatpush.bf16.msra.mxu1 %v12119_v49  ;;  %v1413_v31 = vor.u32 %v1412_v39, %v1409_v11  ;;  %v1467_v24 = vor.u32 %v1466_v17, %v1418_v16  ;;  %v1518_v63 = vrot.slane %v1516_v34, 5 }
 0x17c   : > { %v13450_v48 = vadd.f32 %v4053_v27, %v3965_v13  ;;  %v3049_v27 = vpack.c.b16 %v2815_v55, %v2806_v51  ;;  %v1462_v51 = vrot.slane %v1460_v29, 5  ;;  %v335_v55 = vld [vmem:[%s12889_s27 + $0x330] sm:$0xff]  ;;  %v1574_v11 = vshrl.u32 %v334_v6, 16 }
 0x17d   : > { %v1468_v49 = vrot.slane %v1467_v24, 4  ;;  %v1527_v39 = vshrl.u32 %v330_v43, 16  ;;  %v1530_v17 = vshll.u32 %v330_v43, 16  ;;  %v1536_v14 = vshll.u32 %v335_v55, 16 }
 0x17e   : > { %v1584_v2 = vshrl.u32 %v335_v55, 16  ;;  %v1576_v24 = vrot.slane %v1574_v11, 4 }
 0x17f   : > { %v1473_v29 = vsel %vm12923_vm2, %v1468_v49, %v1472_v57  ;;  %v1529_v38 = vrot.slane %v1527_v39, 4  ;;  %v1532_v12 = vrot.slane %v1530_v17, 5  ;;  %v1538_v34 = vrot.slane %v1536_v14, 5 }
 0x180   : > { %v2832_v55 = vunpack.c.l.b16 %v1473_v29  ;;  %v2833_v49 = vunpack.c.h.b16 %v1473_v29 }
 0x181   : > { %v3966_v8 = vpop.f32.mrf.mxu2  ;;  %v3791_v13 = vpop.f32.mrf.mxu0 }
 0x182   : > { %v4055_v54 = vpop.f32.mrf.mxu3  ;;  %v3967_v9 = vadd.f32 %v3966_v8, %v3878_v56  ;;  %v3880_v30 = vpop.f32.mrf.mxu1  ;;  %v1414_v56 = vrot.slane %v1413_v31, 4  ;;  %v1405_v8 = vsel %vm12923_vm2, %v1400_v47, %v1404_v62  ;;  %v1519_v31 = vor.u32 %v1518_v63, %v1515_v1  ;;  %v599_v62 = vld [vmem:[%s12889_s27 + $0x354] sm:$0x11] }
 0x183   : > { %v3881_v41 = vadd.f32 %v3880_v30, %v3791_v13  ;;  %v598_v30 = vld [vmem:[%s12889_s27 + $0x34c] sm:$0x11]  ;;  %v2821_v43 = vunpack.c.l.b16 %v1405_v8  ;;  %v1533_v63 = vor.u32 %v1532_v12, %v1529_v38  ;;  %v344_v12 = vld [vmem:[%s12889_s27 + $0x394] sm:$0xff] }
 0x184   : > { %v13459_v33 = vadd.f32 %v4055_v54, %v3967_v9  ;;  %4106 = vmatmul.bf16.gmra.mxu0 %v3046_v44  ;;  %v1419_v28 = vsel %vm12923_vm2, %v1414_v56, %v1418_v16  ;;  %v1524_v9 = vrot.slane %v1522_v58, 5  ;;  %v1580_v58 = vshll.u32 %v598_v30, 16 }
 0x185   : > { %4195 = vmatmul.bf16.gmra.mxu1 %v3047_v5  ;;  %v2823_v16 = vunpack.c.l.b16 %v1419_v28  ;;  %v2824_v56 = vunpack.c.h.b16 %v1419_v28  ;;  %v1520_v1 = vrot.slane %v1519_v31, 4  ;;  %v1534_v38 = vrot.slane %v1533_v63, 4 }
 0x186   : > { %4284 = vmatmul.bf16.gmra.mxu2 %v3048_v23  ;;  %v1463_v23 = vsel %vm12923_vm2, %v1458_v50, %v1462_v51  ;;  %v2822_v50 = vunpack.c.h.b16 %v1405_v8  ;;  %v1577_v57 = vor.u32 %v1576_v24, %v1524_v9  ;;  %v1582_v29 = vrot.slane %v1580_v58, 5 }
 0x187   : > { %4373 = vmatmul.bf16.gmra.mxu3 %v3049_v27  ;;  %v2830_v47 = vunpack.c.l.b16 %v1463_v23  ;;  %v2831_v51 = vunpack.c.h.b16 %v1463_v23  ;;  %v3057_v23 = vpack.c.b16 %v2832_v55, %v2823_v16  ;;  %v1525_v24 = vsel %vm12923_vm2, %v1520_v1, %v1524_v9 }
 0x188   : > { %v1578_v28 = vrot.slane %v1577_v57, 4  ;;  %v2840_v16 = vunpack.c.h.b16 %v1525_v24  ;;  %v1539_v55 = vsel %vm12923_vm2, %v1534_v38, %v1538_v34  ;;  %v1642_v1 = vshll.u32 %v344_v12, 16 }
 0x189   : > { %v3969_v44 = vpop.f32.mrf.mxu2  ;;  %v3793_v27 = vpop.f32.mrf.mxu0  ;;  %v3056_v17 = vpack.c.b16 %v2831_v51, %v2822_v50  ;;  %v2839_v50 = vunpack.c.l.b16 %v1525_v24  ;;  %v345_v51 = vld [vmem:[%s12889_s27 + $0x39c] sm:$0xff]  ;;  %v1694_v63 = vshrl.u32 %v344_v12, 16 }
 0x18a   : > { %v4058_v5 = vpop.f32.mrf.mxu3  ;;  %v3970_v54 = vadd.f32 %v3969_v44, %v3881_v41  ;;  %v3882_v15 = vpop.f32.mrf.mxu1  ;;  %v1586_v41 = vrot.slane %v1584_v2, 4  ;;  %v1590_v44 = vshll.u32 %v599_v62, 16  ;;  %v1583_v9 = vsel %vm12923_vm2, %v1578_v28, %v1582_v29 }
 0x18b   : > { %v3883_v13 = vadd.f32 %v3882_v15, %v3793_v27  ;;  %v3058_v27 = vpack.c.b16 %v2833_v49, %v2824_v56  ;;  %v1696_v12 = vrot.slane %v1694_v63, 4 }
 0x18c   : > { %v13472_v6 = vadd.f32 %v4058_v5, %v3970_v54  ;;  %v1587_v11 = vor.u32 %v1586_v41, %v1538_v34  ;;  %v3055_v54 = vpack.c.b16 %v2830_v47, %v2821_v43  ;;  %v1592_v30 = vrot.slane %v1590_v44, 5  ;;  %v340_v41 = vld [vmem:[%s12889_s27 + $0x378] sm:$0xff] }
 0x18d   : > { %v12126_v43 = vld [vmem:[%s16219_s1 + $0x58] sm:$0xff] }
 0x18e   : > { %16228 = vst [vmem:[#allocation5_spill] sm:$0xff] %v13472_v6  ;;  %v1588_v62 = vrot.slane %v1587_v11, 4  ;;  %v12254_v47 = vld [vmem:[%s16219_s1 + $0x458] sm:$0xff]  ;;  %5779 = vmatpush.bf16.msra.mxu2 %v12126_v43  ;;  %v1647_v11 = vshrl.u32 %v340_v41, 16  ;;  %v354_v6 = vld [vmem:[%s12889_s27 + $0x400] sm:$0xff] }
 0x18f   : > { %4433 = vmatpush.bf16.msra.mxu0 %v12254_v47 }
 0x190   : > { %v1593_v56 = vsel %vm12923_vm2, %v1588_v62, %v1592_v30  ;;  %v2842_v30 = vunpack.c.h.b16 %v1539_v55  ;;  %v1649_v43 = vrot.slane %v1647_v11, 4 }
 0x191   : > { %v3971_v39 = vpop.f32.mrf.mxu2  ;;  %v3796_v2 = vpop.f32.mrf.mxu0  ;;  %v2850_v29 = vunpack.c.l.b16 %v1593_v56  ;;  %v2851_v24 = vunpack.c.h.b16 %v1593_v56 }
 0x192   : > { %v4060_v5 = vpop.f32.mrf.mxu3  ;;  %v3972_v14 = vadd.f32 %v3971_v39, %v3883_v13  ;;  %v3885_v8 = vpop.f32.mrf.mxu1  ;;  %v339_v13 = vld [vmem:[%s12889_s27 + $0x370] sm:$0xff] }
 0x193   : > { %v3886_v15 = vadd.f32 %v3885_v8, %v3796_v2  ;;  %v1633_v49 = vshrl.u32 %v339_v13, 16  ;;  %v1636_v44 = vshll.u32 %v339_v13, 16  ;;  %v1704_v2 = vshrl.u32 %v345_v51, 16 }
 0x194   : > { %v13475_v31 = vadd.f32 %v4060_v5, %v3972_v14  ;;  %4111 = vmatmul.bf16.gmra.mxu0 %v3055_v54  ;;  %v1656_v14 = vshll.u32 %v345_v51, 16  ;;  %v2848_v8 = vunpack.c.l.b16 %v1583_v9  ;;  %v1644_v13 = vrot.slane %v1642_v1, 5  ;;  %v349_v1 = vld [vmem:[%s12889_s27 + $0x3dc] sm:$0xff] }
 0x195   : > { %4200 = vmatmul.bf16.gmra.mxu1 %v3056_v17  ;;  %v1650_v17 = vshll.u32 %v340_v41, 16  ;;  %v1635_v38 = vrot.slane %v1633_v49, 4  ;;  %v1638_v62 = vrot.slane %v1636_v44, 5  ;;  %v603_v41 = vld [vmem:[%s12889_s27 + $0x3b8] sm:$0x11]  ;;  %v1706_v51 = vrot.slane %v1704_v2, 4 }
 0x196   : > { %16229 = vst [vmem:[#allocation6_spill] sm:$0xff] %v13475_v31  ;;  %4289 = vmatmul.bf16.gmra.mxu2 %v3057_v23  ;;  %v2849_v23 = vunpack.c.h.b16 %v1583_v9  ;;  %v1658_v9 = vrot.slane %v1656_v14, 5  ;;  %v1697_v49 = vor.u32 %v1696_v12, %v1644_v13  ;;  %v1700_v44 = vshll.u32 %v603_v41, 16 }
 0x197   : > { %4378 = vmatmul.bf16.gmra.mxu3 %v3058_v27  ;;  %v2841_v27 = vunpack.c.l.b16 %v1539_v55  ;;  %v1652_v47 = vrot.slane %v1650_v17, 5  ;;  %v1814_v12 = vshrl.u32 %v354_v6, 16 }
 0x198   : > { %v1707_v14 = vor.u32 %v1706_v51, %v1658_v9 }
 0x199   : > { %v3974_v57 = vpop.f32.mrf.mxu2  ;;  %v3798_v5 = vpop.f32.mrf.mxu0  ;;  %v3066_v55 = vpack.c.b16 %v2850_v29, %v2841_v27  ;;  %v1653_v17 = vor.u32 %v1652_v47, %v1649_v43  ;;  %v1698_v27 = vrot.slane %v1697_v49, 4  ;;  %v1702_v29 = vrot.slane %v1700_v44, 5  ;;  %v355_v47 = vld [vmem:[%s12889_s27 + $0x408] sm:$0xff] }
 0x19a   : > { %v4063_v58 = vpop.f32.mrf.mxu3  ;;  %v3975_v39 = vadd.f32 %v3974_v57, %v3886_v15  ;;  %v3887_v54 = vpop.f32.mrf.mxu1  ;;  %v12118_v15 = vld [vmem:[%s16219_s1 + $0x18] sm:$0xff]  ;;  %v604_v57 = vld [vmem:[%s12889_s27 + $0x3c0] sm:$0x11] }
 0x19b   : > { %v3888_v34 = vadd.f32 %v3887_v54, %v3798_v5  ;;  %5690 = vmatpush.bf16.msra.mxu1 %v12118_v15  ;;  %v3067_v54 = vpack.c.b16 %v2851_v24, %v2842_v30  ;;  %v1710_v2 = vshll.u32 %v604_v57, 16  ;;  %v350_v30 = vld [vmem:[%s12889_s27 + $0x3e4] sm:$0xff]  ;;  %v1654_v24 = vrot.slane %v1653_v17, 4 }
 0x19c   : > { %v13495_v28 = vadd.f32 %v4063_v58, %v3975_v39  ;;  %v3064_v58 = vpack.c.b16 %v2848_v8, %v2839_v50  ;;  %v3065_v39 = vpack.c.b16 %v2849_v23, %v2840_v16  ;;  %v12138_v16 = vld [vmem:[%s16219_s1 + $0xb8] sm:$0xff]  ;;  %v1753_v8 = vshrl.u32 %v349_v1, 16 }
 0x19d   : > { %v1756_v23 = vshll.u32 %v349_v1, 16  ;;  %5864 = vmatpush.bf16.msra.mxu3 %v12138_v16  ;;  %v1767_v51 = vshrl.u32 %v350_v30, 16  ;;  %v1770_v57 = vshll.u32 %v350_v30, 16  ;;  %v1824_v17 = vshrl.u32 %v355_v47, 16 }
 0x19e   : > { %16230 = vst [vmem:[#allocation7_spill] sm:$0xff] %v13495_v28  ;;  %v1639_v28 = vor.u32 %v1638_v62, %v1635_v38  ;;  %v1712_v38 = vrot.slane %v1710_v2, 5  ;;  %v1762_v62 = vshll.u32 %v354_v6, 16  ;;  %v1755_v41 = vrot.slane %v1753_v8, 4 }
 0x19f   : > { %v1758_v43 = vrot.slane %v1756_v23, 5  ;;  %v1659_v6 = vsel %vm12923_vm2, %v1654_v24, %v1658_v9  ;;  %v1769_v16 = vrot.slane %v1767_v51, 4 }
 0x1a0   : > { %v1764_v44 = vrot.slane %v1762_v62, 5  ;;  %v2859_v9 = vunpack.c.l.b16 %v1659_v6  ;;  %v2860_v30 = vunpack.c.h.b16 %v1659_v6  ;;  %v609_v62 = vld [vmem:[%s12889_s27 + $0x42c] sm:$0x11] }
 0x1a1   : > { %v3976_v56 = vpop.f32.mrf.mxu2  ;;  %v3801_v31 = vpop.f32.mrf.mxu0  ;;  %v1759_v2 = vor.u32 %v1758_v43, %v1755_v41  ;;  %v1830_v6 = vshll.u32 %v609_v62, 16 }
 0x1a2   : > { %v4065_v5 = vpop.f32.mrf.mxu3  ;;  %v3977_v63 = vadd.f32 %v3976_v56, %v3888_v34  ;;  %v3890_v11 = vpop.f32.mrf.mxu1  ;;  %v1640_v34 = vrot.slane %v1639_v28, 4 }
 0x1a3   : > { %v3891_v15 = vadd.f32 %v3890_v11, %v3801_v31  ;;  %v1708_v31 = vrot.slane %v1707_v14, 4  ;;  %v1776_v11 = vshll.u32 %v355_v47, 16  ;;  %v1826_v47 = vrot.slane %v1824_v17, 4 }
 0x1a4   : > { %v13504_v50 = vadd.f32 %v4065_v5, %v3977_v63  ;;  %4116 = vmatmul.bf16.gmra.mxu0 %v3064_v58  ;;  %v1645_v28 = vsel %vm12923_vm2, %v1640_v34, %v1644_v13  ;;  %v1816_v63 = vrot.slane %v1814_v12, 4  ;;  %v608_v13 = vld [vmem:[%s12889_s27 + $0x424] sm:$0x11] }
 0x1a5   : > { %4205 = vmatmul.bf16.gmra.mxu1 %v3065_v39  ;;  %v1713_v49 = vsel %vm12923_vm2, %v1708_v31, %v1712_v38  ;;  %v2857_v8 = vunpack.c.l.b16 %v1645_v28  ;;  %v2858_v34 = vunpack.c.h.b16 %v1645_v28  ;;  %v1820_v38 = vshll.u32 %v608_v13, 16  ;;  %v359_v13 = vld [vmem:[%s12889_s27 + $0x448] sm:$0xff] }
 0x1a6   : > { %4294 = vmatmul.bf16.gmra.mxu2 %v3066_v55  ;;  %v1703_v55 = vsel %vm12923_vm2, %v1698_v27, %v1702_v29  ;;  %v2868_v29 = vunpack.c.l.b16 %v1713_v49  ;;  %v2869_v24 = vunpack.c.h.b16 %v1713_v49  ;;  %v1817_v31 = vor.u32 %v1816_v63, %v1764_v44 }
 0x1a7   : > { %4383 = vmatmul.bf16.gmra.mxu3 %v3067_v54  ;;  %v2866_v23 = vunpack.c.l.b16 %v1703_v55  ;;  %v2867_v27 = vunpack.c.h.b16 %v1703_v55  ;;  %v1778_v12 = vrot.slane %v1776_v11, 5  ;;  %v1822_v11 = vrot.slane %v1820_v38, 5 }
 0x1a8   : > { %v3075_v55 = vpack.c.b16 %v2868_v29, %v2859_v9  ;;  %v1818_v63 = vrot.slane %v1817_v31, 4  ;;  %v12125_v9 = vld [vmem:[%s16219_s1 + $0x50] sm:$0xff]  ;;  %v1832_v31 = vrot.slane %v1830_v6, 5 }
 0x1a9   : > { %v3979_v58 = vpop.f32.mrf.mxu2  ;;  %v3803_v5 = vpop.f32.mrf.mxu0  ;;  %v3073_v43 = vpack.c.b16 %v2866_v23, %v2857_v8  ;;  %v3074_v51 = vpack.c.b16 %v2867_v27, %v2858_v34  ;;  %v1827_v17 = vor.u32 %v1826_v47, %v1778_v12  ;;  %v364_v8 = vld [vmem:[%s12889_s27 + $0x46c] sm:$0xff]  ;;  %v1873_v34 = vshrl.u32 %v359_v13, 16  ;;  %v365_v27 = vld [vmem:[%s12889_s27 + $0x474] sm:$0xff]  ;;  %5780 = vmatpush.bf16.msra.mxu2 %v12125_v9 }
 0x1aa   : > { %v4068_v39 = vpop.f32.mrf.mxu3  ;;  %v3980_v56 = vadd.f32 %v3979_v58, %v3891_v15  ;;  %v3892_v54 = vpop.f32.mrf.mxu1  ;;  %v1772_v15 = vrot.slane %v1770_v57, 5  ;;  %v1760_v58 = vrot.slane %v1759_v2, 4  ;;  %v360_v23 = vld [vmem:[%s12889_s27 + $0x450] sm:$0xff]  ;;  %v1882_v62 = vshll.u32 %v364_v8, 16 }
 0x1ab   : > { %v3893_v1 = vadd.f32 %v3892_v54, %v3803_v5  ;;  %v3076_v54 = vpack.c.b16 %v2869_v24, %v2860_v30  ;;  %v12253_v29 = vld [vmem:[%s16219_s1 + $0x450] sm:$0xff]  ;;  %v1828_v24 = vrot.slane %v1827_v17, 4  ;;  %v1934_v47 = vshrl.u32 %v364_v8, 16 }
 0x1ac   : > { %v13519_v14 = vadd.f32 %v4068_v39, %v3980_v56  ;;  %v1773_v39 = vor.u32 %v1772_v15, %v1769_v16  ;;  %v1765_v16 = vsel %vm12923_vm2, %v1760_v58, %v1764_v44  ;;  %v1823_v44 = vsel %vm12923_vm2, %v1818_v63, %v1822_v11  ;;  %4434 = vmatpush.bf16.msra.mxu0 %v12253_v29 }
 0x1ad   : > { %v2875_v30 = vunpack.c.l.b16 %v1765_v16  ;;  %v1887_v58 = vshrl.u32 %v360_v23, 16  ;;  %v1875_v6 = vrot.slane %v1873_v34, 4  ;;  %v2885_v63 = vunpack.c.h.b16 %v1823_v44 }
 0x1ae   : > { %v1833_v11 = vsel %vm12923_vm2, %v1828_v24, %v1832_v31  ;;  %v1936_v8 = vrot.slane %v1934_v47, 4  ;;  %v614_v31 = vld [vmem:[%s12889_s27 + $0x498] sm:$0x11] }
 0x1af   : > { %v2886_v9 = vunpack.c.l.b16 %v1833_v11 }
 0x1b1   : > { %v3981_v56 = vpop.f32.mrf.mxu2  ;;  %v4082_v5 = vpop.f32.mrf.mxu0 }
 0x1b2   : > { %v4070_v41 = vpop.f32.mrf.mxu3  ;;  %v3982_v57 = vadd.f32 %v3981_v56, %v3893_v1  ;;  %v4171_v28 = vpop.f32.mrf.mxu1  ;;  %v4083_v49 = vadd.f32 %v4082_v5, %v13159_v61  ;;  %v1774_v1 = vrot.slane %v1773_v39, 4  ;;  %v1876_v61 = vshll.u32 %v359_v13, 16 }
 0x1b4   : > { %v13525_v2 = vadd.f32 %v4070_v41, %v3982_v57  ;;  %v4172_v15 = vadd.f32 %v4171_v28, %v4083_v49  ;;  %4121 = vmatmul.bf16.gmra.mxu0 %v3073_v43  ;;  %v1779_v38 = vsel %vm12923_vm2, %v1774_v1, %v1778_v12  ;;  %v2876_v41 = vunpack.c.h.b16 %v1765_v16  ;;  %v613_v16 = vld [vmem:[%s12889_s27 + $0x490] sm:$0x11] }
 0x1b5   : > { %4210 = vmatmul.bf16.gmra.mxu1 %v3074_v51  ;;  %v1890_v43 = vshll.u32 %v360_v23, 16  ;;  %v1896_v51 = vshll.u32 %v365_v27, 16  ;;  %v1944_v57 = vshrl.u32 %v365_v27, 16  ;;  %v1878_v49 = vrot.slane %v1876_v61, 5 }
 0x1b6   : > { %16231 = vst [vmem:[#allocation8_spill] sm:$0xff] %v13525_v2  ;;  %4299 = vmatmul.bf16.gmra.mxu2 %v3075_v55  ;;  %v2877_v17 = vunpack.c.l.b16 %v1779_v38  ;;  %v1884_v1 = vrot.slane %v1882_v62, 5  ;;  %v1889_v23 = vrot.slane %v1887_v58, 4  ;;  %v2878_v29 = vunpack.c.h.b16 %v1779_v38 }
 0x1b7   : > { %4388 = vmatmul.bf16.gmra.mxu3 %v3076_v54  ;;  %v2884_v54 = vunpack.c.l.b16 %v1823_v44  ;;  %v1892_v61 = vrot.slane %v1890_v43, 5  ;;  %v1898_v27 = vrot.slane %v1896_v51, 5  ;;  %v2887_v44 = vunpack.c.h.b16 %v1833_v11  ;;  %v369_v43 = vld [vmem:[%s12889_s27 + $0x4b4] sm:$0xff] }
 0x1b8   : > { %v1879_v24 = vor.u32 %v1878_v49, %v1875_v6  ;;  %v1937_v62 = vor.u32 %v1936_v8, %v1884_v1  ;;  %v3084_v2 = vpack.c.b16 %v2886_v9, %v2877_v17  ;;  %v1996_v8 = vshll.u32 %v369_v43, 16  ;;  %v370_v9 = vld [vmem:[%s12889_s27 + $0x4bc] sm:$0xff] }
 0x1b9   : > { %v4260_v39 = vpop.f32.mrf.mxu2  ;;  %v4084_v28 = vpop.f32.mrf.mxu0  ;;  %v3085_v38 = vpack.c.b16 %v2887_v44, %v2878_v29 }
 0x1ba   : > { %v4349_v56 = vpop.f32.mrf.mxu3  ;;  %v4261_v5 = vadd.f32 %v4260_v39, %v4172_v15  ;;  %v4173_v55 = vpop.f32.mrf.mxu1  ;;  %v4085_v12 = vadd.f32 %v4084_v28, %v13168_v32  ;;  %v12117_v15 = vld [vmem:[%s16219_s1 + $0x10] sm:$0xff]  ;;  %v1946_v32 = vrot.slane %v1944_v57, 4  ;;  %v1940_v39 = vshll.u32 %v613_v16, 16  ;;  %v374_v16 = vld [vmem:[%s12889_s27 + $0x4d8] sm:$0xff] }
 0x1bb   : > { %5691 = vmatpush.bf16.msra.mxu1 %v12117_v15  ;;  %v1893_v28 = vor.u32 %v1892_v61, %v1889_v23  ;;  %v1880_v11 = vrot.slane %v1879_v24, 4  ;;  %v2002_v61 = vshll.u32 %v374_v16, 16  ;;  %v1998_v44 = vrot.slane %v1996_v8, 5  ;;  %v375_v24 = vld [vmem:[%s12889_s27 + $0x4e0] sm:$0xff] }
 0x1bc   : > { %v13545_v13 = vadd.f32 %v4349_v56, %v4261_v5  ;;  %v4174_v34 = vadd.f32 %v4173_v55, %v4085_v12  ;;  %v3082_v56 = vpack.c.b16 %v2884_v54, %v2875_v30  ;;  %v3083_v5 = vpack.c.b16 %v2885_v63, %v2876_v41  ;;  %v12137_v41 = vld [vmem:[%s16219_s1 + $0xb0] sm:$0xff] }
 0x1bd   : > { %v1950_v55 = vshll.u32 %v614_v31, 16  ;;  %v1942_v49 = vrot.slane %v1940_v39, 5  ;;  %v1938_v54 = vrot.slane %v1937_v62, 4  ;;  %v1993_v63 = vshrl.u32 %v369_v43, 16  ;;  %5865 = vmatpush.bf16.msra.mxu3 %v12137_v41 }
 0x1be   : > { %16232 = vst [vmem:[#allocation9_spill] sm:$0xff] %v13545_v13  ;;  %v1947_v13 = vor.u32 %v1946_v32, %v1898_v27  ;;  %v1894_v17 = vrot.slane %v1893_v28, 4  ;;  %v2054_v32 = vshrl.u32 %v374_v16, 16  ;;  %v2007_v28 = vshrl.u32 %v370_v9, 16 }
 0x1bf   : > { %v1995_v29 = vrot.slane %v1993_v63, 4 }
 0x1c0   : > { %v1948_v15 = vrot.slane %v1947_v13, 4 }
 0x1c1   : > { %v4262_v47 = vpop.f32.mrf.mxu2  ;;  %v4087_v57 = vpop.f32.mrf.mxu0 }
 0x1c2   : > { %v4351_v58 = vpop.f32.mrf.mxu3  ;;  %v4263_v51 = vadd.f32 %v4262_v47, %v4174_v34  ;;  %v4176_v12 = vpop.f32.mrf.mxu1  ;;  %v4088_v6 = vadd.f32 %v4087_v57, %v13184_v3  ;;  %v1952_v34 = vrot.slane %v1950_v55, 5  ;;  %v1885_v3 = vsel %vm12923_vm2, %v1880_v11, %v1884_v1 }
 0x1c3   : > { %v2893_v13 = vunpack.c.l.b16 %v1885_v3  ;;  %v2010_v55 = vshll.u32 %v370_v9, 16  ;;  %v2056_v57 = vrot.slane %v2054_v32, 4 }
 0x1c4   : > { %v13555_v30 = vadd.f32 %v4351_v58, %v4263_v51  ;;  %v4177_v23 = vadd.f32 %v4176_v12, %v4088_v6  ;;  %4126 = vmatmul.bf16.gmra.mxu0 %v3082_v56  ;;  %v1943_v56 = vsel %vm12923_vm2, %v1938_v54, %v1942_v49  ;;  %v1953_v1 = vsel %vm12923_vm2, %v1948_v15, %v1952_v34  ;;  %v618_v51 = vld [vmem:[%s12889_s27 + $0x4fc] sm:$0x11]  ;;  %v619_v34 = vld [vmem:[%s12889_s27 + $0x504] sm:$0x11] }
 0x1c5   : > { %4215 = vmatmul.bf16.gmra.mxu1 %v3083_v5  ;;  %v2004_v5 = vrot.slane %v2002_v61, 5  ;;  %v2016_v12 = vshll.u32 %v375_v24, 16  ;;  %v2902_v6 = vunpack.c.l.b16 %v1943_v56  ;;  %v1999_v49 = vor.u32 %v1998_v44, %v1995_v29 }
 0x1c6   : > { %4304 = vmatmul.bf16.gmra.mxu2 %v3084_v2  ;;  %v1899_v2 = vsel %vm12923_vm2, %v1894_v17, %v1898_v27  ;;  %v2894_v27 = vunpack.c.h.b16 %v1885_v3  ;;  %v2903_v54 = vunpack.c.h.b16 %v1943_v56  ;;  %v2904_v63 = vunpack.c.l.b16 %v1953_v1  ;;  %v379_v56 = vld [vmem:[%s12889_s27 + $0x520] sm:$0xff] }
 0x1c7   : > { %4393 = vmatmul.bf16.gmra.mxu3 %v3085_v38  ;;  %v2064_v38 = vshrl.u32 %v375_v24, 16  ;;  %v2895_v41 = vunpack.c.l.b16 %v1899_v2  ;;  %v2896_v8 = vunpack.c.h.b16 %v1899_v2  ;;  %v2060_v17 = vshll.u32 %v618_v51, 16 }
 0x1c8   : > { %v2009_v15 = vrot.slane %v2007_v28, 4  ;;  %v2012_v61 = vrot.slane %v2010_v55, 5  ;;  %v2018_v32 = vrot.slane %v2016_v12, 5  ;;  %v2000_v24 = vrot.slane %v1999_v49, 4 }
 0x1c9   : > { %v4265_v31 = vpop.f32.mrf.mxu2  ;;  %v4089_v47 = vpop.f32.mrf.mxu0  ;;  %v2066_v9 = vrot.slane %v2064_v38, 4  ;;  %v3091_v3 = vpack.c.b16 %v2902_v6, %v2893_v13  ;;  %v3092_v29 = vpack.c.b16 %v2903_v54, %v2894_v27  ;;  %v3093_v44 = vpack.c.b16 %v2904_v63, %v2895_v41  ;;  %v380_v41 = vld [vmem:[%s12889_s27 + $0x528] sm:$0xff] }
 0x1ca   : > { %v4354_v39 = vpop.f32.mrf.mxu3  ;;  %v4266_v62 = vadd.f32 %v4265_v31, %v4177_v23  ;;  %v4178_v58 = vpop.f32.mrf.mxu1  ;;  %v4090_v43 = vadd.f32 %v4089_v47, %v13187_v36  ;;  %v2905_v23 = vunpack.c.h.b16 %v1953_v1  ;;  %v2057_v36 = vor.u32 %v2056_v57, %v2004_v5  ;;  %v385_v63 = vld [vmem:[%s12889_s27 + $0x54c] sm:$0xff] }
 0x1cb   : > { %v2062_v1 = vrot.slane %v2060_v17, 5  ;;  %v2070_v28 = vshll.u32 %v619_v34, 16  ;;  %v2013_v57 = vor.u32 %v2012_v61, %v2009_v15  ;;  %v2067_v12 = vor.u32 %v2066_v9, %v2018_v32  ;;  %v623_v34 = vld [vmem:[%s12889_s27 + $0x568] sm:$0x11] }
 0x1cc   : > { %v13572_v11 = vadd.f32 %v4354_v39, %v4266_v62  ;;  %v4179_v16 = vadd.f32 %v4178_v58, %v4090_v43  ;;  %v3094_v2 = vpack.c.b16 %v2905_v23, %v2896_v8  ;;  %v384_v43 = vld [vmem:[%s12889_s27 + $0x544] sm:$0xff]  ;;  %v2058_v51 = vrot.slane %v2057_v36, 4 }
 0x1cd   : > { %v13582_v13 = vsel %vm12923_vm2, %v2000_v24, %v2004_v5  ;;  %v2113_v6 = vshrl.u32 %v379_v56, 16  ;;  %v2116_v27 = vshll.u32 %v379_v56, 16  ;;  %v2174_v54 = vshrl.u32 %v384_v43, 16  ;;  %v12124_v8 = vld [vmem:[%s16219_s1 + $0x48] sm:$0xff] }
 0x1ce   : > { %v12252_v5 = vld [vmem:[%s16219_s1 + $0x448] sm:$0xff]  ;;  %v2063_v23 = vsel %vm12923_vm2, %v2058_v51, %v2062_v1  ;;  %v2911_v17 = vunpack.c.l.b16 %v13582_v13  ;;  %v2014_v15 = vrot.slane %v2013_v57, 4  ;;  %v2068_v36 = vrot.slane %v2067_v12, 4  ;;  %5781 = vmatpush.bf16.msra.mxu2 %v12124_v8 }
 0x1cf   : > { %v2115_v61 = vrot.slane %v2113_v6, 4  ;;  %v2118_v9 = vrot.slane %v2116_v27, 5  ;;  %v2127_v24 = vshrl.u32 %v380_v41, 16  ;;  %4435 = vmatpush.bf16.msra.mxu0 %v12252_v5  ;;  %v2136_v56 = vshll.u32 %v385_v63, 16 }
 0x1d0   : > { %v2920_v1 = vunpack.c.l.b16 %v2063_v23  ;;  %v2019_v51 = vsel %vm12923_vm2, %v2014_v15, %v2018_v32  ;;  %v2180_v12 = vshll.u32 %v623_v34, 16 }
 0x1d1   : > { %v4267_v31 = vpop.f32.mrf.mxu2  ;;  %v4092_v47 = vpop.f32.mrf.mxu0  ;;  %v2119_v27 = vor.u32 %v2118_v9, %v2115_v61  ;;  %v2913_v5 = vunpack.c.l.b16 %v2019_v51 }
 0x1d2   : > { %v4356_v39 = vpop.f32.mrf.mxu3  ;;  %v4268_v62 = vadd.f32 %v4267_v31, %v4179_v16  ;;  %v4181_v58 = vpop.f32.mrf.mxu1  ;;  %v4093_v55 = vadd.f32 %v4092_v47, %v13207_v7  ;;  %v2122_v16 = vshll.u32 %v384_v43, 16  ;;  %v2072_v7 = vrot.slane %v2070_v28, 5 }
 0x1d3   : > { %v2130_v31 = vshll.u32 %v380_v41, 16  ;;  %v2912_v28 = vunpack.c.h.b16 %v13582_v13  ;;  %v2921_v43 = vunpack.c.h.b16 %v2063_v23  ;;  %v2914_v23 = vunpack.c.h.b16 %v2019_v51 }
 0x1d4   : > { %v13578_v38 = vadd.f32 %v4356_v39, %v4268_v62  ;;  %v4182_v49 = vadd.f32 %v4181_v58, %v4093_v55  ;;  %4131 = vmatmul.bf16.gmra.mxu0 %v3091_v3  ;;  %v2184_v62 = vshrl.u32 %v385_v63, 16  ;;  %v2073_v57 = vsel %vm12923_vm2, %v2068_v36, %v2072_v7  ;;  %v624_v63 = vld [vmem:[%s12889_s27 + $0x570] sm:$0x11] }
 0x1d5   : > { %4220 = vmatmul.bf16.gmra.mxu1 %v3092_v29  ;;  %v2124_v29 = vrot.slane %v2122_v16, 5  ;;  %v2132_v16 = vrot.slane %v2130_v31, 5  ;;  %v2922_v32 = vunpack.c.l.b16 %v2073_v57  ;;  %v2923_v15 = vunpack.c.h.b16 %v2073_v57 }
 0x1d6   : > { %4309 = vmatmul.bf16.gmra.mxu2 %v3093_v44  ;;  %v2176_v44 = vrot.slane %v2174_v54, 4  ;;  %v12116_v54 = vld [vmem:[%s16219_s1 + $0x8] sm:$0xff]  ;;  %v2186_v8 = vrot.slane %v2184_v62, 4  ;;  %v3100_v7 = vpack.c.b16 %v2920_v1, %v2911_v17  ;;  %v2120_v36 = vrot.slane %v2119_v27, 4 }
 0x1d7   : > { %4398 = vmatmul.bf16.gmra.mxu3 %v3094_v2  ;;  %5692 = vmatpush.bf16.msra.mxu1 %v12116_v54  ;;  %v2190_v61 = vshll.u32 %v624_v63, 16  ;;  %v3101_v31 = vpack.c.b16 %v2921_v43, %v2912_v28  ;;  %v12136_v43 = vld [vmem:[%s16219_s1 + $0xa8] sm:$0xff]  ;;  %v395_v63 = vld [vmem:[%s12889_s27 + $0x5b8] sm:$0xff] }
 0x1d8   : > { %v2177_v41 = vor.u32 %v2176_v44, %v2124_v29  ;;  %v2125_v1 = vsel %vm12923_vm2, %v2120_v36, %v2124_v29  ;;  %v390_v29 = vld [vmem:[%s12889_s27 + $0x594] sm:$0xff]  ;;  %5866 = vmatpush.bf16.msra.mxu3 %v12136_v43 }
 0x1d9   : > { %v4270_v39 = vpop.f32.mrf.mxu2  ;;  %v4094_v58 = vpop.f32.mrf.mxu0  ;;  %v2192_v28 = vrot.slane %v2190_v61, 5  ;;  %v2250_v61 = vshll.u32 %v390_v29, 16 }
 0x1da   : > { %v4359_v3 = vpop.f32.mrf.mxu3  ;;  %v4271_v47 = vadd.f32 %v4270_v39, %v4182_v49  ;;  %v4183_v2 = vpop.f32.mrf.mxu1  ;;  %v4095_v55 = vadd.f32 %v4094_v58, %v13216_v45  ;;  %v2129_v49 = vrot.slane %v2127_v24, 4  ;;  %v2138_v45 = vrot.slane %v2136_v56, 5 }
 0x1db   : > { %v2178_v39 = vrot.slane %v2177_v41, 4  ;;  %v3102_v58 = vpack.c.b16 %v2922_v32, %v2913_v5 }
 0x1dc   : > { %v13602_v6 = vadd.f32 %v4359_v3, %v4271_v47  ;;  %v4184_v13 = vadd.f32 %v4183_v2, %v4095_v55  ;;  %v2133_v34 = vor.u32 %v2132_v16, %v2129_v49  ;;  %v2182_v3 = vrot.slane %v2180_v12, 5  ;;  %v389_v55 = vld [vmem:[%s12889_s27 + $0x58c] sm:$0xff] }
 0x1dd   : > { %v2187_v44 = vor.u32 %v2186_v8, %v2138_v45  ;;  %v3103_v2 = vpack.c.b16 %v2923_v15, %v2914_v23  ;;  %v394_v12 = vld [vmem:[%s12889_s27 + $0x5b0] sm:$0xff]  ;;  %v2233_v16 = vshrl.u32 %v389_v55, 16  ;;  %v2236_v54 = vshll.u32 %v389_v55, 16 }
 0x1de   : > { %v2134_v57 = vrot.slane %v2133_v34, 4  ;;  %v2294_v41 = vshrl.u32 %v394_v12, 16  ;;  %v2929_v8 = vunpack.c.l.b16 %v2125_v1  ;;  %v2247_v34 = vshrl.u32 %v390_v29, 16 }
 0x1df   : > { %v2188_v49 = vrot.slane %v2187_v44, 4  ;;  %v2235_v36 = vrot.slane %v2233_v16, 4  ;;  %v2304_v44 = vshrl.u32 %v395_v63, 16 }
 0x1e0   : > { %v2139_v32 = vsel %vm12923_vm2, %v2134_v57, %v2138_v45  ;;  %v628_v57 = vld [vmem:[%s12889_s27 + $0x5d4] sm:$0x11] }
 0x1e1   : > { %v4272_v9 = vpop.f32.mrf.mxu2  ;;  %v4097_v56 = vpop.f32.mrf.mxu0  ;;  %v2931_v55 = vunpack.c.l.b16 %v2139_v32  ;;  %v2932_v43 = vunpack.c.h.b16 %v2139_v32  ;;  %v399_v32 = vld [vmem:[%s12889_s27 + $0x5f8] sm:$0xff] }
 0x1e2   : > { %v4361_v24 = vpop.f32.mrf.mxu3  ;;  %v4273_v47 = vadd.f32 %v4272_v9, %v4184_v13  ;;  %v4186_v62 = vpop.f32.mrf.mxu1  ;;  %v4098_v51 = vadd.f32 %v4097_v56, %v13232_v18  ;;  %v2183_v18 = vsel %vm12923_vm2, %v2178_v39, %v2182_v3  ;;  %v2242_v13 = vshll.u32 %v394_v12, 16 }
 0x1e3   : > { %v2938_v5 = vunpack.c.l.b16 %v2183_v18  ;;  %v2238_v39 = vrot.slane %v2236_v54, 5  ;;  %v2256_v3 = vshll.u32 %v395_v63, 16  ;;  %v2930_v56 = vunpack.c.h.b16 %v2125_v1  ;;  %v629_v54 = vld [vmem:[%s12889_s27 + $0x5dc] sm:$0x11] }
 0x1e4   : > { %v13610_v17 = vadd.f32 %v4361_v24, %v4273_v47  ;;  %v4187_v27 = vadd.f32 %v4186_v62, %v4098_v51  ;;  %4136 = vmatmul.bf16.gmra.mxu0 %v3100_v7  ;;  %v2193_v7 = vsel %vm12923_vm2, %v2188_v49, %v2192_v28  ;;  %v2244_v45 = vrot.slane %v2242_v13, 5 }
 0x1e5   : > { %4225 = vmatmul.bf16.gmra.mxu1 %v3101_v31  ;;  %v2296_v62 = vrot.slane %v2294_v41, 4  ;;  %v2940_v51 = vunpack.c.l.b16 %v2193_v7  ;;  %v2249_v12 = vrot.slane %v2247_v34, 4  ;;  %v2941_v49 = vunpack.c.h.b16 %v2193_v7 }
 0x1e6   : > { %4314 = vmatmul.bf16.gmra.mxu2 %v3102_v58  ;;  %v2239_v16 = vor.u32 %v2238_v39, %v2235_v36  ;;  %v2258_v29 = vrot.slane %v2256_v3, 5  ;;  %v2306_v63 = vrot.slane %v2304_v44, 4  ;;  %v2300_v1 = vshll.u32 %v628_v57, 16 }
 0x1e7   : > { %4403 = vmatmul.bf16.gmra.mxu3 %v3103_v2  ;;  %v2939_v2 = vunpack.c.h.b16 %v2183_v18  ;;  %v3109_v13 = vpack.c.b16 %v2938_v5, %v2929_v8  ;;  %v3112_v7 = vpack.c.b16 %v2941_v49, %v2932_v43  ;;  %v404_v5 = vld [vmem:[%s12889_s27 + $0x61c] sm:$0xff] }
 0x1e8   : > { %v2240_v36 = vrot.slane %v2239_v16, 4  ;;  %v2307_v39 = vor.u32 %v2306_v63, %v2258_v29  ;;  %v2302_v8 = vrot.slane %v2300_v1, 5  ;;  %v12123_v49 = vld [vmem:[%s16219_s1 + $0x40] sm:$0xff] }
 0x1e9   : > { %v4275_v23 = vpop.f32.mrf.mxu2  ;;  %v4099_v24 = vpop.f32.mrf.mxu0  ;;  %v3110_v18 = vpack.c.b16 %v2939_v2, %v2930_v56  ;;  %v2353_v56 = vshrl.u32 %v399_v32, 16  ;;  %v400_v2 = vld [vmem:[%s12889_s27 + $0x600] sm:$0xff]  ;;  %5782 = vmatpush.bf16.msra.mxu2 %v12123_v49 }
 0x1ea   : > { %v4364_v15 = vpop.f32.mrf.mxu3  ;;  %v4276_v9 = vadd.f32 %v4275_v23, %v4187_v27  ;;  %v4188_v31 = vpop.f32.mrf.mxu1  ;;  %v4100_v47 = vadd.f32 %v4099_v24, %v13235_v53  ;;  %v2252_v27 = vrot.slane %v2250_v61, 5  ;;  %v2297_v53 = vor.u32 %v2296_v62, %v2244_v45  ;;  %v12251_v16 = vld [vmem:[%s16219_s1 + $0x440] sm:$0xff] }
 0x1eb   : > { %v2310_v24 = vshll.u32 %v629_v54, 16  ;;  %v2356_v62 = vshll.u32 %v399_v32, 16  ;;  %v2245_v43 = vsel %vm12923_vm2, %v2240_v36, %v2244_v45  ;;  %v2367_v63 = vshrl.u32 %v400_v2, 16  ;;  %4436 = vmatpush.bf16.msra.mxu0 %v12251_v16 }
 0x1ec   : > { %v13627_v58 = vadd.f32 %v4364_v15, %v4276_v9  ;;  %v4189_v28 = vadd.f32 %v4188_v31, %v4100_v47  ;;  %v3111_v15 = vpack.c.b16 %v2940_v51, %v2931_v55  ;;  %v2253_v9 = vor.u32 %v2252_v27, %v2249_v12 }
 0x1ed   : > { %v2298_v44 = vrot.slane %v2297_v53, 4  ;;  %v2312_v57 = vrot.slane %v2310_v24, 5  ;;  %v2362_v12 = vshll.u32 %v404_v5, 16  ;;  %v2414_v27 = vshrl.u32 %v404_v5, 16 }
 0x1ee   : > { %v2254_v51 = vrot.slane %v2253_v9, 4  ;;  %v2370_v53 = vshll.u32 %v400_v2, 16  ;;  %v2355_v1 = vrot.slane %v2353_v56, 4  ;;  %v2948_v9 = vunpack.c.h.b16 %v2245_v43 }
 0x1ef   : > { %v2303_v54 = vsel %vm12923_vm2, %v2298_v44, %v2302_v8  ;;  %v2416_v36 = vrot.slane %v2414_v27, 4  ;;  %v633_v44 = vld [vmem:[%s12889_s27 + $0x640] sm:$0x11]  ;;  %v2369_v8 = vrot.slane %v2367_v63, 4 }
 0x1f0   : > { %v2259_v24 = vsel %vm12923_vm2, %v2254_v51, %v2258_v29  ;;  %v2372_v5 = vrot.slane %v2370_v53, 5  ;;  %v2420_v49 = vshll.u32 %v633_v44, 16 }
 0x1f1   : > { %v4277_v41 = vpop.f32.mrf.mxu2  ;;  %v4102_v31 = vpop.f32.mrf.mxu0 }
 0x1f2   : > { %v4366_v23 = vpop.f32.mrf.mxu3  ;;  %v4278_v34 = vadd.f32 %v4277_v41, %v4189_v28  ;;  %v4191_v61 = vpop.f32.mrf.mxu1  ;;  %v4103_v3 = vadd.f32 %v4102_v31, %v13255_v26  ;;  %v405_v28 = vld [vmem:[%s12889_s27 + $0x624] sm:$0xff]  ;;  %v2308_v26 = vrot.slane %v2307_v39, 4  ;;  %v2373_v16 = vor.u32 %v2372_v5, %v2369_v8 }
 0x1f3   : > { %v2376_v41 = vshll.u32 %v405_v28, 16  ;;  %v2424_v45 = vshrl.u32 %v405_v28, 16  ;;  %v2949_v28 = vunpack.c.l.b16 %v2259_v24 }
 0x1f4   : > { %v13634_v47 = vadd.f32 %v4366_v23, %v4278_v34  ;;  %v4192_v55 = vadd.f32 %v4191_v61, %v4103_v3  ;;  %4141 = vmatmul.bf16.gmra.mxu0 %v3109_v13  ;;  %v2358_v13 = vrot.slane %v2356_v62, 5  ;;  %v2313_v61 = vsel %vm12923_vm2, %v2308_v26, %v2312_v57  ;;  %v634_v26 = vld [vmem:[%s12889_s27 + $0x648] sm:$0x11] }
 0x1f5   : > { %4230 = vmatmul.bf16.gmra.mxu1 %v3110_v18  ;;  %v2956_v3 = vunpack.c.l.b16 %v2303_v54  ;;  %v2378_v2 = vrot.slane %v2376_v41, 5  ;;  %v2426_v29 = vrot.slane %v2424_v45, 4  ;;  %v2957_v57 = vunpack.c.h.b16 %v2303_v54  ;;  %v12135_v54 = vld [vmem:[%s16219_s1 + $0xa0] sm:$0xff] }
 0x1f6   : > { %4319 = vmatmul.bf16.gmra.mxu2 %v3111_v15  ;;  %v2947_v15 = vunpack.c.l.b16 %v2245_v43  ;;  %v2359_v62 = vor.u32 %v2358_v13, %v2355_v1  ;;  %v2958_v43 = vunpack.c.l.b16 %v2313_v61  ;;  %v2430_v1 = vshll.u32 %v634_v26, 16  ;;  %5867 = vmatpush.bf16.msra.mxu3 %v12135_v54 }
 0x1f7   : > { %4408 = vmatmul.bf16.gmra.mxu3 %v3112_v7  ;;  %v2364_v7 = vrot.slane %v2362_v12, 5  ;;  %v2950_v12 = vunpack.c.h.b16 %v2259_v24  ;;  %v2427_v53 = vor.u32 %v2426_v29, %v2378_v2  ;;  %v2374_v44 = vrot.slane %v2373_v16, 4  ;;  %v414_v29 = vld [vmem:[%s12889_s27 + $0x688] sm:$0xff] }
 0x1f8   : > { %v2360_v63 = vrot.slane %v2359_v62, 4  ;;  %v3118_v45 = vpack.c.b16 %v2956_v3, %v2947_v15  ;;  %v2432_v8 = vrot.slane %v2430_v1, 5  ;;  %v409_v62 = vld [vmem:[%s12889_s27 + $0x664] sm:$0xff] }
 0x1f9   : > { %v4280_v23 = vpop.f32.mrf.mxu2  ;;  %v4104_v34 = vpop.f32.mrf.mxu0  ;;  %v2417_v27 = vor.u32 %v2416_v36, %v2364_v7  ;;  %v2422_v36 = vrot.slane %v2420_v49, 5  ;;  %v2428_v3 = vrot.slane %v2427_v53, 4  ;;  %v2473_v26 = vshrl.u32 %v409_v62, 16 }
 0x1fa   : > { %v4369_v18 = vpop.f32.mrf.mxu3  ;;  %v4281_v32 = vadd.f32 %v4280_v23, %v4192_v55  ;;  %v4193_v31 = vpop.f32.mrf.mxu1  ;;  %v4105_v39 = vadd.f32 %v4104_v34, %v13267_v4  ;;  %v12115_v55 = vld [vmem:[%s16219_s1] sm:$0xff]  ;;  %v2959_v4 = vunpack.c.h.b16 %v2313_v61  ;;  %v3119_v23 = vpack.c.b16 %v2957_v57, %v2948_v9 }
 0x1fb   : > { %5693 = vmatpush.bf16.msra.mxu1 %v12115_v55  ;;  %v2418_v61 = vrot.slane %v2417_v27, 4  ;;  %v2365_v9 = vsel %vm12923_vm2, %v2360_v63, %v2364_v7  ;;  %v2379_v7 = vsel %vm12923_vm2, %v2374_v44, %v2378_v2  ;;  %v2534_v63 = vshrl.u32 %v414_v29, 16 }
 0x1fc   : > { %v13654_v56 = vadd.f32 %v4369_v18, %v4281_v32  ;;  %v4194_v51 = vadd.f32 %v4193_v31, %v4105_v39  ;;  %v3120_v18 = vpack.c.b16 %v2958_v43, %v2949_v28  ;;  %v3121_v31 = vpack.c.b16 %v2959_v4, %v2950_v12  ;;  %v415_v28 = vld [vmem:[%s12889_s27 + $0x690] sm:$0xff] }
 0x1fd   : > { %v2423_v55 = vsel %vm12923_vm2, %v2418_v61, %v2422_v36  ;;  %v2965_v57 = vunpack.c.l.b16 %v2365_v9  ;;  %v2433_v43 = vsel %vm12923_vm2, %v2428_v3, %v2432_v8  ;;  %v2476_v12 = vshll.u32 %v409_v62, 16 }
 0x1fe   : > { %v2482_v4 = vshll.u32 %v414_v29, 16  ;;  %v2974_v16 = vunpack.c.l.b16 %v2423_v55  ;;  %v2544_v54 = vshrl.u32 %v415_v28, 16  ;;  %v2475_v36 = vrot.slane %v2473_v26, 4 }
 0x1ff   : > { %v2536_v8 = vrot.slane %v2534_v63, 4  ;;  %v2977_v29 = vunpack.c.h.b16 %v2433_v43 }
 0x200   : > { %v2484_v44 = vrot.slane %v2482_v4, 5 }
 0x201   : > { %v4282_v13 = vpop.f32.mrf.mxu2  ;;  %v4107_v24 = vpop.f32.mrf.mxu0 }
 0x202   : > { %v4371_v41 = vpop.f32.mrf.mxu3  ;;  %v4283_v32 = vadd.f32 %v4282_v13, %v4194_v51  ;;  %v4196_v34 = vpop.f32.mrf.mxu1  ;;  %v4108_v39 = vadd.f32 %v4107_v24, %v13286_v46  ;;  %v12134_v46 = vld [vmem:[%s16219_s1 + $0x98] sm:$0xff]  ;;  %v410_v51 = vld [vmem:[%s12889_s27 + $0x66c] sm:$0xff]  ;;  %v2975_v24 = vunpack.c.h.b16 %v2423_v55  ;;  %v2537_v63 = vor.u32 %v2536_v8, %v2484_v44 }
 0x203   : > { %5868 = vmatpush.bf16.msra.mxu3 %v12134_v46  ;;  %v2487_v53 = vshrl.u32 %v410_v51, 16  ;;  %v2490_v1 = vshll.u32 %v410_v51, 16  ;;  %v12133_v13 = vld [vmem:[%s16219_s1 + $0x90] sm:$0xff]  ;;  %v2546_v51 = vrot.slane %v2544_v54, 4  ;;  %v12146_v8 = vld [vmem:[%s16219_s1 + $0xf8] sm:$0xff] }
 0x204   : > { %v13664_v15 = vadd.f32 %v4371_v41, %v4283_v32  ;;  %v4197_v5 = vadd.f32 %v4196_v34, %v4108_v39  ;;  %4146 = vmatmul.bf16.gmra.mxu0 %v3118_v45  ;;  %v2967_v34 = vunpack.c.l.b16 %v2379_v7  ;;  %v2478_v39 = vrot.slane %v2476_v12, 5  ;;  %v638_v46 = vld [vmem:[%s12889_s27 + $0x6ac] sm:$0x11] }
 0x205   : > { %4235 = vmatmul.bf16.gmra.mxu1 %v3119_v23  ;;  %v2966_v23 = vunpack.c.h.b16 %v2365_v9  ;;  %v2492_v62 = vrot.slane %v2490_v1, 5  ;;  %v12132_v9 = vld [vmem:[%s16219_s1 + $0x88] sm:$0xff]  ;;  %5953 = vmatpush.bf16.msrb.mxu0 %v12146_v8 }
 0x206   : > { %4324 = vmatmul.bf16.gmra.mxu2 %v3120_v18  ;;  %v2496_v18 = vshll.u32 %v415_v28, 16  ;;  %v639_v28 = vld [vmem:[%s12889_s27 + $0x6b4] sm:$0x11]  ;;  %v2479_v26 = vor.u32 %v2478_v39, %v2475_v36 }
 0x207   : > { %4413 = vmatmul.bf16.gmra.mxu3 %v3121_v31  ;;  %v2976_v31 = vunpack.c.l.b16 %v2433_v43  ;;  %v2550_v54 = vshll.u32 %v639_v28, 16 }
 0x208   : > { %5869 = vmatpush.bf16.msra.mxu3 %v12133_v13  ;;  %v2498_v55 = vrot.slane %v2496_v18, 5 }
 0x209   : > { %v4285_v27 = vpop.f32.mrf.mxu2  ;;  %v4109_v2 = vpop.f32.mrf.mxu0  ;;  %v3129_v13 = vpack.c.b16 %v2976_v31, %v2967_v34  ;;  %v2552_v39 = vrot.slane %v2550_v54, 5 }
 0x20a   : > { %v4374_v49 = vpop.f32.mrf.mxu3  ;;  %v4286_v41 = vadd.f32 %v4285_v27, %v4197_v5  ;;  %v4198_v45 = vpop.f32.mrf.mxu1  ;;  %v4110_v32 = vadd.f32 %v4109_v2, %v13295_v21  ;;  %v2489_v5 = vrot.slane %v2487_v53, 4  ;;  %v2968_v21 = vunpack.c.h.b16 %v2379_v7 }
 0x20b   : > { %v3127_v27 = vpack.c.b16 %v2974_v16, %v2965_v57  ;;  %v2540_v53 = vshll.u32 %v638_v46, 16  ;;  %v2547_v18 = vor.u32 %v2546_v51, %v2498_v55 }
 0x20c   : > { %v13685_v61 = vadd.f32 %v4374_v49, %v4286_v41  ;;  %v4199_v3 = vadd.f32 %v4198_v45, %v4110_v32  ;;  %5870 = vmatpush.bf16.msra.mxu3 %v12132_v9  ;;  %v3128_v49 = vpack.c.b16 %v2975_v24, %v2966_v23  ;;  %v2493_v1 = vor.u32 %v2492_v62, %v2489_v5  ;;  %v12131_v41 = vld [vmem:[%s16219_s1 + $0x80] sm:$0xff] }
 0x20d   : > { %v3130_v45 = vpack.c.b16 %v2977_v29, %v2968_v21  ;;  %v2480_v23 = vrot.slane %v2479_v26, 4  ;;  %v2538_v24 = vrot.slane %v2537_v63, 4  ;;  %v2542_v34 = vrot.slane %v2540_v53, 5  ;;  %v266_v5 = vld [vmem:[%s12889_s27 + $0x44] sm:$0xf] }
 0x20e   : > { %v2494_v31 = vrot.slane %v2493_v1, 4  ;;  %v2548_v36 = vrot.slane %v2547_v18, 4 }
 0x20f   : > { %v2485_v62 = vsel %vm12923_vm2, %v2480_v23, %v2484_v44  ;;  %v2543_v29 = vsel %vm12923_vm2, %v2538_v24, %v2542_v34  ;;  %v754_v44 = vshrl.u32 %v266_v5, 16  ;;  %v565_v24 = vld [vmem:[%s12889_s27 + $0x68] sm:$0x1] }
 0x210   : > { %5871 = vmatpush.bf16.msra.mxu3 %v12131_v41  ;;  %v2499_v46 = vsel %vm12923_vm2, %v2494_v31, %v2498_v55  ;;  %v2983_v63 = vunpack.c.l.b16 %v2485_v62  ;;  %v2984_v53 = vunpack.c.h.b16 %v2485_v62  ;;  %v2992_v41 = vunpack.c.l.b16 %v2543_v29 }
 0x211   : > { %v4287_v12 = vpop.f32.mrf.mxu2  ;;  %v4112_v43 = vpop.f32.mrf.mxu0  ;;  %v2985_v55 = vunpack.c.l.b16 %v2499_v46 }
 0x212   : > { %v4376_v4 = vpop.f32.mrf.mxu3  ;;  %v4288_v7 = vadd.f32 %v4287_v12, %v4199_v3  ;;  %v4201_v2 = vpop.f32.mrf.mxu1  ;;  %v4113_v57 = vadd.f32 %v4112_v43, %v13315_v60  ;;  %v261_v3 = vld [vmem:[%s12889_s27 + $0x20] sm:$0xf]  ;;  %v12162_v60 = vld [vmem:[%s16219_s1 + $0x178] sm:$0xff]  ;;  %v2553_v12 = vsel %vm12923_vm2, %v2548_v36, %v2552_v39  ;;  %v3136_v36 = vpack.c.b16 %v2992_v41, %v2983_v63 }
 0x213   : > { %6131 = vmatpush.bf16.msrb.mxu2 %v12162_v60  ;;  %v701_v51 = vshrl.u32 %v261_v3, 16  ;;  %v704_v28 = vshll.u32 %v261_v3, 16  ;;  %v12154_v43 = vld [vmem:[%s16219_s1 + $0x138] sm:$0xff]  ;;  %v2995_v23 = vunpack.c.h.b16 %v2553_v12 }
 0x214   : > { %v13696_v16 = vadd.f32 %v4376_v4, %v4288_v7  ;;  %v4202_v32 = vadd.f32 %v4201_v2, %v4113_v57  ;;  %4151 = vmatmul.bf16.gmra.mxu0 %v3127_v27  ;;  %v710_v4 = vshll.u32 %v266_v5, 16  ;;  %v2993_v7 = vunpack.c.h.b16 %v2543_v29  ;;  %6042 = vmatpush.bf16.msrb.mxu1 %v12154_v43 }
 0x215   : > { %4240 = vmatmul.bf16.gmra.mxu1 %v3128_v49  ;;  %v703_v18 = vrot.slane %v701_v51, 4  ;;  %v706_v54 = vrot.slane %v704_v28, 5  ;;  %v2986_v57 = vunpack.c.h.b16 %v2499_v46  ;;  %v760_v29 = vshll.u32 %v565_v24, 16  ;;  %v11975_v24 = vld [vmem:[%s12889_s27 + $0x20] sm:$0xf0] }
 0x216   : > { %4329 = vmatmul.bf16.gmra.mxu2 %v3129_v13  ;;  %v3137_v39 = vpack.c.b16 %v2993_v7, %v2984_v53 }
 0x217   : > { %4418 = vmatmul.bf16.gmra.mxu3 %v3130_v45  ;;  %v2994_v45 = vunpack.c.l.b16 %v2553_v12  ;;  %v707_v60 = vor.u32 %v706_v54, %v703_v18  ;;  %v271_v12 = vld [vmem:[%s12889_s27 + $0x8c] sm:$0xf] }
 0x218   : > { %v824_v53 = vshll.u32 %v271_v12, 16 }
 0x219   : > { %v4290_v9 = vpop.f32.mrf.mxu2  ;;  %v4114_v49 = vpop.f32.mrf.mxu0  ;;  %v3138_v3 = vpack.c.b16 %v2994_v45, %v2985_v55 }
 0x21a   : > { %v4379_v21 = vpop.f32.mrf.mxu3  ;;  %v4291_v27 = vadd.f32 %v4290_v9, %v4202_v32  ;;  %v4203_v26 = vpop.f32.mrf.mxu1  ;;  %v4115_v13 = vadd.f32 %v4114_v49, %v13324_v42  ;;  %v712_v32 = vrot.slane %v710_v4, 5  ;;  %v756_v42 = vrot.slane %v754_v44, 4  ;;  %v276_v4 = vld [vmem:[%s12889_s27 + $0xb0] sm:$0xf] }
 0x21b   : > { %v3139_v9 = vpack.c.b16 %v2995_v23, %v2986_v57  ;;  %v874_v45 = vshrl.u32 %v276_v4, 16 }
 0x21c   : > { %v13715_v1 = vadd.f32 %v4379_v21, %v4291_v27  ;;  %v4204_v2 = vadd.f32 %v4203_v26, %v4115_v13  ;;  %v757_v21 = vor.u32 %v756_v42, %v712_v32  ;;  %v708_v27 = vrot.slane %v707_v60, 4  ;;  %v10560_v42 = vld [vmem:[%s12889_s27] sm:$0xf] }
 0x21d   : > { %v762_v26 = vrot.slane %v760_v29, 5  ;;  %v876_v60 = vrot.slane %v874_v45, 4 }
 0x21e   : > { %v758_v49 = vrot.slane %v757_v21, 4  ;;  %v713_v63 = vsel %vm12923_vm2, %v708_v27, %v712_v32 }
 0x21f   : > { %v2717_v57 = vunpack.c.l.b16 %v713_v63 }
 0x220   : > { %v763_v43 = vsel %vm12923_vm2, %v758_v49, %v762_v26 }
 0x221   : > { %v4292_v34 = vpop.f32.mrf.mxu2  ;;  %v4117_v5 = vpop.f32.mrf.mxu0  ;;  %v2726_v32 = vunpack.c.l.b16 %v763_v43  ;;  %v12161_v43 = vld [vmem:[%s16219_s1 + $0x170] sm:$0xff] }
 0x222   : > { %v4381_v31 = vpop.f32.mrf.mxu3  ;;  %v4293_v8 = vadd.f32 %v4292_v34, %v4204_v2  ;;  %v4206_v62 = vpop.f32.mrf.mxu1  ;;  %v4118_v46 = vadd.f32 %v4117_v5, %v13337_v22  ;;  %v821_v22 = vshrl.u32 %v271_v12, 16  ;;  %v830_v2 = vshll.u32 %v276_v4, 16  ;;  %v11976_v5 = vld [vmem:[%s12889_s27 + $0x28] sm:$0xf0]  ;;  %6132 = vmatpush.bf16.msrb.mxu2 %v12161_v43 }
 0x223   : > { %v3005_v29 = vpack.c.b16 %v2726_v32, %v2717_v57 }
 0x224   : > { %v13722_v51 = vadd.f32 %v4381_v31, %v4293_v8  ;;  %v4207_v28 = vadd.f32 %v4206_v62, %v4118_v46  ;;  %4156 = vmatmul.bf16.gmra.mxu0 %v3136_v36  ;;  %v823_v34 = vrot.slane %v821_v22, 4  ;;  %v826_v31 = vrot.slane %v824_v53, 5  ;;  %v11971_v36 = vld [vmem:[%s12889_s27 + $0x4] sm:$0xf]  ;;  %v10568_v8 = vld [vmem:[%s12889_s27 + $0x8] sm:$0xf] }
 0x225   : > { %4245 = vmatmul.bf16.gmra.mxu1 %v3137_v39  ;;  %v10562_v39 = vld [vmem:[%s12889_s27 + $0x24] sm:$0xf0]  ;;  %v570_v62 = vld [vmem:[%s12889_s27 + $0xd4] sm:$0x1]  ;;  %v10569_v12 = vor.u32 %v11976_v5, %v10568_v8 }
 0x226   : > { %4334 = vmatmul.bf16.gmra.mxu2 %v3138_v3  ;;  %v832_v3 = vrot.slane %v830_v2, 5  ;;  %v10565_v46 = vor.u32 %v11971_v36, %v10562_v39  ;;  %v12145_v2 = vld [vmem:[%s16219_s1 + $0xf0] sm:$0xff] }
 0x227   : > { %4423 = vmatmul.bf16.gmra.mxu3 %v3139_v9  ;;  %5954 = vmatpush.bf16.msrb.mxu0 %v12145_v2  ;;  %v12153_v5 = vld [vmem:[%s16219_s1 + $0x130] sm:$0xff] }
 0x228   : > { %v877_v4 = vor.u32 %v876_v60, %v832_v3  ;;  %6043 = vmatpush.bf16.msrb.mxu1 %v12153_v5 }
 0x229   : > { %v4295_v44 = vpop.f32.mrf.mxu2  ;;  %v4119_v7 = vpop.f32.mrf.mxu0 }
 0x22a   : > { %v4384_v13 = vpop.f32.mrf.mxu3  ;;  %v4296_v41 = vadd.f32 %v4295_v44, %v4207_v28  ;;  %v4208_v55 = vpop.f32.mrf.mxu1  ;;  %v4120_v18 = vadd.f32 %v4119_v7, %v13340_v59  ;;  %v10561_v59 = vor.u32 %v11975_v24, %v10560_v42  ;;  %v827_v28 = vor.u32 %v826_v31, %v823_v34 }
 0x22b   : > { %v880_v44 = vshll.u32 %v570_v62, 16 }
 0x22c   : > { %v13731_v54 = vadd.f32 %v4384_v13, %v4296_v41  ;;  %v4209_v23 = vadd.f32 %v4208_v55, %v4120_v18  ;;  %v828_v53 = vrot.slane %v827_v28, 4  ;;  %v878_v41 = vrot.slane %v877_v4, 4  ;;  %v281_v55 = vld [vmem:[%s12889_s27 + $0xf8] sm:$0xf]  ;;  %v11980_v28 = vld [vmem:[%s12889_s27 + $0x70] sm:$0xf] }
 0x22d   : > { %v882_v7 = vrot.slane %v880_v44, 5  ;;  %v944_v32 = vshll.u32 %v281_v55, 16  ;;  %v575_v4 = vld [vmem:[%s12889_s27 + $0x140] sm:$0x1] }
 0x22e   : > { %v833_v57 = vsel %vm12923_vm2, %v828_v53, %v832_v3 }
 0x22f   : > { %v883_v31 = vsel %vm12923_vm2, %v878_v41, %v882_v7  ;;  %v2735_v3 = vunpack.c.l.b16 %v833_v57 }
 0x231   : > { %v4297_v9 = vpop.f32.mrf.mxu2  ;;  %v4122_v49 = vpop.f32.mrf.mxu0 }
 0x232   : > { %v4386_v21 = vpop.f32.mrf.mxu3  ;;  %v4298_v27 = vadd.f32 %v4297_v9, %v4209_v23  ;;  %v4211_v26 = vpop.f32.mrf.mxu1  ;;  %v4123_v13 = vadd.f32 %v4122_v49, %v13360_v37  ;;  %v286_v37 = vld [vmem:[%s12889_s27 + $0x11c] sm:$0xf]  ;;  %v941_v23 = vshrl.u32 %v281_v55, 16  ;;  %v2744_v9 = vunpack.c.l.b16 %v883_v31  ;;  %v291_v31 = vld [vmem:[%s12889_s27 + $0x164] sm:$0xf] }
 0x233   : > { %v950_v36 = vshll.u32 %v286_v37, 16  ;;  %v994_v39 = vshrl.u32 %v286_v37, 16  ;;  %v1064_v5 = vshll.u32 %v291_v31, 16 }
 0x234   : > { %v13741_v63 = vadd.f32 %v4386_v21, %v4298_v27  ;;  %v4212_v22 = vadd.f32 %v4211_v26, %v4123_v13  ;;  %4437 = vmatmul.bf16.vlgmr.msra.gmra.mxu0 %v3005_v29  ;;  %v10596_v21 = vld [vmem:[%s12889_s27 + $0x6c] sm:$0xf]  ;;  %v11984_v29 = vld [vmem:[%s12889_s27 + $0x8c] sm:$0xf0]  ;;  %v10598_v27 = vld [vmem:[%s12889_s27 + $0x90] sm:$0xf0] }
 0x235   : > { %5694 = vmatmul.bf16.vlgmr.msra.gmra.mxu1 %v10561_v59  ;;  %v943_v59 = vrot.slane %v941_v23, 4  ;;  %v952_v49 = vrot.slane %v950_v36, 5  ;;  %v996_v26 = vrot.slane %v994_v39, 4  ;;  %v10597_v53 = vor.u32 %v11984_v29, %v10596_v21  ;;  %v296_v36 = vld [vmem:[%s12889_s27 + $0x188] sm:$0xf] }
 0x236   : > { %5783 = vmatmul.bf16.vlgmr.msra.gmra.mxu2 %v10565_v46  ;;  %v946_v46 = vrot.slane %v944_v32, 5  ;;  %v10601_v41 = vor.u32 %v11980_v28, %v10598_v27 }
 0x237   : > { %5872 = vmatmul.bf16.vlgmr.msra.gmra.mxu3 %v10569_v12  ;;  %v11985_v12 = vld [vmem:[%s12889_s27 + $0x94] sm:$0xf0] }
 0x238   : > { %v947_v7 = vor.u32 %v946_v46, %v943_v59  ;;  %v1070_v59 = vshll.u32 %v296_v36, 16  ;;  %v1114_v46 = vshrl.u32 %v296_v36, 16 }
 0x239   : > { %v4300_v45 = vpop.f32.mrf.mxu2  ;;  %v4124_v24 = vpop.f32.mrf.mxu0 }
 0x23a   : > { %v4389_v18 = vpop.f32.mrf.mxu3  ;;  %v4301_v42 = vadd.f32 %v4300_v45, %v4212_v22  ;;  %v4213_v34 = vpop.f32.mrf.mxu1  ;;  %v4125_v60 = vadd.f32 %v4124_v24, %v13369_v19  ;;  %v10604_v19 = vld [vmem:[%s12889_s27 + $0x74] sm:$0xf]  ;;  %v3014_v22 = vpack.c.b16 %v2744_v9, %v2735_v3  ;;  %v997_v45 = vor.u32 %v996_v26, %v952_v49 }
 0x23b   : > { %v10605_v37 = vor.u32 %v11985_v12, %v10604_v19  ;;  %v10632_v12 = vld [vmem:[%s12889_s27 + $0xd8] sm:$0xf] }
 0x23c   : > { %v13756_v8 = vadd.f32 %v4389_v18, %v4301_v42  ;;  %v4214_v62 = vadd.f32 %v4213_v34, %v4125_v60  ;;  %v1000_v18 = vshll.u32 %v575_v4, 16  ;;  %v948_v42 = vrot.slane %v947_v7, 4  ;;  %v11993_v4 = vld [vmem:[%s12889_s27 + $0xf8] sm:$0xf0] }
 0x23d   : > { %v998_v24 = vrot.slane %v997_v45, 4  ;;  %v1116_v7 = vrot.slane %v1114_v46, 4 }
 0x23e   : > { %v1002_v34 = vrot.slane %v1000_v18, 5  ;;  %v953_v3 = vsel %vm12923_vm2, %v948_v42, %v952_v49 }
 0x23f   : > { %v2753_v49 = vunpack.c.l.b16 %v953_v3 }
 0x240   : > { %v1003_v29 = vsel %vm12923_vm2, %v998_v24, %v1002_v34 }
 0x241   : > { %v4302_v44 = vpop.f32.mrf.mxu2  ;;  %v4127_v43 = vpop.f32.mrf.mxu0  ;;  %v2762_v19 = vunpack.c.l.b16 %v1003_v29  ;;  %v12160_v29 = vld [vmem:[%s16219_s1 + $0x168] sm:$0xff] }
 0x242   : > { %v4391_v13 = vpop.f32.mrf.mxu3  ;;  %v4303_v55 = vadd.f32 %v4302_v44, %v4214_v62  ;;  %v4216_v2 = vpop.f32.mrf.mxu1  ;;  %v4128_v57 = vadd.f32 %v4127_v43, %v13382_v10  ;;  %v1061_v10 = vshrl.u32 %v291_v31, 16  ;;  %v11994_v43 = vld [vmem:[%s12889_s27 + $0x100] sm:$0xf0]  ;;  %6133 = vmatpush.bf16.msrb.mxu2 %v12160_v29 }
 0x243   : > { %v3023_v18 = vpack.c.b16 %v2762_v19, %v2753_v49 }
 0x244   : > { %v13769_v23 = vadd.f32 %v4391_v13, %v4303_v55  ;;  %v4217_v32 = vadd.f32 %v4216_v2, %v4128_v57  ;;  %4442 = vmatmul.bf16.gmra.mxu0 %v3014_v22  ;;  %v1063_v44 = vrot.slane %v1061_v10, 4  ;;  %v1066_v13 = vrot.slane %v1064_v5, 5  ;;  %v11989_v22 = vld [vmem:[%s12889_s27 + $0xdc] sm:$0xf]  ;;  %v10640_v55 = vld [vmem:[%s12889_s27 + $0xe0] sm:$0xf] }
 0x245   : > { %5699 = vmatmul.bf16.gmra.mxu1 %v10597_v53  ;;  %v10634_v53 = vld [vmem:[%s12889_s27 + $0xfc] sm:$0xf0]  ;;  %v580_v2 = vld [vmem:[%s12889_s27 + $0x1ac] sm:$0x1]  ;;  %v10641_v31 = vor.u32 %v11994_v43, %v10640_v55 }
 0x246   : > { %5788 = vmatmul.bf16.gmra.mxu2 %v10601_v41  ;;  %v1072_v41 = vrot.slane %v1070_v59, 5  ;;  %v10637_v57 = vor.u32 %v11989_v22, %v10634_v53  ;;  %v12144_v59 = vld [vmem:[%s16219_s1 + $0xe8] sm:$0xff] }
 0x247   : > { %5877 = vmatmul.bf16.gmra.mxu3 %v10605_v37  ;;  %5955 = vmatpush.bf16.msrb.mxu0 %v12144_v59  ;;  %v12152_v43 = vld [vmem:[%s16219_s1 + $0x128] sm:$0xff] }
 0x248   : > { %v1117_v36 = vor.u32 %v1116_v7, %v1072_v41  ;;  %6044 = vmatpush.bf16.msrb.mxu1 %v12152_v43 }
 0x249   : > { %v4305_v39 = vpop.f32.mrf.mxu2  ;;  %v4129_v9 = vpop.f32.mrf.mxu0 }
 0x24a   : > { %v4394_v60 = vpop.f32.mrf.mxu3  ;;  %v4306_v62 = vadd.f32 %v4305_v39, %v4217_v32  ;;  %v4218_v21 = vpop.f32.mrf.mxu1  ;;  %v4130_v28 = vadd.f32 %v4129_v9, %v13385_v52  ;;  %v10633_v52 = vor.u32 %v11993_v4, %v10632_v12  ;;  %v1067_v32 = vor.u32 %v1066_v13, %v1063_v44 }
 0x24b   : > { %v1120_v39 = vshll.u32 %v580_v2, 16 }
 0x24c   : > { %v13778_v27 = vadd.f32 %v4394_v60, %v4306_v62  ;;  %v4219_v26 = vadd.f32 %v4218_v21, %v4130_v28  ;;  %v1068_v5 = vrot.slane %v1067_v32, 4  ;;  %v1118_v62 = vrot.slane %v1117_v36, 4  ;;  %v301_v21 = vld [vmem:[%s12889_s27 + $0x1d0] sm:$0xf]  ;;  %v11998_v32 = vld [vmem:[%s12889_s27 + $0x148] sm:$0xf] }
 0x24d   : > { %v1122_v9 = vrot.slane %v1120_v39, 5  ;;  %v1184_v19 = vshll.u32 %v301_v21, 16  ;;  %v585_v36 = vld [vmem:[%s12889_s27 + $0x218] sm:$0x1] }
 0x24e   : > { %v1073_v49 = vsel %vm12923_vm2, %v1068_v5, %v1072_v41 }
 0x24f   : > { %v1123_v13 = vsel %vm12923_vm2, %v1118_v62, %v1122_v9  ;;  %v2771_v41 = vunpack.c.l.b16 %v1073_v49 }
 0x251   : > { %v4307_v37 = vpop.f32.mrf.mxu2  ;;  %v4132_v24 = vpop.f32.mrf.mxu0 }
 0x252   : > { %v4396_v45 = vpop.f32.mrf.mxu3  ;;  %v4308_v42 = vadd.f32 %v4307_v37, %v4219_v26  ;;  %v4221_v34 = vpop.f32.mrf.mxu1  ;;  %v4133_v60 = vadd.f32 %v4132_v24, %v13405_v35  ;;  %v306_v35 = vld [vmem:[%s12889_s27 + $0x1f4] sm:$0xf]  ;;  %v1181_v26 = vshrl.u32 %v301_v21, 16  ;;  %v2780_v37 = vunpack.c.l.b16 %v1123_v13  ;;  %v311_v13 = vld [vmem:[%s12889_s27 + $0x23c] sm:$0xf] }
 0x253   : > { %v1190_v22 = vshll.u32 %v306_v35, 16  ;;  %v1234_v53 = vshrl.u32 %v306_v35, 16  ;;  %v1304_v43 = vshll.u32 %v311_v13, 16 }
 0x254   : > { %v13788_v3 = vadd.f32 %v4396_v45, %v4308_v42  ;;  %v4222_v10 = vadd.f32 %v4221_v34, %v4133_v60  ;;  %4447 = vmatmul.bf16.gmra.mxu0 %v3023_v18  ;;  %v10668_v45 = vld [vmem:[%s12889_s27 + $0x144] sm:$0xf]  ;;  %v12002_v18 = vld [vmem:[%s12889_s27 + $0x164] sm:$0xf0]  ;;  %v10670_v42 = vld [vmem:[%s12889_s27 + $0x168] sm:$0xf0] }
 0x255   : > { %5704 = vmatmul.bf16.gmra.mxu1 %v10633_v52  ;;  %v1183_v52 = vrot.slane %v1181_v26, 4  ;;  %v1192_v24 = vrot.slane %v1190_v22, 5  ;;  %v1236_v34 = vrot.slane %v1234_v53, 4  ;;  %v10669_v5 = vor.u32 %v12002_v18, %v10668_v45  ;;  %v316_v22 = vld [vmem:[%s12889_s27 + $0x260] sm:$0xf] }
 0x256   : > { %5793 = vmatmul.bf16.gmra.mxu2 %v10637_v57  ;;  %v1186_v57 = vrot.slane %v1184_v19, 5  ;;  %v10673_v62 = vor.u32 %v11998_v32, %v10670_v42 }
 0x257   : > { %5882 = vmatmul.bf16.gmra.mxu3 %v10641_v31  ;;  %v12003_v31 = vld [vmem:[%s12889_s27 + $0x16c] sm:$0xf0] }
 0x258   : > { %v1187_v9 = vor.u32 %v1186_v57, %v1183_v52  ;;  %v1310_v52 = vshll.u32 %v316_v22, 16  ;;  %v1354_v57 = vshrl.u32 %v316_v22, 16 }
 0x259   : > { %v4310_v46 = vpop.f32.mrf.mxu2  ;;  %v4134_v4 = vpop.f32.mrf.mxu0 }
 0x25a   : > { %v4399_v28 = vpop.f32.mrf.mxu3  ;;  %v4311_v12 = vadd.f32 %v4310_v46, %v4222_v10  ;;  %v4223_v44 = vpop.f32.mrf.mxu1  ;;  %v4135_v7 = vadd.f32 %v4134_v4, %v13414_v25  ;;  %v10676_v25 = vld [vmem:[%s12889_s27 + $0x14c] sm:$0xf]  ;;  %v3032_v10 = vpack.c.b16 %v2780_v37, %v2771_v41  ;;  %v1237_v46 = vor.u32 %v1236_v34, %v1192_v24 }
 0x25b   : > { %v10677_v35 = vor.u32 %v12003_v31, %v10676_v25  ;;  %v10704_v31 = vld [vmem:[%s12889_s27 + $0x1b0] sm:$0xf] }
 0x25c   : > { %v13803_v55 = vadd.f32 %v4399_v28, %v4311_v12  ;;  %v4224_v2 = vadd.f32 %v4223_v44, %v4135_v7  ;;  %v1240_v28 = vshll.u32 %v585_v36, 16  ;;  %v1188_v12 = vrot.slane %v1187_v9, 4  ;;  %v12011_v36 = vld [vmem:[%s12889_s27 + $0x1d0] sm:$0xf0] }
 0x25d   : > { %v1238_v4 = vrot.slane %v1237_v46, 4  ;;  %v1356_v9 = vrot.slane %v1354_v57, 4 }
 0x25e   : > { %v1242_v44 = vrot.slane %v1240_v28, 5  ;;  %v1193_v41 = vsel %vm12923_vm2, %v1188_v12, %v1192_v24 }
 0x25f   : > { %v2789_v24 = vunpack.c.l.b16 %v1193_v41 }
 0x260   : > { %v1243_v18 = vsel %vm12923_vm2, %v1238_v4, %v1242_v44 }
 0x261   : > { %v4312_v39 = vpop.f32.mrf.mxu2  ;;  %v4137_v29 = vpop.f32.mrf.mxu0  ;;  %v2798_v25 = vunpack.c.l.b16 %v1243_v18  ;;  %v12159_v18 = vld [vmem:[%s16219_s1 + $0x160] sm:$0xff] }
 0x262   : > { %v4401_v60 = vpop.f32.mrf.mxu3  ;;  %v4313_v21 = vadd.f32 %v4312_v39, %v4224_v2  ;;  %v4226_v59 = vpop.f32.mrf.mxu1  ;;  %v4138_v49 = vadd.f32 %v4137_v29, %v13427_v20  ;;  %v1301_v20 = vshrl.u32 %v311_v13, 16  ;;  %v12012_v29 = vld [vmem:[%s12889_s27 + $0x1d8] sm:$0xf0]  ;;  %6134 = vmatpush.bf16.msrb.mxu2 %v12159_v18 }
 0x263   : > { %v3041_v28 = vpack.c.b16 %v2798_v25, %v2789_v24 }
 0x264   : > { %v13816_v26 = vadd.f32 %v4401_v60, %v4313_v21  ;;  %v4227_v19 = vadd.f32 %v4226_v59, %v4138_v49  ;;  %4452 = vmatmul.bf16.gmra.mxu0 %v3032_v10  ;;  %v1303_v39 = vrot.slane %v1301_v20, 4  ;;  %v1306_v60 = vrot.slane %v1304_v43, 5  ;;  %v12007_v10 = vld [vmem:[%s12889_s27 + $0x1b4] sm:$0xf]  ;;  %v10712_v21 = vld [vmem:[%s12889_s27 + $0x1b8] sm:$0xf] }
 0x265   : > { %5709 = vmatmul.bf16.gmra.mxu1 %v10669_v5  ;;  %v10706_v5 = vld [vmem:[%s12889_s27 + $0x1d4] sm:$0xf0]  ;;  %v590_v59 = vld [vmem:[%s12889_s27 + $0x284] sm:$0x1]  ;;  %v10713_v13 = vor.u32 %v12012_v29, %v10712_v21 }
 0x266   : > { %5798 = vmatmul.bf16.gmra.mxu2 %v10673_v62  ;;  %v1312_v62 = vrot.slane %v1310_v52, 5  ;;  %v10709_v49 = vor.u32 %v12007_v10, %v10706_v5  ;;  %v12143_v52 = vld [vmem:[%s16219_s1 + $0xe0] sm:$0xff] }
 0x267   : > { %5887 = vmatmul.bf16.gmra.mxu3 %v10677_v35  ;;  %5956 = vmatpush.bf16.msrb.mxu0 %v12143_v52  ;;  %v12151_v29 = vld [vmem:[%s16219_s1 + $0x120] sm:$0xff] }
 0x268   : > { %v1357_v22 = vor.u32 %v1356_v9, %v1312_v62  ;;  %6045 = vmatpush.bf16.msrb.mxu1 %v12151_v29 }
 0x269   : > { %v4315_v53 = vpop.f32.mrf.mxu2  ;;  %v4139_v37 = vpop.f32.mrf.mxu0 }
 0x26a   : > { %v4404_v7 = vpop.f32.mrf.mxu3  ;;  %v4316_v2 = vadd.f32 %v4315_v53, %v4227_v19  ;;  %v4228_v45 = vpop.f32.mrf.mxu1  ;;  %v4140_v32 = vadd.f32 %v4139_v37, %v13430_v0  ;;  %v10705_v0 = vor.u32 %v12011_v36, %v10704_v31  ;;  %v1307_v19 = vor.u32 %v1306_v60, %v1303_v39 }
 0x26b   : > { %v1360_v53 = vshll.u32 %v590_v59, 16 }
 0x26c   : > { %v13825_v42 = vadd.f32 %v4404_v7, %v4316_v2  ;;  %v4229_v34 = vadd.f32 %v4228_v45, %v4140_v32  ;;  %v1308_v43 = vrot.slane %v1307_v19, 4  ;;  %v1358_v2 = vrot.slane %v1357_v22, 4  ;;  %v321_v45 = vld [vmem:[%s12889_s27 + $0x2a8] sm:$0xf]  ;;  %v12016_v19 = vld [vmem:[%s12889_s27 + $0x220] sm:$0xf] }
 0x26d   : > { %v1362_v37 = vrot.slane %v1360_v53, 5  ;;  %v1424_v25 = vshll.u32 %v321_v45, 16  ;;  %v595_v22 = vld [vmem:[%s12889_s27 + $0x2f0] sm:$0x1] }
 0x26e   : > { %v1313_v24 = vsel %vm12923_vm2, %v1308_v43, %v1312_v62 }
 0x26f   : > { %v1363_v60 = vsel %vm12923_vm2, %v1358_v2, %v1362_v37  ;;  %v2807_v62 = vunpack.c.l.b16 %v1313_v24  ;;  %v16233_v24 = vld [vmem:[#allocation5_spill] sm:$0xff] }
 0x271   : > { %v4317_v35 = vpop.f32.mrf.mxu2  ;;  %v4142_v4 = vpop.f32.mrf.mxu0 }
 0x272   : > { %v4406_v46 = vpop.f32.mrf.mxu3  ;;  %v4318_v12 = vadd.f32 %v4317_v35, %v4229_v34  ;;  %v4231_v44 = vpop.f32.mrf.mxu1  ;;  %v4143_v7 = vadd.f32 %v4142_v4, %v13450_v48  ;;  %v326_v48 = vld [vmem:[%s12889_s27 + $0x2cc] sm:$0xf]  ;;  %v1421_v34 = vshrl.u32 %v321_v45, 16  ;;  %v2816_v35 = vunpack.c.l.b16 %v1363_v60 }
 0x273   : > { %v1430_v10 = vshll.u32 %v326_v48, 16  ;;  %v1474_v5 = vshrl.u32 %v326_v48, 16 }
 0x274   : > { %v13835_v41 = vadd.f32 %v4406_v46, %v4318_v12  ;;  %v4232_v20 = vadd.f32 %v4231_v44, %v4143_v7  ;;  %4457 = vmatmul.bf16.gmra.mxu0 %v3041_v28  ;;  %v10740_v46 = vld [vmem:[%s12889_s27 + $0x21c] sm:$0xf]  ;;  %v12020_v28 = vld [vmem:[%s12889_s27 + $0x23c] sm:$0xf0]  ;;  %v10742_v12 = vld [vmem:[%s12889_s27 + $0x240] sm:$0xf0] }
 0x275   : > { %5714 = vmatmul.bf16.gmra.mxu1 %v10705_v0  ;;  %v1423_v0 = vrot.slane %v1421_v34, 4  ;;  %v1432_v4 = vrot.slane %v1430_v10, 5  ;;  %v1476_v44 = vrot.slane %v1474_v5, 4  ;;  %v10741_v43 = vor.u32 %v12020_v28, %v10740_v46  ;;  %v331_v10 = vld [vmem:[%s12889_s27 + $0x314] sm:$0xf] }
 0x276   : > { %5803 = vmatmul.bf16.gmra.mxu2 %v10709_v49  ;;  %v1426_v49 = vrot.slane %v1424_v25, 5  ;;  %v10745_v2 = vor.u32 %v12016_v19, %v10742_v12  ;;  %v336_v5 = vld [vmem:[%s12889_s27 + $0x338] sm:$0xf] }
 0x277   : > { %5892 = vmatmul.bf16.gmra.mxu3 %v10713_v13  ;;  %v12021_v13 = vld [vmem:[%s12889_s27 + $0x244] sm:$0xf0]  ;;  %v1550_v19 = vshll.u32 %v336_v5, 16  ;;  %v1594_v12 = vshrl.u32 %v336_v5, 16 }
 0x278   : > { %v1427_v37 = vor.u32 %v1426_v49, %v1423_v0 }
 0x279   : > { %v4320_v57 = vpop.f32.mrf.mxu2  ;;  %v4144_v36 = vpop.f32.mrf.mxu0 }
 0x27a   : > { %v4409_v32 = vpop.f32.mrf.mxu3  ;;  %v4321_v31 = vadd.f32 %v4320_v57, %v4232_v20  ;;  %v4233_v39 = vpop.f32.mrf.mxu1  ;;  %v4145_v9 = vadd.f32 %v4144_v36, %v13459_v33  ;;  %v10748_v33 = vld [vmem:[%s12889_s27 + $0x224] sm:$0xf]  ;;  %v3050_v20 = vpack.c.b16 %v2816_v35, %v2807_v62  ;;  %v1477_v57 = vor.u32 %v1476_v44, %v1432_v4  ;;  %v16234_v44 = vld [vmem:[#allocation6_spill] sm:$0xff] }
 0x27b   : > { %v10749_v48 = vor.u32 %v12021_v13, %v10748_v33  ;;  %v1428_v36 = vrot.slane %v1427_v37, 4  ;;  %v1544_v35 = vshll.u32 %v331_v10, 16  ;;  %v12025_v37 = vld [vmem:[%s12889_s27 + $0x28c] sm:$0xf] }
 0x27c   : > { %v13850_v21 = vadd.f32 %v4409_v32, %v4321_v31  ;;  %v4234_v59 = vadd.f32 %v4233_v39, %v4145_v9  ;;  %v1480_v32 = vshll.u32 %v595_v22, 16  ;;  %v1478_v39 = vrot.slane %v1477_v57, 4  ;;  %v12030_v57 = vld [vmem:[%s12889_s27 + $0x2b0] sm:$0xf0] }
 0x27d   : > { %v1433_v29 = vsel %vm12923_vm2, %v1428_v36, %v1432_v4 }
 0x27e   : > { %v1482_v60 = vrot.slane %v1480_v32, 5  ;;  %v2825_v4 = vunpack.c.l.b16 %v1433_v29  ;;  %v600_v32 = vld [vmem:[%s12889_s27 + $0x35c] sm:$0x1] }
 0x280   : > { %v1483_v49 = vsel %vm12923_vm2, %v1478_v39, %v1482_v60 }
 0x281   : > { %v4322_v53 = vpop.f32.mrf.mxu2  ;;  %v4147_v18 = vpop.f32.mrf.mxu0 }
 0x282   : > { %v4411_v7 = vpop.f32.mrf.mxu3  ;;  %v4323_v45 = vadd.f32 %v4322_v53, %v4234_v59  ;;  %v4236_v52 = vpop.f32.mrf.mxu1  ;;  %v4148_v34 = vadd.f32 %v4147_v18, %v16233_v24  ;;  %v1541_v59 = vshrl.u32 %v331_v10, 16  ;;  %v2834_v53 = vunpack.c.l.b16 %v1483_v49 }
 0x283   : > { %v1552_v18 = vrot.slane %v1550_v19, 5 }
 0x284   : > { %v13863_v25 = vadd.f32 %v4411_v7, %v4323_v45  ;;  %v4237_v31 = vadd.f32 %v4236_v52, %v4148_v34  ;;  %4462 = vmatmul.bf16.gmra.mxu0 %v3050_v20  ;;  %v10776_v7 = vld [vmem:[%s12889_s27 + $0x288] sm:$0xf]  ;;  %v12029_v20 = vld [vmem:[%s12889_s27 + $0x2a8] sm:$0xf0]  ;;  %v10778_v45 = vld [vmem:[%s12889_s27 + $0x2ac] sm:$0xf0] }
 0x285   : > { %5719 = vmatmul.bf16.gmra.mxu1 %v10741_v43  ;;  %v1543_v43 = vrot.slane %v1541_v59, 4  ;;  %v1596_v52 = vrot.slane %v1594_v12, 4  ;;  %v10777_v36 = vor.u32 %v12029_v20, %v10776_v7  ;;  %v10781_v39 = vor.u32 %v12025_v37, %v10778_v45 }
 0x286   : > { %5808 = vmatmul.bf16.gmra.mxu2 %v10745_v2  ;;  %v1546_v2 = vrot.slane %v1544_v35, 5  ;;  %v1600_v59 = vshll.u32 %v600_v32, 16  ;;  %v16235_v35 = vld [vmem:[#allocation7_spill] sm:$0xff] }
 0x287   : > { %5897 = vmatmul.bf16.gmra.mxu3 %v10749_v48  ;;  %v10784_v48 = vld [vmem:[%s12889_s27 + $0x290] sm:$0xf]  ;;  %v1597_v29 = vor.u32 %v1596_v52, %v1552_v18 }
 0x288   : > { %v1547_v60 = vor.u32 %v1546_v2, %v1543_v43  ;;  %v1602_v12 = vrot.slane %v1600_v59, 5 }
 0x289   : > { %v4325_v9 = vpop.f32.mrf.mxu2  ;;  %v4149_v28 = vpop.f32.mrf.mxu0  ;;  %v1598_v19 = vrot.slane %v1597_v29, 4  ;;  %v10814_v29 = vld [vmem:[%s12889_s27 + $0x318] sm:$0xf0] }
 0x28a   : > { %v4414_v62 = vpop.f32.mrf.mxu3  ;;  %v4326_v46 = vadd.f32 %v4325_v9, %v4237_v31  ;;  %v4238_v0 = vpop.f32.mrf.mxu1  ;;  %v4150_v33 = vadd.f32 %v4149_v28, %v16234_v44  ;;  %v3059_v31 = vpack.c.b16 %v2834_v53, %v2825_v4  ;;  %v1548_v49 = vrot.slane %v1547_v60, 4  ;;  %v341_v44 = vld [vmem:[%s12889_s27 + $0x380] sm:$0xf]  ;;  %v12142_v4 = vld [vmem:[%s16219_s1 + $0xd8] sm:$0xff]  ;;  %v10812_v60 = vld [vmem:[%s12889_s27 + $0x2f4] sm:$0xf] }
 0x28b   : > { %5957 = vmatpush.bf16.msrb.mxu0 %v12142_v4  ;;  %v1661_v43 = vshrl.u32 %v341_v44, 16  ;;  %v1664_v2 = vshll.u32 %v341_v44, 16 }
 0x28c   : > { %v13872_v13 = vadd.f32 %v4414_v62, %v4326_v46  ;;  %v4239_v22 = vadd.f32 %v4238_v0, %v4150_v33  ;;  %v10785_v62 = vor.u32 %v12030_v57, %v10784_v48  ;;  %v12158_v33 = vld [vmem:[%s16219_s1 + $0x158] sm:$0xff]  ;;  %v1553_v20 = vsel %vm12923_vm2, %v1548_v49, %v1552_v18 }
 0x28d   : > { %6135 = vmatpush.bf16.msrb.mxu2 %v12158_v33  ;;  %v1603_v48 = vsel %vm12923_vm2, %v1598_v19, %v1602_v12  ;;  %v2843_v18 = vunpack.c.l.b16 %v1553_v20 }
 0x291   : > { %v4327_v24 = vpop.f32.mrf.mxu2  ;;  %v4152_v5 = vpop.f32.mrf.mxu0 }
 0x292   : > { %v4416_v34 = vpop.f32.mrf.mxu3  ;;  %v4328_v10 = vadd.f32 %v4327_v24, %v4239_v22  ;;  %v4241_v9 = vpop.f32.mrf.mxu1  ;;  %v4153_v46 = vadd.f32 %v4152_v5, %v16235_v35  ;;  %v346_v22 = vld [vmem:[%s12889_s27 + $0x3a4] sm:$0xf]  ;;  %v1663_v5 = vrot.slane %v1661_v43, 4 }
 0x293   : > { %v1670_v57 = vshll.u32 %v346_v22, 16  ;;  %v1714_v32 = vshrl.u32 %v346_v22, 16 }
 0x294   : > { %v13882_v28 = vadd.f32 %v4416_v34, %v4328_v10  ;;  %v4242_v0 = vadd.f32 %v4241_v9, %v4153_v46  ;;  %4467 = vmatmul.bf16.gmra.mxu0 %v3059_v31  ;;  %v12150_v31 = vld [vmem:[%s16219_s1 + $0x118] sm:$0xff]  ;;  %v1666_v9 = vrot.slane %v1664_v2, 5  ;;  %v12039_v46 = vld [vmem:[%s12889_s27 + $0x31c] sm:$0xf0] }
 0x295   : > { %5724 = vmatmul.bf16.gmra.mxu1 %v10777_v36  ;;  %v12038_v10 = vld [vmem:[%s12889_s27 + $0x314] sm:$0xf0]  ;;  %v1672_v59 = vrot.slane %v1670_v57, 5  ;;  %v1716_v35 = vrot.slane %v1714_v32, 4 }
 0x296   : > { %5813 = vmatmul.bf16.gmra.mxu2 %v10781_v39  ;;  %v2852_v39 = vunpack.c.l.b16 %v1603_v48  ;;  %6046 = vmatpush.bf16.msrb.mxu1 %v12150_v31  ;;  %v10813_v44 = vor.u32 %v12038_v10, %v10812_v60  ;;  %v1667_v4 = vor.u32 %v1666_v9, %v1663_v5  ;;  %v356_v31 = vld [vmem:[%s12889_s27 + $0x410] sm:$0xf] }
 0x297   : > { %5902 = vmatmul.bf16.gmra.mxu3 %v10785_v62  ;;  %v12034_v62 = vld [vmem:[%s12889_s27 + $0x2f8] sm:$0xf]  ;;  %v1717_v43 = vor.u32 %v1716_v35, %v1672_v59  ;;  %v1790_v35 = vshll.u32 %v356_v31, 16 }
 0x298   : > { %v3068_v12 = vpack.c.b16 %v2852_v39, %v2843_v18  ;;  %v10817_v33 = vor.u32 %v12034_v62, %v10814_v29  ;;  %v1668_v57 = vrot.slane %v1667_v4, 4  ;;  %v351_v18 = vld [vmem:[%s12889_s27 + $0x3ec] sm:$0xf] }
 0x299   : > { %v4330_v53 = vpop.f32.mrf.mxu2  ;;  %v4154_v45 = vpop.f32.mrf.mxu0  ;;  %v1718_v32 = vrot.slane %v1717_v43, 4  ;;  %v1781_v60 = vshrl.u32 %v351_v18, 16  ;;  %v1784_v10 = vshll.u32 %v351_v18, 16 }
 0x29a   : > { %v4419_v7 = vpop.f32.mrf.mxu3  ;;  %v4331_v37 = vadd.f32 %v4330_v53, %v4242_v0  ;;  %v4243_v52 = vpop.f32.mrf.mxu1  ;;  %v4155_v24 = vadd.f32 %v4154_v45, %v13504_v50  ;;  %v10820_v50 = vld [vmem:[%s12889_s27 + $0x2fc] sm:$0xf]  ;;  %v605_v0 = vld [vmem:[%s12889_s27 + $0x3c8] sm:$0x1]  ;;  %v1673_v39 = vsel %vm12923_vm2, %v1668_v57, %v1672_v59 }
 0x29b   : > { %v10821_v20 = vor.u32 %v12039_v46, %v10820_v50  ;;  %v1720_v2 = vshll.u32 %v605_v0, 16  ;;  %v1834_v50 = vshrl.u32 %v356_v31, 16  ;;  %v16236_v46 = vld [vmem:[#allocation8_spill] sm:$0xff]  ;;  %v2861_v59 = vunpack.c.l.b16 %v1673_v39 }
 0x29c   : > { %v13897_v34 = vadd.f32 %v4419_v7, %v4331_v37  ;;  %v4244_v36 = vadd.f32 %v4243_v52, %v4155_v24  ;;  %v12170_v52 = vld [vmem:[%s16219_s1 + $0x1b8] sm:$0xff]  ;;  %v1783_v4 = vrot.slane %v1781_v60, 4 }
 0x29d   : > { %v1722_v24 = vrot.slane %v1720_v2, 5  ;;  %6220 = vmatpush.bf16.msrb.mxu3 %v12170_v52  ;;  %v1836_v43 = vrot.slane %v1834_v50, 4  ;;  %v10856_v2 = vld [vmem:[%s12889_s27 + $0x368] sm:$0xf]  ;;  %v610_v52 = vld [vmem:[%s12889_s27 + $0x434] sm:$0x1] }
 0x29f   : > { %v1723_v29 = vsel %vm12923_vm2, %v1718_v32, %v1722_v24 }
 0x2a1   : > { %v4332_v49 = vpop.f32.mrf.mxu2  ;;  %v4157_v53 = vpop.f32.mrf.mxu0 }
 0x2a2   : > { %v4421_v19 = vpop.f32.mrf.mxu3  ;;  %v4333_v22 = vadd.f32 %v4332_v49, %v4244_v36  ;;  %v4246_v7 = vpop.f32.mrf.mxu1  ;;  %v4158_v37 = vadd.f32 %v4157_v53, %v13519_v14  ;;  %v12043_v53 = vld [vmem:[%s12889_s27 + $0x364] sm:$0xf] }
 0x2a4   : > { %v13910_v45 = vadd.f32 %v4421_v19, %v4333_v22  ;;  %v4247_v48 = vadd.f32 %v4246_v7, %v4158_v37  ;;  %4472 = vmatmul.bf16.gmra.mxu0 %v3068_v12  ;;  %v2870_v12 = vunpack.c.l.b16 %v1723_v29  ;;  %v1786_v22 = vrot.slane %v1784_v10, 5  ;;  %v10850_v7 = vld [vmem:[%s12889_s27 + $0x384] sm:$0xf0]  ;;  %v12048_v37 = vld [vmem:[%s12889_s27 + $0x388] sm:$0xf0] }
 0x2a5   : > { %5729 = vmatmul.bf16.gmra.mxu1 %v10813_v44  ;;  %v10848_v44 = vld [vmem:[%s12889_s27 + $0x360] sm:$0xf]  ;;  %v10853_v18 = vor.u32 %v12043_v53, %v10850_v7  ;;  %v1840_v10 = vshll.u32 %v610_v52, 16 }
 0x2a6   : > { %5818 = vmatmul.bf16.gmra.mxu2 %v10817_v33  ;;  %v12047_v33 = vld [vmem:[%s12889_s27 + $0x380] sm:$0xf0]  ;;  %v3077_v32 = vpack.c.b16 %v2870_v12, %v2861_v59  ;;  %v1787_v31 = vor.u32 %v1786_v22, %v1783_v4  ;;  %v361_v59 = vld [vmem:[%s12889_s27 + $0x458] sm:$0xf]  ;;  %v12141_v12 = vld [vmem:[%s16219_s1 + $0xd0] sm:$0xff] }
 0x2a7   : > { %5907 = vmatmul.bf16.gmra.mxu3 %v10821_v20  ;;  %v1792_v20 = vrot.slane %v1790_v35, 5  ;;  %v10849_v24 = vor.u32 %v12047_v33, %v10848_v44  ;;  %v366_v44 = vld [vmem:[%s12889_s27 + $0x47c] sm:$0xf]  ;;  %5958 = vmatpush.bf16.msrb.mxu0 %v12141_v12  ;;  %v1901_v53 = vshrl.u32 %v361_v59, 16  ;;  %v1904_v7 = vshll.u32 %v361_v59, 16 }
 0x2a8   : > { %v1788_v50 = vrot.slane %v1787_v31, 4 }
 0x2a9   : > { %v4335_v36 = vpop.f32.mrf.mxu2  ;;  %v4159_v9 = vpop.f32.mrf.mxu0  ;;  %v1837_v60 = vor.u32 %v1836_v43, %v1792_v20 }
 0x2aa   : > { %v4424_v14 = vpop.f32.mrf.mxu3  ;;  %v4336_v5 = vadd.f32 %v4335_v36, %v4247_v48  ;;  %v4248_v62 = vpop.f32.mrf.mxu1  ;;  %v4160_v0 = vadd.f32 %v4159_v9, %v16236_v46  ;;  %v16237_v9 = vld [vmem:[#allocation9_spill] sm:$0xff]  ;;  %v1793_v22 = vsel %vm12923_vm2, %v1788_v50, %v1792_v20  ;;  %v12057_v50 = vld [vmem:[%s12889_s27 + $0x3f4] sm:$0xf0] }
 0x2ab   : > { %v1838_v46 = vrot.slane %v1837_v60, 4  ;;  %v2879_v20 = vunpack.c.l.b16 %v1793_v22  ;;  %v1906_v60 = vrot.slane %v1904_v7, 5 }
 0x2ac   : > { %v13922_v49 = vadd.f32 %v4424_v14, %v4336_v5  ;;  %v4249_v19 = vadd.f32 %v4248_v62, %v4160_v0  ;;  %v10857_v5 = vor.u32 %v12048_v37, %v10856_v2  ;;  %v1842_v0 = vrot.slane %v1840_v10, 5  ;;  %v12052_v10 = vld [vmem:[%s12889_s27 + $0x3d0] sm:$0xf] }
 0x2ae   : > { %v1843_v52 = vsel %vm12923_vm2, %v1838_v46, %v1842_v0  ;;  %v615_v46 = vld [vmem:[%s12889_s27 + $0x4a0] sm:$0x1] }
 0x2b1   : > { %v4337_v48 = vpop.f32.mrf.mxu2  ;;  %v4438_v14 = vpop.f32.mrf.mxu0 }
 0x2b2   : > { %v4426_v57 = vpop.f32.mrf.mxu3  ;;  %v4338_v36 = vadd.f32 %v4337_v48, %v4249_v19  ;;  %v5695_v39 = vpop.f32.mrf.mxu1  ;;  %v4439_v62 = vadd.f32 %v4438_v14, %v16237_v9  ;;  %v12157_v19 = vld [vmem:[%s16219_s1 + $0x150] sm:$0xff]  ;;  %v1910_v48 = vshll.u32 %v366_v44, 16  ;;  %v10884_v14 = vld [vmem:[%s12889_s27 + $0x3cc] sm:$0xf] }
 0x2b3   : > { %6136 = vmatpush.bf16.msrb.mxu2 %v12157_v19  ;;  %v10886_v9 = vld [vmem:[%s12889_s27 + $0x3f0] sm:$0xf0] }
 0x2b4   : > { %v13932_v29 = vadd.f32 %v4426_v57, %v4338_v36  ;;  %v5696_v35 = vadd.f32 %v5695_v39, %v4439_v62  ;;  %4477 = vmatmul.bf16.gmra.mxu0 %v3077_v32  ;;  %v1954_v57 = vshrl.u32 %v366_v44, 16  ;;  %v2888_v36 = vunpack.c.l.b16 %v1843_v52  ;;  %v12056_v39 = vld [vmem:[%s12889_s27 + $0x3ec] sm:$0xf0] }
 0x2b5   : > { %5734 = vmatmul.bf16.gmra.mxu1 %v10849_v24  ;;  %v1912_v62 = vrot.slane %v1910_v48, 5  ;;  %v10885_v12 = vor.u32 %v12056_v39, %v10884_v14  ;;  %v10889_v44 = vor.u32 %v12052_v10, %v10886_v9  ;;  %v12169_v48 = vld [vmem:[%s16219_s1 + $0x1b0] sm:$0xff] }
 0x2b6   : > { %5823 = vmatmul.bf16.gmra.mxu2 %v10853_v18  ;;  %v12149_v18 = vld [vmem:[%s16219_s1 + $0x110] sm:$0xff]  ;;  %v3086_v19 = vpack.c.b16 %v2888_v36, %v2879_v20  ;;  %6221 = vmatpush.bf16.msrb.mxu3 %v12169_v48  ;;  %v376_v36 = vld [vmem:[%s12889_s27 + $0x4e8] sm:$0xf]  ;;  %v12066_v48 = vld [vmem:[%s12889_s27 + $0x460] sm:$0xf0] }
 0x2b7   : > { %5912 = vmatmul.bf16.gmra.mxu3 %v10857_v5  ;;  %v1903_v5 = vrot.slane %v1901_v53, 4  ;;  %6047 = vmatpush.bf16.msrb.mxu1 %v12149_v18 }
 0x2b9   : > { %v5784_v33 = vpop.f32.mrf.mxu2  ;;  %v4440_v2 = vpop.f32.mrf.mxu0 }
 0x2ba   : > { %v5873_v4 = vpop.f32.mrf.mxu3  ;;  %v5785_v43 = vadd.f32 %v5784_v33, %v5696_v35  ;;  %v5697_v37 = vpop.f32.mrf.mxu1  ;;  %v4441_v32 = vadd.f32 %v4440_v2, %v13555_v30  ;;  %v1956_v35 = vrot.slane %v1954_v57, 4  ;;  %v10892_v30 = vld [vmem:[%s12889_s27 + $0x3d4] sm:$0xf]  ;;  %v1907_v33 = vor.u32 %v1906_v60, %v1903_v5 }
 0x2bb   : > { %v10893_v53 = vor.u32 %v12057_v50, %v10892_v30  ;;  %v1960_v2 = vshll.u32 %v615_v46, 16  ;;  %v2030_v50 = vshll.u32 %v376_v36, 16  ;;  %v2074_v46 = vshrl.u32 %v376_v36, 16 }
 0x2bc   : > { %v13947_v24 = vadd.f32 %v5873_v4, %v5785_v43  ;;  %v5698_v31 = vadd.f32 %v5697_v37, %v4441_v32  ;;  %v1957_v7 = vor.u32 %v1956_v35, %v1912_v62  ;;  %v1908_v32 = vrot.slane %v1907_v33, 4  ;;  %v12065_v33 = vld [vmem:[%s12889_s27 + $0x458] sm:$0xf0] }
 0x2bd   : > { %v1962_v18 = vrot.slane %v1960_v2, 5  ;;  %v2076_v2 = vrot.slane %v2074_v46, 4 }
 0x2be   : > { %v1958_v20 = vrot.slane %v1957_v7, 4  ;;  %v1913_v39 = vsel %vm12923_vm2, %v1908_v32, %v1912_v62  ;;  %v2032_v7 = vrot.slane %v2030_v50, 5 }
 0x2bf   : > { %v2897_v62 = vunpack.c.l.b16 %v1913_v39 }
 0x2c0   : > { %v1963_v30 = vsel %vm12923_vm2, %v1958_v20, %v1962_v18 }
 0x2c1   : > { %v5786_v0 = vpop.f32.mrf.mxu2  ;;  %v4443_v22 = vpop.f32.mrf.mxu0 }
 0x2c2   : > { %v5875_v59 = vpop.f32.mrf.mxu3  ;;  %v5787_v4 = vadd.f32 %v5786_v0, %v5698_v31  ;;  %v5700_v43 = vpop.f32.mrf.mxu1  ;;  %v4444_v37 = vadd.f32 %v4443_v22, %v13572_v11  ;;  %v371_v31 = vld [vmem:[%s12889_s27 + $0x4c4] sm:$0xf] }
 0x2c3   : > { %v2021_v5 = vshrl.u32 %v371_v31, 16  ;;  %v2024_v60 = vshll.u32 %v371_v31, 16 }
 0x2c4   : > { %v13960_v52 = vadd.f32 %v5875_v59, %v5787_v4  ;;  %v5701_v57 = vadd.f32 %v5700_v43, %v4444_v37  ;;  %4482 = vmatmul.bf16.gmra.mxu0 %v3086_v19  ;;  %v12061_v43 = vld [vmem:[%s12889_s27 + $0x43c] sm:$0xf]  ;;  %v10928_v37 = vld [vmem:[%s12889_s27 + $0x440] sm:$0xf] }
 0x2c5   : > { %5739 = vmatmul.bf16.gmra.mxu1 %v10885_v12  ;;  %v2906_v12 = vunpack.c.l.b16 %v1963_v30  ;;  %v2023_v4 = vrot.slane %v2021_v5, 4  ;;  %v2026_v22 = vrot.slane %v2024_v60, 5  ;;  %v2077_v5 = vor.u32 %v2076_v2, %v2032_v7 }
 0x2c6   : > { %5828 = vmatmul.bf16.gmra.mxu2 %v10889_v44  ;;  %v10920_v44 = vld [vmem:[%s12889_s27 + $0x438] sm:$0xf] }
 0x2c7   : > { %5917 = vmatmul.bf16.gmra.mxu3 %v10893_v53  ;;  %v10922_v53 = vld [vmem:[%s12889_s27 + $0x45c] sm:$0xf0]  ;;  %v3095_v18 = vpack.c.b16 %v2906_v12, %v2897_v62  ;;  %v2027_v36 = vor.u32 %v2026_v22, %v2023_v4  ;;  %v2078_v46 = vrot.slane %v2077_v5, 4  ;;  %v381_v62 = vld [vmem:[%s12889_s27 + $0x530] sm:$0xf]  ;;  %v12140_v12 = vld [vmem:[%s16219_s1 + $0xc8] sm:$0xff] }
 0x2c8   : > { %v10925_v31 = vor.u32 %v12061_v43, %v10922_v53  ;;  %5959 = vmatpush.bf16.msrb.mxu0 %v12140_v12  ;;  %v2141_v22 = vshrl.u32 %v381_v62, 16  ;;  %v2144_v43 = vshll.u32 %v381_v62, 16  ;;  %v12070_v5 = vld [vmem:[%s12889_s27 + $0x4a8] sm:$0xf] }
 0x2c9   : > { %v5789_v14 = vpop.f32.mrf.mxu2  ;;  %v4445_v9 = vpop.f32.mrf.mxu0  ;;  %v2028_v50 = vrot.slane %v2027_v36, 4 }
 0x2ca   : > { %v5878_v11 = vpop.f32.mrf.mxu3  ;;  %v5790_v10 = vadd.f32 %v5789_v14, %v5701_v57  ;;  %v5702_v35 = vpop.f32.mrf.mxu1  ;;  %v4446_v0 = vadd.f32 %v4445_v9, %v13578_v38  ;;  %v620_v57 = vld [vmem:[%s12889_s27 + $0x50c] sm:$0x1]  ;;  %v10921_v38 = vor.u32 %v12065_v33, %v10920_v44 }
 0x2cb   : > { %v2080_v60 = vshll.u32 %v620_v57, 16  ;;  %v2033_v4 = vsel %vm12923_vm2, %v2028_v50, %v2032_v7  ;;  %v12075_v50 = vld [vmem:[%s12889_s27 + $0x4cc] sm:$0xf0] }
 0x2cc   : > { %v13972_v59 = vadd.f32 %v5878_v11, %v5790_v10  ;;  %v5703_v19 = vadd.f32 %v5702_v35, %v4446_v0  ;;  %v10929_v10 = vor.u32 %v12066_v48, %v10928_v37  ;;  %v2915_v7 = vunpack.c.l.b16 %v2033_v4 }
 0x2cd   : > { %v2082_v0 = vrot.slane %v2080_v60, 5  ;;  %v10958_v60 = vld [vmem:[%s12889_s27 + $0x4c8] sm:$0xf0] }
 0x2cf   : > { %v2083_v48 = vsel %vm12923_vm2, %v2078_v46, %v2082_v0  ;;  %v625_v46 = vld [vmem:[%s12889_s27 + $0x578] sm:$0x1] }
 0x2d0   : > { %v2924_v36 = vunpack.c.l.b16 %v2083_v48 }
 0x2d1   : > { %v5791_v32 = vpop.f32.mrf.mxu2  ;;  %v4448_v11 = vpop.f32.mrf.mxu0 }
 0x2d2   : > { %v5880_v20 = vpop.f32.mrf.mxu3  ;;  %v5792_v14 = vadd.f32 %v5791_v32, %v5703_v19  ;;  %v5705_v39 = vpop.f32.mrf.mxu1  ;;  %v4449_v9 = vadd.f32 %v4448_v11, %v13602_v6  ;;  %v12156_v19 = vld [vmem:[%s16219_s1 + $0x148] sm:$0xff]  ;;  %v386_v6 = vld [vmem:[%s12889_s27 + $0x554] sm:$0xf] }
 0x2d3   : > { %6137 = vmatpush.bf16.msrb.mxu2 %v12156_v19  ;;  %v2150_v57 = vshll.u32 %v386_v6, 16  ;;  %v2194_v32 = vshrl.u32 %v386_v6, 16  ;;  %v12074_v11 = vld [vmem:[%s12889_s27 + $0x4c4] sm:$0xf0]  ;;  %v3104_v19 = vpack.c.b16 %v2924_v36, %v2915_v7  ;;  %v10961_v6 = vor.u32 %v12070_v5, %v10958_v60  ;;  %v391_v7 = vld [vmem:[%s12889_s27 + $0x59c] sm:$0xf] }
 0x2d4   : > { %v13982_v35 = vadd.f32 %v5880_v20, %v5792_v14  ;;  %v5706_v30 = vadd.f32 %v5705_v39, %v4449_v9  ;;  %4487 = vmatmul.bf16.gmra.mxu0 %v3095_v18  ;;  %v10956_v14 = vld [vmem:[%s12889_s27 + $0x4a4] sm:$0xf]  ;;  %v2143_v39 = vrot.slane %v2141_v22, 4  ;;  %v396_v36 = vld [vmem:[%s12889_s27 + $0x5c0] sm:$0xf] }
 0x2d5   : > { %5744 = vmatmul.bf16.gmra.mxu1 %v10921_v38  ;;  %v12148_v38 = vld [vmem:[%s16219_s1 + $0x108] sm:$0xff]  ;;  %v2152_v9 = vrot.slane %v2150_v57, 5  ;;  %v10957_v12 = vor.u32 %v12074_v11, %v10956_v14  ;;  %v2261_v14 = vshrl.u32 %v391_v7, 16  ;;  %v2264_v11 = vshll.u32 %v391_v7, 16 }
 0x2d6   : > { %5833 = vmatmul.bf16.gmra.mxu2 %v10925_v31  ;;  %6048 = vmatpush.bf16.msrb.mxu1 %v12148_v38  ;;  %v12168_v57 = vld [vmem:[%s16219_s1 + $0x1a8] sm:$0xff]  ;;  %v2270_v5 = vshll.u32 %v396_v36, 16  ;;  %v2314_v60 = vshrl.u32 %v396_v36, 16 }
 0x2d7   : > { %5922 = vmatmul.bf16.gmra.mxu3 %v10929_v10  ;;  %v2146_v10 = vrot.slane %v2144_v43, 5 }
 0x2d8   : > { %6222 = vmatpush.bf16.msrb.mxu3 %v12168_v57  ;;  %v11000_v57 = vld [vmem:[%s12889_s27 + $0x518] sm:$0xf] }
 0x2d9   : > { %v5794_v44 = vpop.f32.mrf.mxu2  ;;  %v4450_v2 = vpop.f32.mrf.mxu0 }
 0x2da   : > { %v5883_v33 = vpop.f32.mrf.mxu3  ;;  %v5795_v53 = vadd.f32 %v5794_v44, %v5706_v30  ;;  %v5707_v37 = vpop.f32.mrf.mxu1  ;;  %v4451_v20 = vadd.f32 %v4450_v2, %v13610_v17  ;;  %v2196_v30 = vrot.slane %v2194_v32, 4  ;;  %v10964_v17 = vld [vmem:[%s12889_s27 + $0x4ac] sm:$0xf]  ;;  %v2147_v44 = vor.u32 %v2146_v10, %v2143_v39 }
 0x2db   : > { %v10965_v22 = vor.u32 %v12075_v50, %v10964_v17  ;;  %v2200_v2 = vshll.u32 %v625_v46, 16 }
 0x2dc   : > { %v13997_v18 = vadd.f32 %v5883_v33, %v5795_v53  ;;  %v5708_v31 = vadd.f32 %v5707_v37, %v4451_v20  ;;  %v2197_v43 = vor.u32 %v2196_v30, %v2152_v9  ;;  %v2148_v20 = vrot.slane %v2147_v44, 4 }
 0x2de   : > { %v2198_v38 = vrot.slane %v2197_v43, 4  ;;  %v2153_v10 = vsel %vm12923_vm2, %v2148_v20, %v2152_v9  ;;  %v2263_v9 = vrot.slane %v2261_v14, 4  ;;  %v12079_v43 = vld [vmem:[%s12889_s27 + $0x514] sm:$0xf] }
 0x2e1   : > { %v5796_v0 = vpop.f32.mrf.mxu2  ;;  %v4453_v4 = vpop.f32.mrf.mxu0 }
 0x2e2   : > { %v5885_v62 = vpop.f32.mrf.mxu3  ;;  %v5797_v33 = vadd.f32 %v5796_v0, %v5708_v31  ;;  %v5710_v53 = vpop.f32.mrf.mxu1  ;;  %v4454_v37 = vadd.f32 %v4453_v4, %v13627_v58  ;;  %v2202_v31 = vrot.slane %v2200_v2, 5  ;;  %v2272_v4 = vrot.slane %v2270_v5, 5  ;;  %v630_v2 = vld [vmem:[%s12889_s27 + $0x5e4] sm:$0x1] }
 0x2e3   : > { %v2320_v14 = vshll.u32 %v630_v2, 16 }
 0x2e4   : > { %v14010_v48 = vadd.f32 %v5885_v62, %v5797_v33  ;;  %v5711_v32 = vadd.f32 %v5710_v53, %v4454_v37  ;;  %4492 = vmatmul.bf16.gmra.mxu0 %v3104_v19  ;;  %v2203_v46 = vsel %vm12923_vm2, %v2198_v38, %v2202_v31  ;;  %v2933_v19 = vunpack.c.l.b16 %v2153_v10  ;;  %v10992_v33 = vld [vmem:[%s12889_s27 + $0x510] sm:$0xf]  ;;  %v10994_v37 = vld [vmem:[%s12889_s27 + $0x534] sm:$0xf0] }
 0x2e5   : > { %5749 = vmatmul.bf16.gmra.mxu1 %v10957_v12  ;;  %v2266_v12 = vrot.slane %v2264_v11, 5  ;;  %v2942_v44 = vunpack.c.l.b16 %v2203_v46  ;;  %v2316_v53 = vrot.slane %v2314_v60, 4  ;;  %v10997_v10 = vor.u32 %v12079_v43, %v10994_v37 }
 0x2e6   : > { %5838 = vmatmul.bf16.gmra.mxu2 %v10961_v6 }
 0x2e7   : > { %5927 = vmatmul.bf16.gmra.mxu3 %v10965_v22  ;;  %v12083_v22 = vld [vmem:[%s12889_s27 + $0x530] sm:$0xf0]  ;;  %v2267_v20 = vor.u32 %v2266_v12, %v2263_v9  ;;  %v2317_v36 = vor.u32 %v2316_v53, %v2272_v4  ;;  %v406_v9 = vld [vmem:[%s12889_s27 + $0x62c] sm:$0xf]  ;;  %v12155_v12 = vld [vmem:[%s16219_s1 + $0x140] sm:$0xff] }
 0x2e8   : > { %v10993_v31 = vor.u32 %v12083_v22, %v10992_v33  ;;  %6138 = vmatpush.bf16.msrb.mxu2 %v12155_v12  ;;  %v2390_v2 = vshll.u32 %v406_v9, 16  ;;  %v2434_v37 = vshrl.u32 %v406_v9, 16 }
 0x2e9   : > { %v5799_v58 = vpop.f32.mrf.mxu2  ;;  %v4455_v17 = vpop.f32.mrf.mxu0  ;;  %v2318_v46 = vrot.slane %v2317_v36, 4 }
 0x2ea   : > { %v5888_v39 = vpop.f32.mrf.mxu3  ;;  %v5800_v30 = vadd.f32 %v5799_v58, %v5711_v32  ;;  %v5712_v50 = vpop.f32.mrf.mxu1  ;;  %v4456_v0 = vadd.f32 %v4455_v17, %v13634_v47  ;;  %v12084_v32 = vld [vmem:[%s12889_s27 + $0x538] sm:$0xf0]  ;;  %v3113_v47 = vpack.c.b16 %v2942_v44, %v2933_v19  ;;  %v2268_v17 = vrot.slane %v2267_v20, 4  ;;  %v401_v19 = vld [vmem:[%s12889_s27 + $0x608] sm:$0xf] }
 0x2eb   : > { %v11001_v5 = vor.u32 %v12084_v32, %v11000_v57  ;;  %v2381_v44 = vshrl.u32 %v401_v19, 16  ;;  %v2384_v43 = vshll.u32 %v401_v19, 16 }
 0x2ec   : > { %v14022_v62 = vadd.f32 %v5888_v39, %v5800_v30  ;;  %v5713_v6 = vadd.f32 %v5712_v50, %v4456_v0  ;;  %v2322_v0 = vrot.slane %v2320_v14, 5  ;;  %v12147_v14 = vld [vmem:[%s16219_s1 + $0x100] sm:$0xff] }
 0x2ed   : > { %v2383_v36 = vrot.slane %v2381_v44, 4  ;;  %6049 = vmatpush.bf16.msrb.mxu1 %v12147_v14  ;;  %v416_v14 = vld [vmem:[%s12889_s27 + $0x698] sm:$0xf] }
 0x2ee   : > { %v2323_v22 = vsel %vm12923_vm2, %v2318_v46, %v2322_v0  ;;  %v12093_v46 = vld [vmem:[%s12889_s27 + $0x5a4] sm:$0xf0] }
 0x2f1   : > { %v5801_v7 = vpop.f32.mrf.mxu2  ;;  %v4458_v58 = vpop.f32.mrf.mxu0 }
 0x2f2   : > { %v5890_v38 = vpop.f32.mrf.mxu3  ;;  %v5802_v11 = vadd.f32 %v5801_v7, %v5713_v6  ;;  %v5715_v39 = vpop.f32.mrf.mxu1  ;;  %v4459_v60 = vadd.f32 %v4458_v58, %v13654_v56  ;;  %v12139_v56 = vld [vmem:[%s16219_s1 + $0xc0] sm:$0xff]  ;;  %v2273_v6 = vsel %vm12923_vm2, %v2268_v17, %v2272_v4  ;;  %v635_v17 = vld [vmem:[%s12889_s27 + $0x650] sm:$0x1] }
 0x2f3   : > { %5960 = vmatpush.bf16.msrb.mxu0 %v12139_v56  ;;  %v12092_v58 = vld [vmem:[%s12889_s27 + $0x59c] sm:$0xf0]  ;;  %v2440_v44 = vshll.u32 %v635_v17, 16 }
 0x2f4   : > { %v14032_v30 = vadd.f32 %v5890_v38, %v5802_v11  ;;  %v5716_v50 = vadd.f32 %v5715_v39, %v4459_v60  ;;  %4497 = vmatmul.bf16.gmra.mxu0 %v3113_v47  ;;  %v2951_v38 = vunpack.c.l.b16 %v2273_v6  ;;  %v2960_v47 = vunpack.c.l.b16 %v2323_v22  ;;  %v12088_v60 = vld [vmem:[%s12889_s27 + $0x580] sm:$0xf] }
 0x2f5   : > { %5754 = vmatmul.bf16.gmra.mxu1 %v10993_v31  ;;  %v11028_v31 = vld [vmem:[%s12889_s27 + $0x57c] sm:$0xf]  ;;  %v2386_v39 = vrot.slane %v2384_v43, 5 }
 0x2f6   : > { %5843 = vmatmul.bf16.gmra.mxu2 %v10997_v10  ;;  %v2392_v10 = vrot.slane %v2390_v2, 5  ;;  %v11029_v0 = vor.u32 %v12092_v58, %v11028_v31  ;;  %v3122_v12 = vpack.c.b16 %v2960_v47, %v2951_v38  ;;  %v2442_v47 = vrot.slane %v2440_v44, 5  ;;  %v12166_v31 = vld [vmem:[%s16219_s1 + $0x198] sm:$0xff] }
 0x2f7   : > { %5932 = vmatmul.bf16.gmra.mxu3 %v11001_v5  ;;  %v2436_v5 = vrot.slane %v2434_v37, 4  ;;  %v2387_v56 = vor.u32 %v2386_v39, %v2383_v36  ;;  %v411_v36 = vld [vmem:[%s12889_s27 + $0x674] sm:$0xf] }
 0x2f9   : > { %v5804_v33 = vpop.f32.mrf.mxu2  ;;  %v4460_v32 = vpop.f32.mrf.mxu0  ;;  %v2437_v6 = vor.u32 %v2436_v5, %v2392_v10  ;;  %v2501_v5 = vshrl.u32 %v411_v36, 16 }
 0x2fa   : > { %v5893_v53 = vpop.f32.mrf.mxu3  ;;  %v5805_v57 = vadd.f32 %v5804_v33, %v5716_v50  ;;  %v5717_v20 = vpop.f32.mrf.mxu1  ;;  %v4461_v4 = vadd.f32 %v4460_v32, %v13664_v15  ;;  %v11030_v15 = vld [vmem:[%s12889_s27 + $0x5a0] sm:$0xf0] }
 0x2fb   : > { %v11036_v50 = vld [vmem:[%s12889_s27 + $0x584] sm:$0xf]  ;;  %v11033_v2 = vor.u32 %v12088_v60, %v11030_v15  ;;  %v2438_v38 = vrot.slane %v2437_v6, 4  ;;  %v12165_v60 = vld [vmem:[%s16219_s1 + $0x190] sm:$0xff]  ;;  %v12097_v6 = vld [vmem:[%s12889_s27 + $0x5ec] sm:$0xf] }
 0x2fc   : > { %v14047_v7 = vadd.f32 %v5893_v53, %v5805_v57  ;;  %v5718_v11 = vadd.f32 %v5717_v20, %v4461_v4  ;;  %v12167_v33 = vld [vmem:[%s16219_s1 + $0x1a0] sm:$0xff]  ;;  %v11037_v37 = vor.u32 %v12093_v46, %v11036_v50  ;;  %v2388_v4 = vrot.slane %v2387_v56, 4  ;;  %v12101_v56 = vld [vmem:[%s12889_s27 + $0x608] sm:$0xf0] }
 0x2fd   : > { %6223 = vmatpush.bf16.msrb.mxu3 %v12167_v33  ;;  %v2443_v39 = vsel %vm12923_vm2, %v2438_v38, %v2442_v47  ;;  %v2504_v46 = vshll.u32 %v411_v36, 16  ;;  %v640_v38 = vld [vmem:[%s12889_s27 + $0x6bc] sm:$0x1] }
 0x2fe   : > { %v2393_v58 = vsel %vm12923_vm2, %v2388_v4, %v2392_v10 }
 0x2ff   : > { %v2969_v33 = vunpack.c.l.b16 %v2393_v58  ;;  %v12163_v58 = vld [vmem:[%s16219_s1 + $0x180] sm:$0xff] }
 0x301   : > { %v5806_v19 = vpop.f32.mrf.mxu2  ;;  %v4463_v22 = vpop.f32.mrf.mxu0  ;;  %6224 = vmatpush.bf16.msrb.mxu3 %v12166_v31 }
 0x302   : > { %v5895_v9 = vpop.f32.mrf.mxu3  ;;  %v5807_v53 = vadd.f32 %v5806_v19, %v5718_v11  ;;  %v5720_v43 = vpop.f32.mrf.mxu1  ;;  %v4464_v57 = vadd.f32 %v4463_v22, %v13685_v61  ;;  %v2554_v19 = vshrl.u32 %v416_v14, 16  ;;  %v11066_v22 = vld [vmem:[%s12889_s27 + $0x60c] sm:$0xf0] }
 0x304   : > { %v14063_v32 = vadd.f32 %v5895_v9, %v5807_v53  ;;  %v5721_v20 = vadd.f32 %v5720_v43, %v4464_v57  ;;  %4502 = vmatmul.bf16.gmra.mxu0 %v3122_v12  ;;  %v11064_v12 = vld [vmem:[%s12889_s27 + $0x5e8] sm:$0xf]  ;;  %v2978_v53 = vunpack.c.l.b16 %v2443_v39  ;;  %v11072_v43 = vld [vmem:[%s12889_s27 + $0x5f0] sm:$0xf]  ;;  %v2503_v57 = vrot.slane %v2501_v5, 4 }
 0x305   : > { %5759 = vmatmul.bf16.gmra.mxu1 %v11029_v0  ;;  %v2510_v0 = vshll.u32 %v416_v14, 16  ;;  %6225 = vmatpush.bf16.msrb.mxu3 %v12165_v60  ;;  %v2556_v4 = vrot.slane %v2554_v19, 4  ;;  %v11065_v14 = vor.u32 %v12101_v56, %v11064_v12 }
 0x306   : > { %5848 = vmatmul.bf16.gmra.mxu2 %v11033_v2  ;;  %v12164_v2 = vld [vmem:[%s16219_s1 + $0x188] sm:$0xff]  ;;  %v3131_v36 = vpack.c.b16 %v2978_v53, %v2969_v33 }
 0x307   : > { %5937 = vmatmul.bf16.gmra.mxu3 %v11037_v37  ;;  %v12102_v37 = vld [vmem:[%s12889_s27 + $0x610] sm:$0xf0] }
 0x309   : > { %v5809_v61 = vpop.f32.mrf.mxu2  ;;  %v4465_v15 = vpop.f32.mrf.mxu0  ;;  %6226 = vmatpush.bf16.msrb.mxu3 %v12164_v2 }
 0x30a   : > { %v5898_v11 = vpop.f32.mrf.mxu3  ;;  %v5810_v17 = vadd.f32 %v5809_v61, %v5721_v20  ;;  %v5722_v50 = vpop.f32.mrf.mxu1  ;;  %v4466_v9 = vadd.f32 %v4465_v15, %v13696_v16  ;;  %v2506_v20 = vrot.slane %v2504_v46, 5  ;;  %v2512_v16 = vrot.slane %v2510_v0, 5 }
 0x30b   : > { %v11069_v61 = vor.u32 %v12097_v6, %v11066_v22  ;;  %v12266_v6 = vld [vmem:[%s16219_s1 + $0x4b8] sm:$0xff] }
 0x30c   : > { %v14078_v10 = vadd.f32 %v5898_v11, %v5810_v17  ;;  %v5723_v44 = vadd.f32 %v5722_v50, %v4466_v9  ;;  %v11073_v11 = vor.u32 %v12102_v37, %v11072_v43  ;;  %v2507_v15 = vor.u32 %v2506_v20, %v2503_v57  ;;  %8443 = vmatpush.bf16.msra.mxu2 %v12266_v6 }
 0x30d   : > { %v2557_v5 = vor.u32 %v2556_v4, %v2512_v16  ;;  %v2560_v50 = vshll.u32 %v640_v38, 16  ;;  %6227 = vmatpush.bf16.msrb.mxu3 %v12163_v58  ;;  %v12186_v4 = vld [vmem:[%s16219_s1 + $0x238] sm:$0xff]  ;;  %v12111_v58 = vld [vmem:[%s12889_s27 + $0x67c] sm:$0xf0] }
 0x30e   : > { %v2508_v9 = vrot.slane %v2507_v15, 4  ;;  %6398 = vmatpush.bf16.msra.mxu1 %v12186_v4  ;;  %v11973_v4 = vld [vmem:[%s12889_s27 + $0x14] sm:$0xf] }
 0x30f   : > { %v2558_v12 = vrot.slane %v2557_v5, 4  ;;  %v2562_v56 = vrot.slane %v2560_v50, 5 }
 0x310   : > { %v2513_v2 = vsel %vm12923_vm2, %v2508_v9, %v2512_v16  ;;  %v11108_v16 = vld [vmem:[%s12889_s27 + $0x65c] sm:$0xf] }
 0x311   : > { %v5811_v47 = vpop.f32.mrf.mxu2  ;;  %v4468_v60 = vpop.f32.mrf.mxu0  ;;  %v2563_v37 = vsel %vm12923_vm2, %v2558_v12, %v2562_v56 }
 0x312   : > { %v5900_v31 = vpop.f32.mrf.mxu3  ;;  %v5812_v39 = vadd.f32 %v5811_v47, %v5723_v44  ;;  %v5725_v17 = vpop.f32.mrf.mxu1  ;;  %v4469_v46 = vadd.f32 %v4468_v60, %v13715_v1  ;;  %v12178_v44 = vld [vmem:[%s16219_s1 + $0x1f8] sm:$0xff]  ;;  %v2987_v47 = vunpack.c.l.b16 %v2513_v2  ;;  %v10570_v2 = vld [vmem:[%s12889_s27 + $0x2c] sm:$0xf0] }
 0x313   : > { %6309 = vmatpush.bf16.msra.mxu0 %v12178_v44 }
 0x314   : > { %v14094_v0 = vadd.f32 %v5900_v31, %v5812_v39  ;;  %v5726_v19 = vadd.f32 %v5725_v17, %v4469_v46  ;;  %4507 = vmatmul.bf16.gmra.mxu0 %v3131_v36  ;;  %v2996_v31 = vunpack.c.l.b16 %v2563_v37  ;;  %v11100_v36 = vld [vmem:[%s12889_s27 + $0x654] sm:$0xf]  ;;  %v11109_v46 = vor.u32 %v12111_v58, %v11108_v16  ;;  %v10576_v37 = vld [vmem:[%s12889_s27 + $0x10] sm:$0xf] }
 0x315   : > { %5764 = vmatmul.bf16.gmra.mxu1 %v11065_v14  ;;  %v12110_v14 = vld [vmem:[%s12889_s27 + $0x674] sm:$0xf0] }
 0x316   : > { %5853 = vmatmul.bf16.gmra.mxu2 %v11069_v61  ;;  %v12106_v61 = vld [vmem:[%s12889_s27 + $0x658] sm:$0xf]  ;;  %v3140_v60 = vpack.c.b16 %v2996_v31, %v2987_v47  ;;  %v11978_v31 = vld [vmem:[%s12889_s27 + $0x38] sm:$0xf0] }
 0x317   : > { %5942 = vmatmul.bf16.gmra.mxu3 %v11073_v11  ;;  %v11102_v11 = vld [vmem:[%s12889_s27 + $0x678] sm:$0xf0]  ;;  %v10584_v47 = vld [vmem:[%s12889_s27 + $0x18] sm:$0xf] }
 0x318   : > { %v11105_v50 = vor.u32 %v12106_v61, %v11102_v11 }
 0x319   : > { %v5814_v1 = vpop.f32.mrf.mxu2  ;;  %v4470_v22 = vpop.f32.mrf.mxu0 }
 0x31a   : > { %v5903_v33 = vpop.f32.mrf.mxu3  ;;  %v5815_v53 = vadd.f32 %v5814_v1, %v5726_v19  ;;  %v5727_v43 = vpop.f32.mrf.mxu1  ;;  %v4471_v57 = vadd.f32 %v4470_v22, %v13722_v51  ;;  %v11101_v51 = vor.u32 %v12110_v14, %v11100_v36 }
 0x31c   : > { %v14107_v20 = vadd.f32 %v5903_v33, %v5815_v53  ;;  %v5728_v38 = vadd.f32 %v5727_v43, %v4471_v57  ;;  %v11972_v43 = vld [vmem:[%s12889_s27 + $0xc] sm:$0xf]  ;;  %v11977_v57 = vld [vmem:[%s12889_s27 + $0x30] sm:$0xf0] }
 0x31d   : > { %v10573_v61 = vor.u32 %v11972_v43, %v10570_v2  ;;  %v10577_v11 = vor.u32 %v11977_v57, %v10576_v37  ;;  %v11986_v43 = vld [vmem:[%s12889_s27 + $0x9c] sm:$0xf0]  ;;  %v10614_v37 = vld [vmem:[%s12889_s27 + $0xa0] sm:$0xf0] }
 0x31e   : > { %v11982_v2 = vld [vmem:[%s12889_s27 + $0x80] sm:$0xf]  ;;  %v10620_v57 = vld [vmem:[%s12889_s27 + $0x84] sm:$0xf] }
 0x321   : > { %v5816_v40 = vpop.f32.mrf.mxu2  ;;  %v4473_v15 = vpop.f32.mrf.mxu0 }
 0x322   : > { %v5905_v39 = vpop.f32.mrf.mxu3  ;;  %v5817_v17 = vadd.f32 %v5816_v40, %v5728_v38  ;;  %v5730_v5 = vpop.f32.mrf.mxu1  ;;  %v4474_v19 = vadd.f32 %v4473_v15, %v13731_v54  ;;  %v10578_v38 = vld [vmem:[%s12889_s27 + $0x34] sm:$0xf0]  ;;  %v12265_v15 = vld [vmem:[%s16219_s1 + $0x4b0] sm:$0xff] }
 0x323   : > { %8444 = vmatpush.bf16.msra.mxu2 %v12265_v15 }
 0x324   : > { %v14119_v9 = vadd.f32 %v5905_v39, %v5817_v17  ;;  %v5731_v12 = vadd.f32 %v5730_v5, %v4474_v19  ;;  %4512 = vmatmul.bf16.gmra.mxu0 %v3140_v60  ;;  %v10581_v39 = vor.u32 %v11973_v4, %v10578_v38  ;;  %v12177_v5 = vld [vmem:[%s16219_s1 + $0x1f0] sm:$0xff]  ;;  %v11987_v4 = vld [vmem:[%s12889_s27 + $0xa4] sm:$0xf0] }
 0x325   : > { %5769 = vmatmul.bf16.gmra.mxu1 %v11101_v51  ;;  %6310 = vmatpush.bf16.msra.mxu0 %v12177_v5 }
 0x326   : > { %5858 = vmatmul.bf16.gmra.mxu2 %v11105_v50 }
 0x327   : > { %5947 = vmatmul.bf16.gmra.mxu3 %v11109_v46 }
 0x329   : > { %v5819_v56 = vpop.f32.mrf.mxu2  ;;  %v4475_v1 = vpop.f32.mrf.mxu0 }
 0x32a   : > { %v5908_v6 = vpop.f32.mrf.mxu3  ;;  %v5820_v44 = vadd.f32 %v5819_v56, %v5731_v12  ;;  %v5732_v33 = vpop.f32.mrf.mxu1  ;;  %v4476_v54 = vadd.f32 %v4475_v1, %v13741_v63  ;;  %v10585_v63 = vor.u32 %v11978_v31, %v10584_v47 }
 0x32c   : > { %v14122_v53 = vadd.f32 %v5908_v6, %v5820_v44  ;;  %v5733_v22 = vadd.f32 %v5732_v33, %v4476_v54  ;;  %v12185_v44 = vld [vmem:[%s16219_s1 + $0x230] sm:$0xff]  ;;  %v11981_v33 = vld [vmem:[%s12889_s27 + $0x78] sm:$0xf]  ;;  %v10606_v54 = vld [vmem:[%s12889_s27 + $0x98] sm:$0xf0] }
 0x32d   : > { %6399 = vmatpush.bf16.msra.mxu1 %v12185_v44  ;;  %v10609_v31 = vor.u32 %v11981_v33, %v10606_v54  ;;  %v11991_v44 = vld [vmem:[%s12889_s27 + $0xec] sm:$0xf]  ;;  %v10656_v33 = vld [vmem:[%s12889_s27 + $0xf0] sm:$0xf]  ;;  %v11996_v54 = vld [vmem:[%s12889_s27 + $0x110] sm:$0xf0] }
 0x331   : > { %v5821_v36 = vpop.f32.mrf.mxu2  ;;  %v4478_v58 = vpop.f32.mrf.mxu0 }
 0x332   : > { %v5910_v14 = vpop.f32.mrf.mxu3  ;;  %v5822_v16 = vadd.f32 %v5821_v36, %v5733_v22  ;;  %v5735_v40 = vpop.f32.mrf.mxu1  ;;  %v4479_v60 = vadd.f32 %v4478_v58, %v13756_v8  ;;  %v10612_v22 = vld [vmem:[%s12889_s27 + $0x7c] sm:$0xf] }
 0x334   : > { %v14133_v51 = vadd.f32 %v5910_v14, %v5822_v16  ;;  %v5736_v17 = vadd.f32 %v5735_v40, %v4479_v60  ;;  %5961 = vmatmul.bf16.vlgmr.msrb.gmra.mxu0 %v10573_v61  ;;  %v10621_v16 = vor.u32 %v11987_v4, %v10620_v57 }
 0x335   : > { %6050 = vmatmul.bf16.vlgmr.msrb.gmra.mxu1 %v10577_v11  ;;  %v10617_v11 = vor.u32 %v11982_v2, %v10614_v37 }
 0x336   : > { %6139 = vmatmul.bf16.vlgmr.msrb.gmra.mxu2 %v10581_v39 }
 0x337   : > { %6228 = vmatmul.bf16.vlgmr.msrb.gmra.mxu3 %v10585_v63 }
 0x339   : > { %v5824_v8 = vpop.f32.mrf.mxu2  ;;  %v4480_v19 = vpop.f32.mrf.mxu0 }
 0x33a   : > { %v5913_v50 = vpop.f32.mrf.mxu3  ;;  %v5825_v46 = vadd.f32 %v5824_v8, %v5736_v17  ;;  %v5737_v12 = vpop.f32.mrf.mxu1  ;;  %v4481_v56 = vadd.f32 %v4480_v19, %v13769_v23  ;;  %v10613_v23 = vor.u32 %v11986_v43, %v10612_v22  ;;  %v10642_v19 = vld [vmem:[%s12889_s27 + $0x104] sm:$0xf0] }
 0x33c   : > { %v14142_v6 = vadd.f32 %v5913_v50, %v5825_v46  ;;  %v5738_v1 = vadd.f32 %v5737_v12, %v4481_v56  ;;  %v11990_v46 = vld [vmem:[%s12889_s27 + $0xe4] sm:$0xf]  ;;  %v10648_v12 = vld [vmem:[%s12889_s27 + $0xe8] sm:$0xf]  ;;  %v11995_v56 = vld [vmem:[%s12889_s27 + $0x108] sm:$0xf0] }
 0x33d   : > { %v10645_v2 = vor.u32 %v11990_v46, %v10642_v19  ;;  %v10649_v37 = vor.u32 %v11995_v56, %v10648_v12  ;;  %v12004_v46 = vld [vmem:[%s12889_s27 + $0x174] sm:$0xf0]  ;;  %v10686_v12 = vld [vmem:[%s12889_s27 + $0x178] sm:$0xf0] }
 0x33e   : > { %v12000_v19 = vld [vmem:[%s12889_s27 + $0x158] sm:$0xf]  ;;  %v10692_v56 = vld [vmem:[%s12889_s27 + $0x15c] sm:$0xf] }
 0x341   : > { %v5826_v38 = vpop.f32.mrf.mxu2  ;;  %v4483_v14 = vpop.f32.mrf.mxu0 }
 0x342   : > { %v5915_v47 = vpop.f32.mrf.mxu3  ;;  %v5827_v36 = vadd.f32 %v5826_v38, %v5738_v1  ;;  %v5740_v61 = vpop.f32.mrf.mxu1  ;;  %v4484_v58 = vadd.f32 %v4483_v14, %v13778_v27  ;;  %v10650_v1 = vld [vmem:[%s12889_s27 + $0x10c] sm:$0xf0]  ;;  %v12264_v14 = vld [vmem:[%s16219_s1 + $0x4a8] sm:$0xff] }
 0x343   : > { %8445 = vmatpush.bf16.msra.mxu2 %v12264_v14 }
 0x344   : > { %v14156_v40 = vadd.f32 %v5915_v47, %v5827_v36  ;;  %v5741_v39 = vadd.f32 %v5740_v61, %v4484_v58  ;;  %5966 = vmatmul.bf16.gmra.mxu0 %v10609_v31  ;;  %v10653_v47 = vor.u32 %v11991_v44, %v10650_v1  ;;  %v12176_v61 = vld [vmem:[%s16219_s1 + $0x1e8] sm:$0xff]  ;;  %v12005_v44 = vld [vmem:[%s12889_s27 + $0x17c] sm:$0xf0] }
 0x345   : > { %6055 = vmatmul.bf16.gmra.mxu1 %v10613_v23  ;;  %6311 = vmatpush.bf16.msra.mxu0 %v12176_v61 }
 0x346   : > { %6144 = vmatmul.bf16.gmra.mxu2 %v10617_v11 }
 0x347   : > { %6233 = vmatmul.bf16.gmra.mxu3 %v10621_v16 }
 0x349   : > { %v5829_v63 = vpop.f32.mrf.mxu2  ;;  %v4485_v15 = vpop.f32.mrf.mxu0 }
 0x34a   : > { %v5918_v60 = vpop.f32.mrf.mxu3  ;;  %v5830_v17 = vadd.f32 %v5829_v63, %v5741_v39  ;;  %v5742_v5 = vpop.f32.mrf.mxu1  ;;  %v4486_v27 = vadd.f32 %v4485_v15, %v13788_v3  ;;  %v10657_v3 = vor.u32 %v11996_v54, %v10656_v33 }
 0x34c   : > { %v14159_v8 = vadd.f32 %v5918_v60, %v5830_v17  ;;  %v5743_v50 = vadd.f32 %v5742_v5, %v4486_v27  ;;  %v12184_v17 = vld [vmem:[%s16219_s1 + $0x228] sm:$0xff]  ;;  %v11999_v5 = vld [vmem:[%s12889_s27 + $0x150] sm:$0xf]  ;;  %v10678_v27 = vld [vmem:[%s12889_s27 + $0x170] sm:$0xf0] }
 0x34d   : > { %6400 = vmatpush.bf16.msra.mxu1 %v12184_v17  ;;  %v10681_v54 = vor.u32 %v11999_v5, %v10678_v27  ;;  %v12009_v17 = vld [vmem:[%s12889_s27 + $0x1c4] sm:$0xf]  ;;  %v10728_v5 = vld [vmem:[%s12889_s27 + $0x1c8] sm:$0xf]  ;;  %v12014_v27 = vld [vmem:[%s12889_s27 + $0x1e8] sm:$0xf0] }
 0x351   : > { %v5831_v22 = vpop.f32.mrf.mxu2  ;;  %v4488_v4 = vpop.f32.mrf.mxu0 }
 0x352   : > { %v5920_v43 = vpop.f32.mrf.mxu3  ;;  %v5832_v57 = vadd.f32 %v5831_v22, %v5743_v50  ;;  %v5745_v38 = vpop.f32.mrf.mxu1  ;;  %v4489_v31 = vadd.f32 %v4488_v4, %v13803_v55  ;;  %v10684_v50 = vld [vmem:[%s12889_s27 + $0x154] sm:$0xf] }
 0x354   : > { %v14170_v23 = vadd.f32 %v5920_v43, %v5832_v57  ;;  %v5746_v36 = vadd.f32 %v5745_v38, %v4489_v31  ;;  %5971 = vmatmul.bf16.gmra.mxu0 %v10645_v2  ;;  %v10693_v57 = vor.u32 %v12005_v44, %v10692_v56 }
 0x355   : > { %6060 = vmatmul.bf16.gmra.mxu1 %v10649_v37  ;;  %v10689_v37 = vor.u32 %v12000_v19, %v10686_v12 }
 0x356   : > { %6149 = vmatmul.bf16.gmra.mxu2 %v10653_v47 }
 0x357   : > { %6238 = vmatmul.bf16.gmra.mxu3 %v10657_v3 }
 0x359   : > { %v5834_v55 = vpop.f32.mrf.mxu2  ;;  %v4490_v58 = vpop.f32.mrf.mxu0 }
 0x35a   : > { %v5923_v11 = vpop.f32.mrf.mxu3  ;;  %v5835_v16 = vadd.f32 %v5834_v55, %v5746_v36  ;;  %v5747_v39 = vpop.f32.mrf.mxu1  ;;  %v4491_v63 = vadd.f32 %v4490_v58, %v13816_v26  ;;  %v10685_v26 = vor.u32 %v12004_v46, %v10684_v50  ;;  %v10714_v58 = vld [vmem:[%s12889_s27 + $0x1dc] sm:$0xf0] }
 0x35c   : > { %v14179_v60 = vadd.f32 %v5923_v11, %v5835_v16  ;;  %v5748_v15 = vadd.f32 %v5747_v39, %v4491_v63  ;;  %v12008_v16 = vld [vmem:[%s12889_s27 + $0x1bc] sm:$0xf]  ;;  %v10720_v39 = vld [vmem:[%s12889_s27 + $0x1c0] sm:$0xf]  ;;  %v12013_v63 = vld [vmem:[%s12889_s27 + $0x1e0] sm:$0xf0] }
 0x35d   : > { %v10717_v19 = vor.u32 %v12008_v16, %v10714_v58  ;;  %v10721_v12 = vor.u32 %v12013_v63, %v10720_v39  ;;  %v12022_v16 = vld [vmem:[%s12889_s27 + $0x24c] sm:$0xf0]  ;;  %v10758_v39 = vld [vmem:[%s12889_s27 + $0x250] sm:$0xf0] }
 0x35e   : > { %v12018_v58 = vld [vmem:[%s12889_s27 + $0x230] sm:$0xf]  ;;  %v10764_v63 = vld [vmem:[%s12889_s27 + $0x234] sm:$0xf] }
 0x361   : > { %v5836_v1 = vpop.f32.mrf.mxu2  ;;  %v4493_v43 = vpop.f32.mrf.mxu0 }
 0x362   : > { %v5925_v33 = vpop.f32.mrf.mxu3  ;;  %v5837_v22 = vadd.f32 %v5836_v1, %v5748_v15  ;;  %v5750_v2 = vpop.f32.mrf.mxu1  ;;  %v4494_v4 = vadd.f32 %v4493_v43, %v13825_v42  ;;  %v10722_v15 = vld [vmem:[%s12889_s27 + $0x1e4] sm:$0xf0]  ;;  %v12263_v43 = vld [vmem:[%s16219_s1 + $0x4a0] sm:$0xff] }
 0x363   : > { %8446 = vmatpush.bf16.msra.mxu2 %v12263_v43 }
 0x364   : > { %v14193_v38 = vadd.f32 %v5925_v33, %v5837_v22  ;;  %v5751_v47 = vadd.f32 %v5750_v2, %v4494_v4  ;;  %5976 = vmatmul.bf16.gmra.mxu0 %v10681_v54  ;;  %v10725_v33 = vor.u32 %v12009_v17, %v10722_v15  ;;  %v12175_v2 = vld [vmem:[%s16219_s1 + $0x1e0] sm:$0xff]  ;;  %v12023_v17 = vld [vmem:[%s12889_s27 + $0x254] sm:$0xf0] }
 0x365   : > { %6065 = vmatmul.bf16.gmra.mxu1 %v10685_v26  ;;  %6312 = vmatpush.bf16.msra.mxu0 %v12175_v2 }
 0x366   : > { %6154 = vmatmul.bf16.gmra.mxu2 %v10689_v37 }
 0x367   : > { %6243 = vmatmul.bf16.gmra.mxu3 %v10693_v57 }
 0x369   : > { %v5839_v3 = vpop.f32.mrf.mxu2  ;;  %v4495_v14 = vpop.f32.mrf.mxu0 }
 0x36a   : > { %v5928_v31 = vpop.f32.mrf.mxu3  ;;  %v5840_v36 = vadd.f32 %v5839_v3, %v5751_v47  ;;  %v5752_v61 = vpop.f32.mrf.mxu1  ;;  %v4496_v42 = vadd.f32 %v4495_v14, %v13835_v41  ;;  %v10729_v41 = vor.u32 %v12014_v27, %v10728_v5 }
 0x36c   : > { %v14196_v55 = vadd.f32 %v5928_v31, %v5840_v36  ;;  %v5753_v11 = vadd.f32 %v5752_v61, %v4496_v42  ;;  %v12183_v36 = vld [vmem:[%s16219_s1 + $0x220] sm:$0xff]  ;;  %v12017_v61 = vld [vmem:[%s12889_s27 + $0x228] sm:$0xf]  ;;  %v10750_v42 = vld [vmem:[%s12889_s27 + $0x248] sm:$0xf0] }
 0x36d   : > { %6401 = vmatpush.bf16.msra.mxu1 %v12183_v36  ;;  %v10753_v27 = vor.u32 %v12017_v61, %v10750_v42  ;;  %v12027_v36 = vld [vmem:[%s12889_s27 + $0x29c] sm:$0xf]  ;;  %v10800_v61 = vld [vmem:[%s12889_s27 + $0x2a0] sm:$0xf]  ;;  %v12032_v42 = vld [vmem:[%s12889_s27 + $0x2c0] sm:$0xf0] }
 0x371   : > { %v5841_v50 = vpop.f32.mrf.mxu2  ;;  %v4498_v44 = vpop.f32.mrf.mxu0 }
 0x372   : > { %v5930_v46 = vpop.f32.mrf.mxu3  ;;  %v5842_v56 = vadd.f32 %v5841_v50, %v5753_v11  ;;  %v5755_v1 = vpop.f32.mrf.mxu1  ;;  %v4499_v54 = vadd.f32 %v4498_v44, %v13850_v21  ;;  %v10756_v11 = vld [vmem:[%s12889_s27 + $0x22c] sm:$0xf] }
 0x374   : > { %v14207_v26 = vadd.f32 %v5930_v46, %v5842_v56  ;;  %v5756_v22 = vadd.f32 %v5755_v1, %v4499_v54  ;;  %5981 = vmatmul.bf16.gmra.mxu0 %v10717_v19  ;;  %v10765_v56 = vor.u32 %v12023_v17, %v10764_v63 }
 0x375   : > { %6070 = vmatmul.bf16.gmra.mxu1 %v10721_v12  ;;  %v10761_v12 = vor.u32 %v12018_v58, %v10758_v39 }
 0x376   : > { %6159 = vmatmul.bf16.gmra.mxu2 %v10725_v33 }
 0x377   : > { %6248 = vmatmul.bf16.gmra.mxu3 %v10729_v41 }
 0x379   : > { %v5844_v21 = vpop.f32.mrf.mxu2  ;;  %v4500_v4 = vpop.f32.mrf.mxu0 }
 0x37a   : > { %v5933_v37 = vpop.f32.mrf.mxu3  ;;  %v5845_v57 = vadd.f32 %v5844_v21, %v5756_v22  ;;  %v5757_v47 = vpop.f32.mrf.mxu1  ;;  %v4501_v3 = vadd.f32 %v4500_v4, %v13863_v25  ;;  %v10757_v25 = vor.u32 %v12022_v16, %v10756_v11  ;;  %v10786_v4 = vld [vmem:[%s12889_s27 + $0x2b4] sm:$0xf0] }
 0x37c   : > { %v14216_v31 = vadd.f32 %v5933_v37, %v5845_v57  ;;  %v5758_v14 = vadd.f32 %v5757_v47, %v4501_v3  ;;  %v12026_v57 = vld [vmem:[%s12889_s27 + $0x294] sm:$0xf]  ;;  %v10792_v47 = vld [vmem:[%s12889_s27 + $0x298] sm:$0xf]  ;;  %v12031_v3 = vld [vmem:[%s12889_s27 + $0x2b8] sm:$0xf0] }
 0x37d   : > { %v10789_v58 = vor.u32 %v12026_v57, %v10786_v4  ;;  %v10793_v39 = vor.u32 %v12031_v3, %v10792_v47  ;;  %v12040_v57 = vld [vmem:[%s12889_s27 + $0x324] sm:$0xf0]  ;;  %v10830_v47 = vld [vmem:[%s12889_s27 + $0x328] sm:$0xf0] }
 0x37e   : > { %v12036_v4 = vld [vmem:[%s12889_s27 + $0x308] sm:$0xf]  ;;  %v10836_v3 = vld [vmem:[%s12889_s27 + $0x30c] sm:$0xf] }
 0x381   : > { %v5846_v15 = vpop.f32.mrf.mxu2  ;;  %v4503_v46 = vpop.f32.mrf.mxu0 }
 0x382   : > { %v5935_v5 = vpop.f32.mrf.mxu3  ;;  %v5847_v50 = vadd.f32 %v5846_v15, %v5758_v14  ;;  %v5760_v19 = vpop.f32.mrf.mxu1  ;;  %v4504_v44 = vadd.f32 %v4503_v46, %v13872_v13  ;;  %v10794_v14 = vld [vmem:[%s12889_s27 + $0x2bc] sm:$0xf0]  ;;  %v12262_v46 = vld [vmem:[%s16219_s1 + $0x498] sm:$0xff] }
 0x383   : > { %8447 = vmatpush.bf16.msra.mxu2 %v12262_v46 }
 0x384   : > { %v14230_v1 = vadd.f32 %v5935_v5, %v5847_v50  ;;  %v5761_v33 = vadd.f32 %v5760_v19, %v4504_v44  ;;  %5986 = vmatmul.bf16.gmra.mxu0 %v10753_v27  ;;  %v10797_v5 = vor.u32 %v12027_v36, %v10794_v14  ;;  %v12174_v19 = vld [vmem:[%s16219_s1 + $0x1d8] sm:$0xff]  ;;  %v12041_v36 = vld [vmem:[%s12889_s27 + $0x32c] sm:$0xf0] }
 0x385   : > { %6075 = vmatmul.bf16.gmra.mxu1 %v10757_v25  ;;  %6313 = vmatpush.bf16.msra.mxu0 %v12174_v19 }
 0x386   : > { %6164 = vmatmul.bf16.gmra.mxu2 %v10761_v12 }
 0x387   : > { %6253 = vmatmul.bf16.gmra.mxu3 %v10765_v56 }
 0x389   : > { %v5849_v41 = vpop.f32.mrf.mxu2  ;;  %v4505_v43 = vpop.f32.mrf.mxu0 }
 0x38a   : > { %v5938_v54 = vpop.f32.mrf.mxu3  ;;  %v5850_v22 = vadd.f32 %v5849_v41, %v5761_v33  ;;  %v5762_v2 = vpop.f32.mrf.mxu1  ;;  %v4506_v13 = vadd.f32 %v4505_v43, %v13882_v28  ;;  %v10801_v28 = vor.u32 %v12032_v42, %v10800_v61 }
 0x38c   : > { %v14233_v21 = vadd.f32 %v5938_v54, %v5850_v22  ;;  %v5763_v37 = vadd.f32 %v5762_v2, %v4506_v13  ;;  %v12182_v22 = vld [vmem:[%s16219_s1 + $0x218] sm:$0xff]  ;;  %v12035_v2 = vld [vmem:[%s12889_s27 + $0x300] sm:$0xf]  ;;  %v10822_v13 = vld [vmem:[%s12889_s27 + $0x320] sm:$0xf0] }
 0x38d   : > { %6402 = vmatpush.bf16.msra.mxu1 %v12182_v22  ;;  %v10825_v42 = vor.u32 %v12035_v2, %v10822_v13  ;;  %v12049_v22 = vld [vmem:[%s12889_s27 + $0x390] sm:$0xf0]  ;;  %v10866_v2 = vld [vmem:[%s12889_s27 + $0x394] sm:$0xf0] }
 0x38e   : > { %v10872_v13 = vld [vmem:[%s12889_s27 + $0x378] sm:$0xf] }
 0x391   : > { %v5851_v11 = vpop.f32.mrf.mxu2  ;;  %v4508_v17 = vpop.f32.mrf.mxu0 }
 0x392   : > { %v5940_v16 = vpop.f32.mrf.mxu3  ;;  %v5852_v63 = vadd.f32 %v5851_v11, %v5763_v37  ;;  %v5765_v15 = vpop.f32.mrf.mxu1  ;;  %v4509_v27 = vadd.f32 %v4508_v17, %v13897_v34  ;;  %v10828_v37 = vld [vmem:[%s12889_s27 + $0x304] sm:$0xf] }
 0x394   : > { %v14244_v25 = vadd.f32 %v5940_v16, %v5852_v63  ;;  %v5766_v50 = vadd.f32 %v5765_v15, %v4509_v27  ;;  %5991 = vmatmul.bf16.gmra.mxu0 %v10789_v58  ;;  %v10837_v63 = vor.u32 %v12041_v36, %v10836_v3 }
 0x395   : > { %6080 = vmatmul.bf16.gmra.mxu1 %v10793_v39  ;;  %v10833_v39 = vor.u32 %v12036_v4, %v10830_v47 }
 0x396   : > { %6169 = vmatmul.bf16.gmra.mxu2 %v10797_v5  ;;  %v12274_v5 = vld [vmem:[%s16219_s1 + $0x4f8] sm:$0xff] }
 0x397   : > { %6258 = vmatmul.bf16.gmra.mxu3 %v10801_v28 }
 0x398   : > { %8532 = vmatpush.bf16.msra.mxu3 %v12274_v5 }
 0x399   : > { %v5854_v34 = vpop.f32.mrf.mxu2  ;;  %v4510_v44 = vpop.f32.mrf.mxu0 }
 0x39a   : > { %v5943_v12 = vpop.f32.mrf.mxu3  ;;  %v5855_v56 = vadd.f32 %v5854_v34, %v5766_v50  ;;  %v5767_v33 = vpop.f32.mrf.mxu1  ;;  %v4511_v41 = vadd.f32 %v4510_v44, %v13910_v45  ;;  %v10829_v45 = vor.u32 %v12040_v57, %v10828_v37  ;;  %v12044_v44 = vld [vmem:[%s12889_s27 + $0x36c] sm:$0xf]  ;;  %v12050_v37 = vld [vmem:[%s12889_s27 + $0x398] sm:$0xf0] }
 0x39c   : > { %v14253_v54 = vadd.f32 %v5943_v12, %v5855_v56  ;;  %v5768_v43 = vadd.f32 %v5767_v33, %v4511_v41  ;;  %v10858_v33 = vld [vmem:[%s12889_s27 + $0x38c] sm:$0xf0] }
 0x39d   : > { %v10864_v41 = vld [vmem:[%s12889_s27 + $0x370] sm:$0xf]  ;;  %v10861_v47 = vor.u32 %v12044_v44, %v10858_v33  ;;  %v12058_v44 = vld [vmem:[%s12889_s27 + $0x3fc] sm:$0xf0] }
 0x39e   : > { %v10865_v3 = vor.u32 %v12049_v22, %v10864_v41  ;;  %v12054_v33 = vld [vmem:[%s12889_s27 + $0x3e0] sm:$0xf]  ;;  %v10902_v41 = vld [vmem:[%s12889_s27 + $0x400] sm:$0xf0] }
 0x39f   : > { %v10908_v22 = vld [vmem:[%s12889_s27 + $0x3e4] sm:$0xf] }
 0x3a1   : > { %v5856_v14 = vpop.f32.mrf.mxu2  ;;  %v4513_v16 = vpop.f32.mrf.mxu0 }
 0x3a2   : > { %v5945_v61 = vpop.f32.mrf.mxu3  ;;  %v5857_v11 = vadd.f32 %v5856_v14, %v5768_v43  ;;  %v5770_v58 = vpop.f32.mrf.mxu1  ;;  %v4514_v17 = vadd.f32 %v4513_v16, %v13922_v49  ;;  %v12045_v43 = vld [vmem:[%s12889_s27 + $0x374] sm:$0xf] }
 0x3a4   : > { %v14267_v15 = vadd.f32 %v5945_v61, %v5857_v11  ;;  %v5771_v28 = vadd.f32 %v5770_v58, %v4514_v17  ;;  %5996 = vmatmul.bf16.gmra.mxu0 %v10825_v42  ;;  %v10869_v42 = vor.u32 %v12045_v43, %v10866_v2  ;;  %v12261_v58 = vld [vmem:[%s16219_s1 + $0x490] sm:$0xff]  ;;  %v12059_v43 = vld [vmem:[%s12889_s27 + $0x404] sm:$0xf0] }
 0x3a5   : > { %6085 = vmatmul.bf16.gmra.mxu1 %v10829_v45  ;;  %8448 = vmatpush.bf16.msra.mxu2 %v12261_v58 }
 0x3a6   : > { %6174 = vmatmul.bf16.gmra.mxu2 %v10833_v39  ;;  %v12173_v39 = vld [vmem:[%s16219_s1 + $0x1d0] sm:$0xff] }
 0x3a7   : > { %6263 = vmatmul.bf16.gmra.mxu3 %v10837_v63  ;;  %6314 = vmatpush.bf16.msra.mxu0 %v12173_v39 }
 0x3a9   : > { %v5859_v49 = vpop.f32.mrf.mxu2  ;;  %v4515_v46 = vpop.f32.mrf.mxu0 }
 0x3aa   : > { %v5948_v27 = vpop.f32.mrf.mxu3  ;;  %v5860_v50 = vadd.f32 %v5859_v49, %v5771_v28  ;;  %v5772_v19 = vpop.f32.mrf.mxu1  ;;  %v4516_v34 = vadd.f32 %v4515_v46, %v13932_v29  ;;  %v10873_v29 = vor.u32 %v12050_v37, %v10872_v13 }
 0x3ac   : > { %v14273_v12 = vadd.f32 %v5948_v27, %v5860_v50  ;;  %v5773_v56 = vadd.f32 %v5772_v19, %v4516_v34  ;;  %v12181_v50 = vld [vmem:[%s16219_s1 + $0x210] sm:$0xff]  ;;  %v12053_v19 = vld [vmem:[%s12889_s27 + $0x3d8] sm:$0xf]  ;;  %v10894_v34 = vld [vmem:[%s12889_s27 + $0x3f8] sm:$0xf0] }
 0x3ad   : > { %6403 = vmatpush.bf16.msra.mxu1 %v12181_v50  ;;  %v10897_v37 = vor.u32 %v12053_v19, %v10894_v34  ;;  %v12067_v50 = vld [vmem:[%s12889_s27 + $0x468] sm:$0xf0]  ;;  %v10938_v19 = vld [vmem:[%s12889_s27 + $0x46c] sm:$0xf0] }
 0x3ae   : > { %v10944_v34 = vld [vmem:[%s12889_s27 + $0x450] sm:$0xf] }
 0x3b1   : > { %v5861_v57 = vpop.f32.mrf.mxu2  ;;  %v5962_v14 = vpop.f32.mrf.mxu0 }
 0x3b2   : > { %v5950_v4 = vpop.f32.mrf.mxu3  ;;  %v5862_v36 = vadd.f32 %v5861_v57, %v5773_v56  ;;  %v6051_v61 = vpop.f32.mrf.mxu1  ;;  %v5963_v45 = vadd.f32 %v5962_v14, %v13947_v24  ;;  %v10900_v56 = vld [vmem:[%s12889_s27 + $0x3dc] sm:$0xf] }
 0x3b4   : > { %v14284_v11 = vadd.f32 %v5950_v4, %v5862_v36  ;;  %v6052_v16 = vadd.f32 %v6051_v61, %v5963_v45  ;;  %6001 = vmatmul.bf16.gmra.mxu0 %v10861_v47  ;;  %v10909_v36 = vor.u32 %v12059_v43, %v10908_v22 }
 0x3b5   : > { %6090 = vmatmul.bf16.gmra.mxu1 %v10865_v3  ;;  %v10905_v3 = vor.u32 %v12054_v33, %v10902_v41 }
 0x3b6   : > { %6179 = vmatmul.bf16.gmra.mxu2 %v10869_v42  ;;  %v12273_v42 = vld [vmem:[%s16219_s1 + $0x4f0] sm:$0xff] }
 0x3b7   : > { %6268 = vmatmul.bf16.gmra.mxu3 %v10873_v29 }
 0x3b8   : > { %8533 = vmatpush.bf16.msra.mxu3 %v12273_v42 }
 0x3b9   : > { %v6140_v24 = vpop.f32.mrf.mxu2  ;;  %v5964_v5 = vpop.f32.mrf.mxu0 }
 0x3ba   : > { %v6229_v63 = vpop.f32.mrf.mxu3  ;;  %v6141_v17 = vadd.f32 %v6140_v24, %v6052_v16  ;;  %v6053_v28 = vpop.f32.mrf.mxu1  ;;  %v5965_v49 = vadd.f32 %v5964_v5, %v13960_v52  ;;  %v10901_v52 = vor.u32 %v12058_v44, %v10900_v56  ;;  %v12062_v5 = vld [vmem:[%s12889_s27 + $0x444] sm:$0xf]  ;;  %v12068_v56 = vld [vmem:[%s12889_s27 + $0x470] sm:$0xf0] }
 0x3bc   : > { %v14293_v27 = vadd.f32 %v6229_v63, %v6141_v17  ;;  %v6054_v46 = vadd.f32 %v6053_v28, %v5965_v49  ;;  %v10930_v28 = vld [vmem:[%s12889_s27 + $0x464] sm:$0xf0] }
 0x3bd   : > { %v10936_v49 = vld [vmem:[%s12889_s27 + $0x448] sm:$0xf]  ;;  %v10933_v41 = vor.u32 %v12062_v5, %v10930_v28  ;;  %v12076_v5 = vld [vmem:[%s12889_s27 + $0x4d4] sm:$0xf0] }
 0x3be   : > { %v10937_v22 = vor.u32 %v12067_v50, %v10936_v49  ;;  %v12072_v28 = vld [vmem:[%s12889_s27 + $0x4b8] sm:$0xf]  ;;  %v10974_v49 = vld [vmem:[%s12889_s27 + $0x4d8] sm:$0xf0] }
 0x3bf   : > { %v10980_v50 = vld [vmem:[%s12889_s27 + $0x4bc] sm:$0xf] }
 0x3c1   : > { %v6142_v2 = vpop.f32.mrf.mxu2  ;;  %v5967_v4 = vpop.f32.mrf.mxu0 }
 0x3c2   : > { %v6231_v13 = vpop.f32.mrf.mxu3  ;;  %v6143_v57 = vadd.f32 %v6142_v2, %v6054_v46  ;;  %v6056_v47 = vpop.f32.mrf.mxu1  ;;  %v5968_v14 = vadd.f32 %v5967_v4, %v13972_v59  ;;  %v12063_v46 = vld [vmem:[%s12889_s27 + $0x44c] sm:$0xf] }
 0x3c4   : > { %v14307_v61 = vadd.f32 %v6231_v13, %v6143_v57  ;;  %v6057_v29 = vadd.f32 %v6056_v47, %v5968_v14  ;;  %6006 = vmatmul.bf16.gmra.mxu0 %v10897_v37  ;;  %v10941_v37 = vor.u32 %v12063_v46, %v10938_v19  ;;  %v12260_v47 = vld [vmem:[%s16219_s1 + $0x488] sm:$0xff]  ;;  %v12077_v46 = vld [vmem:[%s12889_s27 + $0x4dc] sm:$0xf0] }
 0x3c5   : > { %6095 = vmatmul.bf16.gmra.mxu1 %v10901_v52  ;;  %8449 = vmatpush.bf16.msra.mxu2 %v12260_v47 }
 0x3c6   : > { %6184 = vmatmul.bf16.gmra.mxu2 %v10905_v3  ;;  %v12172_v3 = vld [vmem:[%s16219_s1 + $0x1c8] sm:$0xff] }
 0x3c7   : > { %6273 = vmatmul.bf16.gmra.mxu3 %v10909_v36  ;;  %6315 = vmatpush.bf16.msra.mxu0 %v12172_v3 }
 0x3c9   : > { %v6145_v59 = vpop.f32.mrf.mxu2  ;;  %v5969_v58 = vpop.f32.mrf.mxu0 }
 0x3ca   : > { %v6234_v45 = vpop.f32.mrf.mxu3  ;;  %v6146_v16 = vadd.f32 %v6145_v59, %v6057_v29  ;;  %v6058_v39 = vpop.f32.mrf.mxu1  ;;  %v5970_v24 = vadd.f32 %v5969_v58, %v13982_v35  ;;  %v10945_v35 = vor.u32 %v12068_v56, %v10944_v34 }
 0x3cc   : > { %v14313_v63 = vadd.f32 %v6234_v45, %v6146_v16  ;;  %v6059_v17 = vadd.f32 %v6058_v39, %v5970_v24  ;;  %v12180_v16 = vld [vmem:[%s16219_s1 + $0x208] sm:$0xff]  ;;  %v12071_v39 = vld [vmem:[%s12889_s27 + $0x4b0] sm:$0xf]  ;;  %v10966_v24 = vld [vmem:[%s12889_s27 + $0x4d0] sm:$0xf0] }
 0x3cd   : > { %6404 = vmatpush.bf16.msra.mxu1 %v12180_v16  ;;  %v10969_v56 = vor.u32 %v12071_v39, %v10966_v24  ;;  %v12085_v16 = vld [vmem:[%s12889_s27 + $0x540] sm:$0xf0]  ;;  %v11010_v39 = vld [vmem:[%s12889_s27 + $0x544] sm:$0xf0] }
 0x3ce   : > { %v11016_v24 = vld [vmem:[%s12889_s27 + $0x528] sm:$0xf] }
 0x3d1   : > { %v6147_v44 = vpop.f32.mrf.mxu2  ;;  %v5972_v2 = vpop.f32.mrf.mxu0 }
 0x3d2   : > { %v6236_v33 = vpop.f32.mrf.mxu3  ;;  %v6148_v43 = vadd.f32 %v6147_v44, %v6059_v17  ;;  %v6061_v13 = vpop.f32.mrf.mxu1  ;;  %v5973_v52 = vadd.f32 %v5972_v2, %v13997_v18  ;;  %v10972_v17 = vld [vmem:[%s12889_s27 + $0x4b4] sm:$0xf] }
 0x3d4   : > { %v14324_v57 = vadd.f32 %v6236_v33, %v6148_v43  ;;  %v6062_v4 = vadd.f32 %v6061_v13, %v5973_v52  ;;  %6011 = vmatmul.bf16.gmra.mxu0 %v10933_v41  ;;  %v10981_v43 = vor.u32 %v12077_v46, %v10980_v50 }
 0x3d5   : > { %6100 = vmatmul.bf16.gmra.mxu1 %v10937_v22  ;;  %v10977_v22 = vor.u32 %v12072_v28, %v10974_v49 }
 0x3d6   : > { %6189 = vmatmul.bf16.gmra.mxu2 %v10941_v37  ;;  %v12272_v37 = vld [vmem:[%s16219_s1 + $0x4e8] sm:$0xff] }
 0x3d7   : > { %6278 = vmatmul.bf16.gmra.mxu3 %v10945_v35 }
 0x3d8   : > { %8534 = vmatpush.bf16.msra.mxu3 %v12272_v37 }
 0x3d9   : > { %v6150_v18 = vpop.f32.mrf.mxu2  ;;  %v5974_v42 = vpop.f32.mrf.mxu0 }
 0x3da   : > { %v6239_v36 = vpop.f32.mrf.mxu3  ;;  %v6151_v14 = vadd.f32 %v6150_v18, %v6062_v4  ;;  %v6063_v29 = vpop.f32.mrf.mxu1  ;;  %v5975_v59 = vadd.f32 %v5974_v42, %v14010_v48  ;;  %v10973_v48 = vor.u32 %v12076_v5, %v10972_v17  ;;  %v12080_v42 = vld [vmem:[%s12889_s27 + $0x51c] sm:$0xf]  ;;  %v12086_v17 = vld [vmem:[%s12889_s27 + $0x548] sm:$0xf0] }
 0x3dc   : > { %v14333_v45 = vadd.f32 %v6239_v36, %v6151_v14  ;;  %v6064_v58 = vadd.f32 %v6063_v29, %v5975_v59  ;;  %v11002_v29 = vld [vmem:[%s12889_s27 + $0x53c] sm:$0xf0] }
 0x3dd   : > { %v11008_v59 = vld [vmem:[%s12889_s27 + $0x520] sm:$0xf]  ;;  %v11005_v49 = vor.u32 %v12080_v42, %v11002_v29  ;;  %v12094_v42 = vld [vmem:[%s12889_s27 + $0x5ac] sm:$0xf0] }
 0x3de   : > { %v11009_v50 = vor.u32 %v12085_v16, %v11008_v59  ;;  %v12090_v29 = vld [vmem:[%s12889_s27 + $0x590] sm:$0xf]  ;;  %v11046_v59 = vld [vmem:[%s12889_s27 + $0x5b0] sm:$0xf0] }
 0x3df   : > { %v11052_v16 = vld [vmem:[%s12889_s27 + $0x594] sm:$0xf] }
 0x3e1   : > { %v6152_v19 = vpop.f32.mrf.mxu2  ;;  %v5977_v33 = vpop.f32.mrf.mxu0 }
 0x3e2   : > { %v6241_v34 = vpop.f32.mrf.mxu3  ;;  %v6153_v44 = vadd.f32 %v6152_v19, %v6064_v58  ;;  %v6066_v41 = vpop.f32.mrf.mxu1  ;;  %v5978_v2 = vadd.f32 %v5977_v33, %v14022_v62  ;;  %v12081_v58 = vld [vmem:[%s12889_s27 + $0x524] sm:$0xf] }
 0x3e4   : > { %v14347_v13 = vadd.f32 %v6241_v34, %v6153_v44  ;;  %v6067_v35 = vadd.f32 %v6066_v41, %v5978_v2  ;;  %6016 = vmatmul.bf16.gmra.mxu0 %v10969_v56  ;;  %v11013_v56 = vor.u32 %v12081_v58, %v11010_v39  ;;  %v12259_v41 = vld [vmem:[%s16219_s1 + $0x480] sm:$0xff]  ;;  %v12095_v58 = vld [vmem:[%s12889_s27 + $0x5b4] sm:$0xf0] }
 0x3e5   : > { %6105 = vmatmul.bf16.gmra.mxu1 %v10973_v48  ;;  %8450 = vmatpush.bf16.msra.mxu2 %v12259_v41 }
 0x3e6   : > { %6194 = vmatmul.bf16.gmra.mxu2 %v10977_v22  ;;  %v12171_v22 = vld [vmem:[%s16219_s1 + $0x1c0] sm:$0xff] }
 0x3e7   : > { %6283 = vmatmul.bf16.gmra.mxu3 %v10981_v43  ;;  %6316 = vmatpush.bf16.msra.mxu0 %v12171_v22 }
 0x3e9   : > { %v6155_v62 = vpop.f32.mrf.mxu2  ;;  %v5979_v47 = vpop.f32.mrf.mxu0 }
 0x3ea   : > { %v6244_v52 = vpop.f32.mrf.mxu3  ;;  %v6156_v4 = vadd.f32 %v6155_v62, %v6067_v35  ;;  %v6068_v3 = vpop.f32.mrf.mxu1  ;;  %v5980_v18 = vadd.f32 %v5979_v47, %v14032_v30  ;;  %v11017_v30 = vor.u32 %v12086_v17, %v11016_v24 }
 0x3ec   : > { %v14353_v36 = vadd.f32 %v6244_v52, %v6156_v4  ;;  %v6069_v14 = vadd.f32 %v6068_v3, %v5980_v18  ;;  %v12179_v4 = vld [vmem:[%s16219_s1 + $0x200] sm:$0xff]  ;;  %v12089_v3 = vld [vmem:[%s12889_s27 + $0x588] sm:$0xf]  ;;  %v11038_v18 = vld [vmem:[%s12889_s27 + $0x5a8] sm:$0xf0] }
 0x3ed   : > { %6405 = vmatpush.bf16.msra.mxu1 %v12179_v4  ;;  %v11041_v17 = vor.u32 %v12089_v3, %v11038_v18  ;;  %v11074_v18 = vld [vmem:[%s12889_s27 + $0x614] sm:$0xf0] }
 0x3f1   : > { %v6157_v5 = vpop.f32.mrf.mxu2  ;;  %v5982_v19 = vpop.f32.mrf.mxu0 }
 0x3f2   : > { %v6246_v28 = vpop.f32.mrf.mxu3  ;;  %v6158_v46 = vadd.f32 %v6157_v5, %v6069_v14  ;;  %v6071_v34 = vpop.f32.mrf.mxu1  ;;  %v5983_v48 = vadd.f32 %v5982_v19, %v14047_v7  ;;  %v11044_v14 = vld [vmem:[%s12889_s27 + $0x58c] sm:$0xf]  ;;  %v12271_v5 = vld [vmem:[%s16219_s1 + $0x4e0] sm:$0xff]  ;;  %v11053_v19 = vor.u32 %v12095_v58, %v11052_v16  ;;  %v12099_v16 = vld [vmem:[%s12889_s27 + $0x5fc] sm:$0xf] }
 0x3f3   : > { %8535 = vmatpush.bf16.msra.mxu3 %v12271_v5  ;;  %v11082_v58 = vld [vmem:[%s12889_s27 + $0x61c] sm:$0xf0] }
 0x3f4   : > { %v14364_v44 = vadd.f32 %v6246_v28, %v6158_v46  ;;  %v6072_v33 = vadd.f32 %v6071_v34, %v5983_v48  ;;  %6021 = vmatmul.bf16.gmra.mxu0 %v11005_v49  ;;  %v11049_v46 = vor.u32 %v12090_v29, %v11046_v59  ;;  %v12270_v48 = vld [vmem:[%s16219_s1 + $0x4d8] sm:$0xff] }
 0x3f5   : > { %6110 = vmatmul.bf16.gmra.mxu1 %v11009_v50 }
 0x3f6   : > { %6199 = vmatmul.bf16.gmra.mxu2 %v11013_v56 }
 0x3f7   : > { %6288 = vmatmul.bf16.gmra.mxu3 %v11017_v30 }
 0x3f8   : > { %8536 = vmatpush.bf16.msra.mxu3 %v12270_v48 }
 0x3f9   : > { %v6160_v7 = vpop.f32.mrf.mxu2  ;;  %v5984_v37 = vpop.f32.mrf.mxu0 }
 0x3fa   : > { %v6249_v43 = vpop.f32.mrf.mxu3  ;;  %v6161_v2 = vadd.f32 %v6160_v7, %v6072_v33  ;;  %v6073_v35 = vpop.f32.mrf.mxu1  ;;  %v5985_v62 = vadd.f32 %v5984_v37, %v14063_v32  ;;  %v11045_v32 = vor.u32 %v12094_v42, %v11044_v14  ;;  %v12520_v33 = vld [vmem:[%s12889_s27 + $0x24] sm:$0xff]  ;;  %v12269_v7 = vld [vmem:[%s16219_s1 + $0x4d0] sm:$0xff]  ;;  %v11080_v14 = vld [vmem:[%s12889_s27 + $0x5f8] sm:$0xf] }
 0x3fb   : > { %v12103_v42 = vld [vmem:[%s12889_s27 + $0x618] sm:$0xf0] }
 0x3fc   : > { %v14373_v52 = vadd.f32 %v6249_v43, %v6161_v2  ;;  %v6074_v47 = vadd.f32 %v6073_v35, %v5985_v62  ;;  %v12521_v35 = vld [vmem:[%s12889_s27 + $0x48] sm:$0x11]  ;;  %8537 = vmatpush.bf16.msra.mxu3 %v12269_v7 }
 0x3fd   : > { %v6751_v62 = vrot.slane %v12521_v35, 5 }
 0x401   : > { %v6162_v39 = vpop.f32.mrf.mxu2  ;;  %v5987_v49 = vpop.f32.mrf.mxu0 }
 0x402   : > { %v6251_v24 = vpop.f32.mrf.mxu3  ;;  %v6163_v28 = vadd.f32 %v6162_v39, %v6074_v47  ;;  %v6076_v50 = vpop.f32.mrf.mxu1  ;;  %v5988_v34 = vadd.f32 %v5987_v49, %v14078_v10  ;;  %v6732_v10 = vrot.slane %v12520_v33, 5  ;;  %v12098_v47 = vld [vmem:[%s12889_s27 + $0x5f4] sm:$0xf]  ;;  %v12268_v39 = vld [vmem:[%s16219_s1 + $0x4c8] sm:$0xff] }
 0x403   : > { %8538 = vmatpush.bf16.msra.mxu3 %v12268_v39  ;;  %v11077_v5 = vor.u32 %v12098_v47, %v11074_v18 }
 0x404   : > { %v14390_v56 = vadd.f32 %v6251_v24, %v6163_v28  ;;  %v6077_v30 = vadd.f32 %v6076_v50, %v5988_v34  ;;  %6026 = vmatmul.bf16.gmra.mxu0 %v11041_v17  ;;  %v6750_v29 = vrot.slane %v6732_v10, 4  ;;  %v11088_v24 = vld [vmem:[%s12889_s27 + $0x600] sm:$0xf]  ;;  %v12104_v17 = vld [vmem:[%s12889_s27 + $0x620] sm:$0xf0]  ;;  %v11081_v28 = vor.u32 %v12103_v42, %v11080_v14 }
 0x405   : > { %6115 = vmatmul.bf16.gmra.mxu1 %v11045_v32  ;;  %v6487_v32 = vld [vmem:[%s12889_s27] sm:$0xee]  ;;  %v11089_v34 = vor.u32 %v12104_v17, %v11088_v24  ;;  %v12290_v17 = vld [vmem:[%s16219_s1 + $0x578] sm:$0xff] }
 0x406   : > { %6204 = vmatmul.bf16.gmra.mxu2 %v11049_v46  ;;  %v6752_v33 = vsel %vm14415_vm5, %v6750_v29, %v6751_v62  ;;  %v12282_v62 = vld [vmem:[%s16219_s1 + $0x538] sm:$0xff]  ;;  %8710 = vmatpush.bf16.msrb.mxu1 %v12290_v17  ;;  %v10586_v17 = vld [vmem:[%s12889_s27 + $0x3c] sm:$0xf0] }
 0x407   : > { %6293 = vmatmul.bf16.gmra.mxu3 %v11053_v19  ;;  %v11085_v19 = vor.u32 %v12099_v16, %v11082_v58  ;;  %8621 = vmatpush.bf16.msrb.mxu0 %v12282_v62 }
 0x409   : > { %v6165_v41 = vpop.f32.mrf.mxu2  ;;  %v5989_v2 = vpop.f32.mrf.mxu0 }
 0x40a   : > { %v6254_v22 = vpop.f32.mrf.mxu3  ;;  %v6166_v43 = vadd.f32 %v6165_v41, %v6077_v30  ;;  %v6078_v37 = vpop.f32.mrf.mxu1  ;;  %v5990_v4 = vadd.f32 %v5989_v2, %v14094_v0  ;;  %v11422_v0 = vrot.slane %v6487_v32, 9  ;;  %v12267_v30 = vld [vmem:[%s16219_s1 + $0x4c0] sm:$0xff]  ;;  %v7444_v2 = vunpack.c.l.b16 %v6752_v33 }
 0x40b   : > { %8539 = vmatpush.bf16.msra.mxu3 %v12267_v30  ;;  %v12113_v30 = vld [vmem:[%s12889_s27 + $0x68c] sm:$0xf0] }
 0x40c   : > { %v14402_v3 = vadd.f32 %v6254_v22, %v6166_v43  ;;  %v6079_v59 = vadd.f32 %v6078_v37, %v5990_v4  ;;  %v6733_v48 = vsel %vm14415_vm5, %v11422_v0, %v6732_v10  ;;  %v7445_v4 = vunpack.c.h.b16 %v6752_v33  ;;  %v12107_v0 = vld [vmem:[%s12889_s27 + $0x660] sm:$0xf] }
 0x40d   : > { %v7435_v43 = vunpack.c.l.b16 %v6733_v48  ;;  %v7436_v37 = vunpack.c.h.b16 %v6733_v48 }
 0x40f   : > { %v14429_v18 = vpack.c.b16 %v7444_v2, %v7435_v43  ;;  %v14431_v10 = vpack.c.b16 %v7445_v4, %v7436_v37 }
 0x411   : > { %v6167_v50 = vpop.f32.mrf.mxu2  ;;  %v5992_v22 = vpop.f32.mrf.mxu0 }
 0x412   : > { %v6256_v46 = vpop.f32.mrf.mxu3  ;;  %v6168_v41 = vadd.f32 %v6167_v50, %v6079_v59  ;;  %v6081_v7 = vpop.f32.mrf.mxu1  ;;  %v5993_v35 = vadd.f32 %v5992_v22, %v14107_v20  ;;  %v12298_v20 = vld [vmem:[%s16219_s1 + $0x5b8] sm:$0xff]  ;;  %v12112_v50 = vld [vmem:[%s12889_s27 + $0x684] sm:$0xf0] }
 0x413   : > { %8799 = vmatpush.bf16.msrb.mxu2 %v12298_v20 }
 0x414   : > { %v14427_v47 = vadd.f32 %v6256_v46, %v6168_v41  ;;  %v6082_v14 = vadd.f32 %v6081_v7, %v5993_v35  ;;  %6031 = vmatmul.bf16.gmra.mxu0 %v11077_v5  ;;  %v11110_v5 = vld [vmem:[%s12889_s27 + $0x680] sm:$0xf0]  ;;  %v12108_v46 = vld [vmem:[%s12889_s27 + $0x668] sm:$0xf] }
 0x415   : > { %6120 = vmatmul.bf16.gmra.mxu1 %v11081_v28  ;;  %v11116_v28 = vld [vmem:[%s12889_s27 + $0x664] sm:$0xf]  ;;  %v11113_v41 = vor.u32 %v12107_v0, %v11110_v5 }
 0x416   : > { %6209 = vmatmul.bf16.gmra.mxu2 %v11085_v19  ;;  %v11118_v19 = vld [vmem:[%s12889_s27 + $0x688] sm:$0xf0]  ;;  %v11979_v0 = vld [vmem:[%s12889_s27 + $0x40] sm:$0xf0] }
 0x417   : > { %6298 = vmatmul.bf16.gmra.mxu3 %v11089_v34  ;;  %v11124_v34 = vld [vmem:[%s12889_s27 + $0x66c] sm:$0xf]  ;;  %v11121_v2 = vor.u32 %v12108_v46, %v11118_v19 }
 0x418   : > { %v11125_v37 = vor.u32 %v12113_v30, %v11124_v34 }
 0x419   : > { %v6170_v42 = vpop.f32.mrf.mxu2  ;;  %v5994_v16 = vpop.f32.mrf.mxu0 }
 0x41a   : > { %v6259_v29 = vpop.f32.mrf.mxu3  ;;  %v6171_v59 = vadd.f32 %v6170_v42, %v6082_v14  ;;  %v6083_v58 = vpop.f32.mrf.mxu1  ;;  %v5995_v39 = vadd.f32 %v5994_v16, %v14119_v9  ;;  %v11117_v9 = vor.u32 %v12112_v50, %v11116_v28 }
 0x41c   : > { %v14440_v24 = vadd.f32 %v6259_v29, %v6171_v59  ;;  %v6084_v32 = vadd.f32 %v6083_v58, %v5995_v39  ;;  %v11974_v39 = vld [vmem:[%s12889_s27 + $0x1c] sm:$0xf] }
 0x41d   : > { %v10589_v50 = vor.u32 %v11974_v39, %v10586_v17  ;;  %v11983_v17 = vld [vmem:[%s12889_s27 + $0x88] sm:$0xf] }
 0x421   : > { %v6172_v48 = vpop.f32.mrf.mxu2  ;;  %v5997_v7 = vpop.f32.mrf.mxu0 }
 0x422   : > { %v6261_v33 = vpop.f32.mrf.mxu3  ;;  %v6173_v22 = vadd.f32 %v6172_v48, %v6084_v32  ;;  %v6086_v43 = vpop.f32.mrf.mxu1  ;;  %v5998_v35 = vadd.f32 %v5997_v7, %v14122_v53  ;;  %v10592_v32 = vld [vmem:[%s12889_s27 + $0x20] sm:$0xf]  ;;  %v12297_v7 = vld [vmem:[%s16219_s1 + $0x5b0] sm:$0xff] }
 0x423   : > { %v10593_v46 = vor.u32 %v11979_v0, %v10592_v32  ;;  %8800 = vmatpush.bf16.msrb.mxu2 %v12297_v7  ;;  %v10622_v32 = vld [vmem:[%s12889_s27 + $0xa8] sm:$0xf0] }
 0x424   : > { %v14454_v4 = vadd.f32 %v6261_v33, %v6173_v22  ;;  %v6087_v14 = vadd.f32 %v6086_v43, %v5998_v35  ;;  %6036 = vmatmul.bf16.gmra.mxu0 %v11113_v41  ;;  %v12522_v33 = vld [vmem:[%s12889_s27 + $0x90] sm:$0xff]  ;;  %v10628_v0 = vld [vmem:[%s12889_s27 + $0x8c] sm:$0xf] }
 0x425   : > { %6125 = vmatmul.bf16.gmra.mxu1 %v11117_v9  ;;  %v6492_v9 = vld [vmem:[%s12889_s27 + $0x6c] sm:$0xee] }
 0x426   : > { %6214 = vmatmul.bf16.gmra.mxu2 %v11121_v2  ;;  %v11427_v43 = vrot.slane %v6492_v9, 9 }
 0x427   : > { %6303 = vmatmul.bf16.gmra.mxu3 %v11125_v37  ;;  %v12523_v37 = vld [vmem:[%s12889_s27 + $0xb4] sm:$0x11] }
 0x428   : > { %v6786_v35 = vrot.slane %v12523_v37, 5 }
 0x429   : > { %v6175_v20 = vpop.f32.mrf.mxu2  ;;  %v5999_v29 = vpop.f32.mrf.mxu0 }
 0x42a   : > { %v6264_v62 = vpop.f32.mrf.mxu3  ;;  %v6176_v42 = vadd.f32 %v6175_v20, %v6087_v14  ;;  %v6088_v59 = vpop.f32.mrf.mxu1  ;;  %v6000_v16 = vadd.f32 %v5999_v29, %v14133_v51  ;;  %v6767_v51 = vrot.slane %v12522_v33, 5 }
 0x42c   : > { %v14457_v58 = vadd.f32 %v6264_v62, %v6176_v42  ;;  %v6089_v53 = vadd.f32 %v6088_v59, %v6000_v16  ;;  %v6785_v2 = vrot.slane %v6767_v51, 4  ;;  %v6768_v29 = vsel %vm14415_vm5, %v11427_v43, %v6767_v51  ;;  %v12524_v43 = vld [vmem:[%s12889_s27 + $0xfc] sm:$0xff] }
 0x42e   : > { %v6787_v59 = vsel %vm14415_vm5, %v6785_v2, %v6786_v35  ;;  %v6802_v2 = vrot.slane %v12524_v43, 5  ;;  %v6497_v35 = vld [vmem:[%s12889_s27 + $0xd8] sm:$0xee] }
 0x431   : > { %v6177_v5 = vpop.f32.mrf.mxu2  ;;  %v6002_v34 = vpop.f32.mrf.mxu0 }
 0x432   : > { %v6266_v28 = vpop.f32.mrf.mxu3  ;;  %v6178_v19 = vadd.f32 %v6177_v5, %v6089_v53  ;;  %v6091_v30 = vpop.f32.mrf.mxu1  ;;  %v6003_v48 = vadd.f32 %v6002_v34, %v14142_v6  ;;  %v12281_v6 = vld [vmem:[%s16219_s1 + $0x530] sm:$0xff] }
 0x433   : > { %8622 = vmatpush.bf16.msrb.mxu0 %v12281_v6  ;;  %v12289_v53 = vld [vmem:[%s16219_s1 + $0x570] sm:$0xff] }
 0x434   : > { %v14465_v41 = vadd.f32 %v6266_v28, %v6178_v19  ;;  %v6092_v22 = vadd.f32 %v6091_v30, %v6003_v48  ;;  %6317 = vmatmul.bf16.vlgmr.msra.gmra.mxu0 %v10589_v50  ;;  %v11988_v5 = vld [vmem:[%s12889_s27 + $0xac] sm:$0xf0]  ;;  %v7453_v28 = vunpack.c.l.b16 %v6768_v29  ;;  %v7454_v50 = vunpack.c.h.b16 %v6768_v29  ;;  %8711 = vmatpush.bf16.msrb.mxu1 %v12289_v53 }
 0x435   : > { %6406 = vmatmul.bf16.vlgmr.msra.gmra.mxu1 %v10593_v46  ;;  %v7463_v46 = vunpack.c.h.b16 %v6787_v59  ;;  %v10625_v30 = vor.u32 %v11983_v17, %v10622_v32  ;;  %v10629_v48 = vor.u32 %v11988_v5, %v10628_v0 }
 0x436   : > { %8451 = vmatmul.bf16.vlgmr.msra.gmra.mxu2 %v14429_v18 }
 0x437   : > { %8540 = vmatmul.bf16.vlgmr.msra.gmra.mxu3 %v14431_v10  ;;  %v7733_v7 = vpack.c.b16 %v7463_v46, %v7454_v50  ;;  %v10664_v50 = vld [vmem:[%s12889_s27 + $0xf8] sm:$0xf]  ;;  %v11997_v46 = vld [vmem:[%s12889_s27 + $0x118] sm:$0xf0] }
 0x439   : > { %v6180_v18 = vpop.f32.mrf.mxu2  ;;  %v6004_v20 = vpop.f32.mrf.mxu0 }
 0x43a   : > { %v6269_v10 = vpop.f32.mrf.mxu3  ;;  %v6181_v14 = vadd.f32 %v6180_v18, %v6092_v22  ;;  %v6093_v62 = vpop.f32.mrf.mxu1  ;;  %v6005_v42 = vadd.f32 %v6004_v20, %v14156_v40  ;;  %v7462_v40 = vunpack.c.l.b16 %v6787_v59  ;;  %v12525_v20 = vld [vmem:[%s12889_s27 + $0x120] sm:$0x11] }
 0x43c   : > { %v14482_v16 = vadd.f32 %v6269_v10, %v6181_v14  ;;  %v6094_v39 = vadd.f32 %v6093_v62, %v6005_v42  ;;  %v7732_v22 = vpack.c.b16 %v7462_v40, %v7453_v28  ;;  %v11432_v10 = vrot.slane %v6497_v35, 9  ;;  %v11992_v28 = vld [vmem:[%s12889_s27 + $0xf4] sm:$0xf]  ;;  %v10658_v40 = vld [vmem:[%s12889_s27 + $0x114] sm:$0xf0] }
 0x43d   : > { %v6820_v14 = vrot.slane %v6802_v2, 4  ;;  %v6821_v62 = vrot.slane %v12525_v20, 5  ;;  %v6502_v20 = vld [vmem:[%s12889_s27 + $0x144] sm:$0xee] }
 0x43e   : > { %v6803_v17 = vsel %vm14415_vm5, %v11432_v10, %v6802_v2 }
 0x43f   : > { %v6822_v32 = vsel %vm14415_vm5, %v6820_v14, %v6821_v62 }
 0x441   : > { %v6182_v19 = vpop.f32.mrf.mxu2  ;;  %v6007_v51 = vpop.f32.mrf.mxu0 }
 0x442   : > { %v6271_v34 = vpop.f32.mrf.mxu3  ;;  %v6183_v33 = vadd.f32 %v6182_v19, %v6094_v39  ;;  %v6096_v9 = vpop.f32.mrf.mxu1  ;;  %v6008_v6 = vadd.f32 %v6007_v51, %v14159_v8  ;;  %v7471_v19 = vunpack.c.l.b16 %v6803_v17  ;;  %v10661_v51 = vor.u32 %v11992_v28, %v10658_v40 }
 0x444   : > { %v14493_v37 = vadd.f32 %v6271_v34, %v6183_v33  ;;  %v6097_v18 = vadd.f32 %v6096_v9, %v6008_v6  ;;  %6322 = vmatmul.bf16.gmra.mxu0 %v10625_v30  ;;  %v7480_v34 = vunpack.c.l.b16 %v6822_v32  ;;  %v7472_v30 = vunpack.c.h.b16 %v6803_v17 }
 0x445   : > { %6411 = vmatmul.bf16.gmra.mxu1 %v10629_v48  ;;  %v7481_v48 = vunpack.c.h.b16 %v6822_v32  ;;  %v10665_v9 = vor.u32 %v11997_v46, %v10664_v50 }
 0x446   : > { %8456 = vmatmul.bf16.gmra.mxu2 %v7732_v22  ;;  %v7741_v43 = vpack.c.b16 %v7480_v34, %v7471_v19  ;;  %v12288_v34 = vld [vmem:[%s16219_s1 + $0x568] sm:$0xff] }
 0x447   : > { %8545 = vmatmul.bf16.gmra.mxu3 %v7733_v7  ;;  %v7742_v2 = vpack.c.b16 %v7481_v48, %v7472_v30  ;;  %v12001_v48 = vld [vmem:[%s12889_s27 + $0x160] sm:$0xf]  ;;  %8712 = vmatpush.bf16.msrb.mxu1 %v12288_v34 }
 0x449   : > { %v6185_v42 = vpop.f32.mrf.mxu2  ;;  %v6009_v59 = vpop.f32.mrf.mxu0 }
 0x44a   : > { %v6274_v8 = vpop.f32.mrf.mxu3  ;;  %v6186_v29 = vadd.f32 %v6185_v42, %v6097_v18  ;;  %v6098_v53 = vpop.f32.mrf.mxu1  ;;  %v6010_v39 = vadd.f32 %v6009_v59, %v14170_v23  ;;  %v12526_v18 = vld [vmem:[%s12889_s27 + $0x168] sm:$0xff] }
 0x44b   : > { %v6837_v10 = vrot.slane %v12526_v18, 5  ;;  %v12296_v42 = vld [vmem:[%s16219_s1 + $0x5a8] sm:$0xff] }
 0x44c   : > { %v14502_v0 = vadd.f32 %v6274_v8, %v6186_v29  ;;  %v6099_v5 = vadd.f32 %v6098_v53, %v6010_v39  ;;  %v12280_v8 = vld [vmem:[%s16219_s1 + $0x528] sm:$0xff]  ;;  %v11437_v29 = vrot.slane %v6502_v20, 9  ;;  %8801 = vmatpush.bf16.msrb.mxu2 %v12296_v42 }
 0x44d   : > { %v12527_v59 = vld [vmem:[%s12889_s27 + $0x18c] sm:$0x11]  ;;  %8623 = vmatpush.bf16.msrb.mxu0 %v12280_v8 }
 0x44e   : > { %v6856_v53 = vrot.slane %v12527_v59, 5  ;;  %v6838_v50 = vsel %vm14415_vm5, %v11437_v29, %v6837_v10  ;;  %v12528_v29 = vld [vmem:[%s12889_s27 + $0x1d4] sm:$0xff] }
 0x451   : > { %v6187_v23 = vpop.f32.mrf.mxu2  ;;  %v6012_v7 = vpop.f32.mrf.mxu0 }
 0x452   : > { %v6276_v33 = vpop.f32.mrf.mxu3  ;;  %v6188_v22 = vadd.f32 %v6187_v23, %v6099_v5  ;;  %v6101_v6 = vpop.f32.mrf.mxu1  ;;  %v6013_v35 = vadd.f32 %v6012_v7, %v14179_v60  ;;  %v6855_v60 = vrot.slane %v6837_v10, 4  ;;  %v10694_v23 = vld [vmem:[%s12889_s27 + $0x180] sm:$0xf0] }
 0x454   : > { %v14510_v14 = vadd.f32 %v6276_v33, %v6188_v22  ;;  %v6102_v62 = vadd.f32 %v6101_v6, %v6013_v35  ;;  %6327 = vmatmul.bf16.gmra.mxu0 %v10661_v51  ;;  %v6857_v46 = vsel %vm14415_vm5, %v6855_v60, %v6856_v53  ;;  %v10700_v33 = vld [vmem:[%s12889_s27 + $0x164] sm:$0xf]  ;;  %v12006_v51 = vld [vmem:[%s12889_s27 + $0x184] sm:$0xf0]  ;;  %v7490_v22 = vunpack.c.h.b16 %v6838_v50  ;;  %v6507_v53 = vld [vmem:[%s12889_s27 + $0x1b0] sm:$0xee] }
 0x455   : > { %6416 = vmatmul.bf16.gmra.mxu1 %v10665_v9  ;;  %v7489_v9 = vunpack.c.l.b16 %v6838_v50  ;;  %v7499_v7 = vunpack.c.h.b16 %v6857_v46  ;;  %v10701_v35 = vor.u32 %v12006_v51, %v10700_v33  ;;  %v6872_v60 = vrot.slane %v12528_v29, 5 }
 0x456   : > { %8461 = vmatmul.bf16.gmra.mxu2 %v7741_v43 }
 0x457   : > { %8550 = vmatmul.bf16.gmra.mxu3 %v7742_v2  ;;  %v10697_v2 = vor.u32 %v12001_v48, %v10694_v23  ;;  %v7751_v42 = vpack.c.b16 %v7499_v7, %v7490_v22  ;;  %v10736_v22 = vld [vmem:[%s12889_s27 + $0x1d0] sm:$0xf]  ;;  %v12015_v7 = vld [vmem:[%s12889_s27 + $0x1f0] sm:$0xf0] }
 0x459   : > { %v6190_v39 = vpop.f32.mrf.mxu2  ;;  %v6014_v5 = vpop.f32.mrf.mxu0 }
 0x45a   : > { %v6279_v17 = vpop.f32.mrf.mxu3  ;;  %v6191_v32 = vadd.f32 %v6190_v39, %v6102_v62  ;;  %v6103_v28 = vpop.f32.mrf.mxu1  ;;  %v6015_v40 = vadd.f32 %v6014_v5, %v14193_v38  ;;  %v7498_v38 = vunpack.c.l.b16 %v6857_v46  ;;  %v12529_v5 = vld [vmem:[%s12889_s27 + $0x1f8] sm:$0x11] }
 0x45c   : > { %v14525_v19 = vadd.f32 %v6279_v17, %v6191_v32  ;;  %v6104_v30 = vadd.f32 %v6103_v28, %v6015_v40  ;;  %v7750_v62 = vpack.c.b16 %v7498_v38, %v7489_v9  ;;  %v11442_v17 = vrot.slane %v6507_v53, 9  ;;  %v12010_v9 = vld [vmem:[%s12889_s27 + $0x1cc] sm:$0xf]  ;;  %v10730_v38 = vld [vmem:[%s12889_s27 + $0x1ec] sm:$0xf0] }
 0x45d   : > { %v6890_v32 = vrot.slane %v6872_v60, 4  ;;  %v6891_v28 = vrot.slane %v12529_v5, 5  ;;  %v6512_v5 = vld [vmem:[%s12889_s27 + $0x21c] sm:$0xee] }
 0x45e   : > { %v6873_v48 = vsel %vm14415_vm5, %v11442_v17, %v6872_v60 }
 0x45f   : > { %v6892_v23 = vsel %vm14415_vm5, %v6890_v32, %v6891_v28 }
 0x461   : > { %v6192_v6 = vpop.f32.mrf.mxu2  ;;  %v6017_v10 = vpop.f32.mrf.mxu0 }
 0x462   : > { %v6281_v43 = vpop.f32.mrf.mxu3  ;;  %v6193_v18 = vadd.f32 %v6192_v6, %v6104_v30  ;;  %v6106_v20 = vpop.f32.mrf.mxu1  ;;  %v6018_v8 = vadd.f32 %v6017_v10, %v14196_v55  ;;  %v7507_v6 = vunpack.c.l.b16 %v6873_v48  ;;  %v10733_v10 = vor.u32 %v12010_v9, %v10730_v38 }
 0x464   : > { %v14536_v59 = vadd.f32 %v6281_v43, %v6193_v18  ;;  %v6107_v39 = vadd.f32 %v6106_v20, %v6018_v8  ;;  %6332 = vmatmul.bf16.gmra.mxu0 %v10697_v2  ;;  %v7516_v43 = vunpack.c.l.b16 %v6892_v23  ;;  %v7508_v2 = vunpack.c.h.b16 %v6873_v48 }
 0x465   : > { %6421 = vmatmul.bf16.gmra.mxu1 %v10701_v35  ;;  %v7517_v35 = vunpack.c.h.b16 %v6892_v23  ;;  %v10737_v20 = vor.u32 %v12015_v7, %v10736_v22 }
 0x466   : > { %8466 = vmatmul.bf16.gmra.mxu2 %v7750_v62  ;;  %v7759_v29 = vpack.c.b16 %v7516_v43, %v7507_v6  ;;  %v12287_v43 = vld [vmem:[%s16219_s1 + $0x560] sm:$0xff] }
 0x467   : > { %8555 = vmatmul.bf16.gmra.mxu3 %v7751_v42  ;;  %v7760_v60 = vpack.c.b16 %v7517_v35, %v7508_v2  ;;  %v12019_v35 = vld [vmem:[%s12889_s27 + $0x238] sm:$0xf]  ;;  %8713 = vmatpush.bf16.msrb.mxu1 %v12287_v43 }
 0x469   : > { %v6195_v40 = vpop.f32.mrf.mxu2  ;;  %v6019_v46 = vpop.f32.mrf.mxu0 }
 0x46a   : > { %v6284_v55 = vpop.f32.mrf.mxu3  ;;  %v6196_v50 = vadd.f32 %v6195_v40, %v6107_v39  ;;  %v6108_v34 = vpop.f32.mrf.mxu1  ;;  %v6020_v30 = vadd.f32 %v6019_v46, %v14207_v26  ;;  %v12530_v39 = vld [vmem:[%s12889_s27 + $0x240] sm:$0xff] }
 0x46b   : > { %v6907_v17 = vrot.slane %v12530_v39, 5  ;;  %v12295_v40 = vld [vmem:[%s16219_s1 + $0x5a0] sm:$0xff] }
 0x46c   : > { %v14545_v33 = vadd.f32 %v6284_v55, %v6196_v50  ;;  %v6109_v51 = vadd.f32 %v6108_v34, %v6020_v30  ;;  %v12279_v55 = vld [vmem:[%s16219_s1 + $0x520] sm:$0xff]  ;;  %v11447_v50 = vrot.slane %v6512_v5, 9  ;;  %8802 = vmatpush.bf16.msrb.mxu2 %v12295_v40 }
 0x46d   : > { %v12531_v46 = vld [vmem:[%s12889_s27 + $0x264] sm:$0x11]  ;;  %8624 = vmatpush.bf16.msrb.mxu0 %v12279_v55 }
 0x46e   : > { %v6926_v34 = vrot.slane %v12531_v46, 5  ;;  %v6908_v22 = vsel %vm14415_vm5, %v11447_v50, %v6907_v17  ;;  %v12532_v50 = vld [vmem:[%s12889_s27 + $0x2ac] sm:$0xff] }
 0x471   : > { %v6197_v26 = vpop.f32.mrf.mxu2  ;;  %v6022_v42 = vpop.f32.mrf.mxu0 }
 0x472   : > { %v6286_v18 = vpop.f32.mrf.mxu3  ;;  %v6198_v62 = vadd.f32 %v6197_v26, %v6109_v51  ;;  %v6111_v8 = vpop.f32.mrf.mxu1  ;;  %v6023_v53 = vadd.f32 %v6022_v42, %v14216_v31  ;;  %v6925_v31 = vrot.slane %v6907_v17, 4  ;;  %v10766_v26 = vld [vmem:[%s12889_s27 + $0x258] sm:$0xf0] }
 0x474   : > { %v14553_v32 = vadd.f32 %v6286_v18, %v6198_v62  ;;  %v6112_v28 = vadd.f32 %v6111_v8, %v6023_v53  ;;  %6337 = vmatmul.bf16.gmra.mxu0 %v10733_v10  ;;  %v6927_v7 = vsel %vm14415_vm5, %v6925_v31, %v6926_v34  ;;  %v10772_v18 = vld [vmem:[%s12889_s27 + $0x23c] sm:$0xf]  ;;  %v12024_v10 = vld [vmem:[%s12889_s27 + $0x25c] sm:$0xf0]  ;;  %v7526_v62 = vunpack.c.h.b16 %v6908_v22  ;;  %v6517_v34 = vld [vmem:[%s12889_s27 + $0x288] sm:$0xee] }
 0x475   : > { %6426 = vmatmul.bf16.gmra.mxu1 %v10737_v20  ;;  %v7525_v20 = vunpack.c.l.b16 %v6908_v22  ;;  %v7535_v42 = vunpack.c.h.b16 %v6927_v7  ;;  %v10773_v53 = vor.u32 %v12024_v10, %v10772_v18  ;;  %v6942_v31 = vrot.slane %v12532_v50, 5 }
 0x476   : > { %8471 = vmatmul.bf16.gmra.mxu2 %v7759_v29 }
 0x477   : > { %8560 = vmatmul.bf16.gmra.mxu3 %v7760_v60  ;;  %v10769_v60 = vor.u32 %v12019_v35, %v10766_v26  ;;  %v7769_v40 = vpack.c.b16 %v7535_v42, %v7526_v62  ;;  %v10808_v62 = vld [vmem:[%s12889_s27 + $0x2a8] sm:$0xf]  ;;  %v12033_v42 = vld [vmem:[%s12889_s27 + $0x2c8] sm:$0xf0] }
 0x479   : > { %v6200_v30 = vpop.f32.mrf.mxu2  ;;  %v6024_v51 = vpop.f32.mrf.mxu0 }
 0x47a   : > { %v6289_v48 = vpop.f32.mrf.mxu3  ;;  %v6201_v23 = vadd.f32 %v6200_v30, %v6112_v28  ;;  %v6113_v9 = vpop.f32.mrf.mxu1  ;;  %v6025_v38 = vadd.f32 %v6024_v51, %v14230_v1  ;;  %v7534_v1 = vunpack.c.l.b16 %v6927_v7  ;;  %v12533_v51 = vld [vmem:[%s12889_s27 + $0x2d0] sm:$0x11] }
 0x47c   : > { %v14568_v6 = vadd.f32 %v6289_v48, %v6201_v23  ;;  %v6114_v2 = vadd.f32 %v6113_v9, %v6025_v38  ;;  %v7768_v28 = vpack.c.b16 %v7534_v1, %v7525_v20  ;;  %v11452_v48 = vrot.slane %v6517_v34, 9  ;;  %v12028_v20 = vld [vmem:[%s12889_s27 + $0x2a4] sm:$0xf]  ;;  %v10802_v1 = vld [vmem:[%s12889_s27 + $0x2c4] sm:$0xf0] }
 0x47d   : > { %v6960_v23 = vrot.slane %v6942_v31, 4  ;;  %v6961_v9 = vrot.slane %v12533_v51, 5  ;;  %v6522_v51 = vld [vmem:[%s12889_s27 + $0x2f4] sm:$0xee] }
 0x47e   : > { %v6943_v35 = vsel %vm14415_vm5, %v11452_v48, %v6942_v31 }
 0x47f   : > { %v6962_v26 = vsel %vm14415_vm5, %v6960_v23, %v6961_v9 }
 0x481   : > { %v6202_v8 = vpop.f32.mrf.mxu2  ;;  %v6027_v17 = vpop.f32.mrf.mxu0 }
 0x482   : > { %v6291_v29 = vpop.f32.mrf.mxu3  ;;  %v6203_v39 = vadd.f32 %v6202_v8, %v6114_v2  ;;  %v6116_v5 = vpop.f32.mrf.mxu1  ;;  %v6028_v55 = vadd.f32 %v6027_v17, %v14233_v21  ;;  %v7543_v8 = vunpack.c.l.b16 %v6943_v35  ;;  %v10805_v17 = vor.u32 %v12028_v20, %v10802_v1  ;;  %v12286_v1 = vld [vmem:[%s16219_s1 + $0x558] sm:$0xff] }
 0x483   : > { %8714 = vmatpush.bf16.msrb.mxu1 %v12286_v1 }
 0x484   : > { %v14579_v46 = vadd.f32 %v6291_v29, %v6203_v39  ;;  %v6117_v30 = vadd.f32 %v6116_v5, %v6028_v55  ;;  %6342 = vmatmul.bf16.gmra.mxu0 %v10769_v60  ;;  %v7552_v29 = vunpack.c.l.b16 %v6962_v26  ;;  %v7544_v60 = vunpack.c.h.b16 %v6943_v35 }
 0x485   : > { %6431 = vmatmul.bf16.gmra.mxu1 %v10773_v53  ;;  %v7553_v53 = vunpack.c.h.b16 %v6962_v26  ;;  %v10809_v5 = vor.u32 %v12033_v42, %v10808_v62 }
 0x486   : > { %8476 = vmatmul.bf16.gmra.mxu2 %v7768_v28  ;;  %v7777_v50 = vpack.c.b16 %v7552_v29, %v7543_v8 }
 0x487   : > { %8565 = vmatmul.bf16.gmra.mxu3 %v7769_v40  ;;  %v7778_v31 = vpack.c.b16 %v7553_v53, %v7544_v60  ;;  %v12037_v53 = vld [vmem:[%s12889_s27 + $0x310] sm:$0xf] }
 0x489   : > { %v6205_v38 = vpop.f32.mrf.mxu2  ;;  %v6029_v7 = vpop.f32.mrf.mxu0 }
 0x48a   : > { %v6294_v21 = vpop.f32.mrf.mxu3  ;;  %v6206_v22 = vadd.f32 %v6205_v38, %v6117_v30  ;;  %v6118_v43 = vpop.f32.mrf.mxu1  ;;  %v6030_v2 = vadd.f32 %v6029_v7, %v14244_v25  ;;  %v12534_v30 = vld [vmem:[%s12889_s27 + $0x318] sm:$0xff] }
 0x48b   : > { %v6977_v48 = vrot.slane %v12534_v30, 5  ;;  %v12294_v38 = vld [vmem:[%s16219_s1 + $0x598] sm:$0xff] }
 0x48c   : > { %v14588_v18 = vadd.f32 %v6294_v21, %v6206_v22  ;;  %v6119_v10 = vadd.f32 %v6118_v43, %v6030_v2  ;;  %v12278_v21 = vld [vmem:[%s16219_s1 + $0x518] sm:$0xff]  ;;  %v11457_v22 = vrot.slane %v6522_v51, 9  ;;  %8803 = vmatpush.bf16.msrb.mxu2 %v12294_v38 }
 0x48d   : > { %v12535_v7 = vld [vmem:[%s12889_s27 + $0x33c] sm:$0x11]  ;;  %8625 = vmatpush.bf16.msrb.mxu0 %v12278_v21 }
 0x48e   : > { %v6996_v43 = vrot.slane %v12535_v7, 5  ;;  %v6978_v42 = vsel %vm14415_vm5, %v11457_v22, %v6977_v48  ;;  %v12306_v21 = vld [vmem:[%s16219_s1 + $0x5f8] sm:$0xff] }
 0x48f   : > { %8888 = vmatpush.bf16.msrb.mxu3 %v12306_v21 }
 0x491   : > { %v6207_v25 = vpop.f32.mrf.mxu2  ;;  %v6032_v40 = vpop.f32.mrf.mxu0 }
 0x492   : > { %v6296_v39 = vpop.f32.mrf.mxu3  ;;  %v6208_v28 = vadd.f32 %v6207_v25, %v6119_v10  ;;  %v6121_v55 = vpop.f32.mrf.mxu1  ;;  %v6033_v34 = vadd.f32 %v6032_v40, %v14253_v54  ;;  %v6995_v54 = vrot.slane %v6977_v48, 4  ;;  %v10838_v25 = vld [vmem:[%s12889_s27 + $0x330] sm:$0xf0]  ;;  %v7562_v40 = vunpack.c.h.b16 %v6978_v42 }
 0x494   : > { %v14596_v23 = vadd.f32 %v6296_v39, %v6208_v28  ;;  %v6122_v9 = vadd.f32 %v6121_v55, %v6033_v34  ;;  %6347 = vmatmul.bf16.gmra.mxu0 %v10805_v17  ;;  %v6997_v8 = vsel %vm14415_vm5, %v6995_v54, %v6996_v43  ;;  %v10844_v39 = vld [vmem:[%s12889_s27 + $0x314] sm:$0xf]  ;;  %v12042_v17 = vld [vmem:[%s12889_s27 + $0x334] sm:$0xf0]  ;;  %v12536_v54 = vld [vmem:[%s12889_s27 + $0x384] sm:$0xff] }
 0x495   : > { %6436 = vmatmul.bf16.gmra.mxu1 %v10809_v5  ;;  %v7561_v5 = vunpack.c.l.b16 %v6978_v42  ;;  %v7570_v28 = vunpack.c.l.b16 %v6997_v8  ;;  %v10845_v34 = vor.u32 %v12042_v17, %v10844_v39  ;;  %v7012_v7 = vrot.slane %v12536_v54, 5 }
 0x496   : > { %8481 = vmatmul.bf16.gmra.mxu2 %v7777_v50 }
 0x497   : > { %8570 = vmatmul.bf16.gmra.mxu3 %v7778_v31  ;;  %v10841_v31 = vor.u32 %v12037_v53, %v10838_v25 }
 0x499   : > { %v6210_v2 = vpop.f32.mrf.mxu2  ;;  %v6034_v10 = vpop.f32.mrf.mxu0 }
 0x49a   : > { %v6299_v35 = vpop.f32.mrf.mxu3  ;;  %v6211_v26 = vadd.f32 %v6210_v2, %v6122_v9  ;;  %v6123_v20 = vpop.f32.mrf.mxu1  ;;  %v6035_v62 = vadd.f32 %v6034_v10, %v14267_v15  ;;  %v7571_v15 = vunpack.c.h.b16 %v6997_v8  ;;  %v7786_v9 = vpack.c.b16 %v7570_v28, %v7561_v5  ;;  %v6527_v2 = vld [vmem:[%s12889_s27 + $0x360] sm:$0xee]  ;;  %v12046_v28 = vld [vmem:[%s12889_s27 + $0x37c] sm:$0xf] }
 0x49b   : > { %v7030_v10 = vrot.slane %v7012_v7, 4 }
 0x49c   : > { %v14614_v29 = vadd.f32 %v6299_v35, %v6211_v26  ;;  %v6124_v60 = vadd.f32 %v6123_v20, %v6035_v62  ;;  %v7787_v38 = vpack.c.b16 %v7571_v15, %v7562_v40  ;;  %v11462_v26 = vrot.slane %v6527_v2, 9  ;;  %v12537_v20 = vld [vmem:[%s12889_s27 + $0x3a8] sm:$0x11]  ;;  %v10874_v40 = vld [vmem:[%s12889_s27 + $0x39c] sm:$0xf0] }
 0x49d   : > { %v7031_v1 = vrot.slane %v12537_v20, 5  ;;  %v10880_v15 = vld [vmem:[%s12889_s27 + $0x380] sm:$0xf]  ;;  %v6532_v20 = vld [vmem:[%s12889_s27 + $0x3cc] sm:$0xee] }
 0x49e   : > { %v7013_v25 = vsel %vm14415_vm5, %v11462_v26, %v7012_v7 }
 0x49f   : > { %v7032_v39 = vsel %vm14415_vm5, %v7030_v10, %v7031_v1 }
 0x4a1   : > { %v6212_v55 = vpop.f32.mrf.mxu2  ;;  %v6037_v48 = vpop.f32.mrf.mxu0 }
 0x4a2   : > { %v6301_v50 = vpop.f32.mrf.mxu3  ;;  %v6213_v30 = vadd.f32 %v6212_v55, %v6124_v60  ;;  %v6126_v51 = vpop.f32.mrf.mxu1  ;;  %v6038_v22 = vadd.f32 %v6037_v48, %v14273_v12  ;;  %v12051_v55 = vld [vmem:[%s12889_s27 + $0x3a0] sm:$0xf0] }
 0x4a4   : > { %v14625_v43 = vadd.f32 %v6301_v50, %v6213_v30  ;;  %v6127_v35 = vadd.f32 %v6126_v51, %v6038_v22  ;;  %6352 = vmatmul.bf16.gmra.mxu0 %v10841_v31  ;;  %v7579_v50 = vunpack.c.l.b16 %v7013_v25  ;;  %v7588_v31 = vunpack.c.l.b16 %v7032_v39 }
 0x4a5   : > { %6441 = vmatmul.bf16.gmra.mxu1 %v10845_v34  ;;  %v7580_v34 = vunpack.c.h.b16 %v7013_v25  ;;  %v7589_v30 = vunpack.c.h.b16 %v7032_v39  ;;  %v10877_v51 = vor.u32 %v12046_v28, %v10874_v40  ;;  %v12285_v40 = vld [vmem:[%s16219_s1 + $0x550] sm:$0xff] }
 0x4a6   : > { %8486 = vmatmul.bf16.gmra.mxu2 %v7786_v9  ;;  %v10881_v9 = vor.u32 %v12051_v55, %v10880_v15  ;;  %v7795_v54 = vpack.c.b16 %v7588_v31, %v7579_v50  ;;  %8715 = vmatpush.bf16.msrb.mxu1 %v12285_v40 }
 0x4a7   : > { %8575 = vmatmul.bf16.gmra.mxu3 %v7787_v38  ;;  %v7796_v7 = vpack.c.b16 %v7589_v30, %v7580_v34  ;;  %v12055_v34 = vld [vmem:[%s12889_s27 + $0x3e8] sm:$0xf]  ;;  %v10910_v30 = vld [vmem:[%s12889_s27 + $0x408] sm:$0xf0] }
 0x4a9   : > { %v6215_v12 = vpop.f32.mrf.mxu2  ;;  %v6039_v8 = vpop.f32.mrf.mxu0 }
 0x4aa   : > { %v6304_v62 = vpop.f32.mrf.mxu3  ;;  %v6216_v42 = vadd.f32 %v6215_v12, %v6127_v35  ;;  %v6128_v60 = vpop.f32.mrf.mxu1  ;;  %v6040_v53 = vadd.f32 %v6039_v8, %v14284_v11  ;;  %v12538_v35 = vld [vmem:[%s12889_s27 + $0x3f0] sm:$0xff] }
 0x4ab   : > { %v7047_v26 = vrot.slane %v12538_v35, 5  ;;  %v12293_v12 = vld [vmem:[%s16219_s1 + $0x590] sm:$0xff] }
 0x4ac   : > { %v14634_v17 = vadd.f32 %v6304_v62, %v6216_v42  ;;  %v6129_v5 = vadd.f32 %v6128_v60, %v6040_v53  ;;  %v12277_v62 = vld [vmem:[%s16219_s1 + $0x510] sm:$0xff]  ;;  %8804 = vmatpush.bf16.msrb.mxu2 %v12293_v12 }
 0x4ad   : > { %v7065_v42 = vrot.slane %v7047_v26, 4  ;;  %v12539_v8 = vld [vmem:[%s12889_s27 + $0x414] sm:$0x11]  ;;  %8626 = vmatpush.bf16.msrb.mxu0 %v12277_v62 }
 0x4ae   : > { %v7066_v60 = vrot.slane %v12539_v8, 5  ;;  %v12305_v62 = vld [vmem:[%s16219_s1 + $0x5f0] sm:$0xff] }
 0x4af   : > { %8889 = vmatpush.bf16.msrb.mxu3 %v12305_v62 }
 0x4b0   : > { %v7067_v50 = vsel %vm14415_vm5, %v7065_v42, %v7066_v60  ;;  %v12540_v42 = vld [vmem:[%s12889_s27 + $0x45c] sm:$0xff] }
 0x4b1   : > { %v6217_v11 = vpop.f32.mrf.mxu2  ;;  %v6318_v21 = vpop.f32.mrf.mxu0  ;;  %v7082_v8 = vrot.slane %v12540_v42, 5  ;;  %v6537_v60 = vld [vmem:[%s12889_s27 + $0x438] sm:$0xee] }
 0x4b2   : > { %v6306_v48 = vpop.f32.mrf.mxu3  ;;  %v6218_v38 = vadd.f32 %v6217_v11, %v6129_v5  ;;  %v6407_v22 = vpop.f32.mrf.mxu1  ;;  %v6319_v2 = vadd.f32 %v6318_v21, %v14293_v27  ;;  %v11467_v27 = vrot.slane %v6532_v20, 9  ;;  %v10916_v11 = vld [vmem:[%s12889_s27 + $0x3ec] sm:$0xf]  ;;  %v7607_v21 = vunpack.c.h.b16 %v7067_v50 }
 0x4b4   : > { %v14642_v10 = vadd.f32 %v6306_v48, %v6218_v38  ;;  %v14645_v1 = vadd.f32 %v6407_v22, %v6319_v2  ;;  %6357 = vmatmul.bf16.gmra.mxu0 %v10877_v51  ;;  %v7048_v55 = vsel %vm14415_vm5, %v11467_v27, %v7047_v26  ;;  %v12060_v48 = vld [vmem:[%s12889_s27 + $0x40c] sm:$0xf0] }
 0x4b5   : > { %6446 = vmatmul.bf16.gmra.mxu1 %v10881_v9  ;;  %v7597_v51 = vunpack.c.l.b16 %v7048_v55  ;;  %v7606_v9 = vunpack.c.l.b16 %v7067_v50  ;;  %v7598_v38 = vunpack.c.h.b16 %v7048_v55 }
 0x4b6   : > { %8491 = vmatmul.bf16.gmra.mxu2 %v7795_v54  ;;  %v10913_v54 = vor.u32 %v12055_v34, %v10910_v30 }
 0x4b7   : > { %8580 = vmatmul.bf16.gmra.mxu3 %v7796_v7  ;;  %v10917_v7 = vor.u32 %v12060_v48, %v10916_v11  ;;  %v7804_v20 = vpack.c.b16 %v7606_v9, %v7597_v51  ;;  %v7805_v12 = vpack.c.b16 %v7607_v21, %v7598_v38  ;;  %v12064_v9 = vld [vmem:[%s12889_s27 + $0x454] sm:$0xf]  ;;  %v10946_v38 = vld [vmem:[%s12889_s27 + $0x474] sm:$0xf0] }
 0x4b8   : > { %v10952_v21 = vld [vmem:[%s12889_s27 + $0x458] sm:$0xf] }
 0x4b9   : > { %v8452_v53 = vpop.f32.mrf.mxu2  ;;  %v6320_v5 = vpop.f32.mrf.mxu0 }
 0x4ba   : > { %v8541_v25 = vpop.f32.mrf.mxu3  ;;  %v6409_v28 = vpop.f32.mrf.mxu1  ;;  %v6321_v15 = vadd.f32 %v6320_v5, %v14307_v61  ;;  %v7100_v5 = vrot.slane %v7082_v8, 4 }
 0x4bb   : > { %v14654_v39 = vadd.f32 %v8541_v25, %v8452_v53  ;;  %v11472_v25 = vrot.slane %v6537_v60, 9 }
 0x4bc   : > { %v14664_v31 = vadd.f32 %v6409_v28, %v6321_v15  ;;  %v12541_v28 = vld [vmem:[%s12889_s27 + $0x480] sm:$0x11] }
 0x4bd   : > { %v7101_v40 = vrot.slane %v12541_v28, 5  ;;  %v7083_v11 = vsel %vm14415_vm5, %v11472_v25, %v7082_v8 }
 0x4bf   : > { %v7102_v48 = vsel %vm14415_vm5, %v7100_v5, %v7101_v40  ;;  %v12542_v5 = vld [vmem:[%s12889_s27 + $0x4c8] sm:$0xff] }
 0x4c0   : > { %v7117_v28 = vrot.slane %v12542_v5, 5  ;;  %v6542_v40 = vld [vmem:[%s12889_s27 + $0x4a4] sm:$0xee] }
 0x4c1   : > { %v8454_v61 = vpop.f32.mrf.mxu2  ;;  %v6323_v35 = vpop.f32.mrf.mxu0 }
 0x4c2   : > { %v8543_v22 = vpop.f32.mrf.mxu3  ;;  %v6412_v26 = vpop.f32.mrf.mxu1  ;;  %v6324_v27 = vadd.f32 %v6323_v35, %v14313_v63  ;;  %v7625_v35 = vunpack.c.h.b16 %v7102_v48 }
 0x4c3   : > { %v14670_v2 = vadd.f32 %v8543_v22, %v8454_v61  ;;  %v12069_v61 = vld [vmem:[%s12889_s27 + $0x478] sm:$0xf0]  ;;  %v7615_v22 = vunpack.c.l.b16 %v7083_v11 }
 0x4c4   : > { %v14678_v53 = vadd.f32 %v6412_v26, %v6324_v27  ;;  %6362 = vmatmul.bf16.gmra.mxu0 %v10913_v54  ;;  %v7624_v54 = vunpack.c.l.b16 %v7102_v48 }
 0x4c5   : > { %6451 = vmatmul.bf16.gmra.mxu1 %v10917_v7  ;;  %v7616_v7 = vunpack.c.h.b16 %v7083_v11 }
 0x4c6   : > { %8496 = vmatmul.bf16.gmra.mxu2 %v7804_v20  ;;  %v10949_v20 = vor.u32 %v12064_v9, %v10946_v38  ;;  %v7813_v8 = vpack.c.b16 %v7624_v54, %v7615_v22  ;;  %v12284_v22 = vld [vmem:[%s16219_s1 + $0x548] sm:$0xff] }
 0x4c7   : > { %8585 = vmatmul.bf16.gmra.mxu3 %v7805_v12  ;;  %v10953_v12 = vor.u32 %v12069_v61, %v10952_v21  ;;  %v7814_v60 = vpack.c.b16 %v7625_v35, %v7616_v7  ;;  %8716 = vmatpush.bf16.msrb.mxu1 %v12284_v22 }
 0x4c9   : > { %v8457_v15 = vpop.f32.mrf.mxu2  ;;  %v6325_v50 = vpop.f32.mrf.mxu0 }
 0x4ca   : > { %v8546_v63 = vpop.f32.mrf.mxu3  ;;  %v6414_v34 = vpop.f32.mrf.mxu1  ;;  %v6326_v30 = vadd.f32 %v6325_v50, %v14324_v57  ;;  %v12276_v50 = vld [vmem:[%s16219_s1 + $0x508] sm:$0xff] }
 0x4cb   : > { %v14681_v55 = vadd.f32 %v8546_v63, %v8457_v15  ;;  %v12292_v63 = vld [vmem:[%s16219_s1 + $0x588] sm:$0xff]  ;;  %8627 = vmatpush.bf16.msrb.mxu0 %v12276_v50 }
 0x4cc   : > { %v14688_v51 = vadd.f32 %v6414_v34, %v6326_v30  ;;  %v11477_v34 = vrot.slane %v6542_v40, 9  ;;  %v7135_v30 = vrot.slane %v7117_v28, 4  ;;  %8805 = vmatpush.bf16.msrb.mxu2 %v12292_v63 }
 0x4ce   : > { %v7118_v7 = vsel %vm14415_vm5, %v11477_v34, %v7117_v28 }
 0x4d1   : > { %v8459_v26 = vpop.f32.mrf.mxu2  ;;  %v6328_v27 = vpop.f32.mrf.mxu0 }
 0x4d2   : > { %v8548_v57 = vpop.f32.mrf.mxu3  ;;  %v6417_v42 = vpop.f32.mrf.mxu1  ;;  %v6329_v25 = vadd.f32 %v6328_v27, %v14333_v45  ;;  %v12543_v45 = vld [vmem:[%s12889_s27 + $0x4ec] sm:$0x11]  ;;  %v12078_v27 = vld [vmem:[%s12889_s27 + $0x4e4] sm:$0xf0] }
 0x4d3   : > { %v14694_v62 = vadd.f32 %v8548_v57, %v8459_v26  ;;  %v7136_v11 = vrot.slane %v12543_v45, 5  ;;  %v12073_v57 = vld [vmem:[%s12889_s27 + $0x4c0] sm:$0xf] }
 0x4d4   : > { %v14699_v15 = vadd.f32 %v6417_v42, %v6329_v25  ;;  %6367 = vmatmul.bf16.gmra.mxu0 %v10949_v20  ;;  %v10982_v20 = vld [vmem:[%s12889_s27 + $0x4e0] sm:$0xf0]  ;;  %v7633_v42 = vunpack.c.l.b16 %v7118_v7 }
 0x4d5   : > { %6456 = vmatmul.bf16.gmra.mxu1 %v10953_v12  ;;  %v7137_v35 = vsel %vm14415_vm5, %v7135_v30, %v7136_v11  ;;  %v10988_v12 = vld [vmem:[%s12889_s27 + $0x4c4] sm:$0xf]  ;;  %v10985_v40 = vor.u32 %v12073_v57, %v10982_v20  ;;  %v12304_v11 = vld [vmem:[%s16219_s1 + $0x5e8] sm:$0xff] }
 0x4d6   : > { %8501 = vmatmul.bf16.gmra.mxu2 %v7813_v8  ;;  %v7642_v8 = vunpack.c.l.b16 %v7137_v35  ;;  %v7643_v25 = vunpack.c.h.b16 %v7137_v35  ;;  %v10989_v28 = vor.u32 %v12078_v27, %v10988_v12  ;;  %8890 = vmatpush.bf16.msrb.mxu3 %v12304_v11  ;;  %v12545_v35 = vld [vmem:[%s12889_s27 + $0x558] sm:$0x11] }
 0x4d7   : > { %8590 = vmatmul.bf16.gmra.mxu3 %v7814_v60  ;;  %v7634_v60 = vunpack.c.h.b16 %v7118_v7  ;;  %v7171_v57 = vrot.slane %v12545_v35, 5 }
 0x4d8   : > { %v7822_v30 = vpack.c.b16 %v7642_v8, %v7633_v42 }
 0x4d9   : > { %v8462_v48 = vpop.f32.mrf.mxu2  ;;  %v6330_v21 = vpop.f32.mrf.mxu0  ;;  %v7823_v45 = vpack.c.b16 %v7643_v25, %v7634_v60 }
 0x4da   : > { %v8551_v9 = vpop.f32.mrf.mxu3  ;;  %v6419_v61 = vpop.f32.mrf.mxu1  ;;  %v6331_v54 = vadd.f32 %v6330_v21, %v14347_v13 }
 0x4db   : > { %v14708_v38 = vadd.f32 %v8551_v9, %v8462_v48  ;;  %v12544_v9 = vld [vmem:[%s12889_s27 + $0x534] sm:$0xff] }
 0x4dc   : > { %v14718_v26 = vadd.f32 %v6419_v61, %v6331_v54  ;;  %v7152_v21 = vrot.slane %v12544_v9, 5  ;;  %v6547_v61 = vld [vmem:[%s12889_s27 + $0x510] sm:$0xee] }
 0x4dd   : > { %v11482_v54 = vrot.slane %v6547_v61, 9 }
 0x4de   : > { %16240 = vst [vmem:[#allocation5_spill] sm:$0xff] %v14718_v26  ;;  %v7170_v7 = vrot.slane %v7152_v21, 4 }
 0x4df   : > { %v7153_v60 = vsel %vm14415_vm5, %v11482_v54, %v7152_v21 }
 0x4e0   : > { %v7172_v25 = vsel %vm14415_vm5, %v7170_v7, %v7171_v57 }
 0x4e1   : > { %v8464_v13 = vpop.f32.mrf.mxu2  ;;  %v6333_v50 = vpop.f32.mrf.mxu0  ;;  %v7661_v11 = vunpack.c.h.b16 %v7172_v25 }
 0x4e2   : > { %v8553_v5 = vpop.f32.mrf.mxu3  ;;  %v6422_v34 = vpop.f32.mrf.mxu1  ;;  %v6334_v48 = vadd.f32 %v6333_v50, %v14353_v36  ;;  %v12087_v50 = vld [vmem:[%s12889_s27 + $0x550] sm:$0xf0] }
 0x4e3   : > { %v14724_v63 = vadd.f32 %v8553_v5, %v8464_v13  ;;  %v12082_v5 = vld [vmem:[%s12889_s27 + $0x52c] sm:$0xf] }
 0x4e4   : > { %v14732_v22 = vadd.f32 %v6422_v34, %v6334_v48  ;;  %6372 = vmatmul.bf16.gmra.mxu0 %v10985_v40  ;;  %v11018_v40 = vld [vmem:[%s12889_s27 + $0x54c] sm:$0xf0]  ;;  %v7651_v34 = vunpack.c.l.b16 %v7153_v60 }
 0x4e5   : > { %6461 = vmatmul.bf16.gmra.mxu1 %v10989_v28  ;;  %v11024_v28 = vld [vmem:[%s12889_s27 + $0x530] sm:$0xf]  ;;  %v11021_v9 = vor.u32 %v12082_v5, %v11018_v40 }
 0x4e6   : > { %16241 = vst [vmem:[#allocation6_spill] sm:$0xff] %v14732_v22  ;;  %8506 = vmatmul.bf16.gmra.mxu2 %v7822_v30  ;;  %v7660_v30 = vunpack.c.l.b16 %v7172_v25  ;;  %v11025_v61 = vor.u32 %v12087_v50, %v11024_v28  ;;  %v12275_v25 = vld [vmem:[%s16219_s1 + $0x500] sm:$0xff] }
 0x4e7   : > { %8595 = vmatmul.bf16.gmra.mxu3 %v7823_v45  ;;  %v7652_v45 = vunpack.c.h.b16 %v7153_v60  ;;  %v12291_v60 = vld [vmem:[%s16219_s1 + $0x580] sm:$0xff]  ;;  %8628 = vmatpush.bf16.msrb.mxu0 %v12275_v25 }
 0x4e8   : > { %v7831_v35 = vpack.c.b16 %v7660_v30, %v7651_v34  ;;  %8806 = vmatpush.bf16.msrb.mxu2 %v12291_v60 }
 0x4e9   : > { %v8467_v20 = vpop.f32.mrf.mxu2  ;;  %v6335_v27 = vpop.f32.mrf.mxu0  ;;  %v7832_v57 = vpack.c.b16 %v7661_v11, %v7652_v45 }
 0x4ea   : > { %v8556_v36 = vpop.f32.mrf.mxu3  ;;  %v6424_v42 = vpop.f32.mrf.mxu1  ;;  %v6336_v8 = vadd.f32 %v6335_v27, %v14364_v44 }
 0x4eb   : > { %v14735_v12 = vadd.f32 %v8556_v36, %v8467_v20  ;;  %v12546_v36 = vld [vmem:[%s12889_s27 + $0x5a0] sm:$0xff] }
 0x4ec   : > { %v14742_v13 = vadd.f32 %v6424_v42, %v6336_v8  ;;  %v7187_v27 = vrot.slane %v12546_v36, 5  ;;  %v6552_v42 = vld [vmem:[%s12889_s27 + $0x57c] sm:$0xee] }
 0x4ed   : > { %v11487_v5 = vrot.slane %v6552_v42, 9 }
 0x4ee   : > { %16242 = vst [vmem:[#allocation7_spill] sm:$0xff] %v14742_v13  ;;  %v7205_v40 = vrot.slane %v7187_v27, 4 }
 0x4f1   : > { %v8469_v48 = vpop.f32.mrf.mxu2  ;;  %v6338_v54 = vpop.f32.mrf.mxu0 }
 0x4f2   : > { %v8558_v44 = vpop.f32.mrf.mxu3  ;;  %v6427_v7 = vpop.f32.mrf.mxu1  ;;  %v6339_v20 = vadd.f32 %v6338_v54, %v14373_v52  ;;  %v12547_v52 = vld [vmem:[%s12889_s27 + $0x5c4] sm:$0x11] }
 0x4f3   : > { %v14748_v21 = vadd.f32 %v8558_v44, %v8469_v48  ;;  %v7206_v28 = vrot.slane %v12547_v52, 5  ;;  %v12283_v48 = vld [vmem:[%s16219_s1 + $0x540] sm:$0xff] }
 0x4f4   : > { %v14753_v8 = vadd.f32 %v6427_v7, %v6339_v20  ;;  %6377 = vmatmul.bf16.gmra.mxu0 %v11021_v9  ;;  %v7188_v9 = vsel %vm14415_vm5, %v11487_v5, %v7187_v27  ;;  %8717 = vmatpush.bf16.msrb.mxu1 %v12283_v48  ;;  %v12091_v7 = vld [vmem:[%s12889_s27 + $0x598] sm:$0xf]  ;;  %v12096_v20 = vld [vmem:[%s12889_s27 + $0x5bc] sm:$0xf0]  ;;  %v12548_v5 = vld [vmem:[%s12889_s27 + $0x60c] sm:$0xff] }
 0x4f5   : > { %6466 = vmatmul.bf16.gmra.mxu1 %v11025_v61  ;;  %v7207_v61 = vsel %vm14415_vm5, %v7205_v40, %v7206_v28  ;;  %v7669_v36 = vunpack.c.l.b16 %v7188_v9  ;;  %v7670_v60 = vunpack.c.h.b16 %v7188_v9  ;;  %v12303_v9 = vld [vmem:[%s16219_s1 + $0x5e0] sm:$0xff] }
 0x4f6   : > { %16243 = vst [vmem:[#allocation8_spill] sm:$0xff] %v14753_v8  ;;  %8511 = vmatmul.bf16.gmra.mxu2 %v7831_v35  ;;  %v11054_v35 = vld [vmem:[%s12889_s27 + $0x5b8] sm:$0xf0]  ;;  %v7678_v42 = vunpack.c.l.b16 %v7207_v61  ;;  %v7679_v25 = vunpack.c.h.b16 %v7207_v61  ;;  %8891 = vmatpush.bf16.msrb.mxu3 %v12303_v9 }
 0x4f7   : > { %8600 = vmatmul.bf16.gmra.mxu3 %v7832_v57  ;;  %v11060_v57 = vld [vmem:[%s12889_s27 + $0x59c] sm:$0xf] }
 0x4f8   : > { %v11061_v27 = vor.u32 %v12096_v20, %v11060_v57  ;;  %v7841_v48 = vpack.c.b16 %v7679_v25, %v7670_v60  ;;  %v12549_v20 = vld [vmem:[%s12889_s27 + $0x630] sm:$0x11] }
 0x4f9   : > { %v8472_v50 = vpop.f32.mrf.mxu2  ;;  %v6340_v45 = vpop.f32.mrf.mxu0 }
 0x4fa   : > { %v8561_v34 = vpop.f32.mrf.mxu3  ;;  %v6429_v11 = vpop.f32.mrf.mxu1  ;;  %v6341_v44 = vadd.f32 %v6340_v45, %v14390_v56 }
 0x4fb   : > { %v14762_v30 = vadd.f32 %v8561_v34, %v8472_v50  ;;  %v11057_v50 = vor.u32 %v12091_v7, %v11054_v35  ;;  %v7222_v34 = vrot.slane %v12548_v5, 5 }
 0x4fc   : > { %v14772_v54 = vadd.f32 %v6429_v11, %v6341_v44  ;;  %v7840_v11 = vpack.c.b16 %v7678_v42, %v7669_v36  ;;  %v6557_v44 = vld [vmem:[%s12889_s27 + $0x5e8] sm:$0xee]  ;;  %v12302_v36 = vld [vmem:[%s16219_s1 + $0x5d8] sm:$0xff] }
 0x4fd   : > { %v11492_v35 = vrot.slane %v6557_v44, 9  ;;  %v7240_v57 = vrot.slane %v7222_v34, 4  ;;  %v12550_v42 = vld [vmem:[%s12889_s27 + $0x2c] sm:$0xff]  ;;  %8892 = vmatpush.bf16.msrb.mxu3 %v12302_v36 }
 0x4fe   : > { %16244 = vst [vmem:[#allocation9_spill] sm:$0xff] %v14772_v54  ;;  %v6736_v60 = vrot.slane %v12550_v42, 5  ;;  %v11096_v42 = vld [vmem:[%s12889_s27 + $0x608] sm:$0xf] }
 0x501   : > { %v8474_v56 = vpop.f32.mrf.mxu2  ;;  %v6343_v28 = vpop.f32.mrf.mxu0 }
 0x502   : > { %v8563_v52 = vpop.f32.mrf.mxu3  ;;  %v6432_v45 = vpop.f32.mrf.mxu1  ;;  %v6344_v61 = vadd.f32 %v6343_v28, %v14402_v3 }
 0x503   : > { %v14779_v40 = vadd.f32 %v8563_v52, %v8474_v56  ;;  %v7241_v56 = vrot.slane %v12549_v20, 5  ;;  %v7223_v52 = vsel %vm14415_vm5, %v11492_v35, %v7222_v34  ;;  %v11090_v20 = vld [vmem:[%s12889_s27 + $0x624] sm:$0xf0] }
 0x504   : > { %v14786_v7 = vadd.f32 %v6432_v45, %v6344_v61  ;;  %6382 = vmatmul.bf16.gmra.mxu0 %v11057_v50  ;;  %v7687_v34 = vunpack.c.l.b16 %v7223_v52  ;;  %v6753_v61 = vrot.slane %v6736_v60, 4 }
 0x505   : > { %6471 = vmatmul.bf16.gmra.mxu1 %v11061_v27  ;;  %v7242_v50 = vsel %vm14415_vm5, %v7240_v57, %v7241_v56  ;;  %v12100_v57 = vld [vmem:[%s12889_s27 + $0x604] sm:$0xf]  ;;  %v7688_v56 = vunpack.c.h.b16 %v7223_v52 }
 0x506   : > { %16245 = vst [vmem:[#allocation10_spill] sm:$0xff] %v14786_v7  ;;  %8516 = vmatmul.bf16.gmra.mxu2 %v7840_v11  ;;  %v12301_v11 = vld [vmem:[%s16219_s1 + $0x5d0] sm:$0xff]  ;;  %v7696_v9 = vunpack.c.l.b16 %v7242_v50  ;;  %v7697_v36 = vunpack.c.h.b16 %v7242_v50  ;;  %v11093_v7 = vor.u32 %v12100_v57, %v11090_v20 }
 0x507   : > { %8605 = vmatmul.bf16.gmra.mxu3 %v7841_v48  ;;  %v12551_v48 = vld [vmem:[%s12889_s27 + $0x50] sm:$0x11] }
 0x508   : > { %v6754_v44 = vrot.slane %v12551_v48, 5  ;;  %8893 = vmatpush.bf16.msrb.mxu3 %v12301_v11  ;;  %v7849_v48 = vpack.c.b16 %v7696_v9, %v7687_v34  ;;  %v12552_v9 = vld [vmem:[%s12889_s27 + $0x678] sm:$0xff] }
 0x509   : > { %v8477_v25 = vpop.f32.mrf.mxu2  ;;  %v6345_v5 = vpop.f32.mrf.mxu0 }
 0x50a   : > { %v8566_v3 = vpop.f32.mrf.mxu3  ;;  %v6434_v28 = vpop.f32.mrf.mxu1  ;;  %v6346_v45 = vadd.f32 %v6345_v5, %v14427_v47  ;;  %v12300_v47 = vld [vmem:[%s16219_s1 + $0x5c8] sm:$0xff]  ;;  %v6755_v50 = vsel %vm14415_vm5, %v6753_v61, %v6754_v44  ;;  %v12314_v44 = vld [vmem:[%s16219_s1 + $0x638] sm:$0xff] }
 0x50b   : > { %v14797_v27 = vadd.f32 %v8566_v3, %v8477_v25  ;;  %v12105_v25 = vld [vmem:[%s12889_s27 + $0x628] sm:$0xf0]  ;;  %v7446_v57 = vunpack.c.l.b16 %v6755_v50  ;;  %8977 = vmatpush.bf16.msra.mxu0 %v12314_v44 }
 0x50c   : > { %v14804_v35 = vadd.f32 %v6434_v28, %v6346_v45  ;;  %v6488_v3 = vld [vmem:[%s12889_s27 + $0x8] sm:$0xee]  ;;  %v11097_v28 = vor.u32 %v12105_v25, %v11096_v42  ;;  %v7850_v45 = vpack.c.b16 %v7697_v36, %v7688_v56  ;;  %8894 = vmatpush.bf16.msrb.mxu3 %v12300_v47  ;;  %v7257_v42 = vrot.slane %v12552_v9, 5  ;;  %v12299_v56 = vld [vmem:[%s16219_s1 + $0x5c0] sm:$0xff]  ;;  %v6562_v36 = vld [vmem:[%s12889_s27 + $0x654] sm:$0xee] }
 0x50d   : > { %v11423_v5 = vrot.slane %v6488_v3, 9  ;;  %v11497_v61 = vrot.slane %v6562_v36, 9  ;;  %v12553_v47 = vld [vmem:[%s12889_s27 + $0x69c] sm:$0x11]  ;;  %v11126_v9 = vld [vmem:[%s12889_s27 + $0x690] sm:$0xf0] }
 0x50e   : > { %16246 = vst [vmem:[#allocation11_spill] sm:$0xff] %v14804_v35 }
 0x50f   : > { %v6737_v52 = vsel %vm14415_vm5, %v11423_v5, %v6736_v60  ;;  %v7447_v60 = vunpack.c.h.b16 %v6755_v50 }
 0x510   : > { %v7437_v3 = vunpack.c.l.b16 %v6737_v52  ;;  %v7438_v20 = vunpack.c.h.b16 %v6737_v52  ;;  %8895 = vmatpush.bf16.msrb.mxu3 %v12299_v56  ;;  %v12322_v52 = vld [vmem:[%s16219_s1 + $0x678] sm:$0xff]  ;;  %v11132_v56 = vld [vmem:[%s12889_s27 + $0x674] sm:$0xf] }
 0x511   : > { %v8479_v54 = vpop.f32.mrf.mxu2  ;;  %v6348_v35 = vpop.f32.mrf.mxu0  ;;  %9066 = vmatpush.bf16.msra.mxu1 %v12322_v52 }
 0x512   : > { %v8568_v8 = vpop.f32.mrf.mxu3  ;;  %v6437_v13 = vpop.f32.mrf.mxu1  ;;  %v6349_v34 = vadd.f32 %v6348_v35, %v14440_v24  ;;  %v14826_v25 = vpack.c.b16 %v7446_v57, %v7437_v3  ;;  %v12330_v24 = vld [vmem:[%s16219_s1 + $0x6b8] sm:$0xff]  ;;  %v7275_v35 = vrot.slane %v7257_v42, 4  ;;  %v7258_v3 = vsel %vm14415_vm5, %v11497_v61, %v7257_v42 }
 0x513   : > { %v14818_v11 = vadd.f32 %v8568_v8, %v8479_v54  ;;  %v14830_v54 = vpack.c.b16 %v7447_v60, %v7438_v20  ;;  %9155 = vmatpush.bf16.msra.mxu2 %v12330_v24  ;;  %v12114_v60 = vld [vmem:[%s12889_s27 + $0x694] sm:$0xf0]  ;;  %v7705_v36 = vunpack.c.l.b16 %v7258_v3  ;;  %v7706_v44 = vunpack.c.h.b16 %v7258_v3 }
 0x514   : > { %v14828_v8 = vadd.f32 %v6437_v13, %v6349_v34  ;;  %6387 = vmatmul.bf16.gmra.mxu0 %v11093_v7  ;;  %v7276_v13 = vrot.slane %v12553_v47, 5  ;;  %v12109_v34 = vld [vmem:[%s12889_s27 + $0x670] sm:$0xf]  ;;  %v11133_v42 = vor.u32 %v12114_v60, %v11132_v56  ;;  %v12555_v3 = vld [vmem:[%s12889_s27 + $0x58] sm:$0x11] }
 0x515   : > { %6476 = vmatmul.bf16.gmra.mxu1 %v11097_v28 }
 0x516   : > { %16247 = vst [vmem:[#allocation12_spill] sm:$0xff] %v14828_v8  ;;  %8521 = vmatmul.bf16.gmra.mxu2 %v7849_v48  ;;  %v7277_v57 = vsel %vm14415_vm5, %v7275_v35, %v7276_v13  ;;  %v6489_v8 = vld [vmem:[%s12889_s27 + $0x10] sm:$0xee] }
 0x517   : > { %8610 = vmatmul.bf16.gmra.mxu3 %v7850_v45  ;;  %v7714_v24 = vunpack.c.l.b16 %v7277_v57  ;;  %v7715_v47 = vunpack.c.h.b16 %v7277_v57  ;;  %v6757_v57 = vrot.slane %v12555_v3, 5  ;;  %v6493_v3 = vld [vmem:[%s12889_s27 + $0x74] sm:$0xee] }
 0x519   : > { %v8482_v7 = vpop.f32.mrf.mxu2  ;;  %v6350_v28 = vpop.f32.mrf.mxu0 }
 0x51a   : > { %v8571_v5 = vpop.f32.mrf.mxu3  ;;  %v6439_v45 = vpop.f32.mrf.mxu1  ;;  %v6351_v50 = vadd.f32 %v6350_v28, %v14454_v4  ;;  %v7858_v28 = vpack.c.b16 %v7714_v24, %v7705_v36 }
 0x51b   : > { %v14839_v48 = vadd.f32 %v8571_v5, %v8482_v7  ;;  %v11129_v5 = vor.u32 %v12109_v34, %v11126_v9  ;;  %v11424_v34 = vrot.slane %v6489_v8, 9 }
 0x51c   : > { %v14849_v20 = vadd.f32 %v6439_v45, %v6351_v50  ;;  %v7859_v45 = vpack.c.b16 %v7715_v47, %v7706_v44  ;;  %v12554_v50 = vld [vmem:[%s12889_s27 + $0x34] sm:$0xff] }
 0x51e   : > { %16248 = vst [vmem:[#allocation13_spill] sm:$0xff] %v14849_v20  ;;  %v6740_v20 = vrot.slane %v12554_v50, 5 }
 0x520   : > { %v6756_v9 = vrot.slane %v6740_v20, 4  ;;  %v6741_v44 = vsel %vm14415_vm5, %v11424_v34, %v6740_v20  ;;  %v12556_v34 = vld [vmem:[%s12889_s27 + $0x98] sm:$0xff] }
 0x521   : > { %v8484_v4 = vpop.f32.mrf.mxu2  ;;  %v6353_v35 = vpop.f32.mrf.mxu0  ;;  %v7439_v8 = vunpack.c.l.b16 %v6741_v44 }
 0x522   : > { %v8573_v7 = vpop.f32.mrf.mxu3  ;;  %v6442_v13 = vpop.f32.mrf.mxu1  ;;  %v6354_v52 = vadd.f32 %v6353_v35, %v14457_v58  ;;  %v6758_v47 = vsel %vm14415_vm5, %v6756_v9, %v6757_v57  ;;  %v6771_v57 = vrot.slane %v12556_v34, 5  ;;  %v12321_v34 = vld [vmem:[%s16219_s1 + $0x670] sm:$0xff] }
 0x523   : > { %v14855_v61 = vadd.f32 %v8573_v7, %v8484_v4  ;;  %v7449_v35 = vunpack.c.h.b16 %v6758_v47  ;;  %9067 = vmatpush.bf16.msra.mxu1 %v12321_v34 }
 0x524   : > { %v14860_v22 = vadd.f32 %v6442_v13, %v6354_v52  ;;  %6392 = vmatmul.bf16.gmra.mxu0 %v11129_v5  ;;  %v7448_v5 = vunpack.c.l.b16 %v6758_v47  ;;  %v12558_v47 = vld [vmem:[%s12889_s27 + $0xbc] sm:$0x11] }
 0x525   : > { %6481 = vmatmul.bf16.gmra.mxu1 %v11133_v42  ;;  %v7440_v42 = vunpack.c.h.b16 %v6741_v44  ;;  %v6788_v44 = vrot.slane %v6771_v57, 4 }
 0x526   : > { %16249 = vst [vmem:[#allocation14_spill] sm:$0xff] %v14860_v22  ;;  %8526 = vmatmul.bf16.gmra.mxu2 %v7858_v28  ;;  %v7727_v50 = vpack.c.b16 %v7448_v5, %v7439_v8  ;;  %v6789_v8 = vrot.slane %v12558_v47, 5  ;;  %v12313_v5 = vld [vmem:[%s16219_s1 + $0x630] sm:$0xff] }
 0x527   : > { %8615 = vmatmul.bf16.gmra.mxu3 %v7859_v45  ;;  %v7728_v20 = vpack.c.b16 %v7449_v35, %v7440_v42  ;;  %8978 = vmatpush.bf16.msra.mxu0 %v12313_v5 }
 0x529   : > { %v8487_v56 = vpop.f32.mrf.mxu2  ;;  %v6355_v36 = vpop.f32.mrf.mxu0 }
 0x52a   : > { %v8576_v60 = vpop.f32.mrf.mxu3  ;;  %v6444_v24 = vpop.f32.mrf.mxu1  ;;  %v6356_v58 = vadd.f32 %v6355_v36, %v14465_v41  ;;  %v6494_v36 = vld [vmem:[%s12889_s27 + $0x7c] sm:$0xee] }
 0x52b   : > { %v14863_v4 = vadd.f32 %v8576_v60, %v8487_v56  ;;  %v12557_v56 = vld [vmem:[%s12889_s27 + $0xa0] sm:$0xff]  ;;  %v11429_v42 = vrot.slane %v6494_v36, 9 }
 0x52c   : > { %v14870_v7 = vadd.f32 %v6444_v24, %v6356_v58  ;;  %v6775_v60 = vrot.slane %v12557_v56, 5  ;;  %v11428_v58 = vrot.slane %v6493_v3, 9  ;;  %v6790_v3 = vsel %vm14415_vm5, %v6788_v44, %v6789_v8 }
 0x52d   : > { %v7464_v47 = vunpack.c.l.b16 %v6790_v3  ;;  %v7465_v44 = vunpack.c.h.b16 %v6790_v3 }
 0x52e   : > { %16250 = vst [vmem:[#allocation15_spill] sm:$0xff] %v14870_v7  ;;  %v6791_v35 = vrot.slane %v6775_v60, 4  ;;  %v6776_v56 = vsel %vm14415_vm5, %v11429_v42, %v6775_v60 }
 0x52f   : > { %v7457_v8 = vunpack.c.l.b16 %v6776_v56 }
 0x531   : > { %v8489_v13 = vpop.f32.mrf.mxu2  ;;  %v6358_v41 = vpop.f32.mrf.mxu0 }
 0x532   : > { %v8578_v28 = vpop.f32.mrf.mxu3  ;;  %v6447_v52 = vpop.f32.mrf.mxu1  ;;  %v6359_v9 = vadd.f32 %v6358_v41, %v14482_v16  ;;  %v12329_v16 = vld [vmem:[%s16219_s1 + $0x6b0] sm:$0xff]  ;;  %v6772_v41 = vsel %vm14415_vm5, %v11428_v58, %v6771_v57 }
 0x533   : > { %v14872_v45 = vadd.f32 %v8578_v28, %v8489_v13  ;;  %v12559_v13 = vld [vmem:[%s12889_s27 + $0xc4] sm:$0x11]  ;;  %9156 = vmatpush.bf16.msra.mxu2 %v12329_v16  ;;  %v7455_v57 = vunpack.c.l.b16 %v6772_v41  ;;  %v7456_v16 = vunpack.c.h.b16 %v6772_v41  ;;  %v6498_v41 = vld [vmem:[%s12889_s27 + $0xe0] sm:$0xee] }
 0x534   : > { %v14879_v24 = vadd.f32 %v6447_v52, %v6359_v9  ;;  %8629 = vmatmul.bf16.vlgmr.msrb.gmra.mxu0 %v14826_v25  ;;  %v6792_v25 = vrot.slane %v12559_v13, 5  ;;  %v7458_v13 = vunpack.c.h.b16 %v6776_v56  ;;  %v12561_v56 = vld [vmem:[%s12889_s27 + $0x10c] sm:$0xff] }
 0x535   : > { %8718 = vmatmul.bf16.vlgmr.msrb.gmra.mxu1 %v14830_v54  ;;  %v7734_v42 = vpack.c.b16 %v7464_v47, %v7455_v57  ;;  %v11433_v57 = vrot.slane %v6498_v41, 9 }
 0x536   : > { %16251 = vst [vmem:[#allocation16_spill] sm:$0xff] %v14879_v24  ;;  %8807 = vmatmul.bf16.vlgmr.msrb.gmra.mxu2 %v7727_v50  ;;  %v6793_v36 = vsel %vm14415_vm5, %v6791_v35, %v6792_v25  ;;  %v6499_v24 = vld [vmem:[%s12889_s27 + $0xe8] sm:$0xee] }
 0x537   : > { %8896 = vmatmul.bf16.vlgmr.msrb.gmra.mxu3 %v7728_v20  ;;  %v7466_v5 = vunpack.c.l.b16 %v6793_v36 }
 0x539   : > { %v8492_v54 = vpop.f32.mrf.mxu2  ;;  %v6360_v50 = vpop.f32.mrf.mxu0 }
 0x53a   : > { %v8581_v28 = vpop.f32.mrf.mxu3  ;;  %v6449_v20 = vpop.f32.mrf.mxu1  ;;  %v6361_v9 = vadd.f32 %v6360_v50, %v14493_v37  ;;  %v7467_v37 = vunpack.c.h.b16 %v6793_v36  ;;  %v6810_v36 = vrot.slane %v12561_v56, 5 }
 0x53b   : > { %v14893_v52 = vadd.f32 %v8581_v28, %v8492_v54  ;;  %v7735_v28 = vpack.c.b16 %v7465_v44, %v7456_v16  ;;  %v12562_v16 = vld [vmem:[%s12889_s27 + $0x128] sm:$0x11] }
 0x53c   : > { %v14905_v58 = vadd.f32 %v6449_v20, %v6361_v9  ;;  %v7736_v20 = vpack.c.b16 %v7466_v5, %v7457_v8  ;;  %v7737_v34 = vpack.c.b16 %v7467_v37, %v7458_v13  ;;  %v12560_v9 = vld [vmem:[%s12889_s27 + $0x104] sm:$0xff]  ;;  %v6824_v44 = vrot.slane %v12562_v16, 5  ;;  %v12563_v13 = vld [vmem:[%s12889_s27 + $0x130] sm:$0x11] }
 0x53d   : > { %v6806_v3 = vrot.slane %v12560_v9, 5  ;;  %v11434_v8 = vrot.slane %v6499_v24, 9  ;;  %v6826_v5 = vrot.slane %v6810_v36, 4  ;;  %v6827_v37 = vrot.slane %v12563_v13, 5 }
 0x53e   : > { %16252 = vst [vmem:[#allocation17_spill] sm:$0xff] %v14905_v58 }
 0x53f   : > { %v6823_v47 = vrot.slane %v6806_v3, 4  ;;  %v6811_v24 = vsel %vm14415_vm5, %v11434_v8, %v6810_v36 }
 0x541   : > { %v8494_v54 = vpop.f32.mrf.mxu2  ;;  %v6363_v25 = vpop.f32.mrf.mxu0 }
 0x542   : > { %v8583_v60 = vpop.f32.mrf.mxu3  ;;  %v6452_v50 = vpop.f32.mrf.mxu1  ;;  %v6364_v58 = vadd.f32 %v6363_v25, %v14502_v0  ;;  %v6807_v0 = vsel %vm14415_vm5, %v11433_v57, %v6806_v3  ;;  %v7475_v57 = vunpack.c.l.b16 %v6811_v24 }
 0x543   : > { %v14907_v35 = vadd.f32 %v8583_v60, %v8494_v54  ;;  %v7474_v3 = vunpack.c.h.b16 %v6807_v0 }
 0x544   : > { %v14914_v7 = vadd.f32 %v6452_v50, %v6364_v58  ;;  %8634 = vmatmul.bf16.gmra.mxu0 %v7734_v42 }
 0x545   : > { %8723 = vmatmul.bf16.gmra.mxu1 %v7735_v28  ;;  %v6825_v28 = vsel %vm14415_vm5, %v6823_v47, %v6824_v44  ;;  %v7476_v47 = vunpack.c.h.b16 %v6811_v24 }
 0x546   : > { %16253 = vst [vmem:[#allocation18_spill] sm:$0xff] %v14914_v7  ;;  %8812 = vmatmul.bf16.gmra.mxu2 %v7736_v20  ;;  %v6828_v20 = vsel %vm14415_vm5, %v6826_v5, %v6827_v37  ;;  %v7482_v9 = vunpack.c.l.b16 %v6825_v28  ;;  %v7483_v56 = vunpack.c.h.b16 %v6825_v28 }
 0x547   : > { %8901 = vmatmul.bf16.gmra.mxu3 %v7737_v34  ;;  %v7473_v34 = vunpack.c.l.b16 %v6807_v0  ;;  %v7484_v16 = vunpack.c.l.b16 %v6828_v20  ;;  %v7485_v44 = vunpack.c.h.b16 %v6828_v20  ;;  %v6503_v0 = vld [vmem:[%s12889_s27 + $0x14c] sm:$0xee]  ;;  %v6504_v20 = vld [vmem:[%s12889_s27 + $0x154] sm:$0xee] }
 0x548   : > { %v7744_v8 = vpack.c.b16 %v7483_v56, %v7474_v3  ;;  %v12566_v3 = vld [vmem:[%s12889_s27 + $0x194] sm:$0x11] }
 0x549   : > { %v8497_v54 = vpop.f32.mrf.mxu2  ;;  %v6365_v58 = vpop.f32.mrf.mxu0  ;;  %v7743_v36 = vpack.c.b16 %v7482_v9, %v7473_v34  ;;  %v11438_v34 = vrot.slane %v6503_v0, 9  ;;  %v6859_v56 = vrot.slane %v12566_v3, 5 }
 0x54a   : > { %v8586_v60 = vpop.f32.mrf.mxu3  ;;  %v6454_v42 = vpop.f32.mrf.mxu1  ;;  %v6366_v50 = vadd.f32 %v6365_v58, %v14510_v14  ;;  %v7746_v58 = vpack.c.b16 %v7485_v44, %v7476_v47  ;;  %v12567_v47 = vld [vmem:[%s12889_s27 + $0x19c] sm:$0x11] }
 0x54b   : > { %v14920_v25 = vadd.f32 %v8586_v60, %v8497_v54  ;;  %v7745_v60 = vpack.c.b16 %v7484_v16, %v7475_v57  ;;  %v12328_v57 = vld [vmem:[%s16219_s1 + $0x6a8] sm:$0xff]  ;;  %v6862_v44 = vrot.slane %v12567_v47, 5 }
 0x54c   : > { %v14929_v41 = vadd.f32 %v6454_v42, %v6366_v50  ;;  %v12564_v42 = vld [vmem:[%s12889_s27 + $0x170] sm:$0xff]  ;;  %9157 = vmatpush.bf16.msra.mxu2 %v12328_v57 }
 0x54d   : > { %v6841_v28 = vrot.slane %v12564_v42, 5 }
 0x54e   : > { %16254 = vst [vmem:[#allocation19_spill] sm:$0xff] %v14929_v41  ;;  %v12565_v41 = vld [vmem:[%s12889_s27 + $0x178] sm:$0xff] }
 0x54f   : > { %v6845_v24 = vrot.slane %v12565_v41, 5  ;;  %v6858_v9 = vrot.slane %v6841_v28, 4  ;;  %v11439_v41 = vrot.slane %v6504_v20, 9 }
 0x551   : > { %v8499_v14 = vpop.f32.mrf.mxu2  ;;  %v6368_v5 = vpop.f32.mrf.mxu0  ;;  %v6861_v16 = vrot.slane %v6845_v24, 4  ;;  %v6846_v42 = vsel %vm14415_vm5, %v11439_v41, %v6845_v24 }
 0x552   : > { %v8588_v13 = vpop.f32.mrf.mxu3  ;;  %v6457_v37 = vpop.f32.mrf.mxu1  ;;  %v6369_v50 = vadd.f32 %v6368_v5, %v14525_v19  ;;  %v12312_v19 = vld [vmem:[%s16219_s1 + $0x628] sm:$0xff] }
 0x553   : > { %v14931_v54 = vadd.f32 %v8588_v13, %v8499_v14  ;;  %8979 = vmatpush.bf16.msra.mxu0 %v12312_v19  ;;  %v7494_v19 = vunpack.c.h.b16 %v6846_v42 }
 0x554   : > { %v14938_v7 = vadd.f32 %v6457_v37, %v6369_v50  ;;  %8639 = vmatmul.bf16.gmra.mxu0 %v7743_v36  ;;  %v6842_v36 = vsel %vm14415_vm5, %v11438_v34, %v6841_v28  ;;  %v6863_v50 = vsel %vm14415_vm5, %v6861_v16, %v6862_v44 }
 0x555   : > { %8728 = vmatmul.bf16.gmra.mxu1 %v7744_v8  ;;  %v7491_v28 = vunpack.c.l.b16 %v6842_v36  ;;  %v7492_v3 = vunpack.c.h.b16 %v6842_v36  ;;  %v7502_v57 = vunpack.c.l.b16 %v6863_v50  ;;  %v6508_v36 = vld [vmem:[%s12889_s27 + $0x1b8] sm:$0xee] }
 0x556   : > { %16255 = vst [vmem:[#allocation20_spill] sm:$0xff] %v14938_v7  ;;  %8817 = vmatmul.bf16.gmra.mxu2 %v7745_v60  ;;  %v6860_v60 = vsel %vm14415_vm5, %v6858_v9, %v6859_v56  ;;  %v7493_v56 = vunpack.c.l.b16 %v6846_v42  ;;  %v12569_v42 = vld [vmem:[%s12889_s27 + $0x1e4] sm:$0xff] }
 0x557   : > { %8906 = vmatmul.bf16.gmra.mxu3 %v7746_v58  ;;  %v12320_v58 = vld [vmem:[%s16219_s1 + $0x668] sm:$0xff]  ;;  %v7500_v34 = vunpack.c.l.b16 %v6860_v60  ;;  %v7501_v9 = vunpack.c.h.b16 %v6860_v60 }
 0x558   : > { %9068 = vmatpush.bf16.msra.mxu1 %v12320_v58  ;;  %v12568_v58 = vld [vmem:[%s12889_s27 + $0x1dc] sm:$0xff] }
 0x559   : > { %v8502_v14 = vpop.f32.mrf.mxu2  ;;  %v6370_v5 = vpop.f32.mrf.mxu0  ;;  %v7752_v41 = vpack.c.b16 %v7500_v34, %v7491_v28  ;;  %v6876_v60 = vrot.slane %v12568_v58, 5  ;;  %v11443_v28 = vrot.slane %v6508_v36, 9 }
 0x55a   : > { %v8591_v13 = vpop.f32.mrf.mxu3  ;;  %v6459_v37 = vpop.f32.mrf.mxu1  ;;  %v6371_v0 = vadd.f32 %v6370_v5, %v14536_v59  ;;  %v7503_v59 = vunpack.c.h.b16 %v6863_v50  ;;  %v7754_v5 = vpack.c.b16 %v7502_v57, %v7493_v56  ;;  %v6880_v50 = vrot.slane %v12569_v42, 5 }
 0x55b   : > { %v14950_v8 = vadd.f32 %v8591_v13, %v8502_v14  ;;  %v7753_v14 = vpack.c.b16 %v7501_v9, %v7492_v3  ;;  %v6893_v34 = vrot.slane %v6876_v60, 4  ;;  %v12570_v3 = vld [vmem:[%s12889_s27 + $0x200] sm:$0x11] }
 0x55c   : > { %v14962_v20 = vadd.f32 %v6459_v37, %v6371_v0  ;;  %v7755_v37 = vpack.c.b16 %v7503_v59, %v7494_v19  ;;  %v6894_v9 = vrot.slane %v12570_v3, 5  ;;  %v6896_v57 = vrot.slane %v6880_v50, 4  ;;  %v12571_v19 = vld [vmem:[%s12889_s27 + $0x208] sm:$0x11] }
 0x55d   : > { %v6897_v59 = vrot.slane %v12571_v19, 5 }
 0x55e   : > { %16256 = vst [vmem:[#allocation21_spill] sm:$0xff] %v14962_v20  ;;  %v6509_v20 = vld [vmem:[%s12889_s27 + $0x1c0] sm:$0xee] }
 0x55f   : > { %v11444_v56 = vrot.slane %v6509_v20, 9 }
 0x561   : > { %v8504_v47 = vpop.f32.mrf.mxu2  ;;  %v6373_v44 = vpop.f32.mrf.mxu0  ;;  %v6881_v20 = vsel %vm14415_vm5, %v11444_v56, %v6880_v50 }
 0x562   : > { %v8593_v24 = vpop.f32.mrf.mxu3  ;;  %v6462_v13 = vpop.f32.mrf.mxu1  ;;  %v6374_v0 = vadd.f32 %v6373_v44, %v14545_v33  ;;  %v6877_v33 = vsel %vm14415_vm5, %v11443_v28, %v6876_v60  ;;  %v7511_v28 = vunpack.c.l.b16 %v6881_v20 }
 0x563   : > { %v14964_v16 = vadd.f32 %v8593_v24, %v8504_v47  ;;  %v7509_v36 = vunpack.c.l.b16 %v6877_v33  ;;  %v7510_v60 = vunpack.c.h.b16 %v6877_v33  ;;  %v6513_v33 = vld [vmem:[%s12889_s27 + $0x224] sm:$0xee] }
 0x564   : > { %v14971_v7 = vadd.f32 %v6462_v13, %v6374_v0  ;;  %8644 = vmatmul.bf16.gmra.mxu0 %v7752_v41 }
 0x565   : > { %8733 = vmatmul.bf16.gmra.mxu1 %v7753_v14  ;;  %v6895_v14 = vsel %vm14415_vm5, %v6893_v34, %v6894_v9  ;;  %v7512_v34 = vunpack.c.h.b16 %v6881_v20 }
 0x566   : > { %16257 = vst [vmem:[#allocation22_spill] sm:$0xff] %v14971_v7  ;;  %8822 = vmatmul.bf16.gmra.mxu2 %v7754_v5  ;;  %v7518_v0 = vunpack.c.l.b16 %v6895_v14  ;;  %v7519_v42 = vunpack.c.h.b16 %v6895_v14 }
 0x567   : > { %8911 = vmatmul.bf16.gmra.mxu3 %v7755_v37  ;;  %v6898_v37 = vsel %vm14415_vm5, %v6896_v57, %v6897_v59 }
 0x568   : > { %v7520_v3 = vunpack.c.l.b16 %v6898_v37  ;;  %v7521_v9 = vunpack.c.h.b16 %v6898_v37  ;;  %v7761_v50 = vpack.c.b16 %v7518_v0, %v7509_v36  ;;  %v7762_v56 = vpack.c.b16 %v7519_v42, %v7510_v60  ;;  %v6514_v37 = vld [vmem:[%s12889_s27 + $0x22c] sm:$0xee]  ;;  %v12574_v60 = vld [vmem:[%s12889_s27 + $0x26c] sm:$0x11] }
 0x569   : > { %v8507_v47 = vpop.f32.mrf.mxu2  ;;  %v6375_v13 = vpop.f32.mrf.mxu0  ;;  %v11448_v36 = vrot.slane %v6513_v33, 9  ;;  %v6929_v42 = vrot.slane %v12574_v60, 5 }
 0x56a   : > { %v8596_v24 = vpop.f32.mrf.mxu3  ;;  %v6464_v41 = vpop.f32.mrf.mxu1  ;;  %v6376_v5 = vadd.f32 %v6375_v13, %v14553_v32  ;;  %v7764_v13 = vpack.c.b16 %v7521_v9, %v7512_v34  ;;  %v12575_v34 = vld [vmem:[%s12889_s27 + $0x274] sm:$0x11] }
 0x56b   : > { %v14977_v44 = vadd.f32 %v8596_v24, %v8507_v47  ;;  %v7763_v24 = vpack.c.b16 %v7520_v3, %v7511_v28  ;;  %v12327_v28 = vld [vmem:[%s16219_s1 + $0x6a0] sm:$0xff]  ;;  %v6932_v9 = vrot.slane %v12575_v34, 5 }
 0x56c   : > { %v14986_v58 = vadd.f32 %v6464_v41, %v6376_v5  ;;  %v12572_v41 = vld [vmem:[%s12889_s27 + $0x248] sm:$0xff]  ;;  %9158 = vmatpush.bf16.msra.mxu2 %v12327_v28 }
 0x56d   : > { %v6911_v14 = vrot.slane %v12572_v41, 5 }
 0x56e   : > { %16258 = vst [vmem:[#allocation23_spill] sm:$0xff] %v14986_v58  ;;  %v12573_v58 = vld [vmem:[%s12889_s27 + $0x250] sm:$0xff] }
 0x56f   : > { %v6915_v20 = vrot.slane %v12573_v58, 5  ;;  %v6928_v0 = vrot.slane %v6911_v14, 4  ;;  %v11449_v58 = vrot.slane %v6514_v37, 9 }
 0x571   : > { %v8509_v32 = vpop.f32.mrf.mxu2  ;;  %v6378_v57 = vpop.f32.mrf.mxu0  ;;  %v6931_v3 = vrot.slane %v6915_v20, 4  ;;  %v6916_v41 = vsel %vm14415_vm5, %v11449_v58, %v6915_v20 }
 0x572   : > { %v8598_v19 = vpop.f32.mrf.mxu3  ;;  %v6467_v59 = vpop.f32.mrf.mxu1  ;;  %v6379_v5 = vadd.f32 %v6378_v57, %v14568_v6  ;;  %v12311_v6 = vld [vmem:[%s16219_s1 + $0x620] sm:$0xff] }
 0x573   : > { %v14988_v47 = vadd.f32 %v8598_v19, %v8509_v32  ;;  %8980 = vmatpush.bf16.msra.mxu0 %v12311_v6  ;;  %v7530_v6 = vunpack.c.h.b16 %v6916_v41 }
 0x574   : > { %v14995_v7 = vadd.f32 %v6467_v59, %v6379_v5  ;;  %8649 = vmatmul.bf16.gmra.mxu0 %v7761_v50  ;;  %v6912_v50 = vsel %vm14415_vm5, %v11448_v36, %v6911_v14  ;;  %v6933_v5 = vsel %vm14415_vm5, %v6931_v3, %v6932_v9 }
 0x575   : > { %8738 = vmatmul.bf16.gmra.mxu1 %v7762_v56  ;;  %v7527_v14 = vunpack.c.l.b16 %v6912_v50  ;;  %v7528_v60 = vunpack.c.h.b16 %v6912_v50  ;;  %v7538_v28 = vunpack.c.l.b16 %v6933_v5  ;;  %v6518_v50 = vld [vmem:[%s12889_s27 + $0x290] sm:$0xee] }
 0x576   : > { %16259 = vst [vmem:[#allocation24_spill] sm:$0xff] %v14995_v7  ;;  %8827 = vmatmul.bf16.gmra.mxu2 %v7763_v24  ;;  %v6930_v24 = vsel %vm14415_vm5, %v6928_v0, %v6929_v42  ;;  %v7529_v42 = vunpack.c.l.b16 %v6916_v41  ;;  %v12577_v41 = vld [vmem:[%s12889_s27 + $0x2bc] sm:$0xff] }
 0x577   : > { %8916 = vmatmul.bf16.gmra.mxu3 %v7764_v13  ;;  %v12319_v13 = vld [vmem:[%s16219_s1 + $0x660] sm:$0xff]  ;;  %v7536_v36 = vunpack.c.l.b16 %v6930_v24  ;;  %v7537_v0 = vunpack.c.h.b16 %v6930_v24 }
 0x578   : > { %9069 = vmatpush.bf16.msra.mxu1 %v12319_v13  ;;  %v12576_v13 = vld [vmem:[%s12889_s27 + $0x2b4] sm:$0xff] }
 0x579   : > { %v8512_v32 = vpop.f32.mrf.mxu2  ;;  %v6380_v57 = vpop.f32.mrf.mxu0  ;;  %v7770_v58 = vpack.c.b16 %v7536_v36, %v7527_v14  ;;  %v6946_v24 = vrot.slane %v12576_v13, 5  ;;  %v11453_v14 = vrot.slane %v6518_v50, 9 }
 0x57a   : > { %v8601_v19 = vpop.f32.mrf.mxu3  ;;  %v6469_v59 = vpop.f32.mrf.mxu1  ;;  %v6381_v33 = vadd.f32 %v6380_v57, %v14579_v46  ;;  %v7539_v46 = vunpack.c.h.b16 %v6933_v5  ;;  %v7772_v57 = vpack.c.b16 %v7538_v28, %v7529_v42  ;;  %v6950_v5 = vrot.slane %v12577_v41, 5 }
 0x57b   : > { %v15007_v56 = vadd.f32 %v8601_v19, %v8512_v32  ;;  %v7771_v32 = vpack.c.b16 %v7537_v0, %v7528_v60  ;;  %v6963_v36 = vrot.slane %v6946_v24, 4  ;;  %v12578_v60 = vld [vmem:[%s12889_s27 + $0x2d8] sm:$0x11] }
 0x57c   : > { %v15019_v37 = vadd.f32 %v6469_v59, %v6381_v33  ;;  %v7773_v59 = vpack.c.b16 %v7539_v46, %v7530_v6  ;;  %v6964_v0 = vrot.slane %v12578_v60, 5  ;;  %v6966_v28 = vrot.slane %v6950_v5, 4  ;;  %v12579_v6 = vld [vmem:[%s12889_s27 + $0x2e0] sm:$0x11] }
 0x57d   : > { %v6967_v46 = vrot.slane %v12579_v6, 5 }
 0x57e   : > { %16260 = vst [vmem:[#allocation25_spill] sm:$0xff] %v15019_v37  ;;  %v6519_v37 = vld [vmem:[%s12889_s27 + $0x298] sm:$0xee] }
 0x57f   : > { %v11454_v42 = vrot.slane %v6519_v37, 9 }
 0x581   : > { %v8514_v34 = vpop.f32.mrf.mxu2  ;;  %v6383_v9 = vpop.f32.mrf.mxu0  ;;  %v6951_v37 = vsel %vm14415_vm5, %v11454_v42, %v6950_v5 }
 0x582   : > { %v8603_v20 = vpop.f32.mrf.mxu3  ;;  %v6472_v19 = vpop.f32.mrf.mxu1  ;;  %v6384_v33 = vadd.f32 %v6383_v9, %v14588_v18  ;;  %v6947_v18 = vsel %vm14415_vm5, %v11453_v14, %v6946_v24  ;;  %v7547_v14 = vunpack.c.l.b16 %v6951_v37 }
 0x583   : > { %v15021_v3 = vadd.f32 %v8603_v20, %v8514_v34  ;;  %v7545_v50 = vunpack.c.l.b16 %v6947_v18  ;;  %v7546_v24 = vunpack.c.h.b16 %v6947_v18  ;;  %v6523_v18 = vld [vmem:[%s12889_s27 + $0x2fc] sm:$0xee] }
 0x584   : > { %v15028_v7 = vadd.f32 %v6472_v19, %v6384_v33  ;;  %8654 = vmatmul.bf16.gmra.mxu0 %v7770_v58 }
 0x585   : > { %8743 = vmatmul.bf16.gmra.mxu1 %v7771_v32  ;;  %v6965_v32 = vsel %vm14415_vm5, %v6963_v36, %v6964_v0  ;;  %v7548_v36 = vunpack.c.h.b16 %v6951_v37 }
 0x586   : > { %16261 = vst [vmem:[#allocation26_spill] sm:$0xff] %v15028_v7  ;;  %8832 = vmatmul.bf16.gmra.mxu2 %v7772_v57  ;;  %v7554_v33 = vunpack.c.l.b16 %v6965_v32  ;;  %v7555_v41 = vunpack.c.h.b16 %v6965_v32 }
 0x587   : > { %8921 = vmatmul.bf16.gmra.mxu3 %v7773_v59  ;;  %v6968_v59 = vsel %vm14415_vm5, %v6966_v28, %v6967_v46 }
 0x588   : > { %v7556_v60 = vunpack.c.l.b16 %v6968_v59  ;;  %v7557_v0 = vunpack.c.h.b16 %v6968_v59  ;;  %v7779_v5 = vpack.c.b16 %v7554_v33, %v7545_v50  ;;  %v7780_v42 = vpack.c.b16 %v7555_v41, %v7546_v24  ;;  %v6524_v59 = vld [vmem:[%s12889_s27 + $0x304] sm:$0xee]  ;;  %v12582_v24 = vld [vmem:[%s12889_s27 + $0x344] sm:$0x11] }
 0x589   : > { %v8517_v34 = vpop.f32.mrf.mxu2  ;;  %v6385_v19 = vpop.f32.mrf.mxu0  ;;  %v11458_v50 = vrot.slane %v6523_v18, 9  ;;  %v6999_v41 = vrot.slane %v12582_v24, 5 }
 0x58a   : > { %v8606_v20 = vpop.f32.mrf.mxu3  ;;  %v6474_v58 = vpop.f32.mrf.mxu1  ;;  %v6386_v57 = vadd.f32 %v6385_v19, %v14596_v23  ;;  %v7782_v19 = vpack.c.b16 %v7557_v0, %v7548_v36  ;;  %v12583_v36 = vld [vmem:[%s12889_s27 + $0x34c] sm:$0x11] }
 0x58b   : > { %v15034_v9 = vadd.f32 %v8606_v20, %v8517_v34  ;;  %v7781_v20 = vpack.c.b16 %v7556_v60, %v7547_v14  ;;  %v12326_v14 = vld [vmem:[%s16219_s1 + $0x698] sm:$0xff]  ;;  %v7002_v0 = vrot.slane %v12583_v36, 5 }
 0x58c   : > { %v15043_v13 = vadd.f32 %v6474_v58, %v6386_v57  ;;  %v12580_v58 = vld [vmem:[%s12889_s27 + $0x320] sm:$0xff]  ;;  %9159 = vmatpush.bf16.msra.mxu2 %v12326_v14 }
 0x58d   : > { %v6981_v32 = vrot.slane %v12580_v58, 5 }
 0x58e   : > { %16262 = vst [vmem:[#allocation27_spill] sm:$0xff] %v15043_v13  ;;  %v12581_v13 = vld [vmem:[%s12889_s27 + $0x328] sm:$0xff] }
 0x58f   : > { %v6985_v37 = vrot.slane %v12581_v13, 5  ;;  %v6998_v33 = vrot.slane %v6981_v32, 4  ;;  %v11459_v13 = vrot.slane %v6524_v59, 9 }
 0x591   : > { %v8519_v23 = vpop.f32.mrf.mxu2  ;;  %v6388_v28 = vpop.f32.mrf.mxu0  ;;  %v7001_v60 = vrot.slane %v6985_v37, 4  ;;  %v6986_v58 = vsel %vm14415_vm5, %v11459_v13, %v6985_v37 }
 0x592   : > { %v8608_v6 = vpop.f32.mrf.mxu3  ;;  %v6477_v46 = vpop.f32.mrf.mxu1  ;;  %v6389_v57 = vadd.f32 %v6388_v28, %v14614_v29  ;;  %v12310_v29 = vld [vmem:[%s16219_s1 + $0x618] sm:$0xff] }
 0x593   : > { %v15045_v34 = vadd.f32 %v8608_v6, %v8519_v23  ;;  %8981 = vmatpush.bf16.msra.mxu0 %v12310_v29  ;;  %v7566_v29 = vunpack.c.h.b16 %v6986_v58 }
 0x594   : > { %v15052_v7 = vadd.f32 %v6477_v46, %v6389_v57  ;;  %8659 = vmatmul.bf16.gmra.mxu0 %v7779_v5  ;;  %v6982_v5 = vsel %vm14415_vm5, %v11458_v50, %v6981_v32  ;;  %v7003_v57 = vsel %vm14415_vm5, %v7001_v60, %v7002_v0 }
 0x595   : > { %8748 = vmatmul.bf16.gmra.mxu1 %v7780_v42  ;;  %v7563_v32 = vunpack.c.l.b16 %v6982_v5  ;;  %v7564_v24 = vunpack.c.h.b16 %v6982_v5  ;;  %v7574_v14 = vunpack.c.l.b16 %v7003_v57  ;;  %v12584_v5 = vld [vmem:[%s12889_s27 + $0x38c] sm:$0xff] }
 0x596   : > { %16263 = vst [vmem:[#allocation28_spill] sm:$0xff] %v15052_v7  ;;  %8837 = vmatmul.bf16.gmra.mxu2 %v7781_v20  ;;  %v7000_v20 = vsel %vm14415_vm5, %v6998_v33, %v6999_v41  ;;  %v7565_v41 = vunpack.c.l.b16 %v6986_v58 }
 0x597   : > { %8926 = vmatmul.bf16.gmra.mxu3 %v7782_v19  ;;  %v12318_v19 = vld [vmem:[%s16219_s1 + $0x658] sm:$0xff]  ;;  %v7572_v50 = vunpack.c.l.b16 %v7000_v20  ;;  %v7573_v33 = vunpack.c.h.b16 %v7000_v20  ;;  %v7016_v20 = vrot.slane %v12584_v5, 5 }
 0x598   : > { %9070 = vmatpush.bf16.msra.mxu1 %v12318_v19  ;;  %v6528_v19 = vld [vmem:[%s12889_s27 + $0x368] sm:$0xee] }
 0x599   : > { %v8522_v23 = vpop.f32.mrf.mxu2  ;;  %v6390_v28 = vpop.f32.mrf.mxu0  ;;  %v7788_v37 = vpack.c.b16 %v7572_v50, %v7563_v32  ;;  %v7789_v13 = vpack.c.b16 %v7573_v33, %v7564_v24  ;;  %v6529_v50 = vld [vmem:[%s12889_s27 + $0x370] sm:$0xee]  ;;  %v11463_v33 = vrot.slane %v6528_v19, 9 }
 0x59a   : > { %v8611_v6 = vpop.f32.mrf.mxu3  ;;  %v6479_v46 = vpop.f32.mrf.mxu1  ;;  %v6391_v18 = vadd.f32 %v6390_v28, %v14625_v43  ;;  %v7575_v43 = vunpack.c.h.b16 %v7003_v57  ;;  %v7790_v28 = vpack.c.b16 %v7574_v14, %v7565_v41  ;;  %v12585_v57 = vld [vmem:[%s12889_s27 + $0x394] sm:$0xff]  ;;  %v7033_v41 = vrot.slane %v7016_v20, 4 }
 0x59b   : > { %v15064_v42 = vadd.f32 %v8611_v6, %v8522_v23  ;;  %v7020_v32 = vrot.slane %v12585_v57, 5  ;;  %v12586_v14 = vld [vmem:[%s12889_s27 + $0x3b0] sm:$0x11] }
 0x59c   : > { %v15076_v59 = vadd.f32 %v6479_v46, %v6391_v18  ;;  %v7791_v46 = vpack.c.b16 %v7575_v43, %v7566_v29  ;;  %v9351_v18 = vld [vmem:[%s16221_s3 + $0x38] sm:$0xff]  ;;  %v7034_v29 = vrot.slane %v12586_v14, 5  ;;  %v11464_v43 = vrot.slane %v6529_v50, 9 }
 0x59d   : > { %9461 = vmatpush.msra.mxu3 %v9351_v18  ;;  %v7017_v18 = vsel %vm14415_vm5, %v11463_v33, %v7016_v20 }
 0x59e   : > { %16264 = vst [vmem:[#allocation29_spill] sm:$0xff] %v15076_v59  ;;  %v7582_v20 = vunpack.c.h.b16 %v7017_v18  ;;  %v12589_v59 = vld [vmem:[%s12889_s27 + $0x400] sm:$0xff] }
 0x5a1   : > { %v8524_v36 = vpop.f32.mrf.mxu2  ;;  %v6393_v0 = vpop.f32.mrf.mxu0 }
 0x5a2   : > { %v8613_v23 = vpop.f32.mrf.mxu3  ;;  %v6482_v6 = vpop.f32.mrf.mxu1  ;;  %v6394_v58 = vadd.f32 %v6393_v0, %v14634_v17 }
 0x5a3   : > { %v15078_v60 = vadd.f32 %v8613_v23, %v8524_v36  ;;  %v7036_v36 = vrot.slane %v7020_v32, 4  ;;  %v12587_v23 = vld [vmem:[%s12889_s27 + $0x3b8] sm:$0x11] }
 0x5a4   : > { %v15088_v24 = vadd.f32 %v6482_v6, %v6394_v58  ;;  %8664 = vmatmul.bf16.gmra.mxu0 %v7788_v37  ;;  %v7037_v5 = vrot.slane %v12587_v23, 5  ;;  %v7581_v58 = vunpack.c.l.b16 %v7017_v18  ;;  %v6533_v18 = vld [vmem:[%s12889_s27 + $0x3d4] sm:$0xee] }
 0x5a5   : > { %8753 = vmatmul.bf16.gmra.mxu1 %v7789_v13  ;;  %v7035_v13 = vsel %vm14415_vm5, %v7033_v41, %v7034_v29 }
 0x5a6   : > { %16265 = vst [vmem:[#allocation30_spill] sm:$0xff] %v15088_v24  ;;  %8842 = vmatmul.bf16.gmra.mxu2 %v7790_v28  ;;  %v7038_v19 = vsel %vm14415_vm5, %v7036_v36, %v7037_v5  ;;  %v7590_v14 = vunpack.c.l.b16 %v7035_v13  ;;  %v7591_v33 = vunpack.c.h.b16 %v7035_v13 }
 0x5a7   : > { %8931 = vmatmul.bf16.gmra.mxu3 %v7791_v46  ;;  %v7021_v46 = vsel %vm14415_vm5, %v11464_v43, %v7020_v32  ;;  %v7593_v29 = vunpack.c.h.b16 %v7038_v19 }
 0x5a8   : > { %v7583_v23 = vunpack.c.l.b16 %v7021_v46  ;;  %v7584_v41 = vunpack.c.h.b16 %v7021_v46  ;;  %v7797_v32 = vpack.c.b16 %v7590_v14, %v7581_v58  ;;  %v7798_v43 = vpack.c.b16 %v7591_v33, %v7582_v20  ;;  %v12590_v20 = vld [vmem:[%s12889_s27 + $0x41c] sm:$0x11] }
 0x5a9   : > { %v8527_v17 = vpop.f32.mrf.mxu2  ;;  %v6395_v6 = vpop.f32.mrf.mxu0  ;;  %v7055_v46 = vrot.slane %v12589_v59, 5  ;;  %v11468_v58 = vrot.slane %v6533_v18, 9  ;;  %v7069_v33 = vrot.slane %v12590_v20, 5 }
 0x5aa   : > { %v8616_v0 = vpop.f32.mrf.mxu3  ;;  %v6484_v37 = vpop.f32.mrf.mxu1  ;;  %v6396_v28 = vadd.f32 %v6395_v6, %v14642_v10 }
 0x5ab   : > { %v15094_v57 = vadd.f32 %v8616_v0, %v8527_v17  ;;  %v7592_v17 = vunpack.c.l.b16 %v7038_v19  ;;  %v6534_v19 = vld [vmem:[%s12889_s27 + $0x3dc] sm:$0xee]  ;;  %v7071_v59 = vrot.slane %v7055_v46, 4 }
 0x5ac   : > { %v15103_v50 = vadd.f32 %v6484_v37, %v6396_v28  ;;  %v7800_v28 = vpack.c.b16 %v7593_v29, %v7584_v41 }
 0x5ad   : > { %v7799_v37 = vpack.c.b16 %v7592_v17, %v7583_v23  ;;  %v12325_v23 = vld [vmem:[%s16219_s1 + $0x690] sm:$0xff]  ;;  %v12591_v17 = vld [vmem:[%s12889_s27 + $0x424] sm:$0x11] }
 0x5ae   : > { %16266 = vst [vmem:[#allocation31_spill] sm:$0xff] %v15103_v50  ;;  %v12588_v50 = vld [vmem:[%s12889_s27 + $0x3f8] sm:$0xff]  ;;  %9160 = vmatpush.bf16.msra.mxu2 %v12325_v23 }
 0x5af   : > { %v7051_v13 = vrot.slane %v12588_v50, 5  ;;  %v11469_v50 = vrot.slane %v6534_v19, 9 }
 0x5b1   : > { %v8529_v10 = vpop.f32.mrf.mxu2  ;;  %v8630_v36 = vpop.f32.mrf.mxu0  ;;  %v7068_v14 = vrot.slane %v7051_v13, 4 }
 0x5b2   : > { %v8618_v0 = vpop.f32.mrf.mxu3  ;;  %v8719_v5 = vpop.f32.mrf.mxu1  ;;  %v8631_v24 = vadd.f32 %v8630_v36, %v14654_v39  ;;  %v12309_v39 = vld [vmem:[%s16219_s1 + $0x610] sm:$0xff] }
 0x5b3   : > { %v15105_v6 = vadd.f32 %v8618_v0, %v8529_v10  ;;  %8982 = vmatpush.bf16.msra.mxu0 %v12309_v39  ;;  %v7052_v10 = vsel %vm14415_vm5, %v11468_v58, %v7051_v13  ;;  %v7070_v36 = vsel %vm14415_vm5, %v7068_v14, %v7069_v33 }
 0x5b4   : > { %v8720_v7 = vadd.f32 %v8719_v5, %v8631_v24  ;;  %8669 = vmatmul.bf16.gmra.mxu0 %v7797_v32  ;;  %v7072_v24 = vrot.slane %v12591_v17, 5  ;;  %v12317_v5 = vld [vmem:[%s16219_s1 + $0x650] sm:$0xff]  ;;  %v7608_v58 = vunpack.c.l.b16 %v7070_v36  ;;  %v7600_v14 = vunpack.c.h.b16 %v7052_v10 }
 0x5b5   : > { %8758 = vmatmul.bf16.gmra.mxu1 %v7798_v43  ;;  %v7609_v20 = vunpack.c.h.b16 %v7070_v36  ;;  %v9350_v36 = vld [vmem:[%s16221_s3 + $0x30] sm:$0xff] }
 0x5b6   : > { %8847 = vmatmul.bf16.gmra.mxu2 %v7799_v37  ;;  %v7073_v18 = vsel %vm14415_vm5, %v7071_v59, %v7072_v24  ;;  %9071 = vmatpush.bf16.msra.mxu1 %v12317_v5  ;;  %v12592_v5 = vld [vmem:[%s12889_s27 + $0x464] sm:$0xff] }
 0x5b7   : > { %8936 = vmatmul.bf16.gmra.mxu3 %v7800_v28  ;;  %v7056_v28 = vsel %vm14415_vm5, %v11469_v50, %v7055_v46  ;;  %v7610_v23 = vunpack.c.l.b16 %v7073_v18  ;;  %v7807_v59 = vpack.c.b16 %v7609_v20, %v7600_v14 }
 0x5b8   : > { %v7601_v33 = vunpack.c.l.b16 %v7056_v28  ;;  %v7602_v39 = vunpack.c.h.b16 %v7056_v28  ;;  %v12593_v28 = vld [vmem:[%s12889_s27 + $0x46c] sm:$0xff]  ;;  %9462 = vmatpush.msra.mxu3 %v9350_v36 }
 0x5b9   : > { %v8808_v41 = vpop.f32.mrf.mxu2  ;;  %v8632_v32 = vpop.f32.mrf.mxu0 }
 0x5ba   : > { %v8897_v29 = vpop.f32.mrf.mxu3  ;;  %v8809_v0 = vadd.f32 %v8808_v41, %v8720_v7  ;;  %v8721_v43 = vpop.f32.mrf.mxu1  ;;  %v8633_v37 = vadd.f32 %v8632_v32, %v14670_v2  ;;  %v7599_v7 = vunpack.c.l.b16 %v7052_v10  ;;  %v7611_v2 = vunpack.c.h.b16 %v7073_v18 }
 0x5bb   : > { %v7086_v10 = vrot.slane %v12592_v5, 5  ;;  %v7090_v18 = vrot.slane %v12593_v28, 5 }
 0x5bc   : > { %v15132_v19 = vadd.f32 %v8897_v29, %v8809_v0  ;;  %v8722_v13 = vadd.f32 %v8721_v43, %v8633_v37  ;;  %v7806_v50 = vpack.c.b16 %v7608_v58, %v7599_v7  ;;  %v7808_v0 = vpack.c.b16 %v7610_v23, %v7601_v33  ;;  %v6538_v43 = vld [vmem:[%s12889_s27 + $0x440] sm:$0xee]  ;;  %v12594_v33 = vld [vmem:[%s12889_s27 + $0x488] sm:$0x11] }
 0x5bd   : > { %v7809_v32 = vpack.c.b16 %v7611_v2, %v7602_v39  ;;  %v11473_v14 = vrot.slane %v6538_v43, 9  ;;  %v7103_v20 = vrot.slane %v7086_v10, 4  ;;  %v7104_v23 = vrot.slane %v12594_v33, 5 }
 0x5be   : > { %v7106_v2 = vrot.slane %v7090_v18, 4 }
 0x5c1   : > { %v8810_v17 = vpop.f32.mrf.mxu2  ;;  %v8635_v41 = vpop.f32.mrf.mxu0 }
 0x5c2   : > { %v8899_v46 = vpop.f32.mrf.mxu3  ;;  %v8811_v24 = vadd.f32 %v8810_v17, %v8722_v13  ;;  %v8724_v29 = vpop.f32.mrf.mxu1  ;;  %v8636_v37 = vadd.f32 %v8635_v41, %v14681_v55  ;;  %v6539_v13 = vld [vmem:[%s12889_s27 + $0x448] sm:$0xee]  ;;  %v12595_v17 = vld [vmem:[%s12889_s27 + $0x490] sm:$0x11] }
 0x5c3   : > { %v11474_v39 = vrot.slane %v6539_v13, 9  ;;  %v7107_v55 = vrot.slane %v12595_v17, 5 }
 0x5c4   : > { %v15141_v7 = vadd.f32 %v8899_v46, %v8811_v24  ;;  %v8725_v58 = vadd.f32 %v8724_v29, %v8636_v37  ;;  %8674 = vmatmul.bf16.gmra.mxu0 %v7806_v50  ;;  %v7087_v46 = vsel %vm14415_vm5, %v11473_v14, %v7086_v10  ;;  %v7105_v50 = vsel %vm14415_vm5, %v7103_v20, %v7104_v23 }
 0x5c5   : > { %8763 = vmatmul.bf16.gmra.mxu1 %v7807_v59  ;;  %v7617_v37 = vunpack.c.l.b16 %v7087_v46  ;;  %v7626_v13 = vunpack.c.l.b16 %v7105_v50  ;;  %v7618_v10 = vunpack.c.h.b16 %v7087_v46  ;;  %v12596_v46 = vld [vmem:[%s12889_s27 + $0x4d0] sm:$0xff] }
 0x5c6   : > { %8852 = vmatmul.bf16.gmra.mxu2 %v7808_v0  ;;  %v7091_v0 = vsel %vm14415_vm5, %v11474_v39, %v7090_v18 }
 0x5c7   : > { %8941 = vmatmul.bf16.gmra.mxu3 %v7809_v32  ;;  %v7108_v32 = vsel %vm14415_vm5, %v7106_v2, %v7107_v55  ;;  %v7619_v14 = vunpack.c.l.b16 %v7091_v0  ;;  %v7620_v20 = vunpack.c.h.b16 %v7091_v0  ;;  %v7815_v39 = vpack.c.b16 %v7626_v13, %v7617_v37  ;;  %v12598_v13 = vld [vmem:[%s12889_s27 + $0x4f4] sm:$0x11] }
 0x5c8   : > { %v7628_v33 = vunpack.c.l.b16 %v7108_v32 }
 0x5c9   : > { %v8813_v41 = vpop.f32.mrf.mxu2  ;;  %v8637_v36 = vpop.f32.mrf.mxu0 }
 0x5ca   : > { %v8902_v5 = vpop.f32.mrf.mxu3  ;;  %v8814_v24 = vadd.f32 %v8813_v41, %v8725_v58  ;;  %v8726_v29 = vpop.f32.mrf.mxu1  ;;  %v8638_v59 = vadd.f32 %v8637_v36, %v14694_v62  ;;  %v7627_v58 = vunpack.c.h.b16 %v7105_v50  ;;  %v7629_v62 = vunpack.c.h.b16 %v7108_v32  ;;  %v6543_v36 = vld [vmem:[%s12889_s27 + $0x4ac] sm:$0xee]  ;;  %v6544_v32 = vld [vmem:[%s12889_s27 + $0x4b4] sm:$0xee] }
 0x5cb   : > { %v11478_v37 = vrot.slane %v6543_v36, 9 }
 0x5cc   : > { %v15155_v43 = vadd.f32 %v8902_v5, %v8814_v24  ;;  %v8727_v28 = vadd.f32 %v8726_v29, %v8638_v59  ;;  %v7816_v17 = vpack.c.b16 %v7627_v58, %v7618_v10  ;;  %v7817_v5 = vpack.c.b16 %v7628_v33, %v7619_v14  ;;  %v12597_v59 = vld [vmem:[%s12889_s27 + $0x4d8] sm:$0xff]  ;;  %v12324_v58 = vld [vmem:[%s16219_s1 + $0x688] sm:$0xff] }
 0x5cd   : > { %v7818_v24 = vpack.c.b16 %v7629_v62, %v7620_v20  ;;  %v7121_v29 = vrot.slane %v12596_v46, 5  ;;  %v7125_v22 = vrot.slane %v12597_v59, 5  ;;  %v7139_v10 = vrot.slane %v12598_v13, 5  ;;  %v12599_v20 = vld [vmem:[%s12889_s27 + $0x4fc] sm:$0x11]  ;;  %9161 = vmatpush.bf16.msra.mxu2 %v12324_v58 }
 0x5ce   : > { %v11479_v14 = vrot.slane %v6544_v32, 9  ;;  %v7142_v62 = vrot.slane %v12599_v20, 5 }
 0x5cf   : > { %v7141_v33 = vrot.slane %v7125_v22, 4 }
 0x5d0   : > { %v7126_v36 = vsel %vm14415_vm5, %v11479_v14, %v7125_v22 }
 0x5d1   : > { %v8815_v23 = vpop.f32.mrf.mxu2  ;;  %v8640_v55 = vpop.f32.mrf.mxu0  ;;  %v7143_v46 = vsel %vm14415_vm5, %v7141_v33, %v7142_v62 }
 0x5d2   : > { %v8904_v18 = vpop.f32.mrf.mxu3  ;;  %v8816_v2 = vadd.f32 %v8815_v23, %v8727_v28  ;;  %v8729_v41 = vpop.f32.mrf.mxu1  ;;  %v8641_v50 = vadd.f32 %v8640_v55, %v14708_v38  ;;  %v7138_v28 = vrot.slane %v7121_v29, 4  ;;  %v12308_v38 = vld [vmem:[%s16219_s1 + $0x608] sm:$0xff]  ;;  %v7646_v13 = vunpack.c.l.b16 %v7143_v46 }
 0x5d3   : > { %8983 = vmatpush.bf16.msra.mxu0 %v12308_v38 }
 0x5d4   : > { %v15161_v0 = vadd.f32 %v8904_v18, %v8816_v2  ;;  %v8730_v26 = vadd.f32 %v8729_v41, %v8641_v50  ;;  %8679 = vmatmul.bf16.gmra.mxu0 %v7815_v39  ;;  %v7122_v39 = vsel %vm14415_vm5, %v11478_v37, %v7121_v29  ;;  %v7140_v41 = vsel %vm14415_vm5, %v7138_v28, %v7139_v10 }
 0x5d5   : > { %8768 = vmatmul.bf16.gmra.mxu1 %v7816_v17  ;;  %v7644_v59 = vunpack.c.l.b16 %v7140_v41  ;;  %v7636_v32 = vunpack.c.h.b16 %v7122_v39  ;;  %v7645_v37 = vunpack.c.h.b16 %v7140_v41  ;;  %v7637_v28 = vunpack.c.l.b16 %v7126_v36 }
 0x5d6   : > { %8857 = vmatmul.bf16.gmra.mxu2 %v7817_v5  ;;  %v12316_v5 = vld [vmem:[%s16219_s1 + $0x648] sm:$0xff]  ;;  %v7638_v10 = vunpack.c.h.b16 %v7126_v36 }
 0x5d7   : > { %8946 = vmatmul.bf16.gmra.mxu3 %v7818_v24  ;;  %9072 = vmatpush.bf16.msra.mxu1 %v12316_v5  ;;  %v7825_v14 = vpack.c.b16 %v7645_v37, %v7636_v32  ;;  %v12601_v5 = vld [vmem:[%s12889_s27 + $0x544] sm:$0xff] }
 0x5d8   : > { %v12602_v32 = vld [vmem:[%s12889_s27 + $0x560] sm:$0x11] }
 0x5d9   : > { %v8818_v23 = vpop.f32.mrf.mxu2  ;;  %v8642_v2 = vpop.f32.mrf.mxu0  ;;  %v7174_v37 = vrot.slane %v12602_v32, 5 }
 0x5da   : > { %v8907_v18 = vpop.f32.mrf.mxu3  ;;  %v8819_v17 = vadd.f32 %v8818_v23, %v8730_v26  ;;  %v8731_v55 = vpop.f32.mrf.mxu1  ;;  %v8643_v24 = vadd.f32 %v8642_v2, %v14724_v63  ;;  %v7635_v26 = vunpack.c.l.b16 %v7122_v39  ;;  %v7647_v63 = vunpack.c.h.b16 %v7143_v46  ;;  %v12600_v2 = vld [vmem:[%s12889_s27 + $0x53c] sm:$0xff] }
 0x5db   : > { %v7826_v23 = vpack.c.b16 %v7646_v13, %v7637_v28  ;;  %v7156_v39 = vrot.slane %v12600_v2, 5  ;;  %v6549_v46 = vld [vmem:[%s12889_s27 + $0x520] sm:$0xee] }
 0x5dc   : > { %v15184_v50 = vadd.f32 %v8907_v18, %v8819_v17  ;;  %v8732_v29 = vadd.f32 %v8731_v55, %v8643_v24  ;;  %v7824_v38 = vpack.c.b16 %v7644_v59, %v7635_v26  ;;  %v7827_v18 = vpack.c.b16 %v7647_v63, %v7638_v10  ;;  %v6548_v17 = vld [vmem:[%s12889_s27 + $0x518] sm:$0xee]  ;;  %v9349_v55 = vld [vmem:[%s16221_s3 + $0x28] sm:$0xff] }
 0x5dd   : > { %v7160_v24 = vrot.slane %v12601_v5, 5  ;;  %9463 = vmatpush.msra.mxu3 %v9349_v55  ;;  %v7173_v59 = vrot.slane %v7156_v39, 4  ;;  %v11484_v28 = vrot.slane %v6549_v46, 9  ;;  %v12603_v10 = vld [vmem:[%s12889_s27 + $0x568] sm:$0x11] }
 0x5df   : > { %v7176_v13 = vrot.slane %v7160_v24, 4 }
 0x5e1   : > { %v8820_v58 = vpop.f32.mrf.mxu2  ;;  %v8645_v20 = vpop.f32.mrf.mxu0 }
 0x5e2   : > { %v8909_v22 = vpop.f32.mrf.mxu3  ;;  %v8821_v33 = vadd.f32 %v8820_v58, %v8732_v29  ;;  %v8734_v62 = vpop.f32.mrf.mxu1  ;;  %v8646_v41 = vadd.f32 %v8645_v20, %v14735_v12  ;;  %v11483_v29 = vrot.slane %v6548_v17, 9  ;;  %v7177_v12 = vrot.slane %v12603_v10, 5 }
 0x5e4   : > { %v15193_v36 = vadd.f32 %v8909_v22, %v8821_v33  ;;  %v8735_v26 = vadd.f32 %v8734_v62, %v8646_v41  ;;  %8684 = vmatmul.bf16.gmra.mxu0 %v7824_v38  ;;  %v7157_v22 = vsel %vm14415_vm5, %v11483_v29, %v7156_v39  ;;  %v7175_v38 = vsel %vm14415_vm5, %v7173_v59, %v7174_v37 }
 0x5e5   : > { %8773 = vmatmul.bf16.gmra.mxu1 %v7825_v14  ;;  %v7653_v2 = vunpack.c.l.b16 %v7157_v22  ;;  %v7662_v41 = vunpack.c.l.b16 %v7175_v38  ;;  %v7654_v39 = vunpack.c.h.b16 %v7157_v22  ;;  %v7663_v5 = vunpack.c.h.b16 %v7175_v38  ;;  %v12604_v22 = vld [vmem:[%s12889_s27 + $0x5a8] sm:$0xff] }
 0x5e6   : > { %8862 = vmatmul.bf16.gmra.mxu2 %v7826_v23  ;;  %v7161_v23 = vsel %vm14415_vm5, %v11484_v28, %v7160_v24 }
 0x5e7   : > { %8951 = vmatmul.bf16.gmra.mxu3 %v7827_v18  ;;  %v7178_v18 = vsel %vm14415_vm5, %v7176_v13, %v7177_v12  ;;  %v7655_v46 = vunpack.c.l.b16 %v7161_v23  ;;  %v7656_v29 = vunpack.c.h.b16 %v7161_v23  ;;  %v7833_v32 = vpack.c.b16 %v7662_v41, %v7653_v2  ;;  %v6554_v23 = vld [vmem:[%s12889_s27 + $0x58c] sm:$0xee]  ;;  %v12606_v41 = vld [vmem:[%s12889_s27 + $0x5cc] sm:$0x11] }
 0x5e8   : > { %v7834_v37 = vpack.c.b16 %v7663_v5, %v7654_v39  ;;  %v7209_v39 = vrot.slane %v12606_v41, 5  ;;  %v12323_v5 = vld [vmem:[%s16219_s1 + $0x680] sm:$0xff] }
 0x5e9   : > { %v8823_v63 = vpop.f32.mrf.mxu2  ;;  %v8647_v20 = vpop.f32.mrf.mxu0  ;;  %9162 = vmatpush.bf16.msra.mxu2 %v12323_v5 }
 0x5ea   : > { %v8912_v58 = vpop.f32.mrf.mxu3  ;;  %v8824_v33 = vadd.f32 %v8823_v63, %v8735_v26  ;;  %v8736_v62 = vpop.f32.mrf.mxu1  ;;  %v8648_v14 = vadd.f32 %v8647_v20, %v14748_v21  ;;  %v7664_v26 = vunpack.c.l.b16 %v7178_v18  ;;  %v7665_v21 = vunpack.c.h.b16 %v7178_v18 }
 0x5ec   : > { %v15207_v17 = vadd.f32 %v8912_v58, %v8824_v33  ;;  %v8737_v55 = vadd.f32 %v8736_v62, %v8648_v14  ;;  %v7835_v12 = vpack.c.b16 %v7664_v26, %v7655_v46  ;;  %v7836_v63 = vpack.c.b16 %v7665_v21, %v7656_v29  ;;  %v6553_v58 = vld [vmem:[%s12889_s27 + $0x584] sm:$0xee]  ;;  %v12605_v62 = vld [vmem:[%s12889_s27 + $0x5b0] sm:$0xff] }
 0x5ed   : > { %v7191_v33 = vrot.slane %v12604_v22, 5  ;;  %v7195_v38 = vrot.slane %v12605_v62, 5  ;;  %v11488_v2 = vrot.slane %v6553_v58, 9  ;;  %v11489_v46 = vrot.slane %v6554_v23, 9  ;;  %v12607_v29 = vld [vmem:[%s12889_s27 + $0x5d4] sm:$0x11] }
 0x5ee   : > { %v7212_v21 = vrot.slane %v12607_v29, 5 }
 0x5ef   : > { %v7211_v26 = vrot.slane %v7195_v38, 4 }
 0x5f1   : > { %v8825_v59 = vpop.f32.mrf.mxu2  ;;  %v8650_v13 = vpop.f32.mrf.mxu0  ;;  %v7213_v58 = vsel %vm14415_vm5, %v7211_v26, %v7212_v21  ;;  %v6558_v21 = vld [vmem:[%s12889_s27 + $0x5f0] sm:$0xee] }
 0x5f2   : > { %v8914_v24 = vpop.f32.mrf.mxu3  ;;  %v8826_v28 = vadd.f32 %v8825_v59, %v8737_v55  ;;  %v8739_v10 = vpop.f32.mrf.mxu1  ;;  %v8651_v20 = vadd.f32 %v8650_v13, %v14762_v30  ;;  %v7208_v55 = vrot.slane %v7191_v33, 4  ;;  %v12307_v30 = vld [vmem:[%s16219_s1 + $0x600] sm:$0xff]  ;;  %v7683_v41 = vunpack.c.h.b16 %v7213_v58 }
 0x5f3   : > { %8984 = vmatpush.bf16.msra.mxu0 %v12307_v30 }
 0x5f4   : > { %v15213_v14 = vadd.f32 %v8914_v24, %v8826_v28  ;;  %v8740_v18 = vadd.f32 %v8739_v10, %v8651_v20  ;;  %8689 = vmatmul.bf16.gmra.mxu0 %v7833_v32  ;;  %v7192_v24 = vsel %vm14415_vm5, %v11488_v2, %v7191_v33  ;;  %v7210_v13 = vsel %vm14415_vm5, %v7208_v55, %v7209_v39  ;;  %v12315_v10 = vld [vmem:[%s16219_s1 + $0x640] sm:$0xff] }
 0x5f5   : > { %8778 = vmatmul.bf16.gmra.mxu1 %v7834_v37  ;;  %v7671_v22 = vunpack.c.l.b16 %v7192_v24  ;;  %v7680_v20 = vunpack.c.l.b16 %v7210_v13  ;;  %v7672_v62 = vunpack.c.h.b16 %v7192_v24  ;;  %v7681_v23 = vunpack.c.h.b16 %v7210_v13  ;;  %v12609_v13 = vld [vmem:[%s12889_s27 + $0x61c] sm:$0xff] }
 0x5f6   : > { %8867 = vmatmul.bf16.gmra.mxu2 %v7835_v12  ;;  %9073 = vmatpush.bf16.msra.mxu1 %v12315_v10  ;;  %v7682_v2 = vunpack.c.l.b16 %v7213_v58  ;;  %v7230_v10 = vrot.slane %v12609_v13, 5  ;;  %v11493_v58 = vrot.slane %v6558_v21, 9 }
 0x5f7   : > { %8956 = vmatmul.bf16.gmra.mxu3 %v7836_v63  ;;  %v7196_v63 = vsel %vm14415_vm5, %v11489_v46, %v7195_v38  ;;  %v7842_v39 = vpack.c.b16 %v7680_v20, %v7671_v22  ;;  %v7843_v38 = vpack.c.b16 %v7681_v23, %v7672_v62 }
 0x5f8   : > { %v7674_v55 = vunpack.c.h.b16 %v7196_v63  ;;  %v7246_v23 = vrot.slane %v7230_v10, 4 }
 0x5f9   : > { %v8828_v59 = vpop.f32.mrf.mxu2  ;;  %v8652_v37 = vpop.f32.mrf.mxu0 }
 0x5fa   : > { %v15226_v32 = vadd.f32 %v8828_v59, %v8740_v18  ;;  %v8741_v28 = vpop.f32.mrf.mxu1  ;;  %v8653_v12 = vadd.f32 %v8652_v37, %v14779_v40  ;;  %v7673_v18 = vunpack.c.l.b16 %v7196_v63  ;;  %v7845_v29 = vpack.c.b16 %v7683_v41, %v7674_v55  ;;  %v12608_v59 = vld [vmem:[%s12889_s27 + $0x614] sm:$0xff]  ;;  %v9348_v37 = vld [vmem:[%s16221_s3 + $0x20] sm:$0xff] }
 0x5fb   : > { %v7226_v24 = vrot.slane %v12608_v59, 5  ;;  %9464 = vmatpush.msra.mxu3 %v9348_v37 }
 0x5fc   : > { %v8742_v33 = vadd.f32 %v8741_v28, %v8653_v12  ;;  %v7844_v26 = vpack.c.b16 %v7682_v2, %v7673_v18  ;;  %v6559_v12 = vld [vmem:[%s12889_s27 + $0x5f8] sm:$0xee]  ;;  %v12611_v18 = vld [vmem:[%s12889_s27 + $0x640] sm:$0x11] }
 0x5fd   : > { %v7243_v22 = vrot.slane %v7226_v24, 4  ;;  %v11494_v62 = vrot.slane %v6559_v12, 9  ;;  %v7247_v2 = vrot.slane %v12611_v18, 5  ;;  %v6563_v18 = vld [vmem:[%s12889_s27 + $0x65c] sm:$0xee] }
 0x601   : > { %v8830_v40 = vpop.f32.mrf.mxu2  ;;  %v8655_v30 = vpop.f32.mrf.mxu0 }
 0x602   : > { %v15238_v5 = vadd.f32 %v8830_v40, %v8742_v33  ;;  %v8744_v46 = vpop.f32.mrf.mxu1  ;;  %v8656_v28 = vadd.f32 %v8655_v30, %v14797_v27  ;;  %v12610_v33 = vld [vmem:[%s12889_s27 + $0x638] sm:$0x11]  ;;  %v7227_v27 = vsel %vm14415_vm5, %v11493_v58, %v7226_v24 }
 0x603   : > { %v7244_v20 = vrot.slane %v12610_v33, 5  ;;  %v7690_v24 = vunpack.c.h.b16 %v7227_v27 }
 0x604   : > { %v8745_v63 = vadd.f32 %v8744_v46, %v8656_v28  ;;  %8694 = vmatmul.bf16.gmra.mxu0 %v7842_v39  ;;  %v7231_v46 = vsel %vm14415_vm5, %v11494_v62, %v7230_v10 }
 0x605   : > { %8783 = vmatmul.bf16.gmra.mxu1 %v7843_v38  ;;  %v7245_v39 = vsel %vm14415_vm5, %v7243_v22, %v7244_v20  ;;  %v7691_v28 = vunpack.c.l.b16 %v7231_v46  ;;  %v7692_v12 = vunpack.c.h.b16 %v7231_v46  ;;  %v11498_v46 = vrot.slane %v6563_v18, 9 }
 0x606   : > { %8872 = vmatmul.bf16.gmra.mxu2 %v7844_v26  ;;  %v7248_v26 = vsel %vm14415_vm5, %v7246_v23, %v7247_v2  ;;  %v7698_v59 = vunpack.c.l.b16 %v7245_v39  ;;  %v7699_v37 = vunpack.c.h.b16 %v7245_v39  ;;  %v12612_v2 = vld [vmem:[%s12889_s27 + $0x680] sm:$0xff] }
 0x607   : > { %8961 = vmatmul.bf16.gmra.mxu3 %v7845_v29  ;;  %v7689_v29 = vunpack.c.l.b16 %v7227_v27  ;;  %v7700_v13 = vunpack.c.l.b16 %v7248_v26  ;;  %v6564_v39 = vld [vmem:[%s12889_s27 + $0x664] sm:$0xee] }
 0x608   : > { %v7852_v22 = vpack.c.b16 %v7699_v37, %v7690_v24  ;;  %v12615_v37 = vld [vmem:[%s12889_s27 + $0x6ac] sm:$0x11] }
 0x609   : > { %v8833_v55 = vpop.f32.mrf.mxu2  ;;  %v8657_v40 = vpop.f32.mrf.mxu0  ;;  %v7851_v58 = vpack.c.b16 %v7698_v59, %v7689_v29  ;;  %v7853_v62 = vpack.c.b16 %v7700_v13, %v7691_v28  ;;  %v12614_v29 = vld [vmem:[%s12889_s27 + $0x6a4] sm:$0x11]  ;;  %v11499_v59 = vrot.slane %v6564_v39, 9  ;;  %v7282_v28 = vrot.slane %v12615_v37, 5  ;;  %v6490_v37 = vld [vmem:[%s12889_s27 + $0x18] sm:$0xee] }
 0x60a   : > { %v15252_v41 = vadd.f32 %v8833_v55, %v8745_v63  ;;  %v8746_v30 = vpop.f32.mrf.mxu1  ;;  %v8658_v38 = vadd.f32 %v8657_v40, %v14818_v11  ;;  %v7701_v63 = vunpack.c.h.b16 %v7248_v26  ;;  %v7261_v55 = vrot.slane %v12612_v2, 5  ;;  %v12613_v40 = vld [vmem:[%s12889_s27 + $0x688] sm:$0xff] }
 0x60c   : > { %v8747_v21 = vadd.f32 %v8746_v30, %v8658_v38  ;;  %v7854_v23 = vpack.c.b16 %v7701_v63, %v7692_v12  ;;  %v7265_v30 = vrot.slane %v12613_v40, 5  ;;  %v7278_v26 = vrot.slane %v7261_v55, 4 }
 0x60e   : > { %v7281_v24 = vrot.slane %v7265_v30, 4 }
 0x611   : > { %v8835_v11 = vpop.f32.mrf.mxu2  ;;  %v8660_v33 = vpop.f32.mrf.mxu0 }
 0x612   : > { %v15261_v10 = vadd.f32 %v8835_v11, %v8747_v21  ;;  %v8749_v20 = vpop.f32.mrf.mxu1  ;;  %v8661_v27 = vadd.f32 %v8660_v33, %v14839_v48  ;;  %v7279_v21 = vrot.slane %v12614_v29, 5  ;;  %v7262_v48 = vsel %vm14415_vm5, %v11498_v46, %v7261_v55 }
 0x613   : > { %v7266_v33 = vsel %vm14415_vm5, %v11499_v59, %v7265_v30  ;;  %v7708_v2 = vunpack.c.h.b16 %v7262_v48 }
 0x614   : > { %v8750_v38 = vadd.f32 %v8749_v20, %v8661_v27  ;;  %8699 = vmatmul.bf16.gmra.mxu0 %v7851_v58  ;;  %v7280_v58 = vsel %vm14415_vm5, %v7278_v26, %v7279_v21  ;;  %v7283_v20 = vsel %vm14415_vm5, %v7281_v24, %v7282_v28  ;;  %v7709_v27 = vunpack.c.l.b16 %v7266_v33  ;;  %v12616_v28 = vld [vmem:[%s12889_s27 + $0x3c] sm:$0xff] }
 0x615   : > { %8788 = vmatmul.bf16.gmra.mxu1 %v7852_v22  ;;  %v7716_v18 = vunpack.c.l.b16 %v7280_v58  ;;  %v7717_v55 = vunpack.c.h.b16 %v7280_v58  ;;  %v7718_v40 = vunpack.c.l.b16 %v7283_v20  ;;  %v7710_v39 = vunpack.c.h.b16 %v7266_v33 }
 0x616   : > { %8877 = vmatmul.bf16.gmra.mxu2 %v7853_v62  ;;  %v7707_v62 = vunpack.c.l.b16 %v7262_v48  ;;  %v9347_v48 = vld [vmem:[%s16221_s3 + $0x18] sm:$0xff] }
 0x617   : > { %8966 = vmatmul.bf16.gmra.mxu3 %v7854_v23  ;;  %v7861_v26 = vpack.c.b16 %v7717_v55, %v7708_v2  ;;  %v7862_v59 = vpack.c.b16 %v7718_v40, %v7709_v27  ;;  %v12619_v27 = vld [vmem:[%s12889_s27 + $0x68] sm:$0x1] }
 0x618   : > { %9465 = vmatpush.msra.mxu3 %v9347_v48  ;;  %v6763_v40 = vrot.slane %v12619_v27, 5 }
 0x619   : > { %v8838_v13 = vpop.f32.mrf.mxu2  ;;  %v8662_v63 = vpop.f32.mrf.mxu0 }
 0x61a   : > { %v15272_v12 = vadd.f32 %v8838_v13, %v8750_v38  ;;  %v8751_v11 = vpop.f32.mrf.mxu1  ;;  %v8663_v22 = vadd.f32 %v8662_v63, %v14855_v61  ;;  %v7719_v38 = vunpack.c.h.b16 %v7283_v20  ;;  %v7860_v61 = vpack.c.b16 %v7716_v18, %v7707_v62  ;;  %v12618_v62 = vld [vmem:[%s12889_s27 + $0x60] sm:$0x11] }
 0x61b   : > { %v6744_v13 = vrot.slane %v12616_v28, 5  ;;  %v11425_v20 = vrot.slane %v6490_v37, 9 }
 0x61c   : > { %v8752_v23 = vadd.f32 %v8751_v11, %v8663_v22  ;;  %v7863_v24 = vpack.c.b16 %v7719_v38, %v7710_v39  ;;  %v12617_v11 = vld [vmem:[%s12889_s27 + $0x44] sm:$0xf]  ;;  %v6491_v22 = vld [vmem:[%s12889_s27 + $0x20] sm:$0xe] }
 0x61d   : > { %v6748_v58 = vrot.slane %v12617_v11, 5  ;;  %v6759_v18 = vrot.slane %v6744_v13, 4  ;;  %v11426_v2 = vrot.slane %v6491_v22, 9 }
 0x61f   : > { %v6762_v55 = vrot.slane %v6748_v58, 4 }
 0x621   : > { %v8840_v46 = vpop.f32.mrf.mxu2  ;;  %v8665_v29 = vpop.f32.mrf.mxu0 }
 0x622   : > { %v15281_v30 = vadd.f32 %v8840_v46, %v8752_v23  ;;  %v8754_v21 = vpop.f32.mrf.mxu1  ;;  %v8666_v63 = vadd.f32 %v8665_v29, %v14863_v4  ;;  %v6760_v23 = vrot.slane %v12618_v62, 5  ;;  %v6745_v4 = vsel %vm14415_vm5, %v11425_v20, %v6744_v13 }
 0x623   : > { %v7442_v13 = vunpack.c.h.b16 %v6745_v4 }
 0x624   : > { %v8755_v33 = vadd.f32 %v8754_v21, %v8666_v63  ;;  %8704 = vmatmul.bf16.gmra.mxu0 %v7860_v61  ;;  %v6761_v61 = vsel %vm14415_vm5, %v6759_v18, %v6760_v23  ;;  %v6749_v21 = vsel %vm14415_vm5, %v11426_v2, %v6748_v58  ;;  %v6495_v18 = vld [vmem:[%s12889_s27 + $0x84] sm:$0xee] }
 0x625   : > { %8793 = vmatmul.bf16.gmra.mxu1 %v7861_v26  ;;  %v7450_v28 = vunpack.c.l.b16 %v6761_v61  ;;  %v7451_v48 = vunpack.c.h.b16 %v6761_v61  ;;  %v7443_v63 = vunpack.c.l.b16 %v6749_v21  ;;  %v12620_v2 = vld [vmem:[%s12889_s27 + $0xa8] sm:$0xff] }
 0x626   : > { %8882 = vmatmul.bf16.gmra.mxu2 %v7862_v59  ;;  %v6764_v59 = vsel %vm14415_vm5, %v6762_v55, %v6763_v40  ;;  %v6779_v55 = vrot.slane %v12620_v2, 5  ;;  %v12621_v40 = vld [vmem:[%s12889_s27 + $0xb0] sm:$0xf] }
 0x627   : > { %8971 = vmatmul.bf16.gmra.mxu3 %v7863_v24  ;;  %v7441_v24 = vunpack.c.l.b16 %v6745_v4  ;;  %v7452_v11 = vunpack.c.l.b16 %v6764_v59  ;;  %v6496_v4 = vld [vmem:[%s12889_s27 + $0x8c] sm:$0xe] }
 0x628   : > { %v6794_v61 = vrot.slane %v6779_v55, 4  ;;  %v11431_v59 = vrot.slane %v6496_v4, 9 }
 0x629   : > { %v8843_v39 = vpop.f32.mrf.mxu2  ;;  %v8667_v46 = vpop.f32.mrf.mxu0  ;;  %v7731_v23 = vpack.c.b16 %v7452_v11, %v7443_v63 }
 0x62a   : > { %v15295_v38 = vadd.f32 %v8843_v39, %v8755_v33  ;;  %v8756_v29 = vpop.f32.mrf.mxu1  ;;  %v8668_v26 = vadd.f32 %v8667_v46, %v14872_v45  ;;  %v7729_v33 = vpack.c.b16 %v7450_v28, %v7441_v24  ;;  %v7730_v45 = vpack.c.b16 %v7451_v48, %v7442_v13 }
 0x62b   : > { %v6783_v39 = vrot.slane %v12621_v40, 5 }
 0x62c   : > { %v8757_v37 = vadd.f32 %v8756_v29, %v8668_v26  ;;  %v11430_v29 = vrot.slane %v6495_v18, 9  ;;  %v12622_v26 = vld [vmem:[%s12889_s27 + $0xcc] sm:$0x11] }
 0x62d   : > { %v6795_v21 = vrot.slane %v12622_v26, 5  ;;  %v6797_v24 = vrot.slane %v6783_v39, 4 }
 0x62e   : > { %v6780_v48 = vsel %vm14415_vm5, %v11430_v29, %v6779_v55 }
 0x62f   : > { %v7460_v2 = vunpack.c.h.b16 %v6780_v48 }
 0x631   : > { %v8845_v22 = vpop.f32.mrf.mxu2  ;;  %v8670_v58 = vpop.f32.mrf.mxu0 }
 0x632   : > { %v15304_v20 = vadd.f32 %v8845_v22, %v8757_v37  ;;  %v8759_v62 = vpop.f32.mrf.mxu1  ;;  %v8671_v27 = vadd.f32 %v8670_v58, %v14893_v52  ;;  %v12623_v37 = vld [vmem:[%s12889_s27 + $0xd4] sm:$0x1]  ;;  %v6796_v22 = vsel %vm14415_vm5, %v6794_v61, %v6795_v21  ;;  %v6500_v21 = vld [vmem:[%s12889_s27 + $0xf0] sm:$0xee] }
 0x633   : > { %v6798_v28 = vrot.slane %v12623_v37, 5  ;;  %v7468_v18 = vunpack.c.l.b16 %v6796_v22  ;;  %v7469_v55 = vunpack.c.h.b16 %v6796_v22  ;;  %v9346_v37 = vld [vmem:[%s16221_s3 + $0x10] sm:$0xff]  ;;  %v11435_v22 = vrot.slane %v6500_v21, 9 }
 0x634   : > { %v8760_v46 = vadd.f32 %v8759_v62, %v8671_v27  ;;  %8985 = vmatmul.bf16.vlgmr.msra.gmra.mxu0 %v7729_v33  ;;  %v7459_v62 = vunpack.c.l.b16 %v6780_v48  ;;  %9466 = vmatpush.msra.mxu3 %v9346_v37 }
 0x635   : > { %9074 = vmatmul.bf16.vlgmr.msra.gmra.mxu1 %v7730_v45  ;;  %v6784_v45 = vsel %vm14415_vm5, %v11431_v59, %v6783_v39  ;;  %v6799_v58 = vsel %vm14415_vm5, %v6797_v24, %v6798_v28  ;;  %v12624_v59 = vld [vmem:[%s12889_s27 + $0x114] sm:$0xff] }
 0x636   : > { %9163 = vmatmul.bf16.vlgmr.msra.gmra.mxu2 %v7731_v23  ;;  %v7461_v27 = vunpack.c.l.b16 %v6784_v45  ;;  %v7470_v40 = vunpack.c.l.b16 %v6799_v58  ;;  %v6814_v24 = vrot.slane %v12624_v59, 5  ;;  %v12626_v45 = vld [vmem:[%s12889_s27 + $0x138] sm:$0x11] }
 0x637   : > { %v6830_v58 = vrot.slane %v12626_v45, 5 }
 0x638   : > { %v7740_v26 = vpack.c.b16 %v7470_v40, %v7461_v27 }
 0x639   : > { %v8848_v13 = vpop.f32.mrf.mxu2  ;;  %v8672_v63 = vpop.f32.mrf.mxu0 }
 0x63a   : > { %v15315_v52 = vadd.f32 %v8848_v13, %v8760_v46  ;;  %v8761_v11 = vpop.f32.mrf.mxu1  ;;  %v8673_v33 = vadd.f32 %v8672_v63, %v14907_v35  ;;  %v7738_v46 = vpack.c.b16 %v7468_v18, %v7459_v62  ;;  %v7739_v35 = vpack.c.b16 %v7469_v55, %v7460_v2  ;;  %v12625_v13 = vld [vmem:[%s12889_s27 + $0x11c] sm:$0xf]  ;;  %v6501_v63 = vld [vmem:[%s12889_s27 + $0xf8] sm:$0xe]  ;;  %v12627_v18 = vld [vmem:[%s12889_s27 + $0x140] sm:$0x1] }
 0x63b   : > { %v6818_v48 = vrot.slane %v12625_v13, 5  ;;  %v11436_v62 = vrot.slane %v6501_v63, 9  ;;  %v6833_v2 = vrot.slane %v12627_v18, 5 }
 0x63c   : > { %v8762_v23 = vadd.f32 %v8761_v11, %v8673_v33  ;;  %v6829_v33 = vrot.slane %v6814_v24, 4 }
 0x641   : > { %v8850_v4 = vpop.f32.mrf.mxu2  ;;  %v8675_v39 = vpop.f32.mrf.mxu0 }
 0x642   : > { %v15324_v29 = vadd.f32 %v8850_v4, %v8762_v23  ;;  %v8764_v61 = vpop.f32.mrf.mxu1  ;;  %v8676_v28 = vadd.f32 %v8675_v39, %v14920_v25  ;;  %v6832_v23 = vrot.slane %v6818_v48, 4  ;;  %v6815_v25 = vsel %vm14415_vm5, %v11435_v22, %v6814_v24 }
 0x643   : > { %v6819_v39 = vsel %vm14415_vm5, %v11436_v62, %v6818_v48  ;;  %v7478_v24 = vunpack.c.h.b16 %v6815_v25  ;;  %v12628_v62 = vld [vmem:[%s12889_s27 + $0x180] sm:$0xff] }
 0x644   : > { %v8765_v11 = vadd.f32 %v8764_v61, %v8676_v28  ;;  %8990 = vmatmul.bf16.gmra.mxu0 %v7738_v46  ;;  %v6831_v46 = vsel %vm14415_vm5, %v6829_v33, %v6830_v58  ;;  %v6834_v61 = vsel %vm14415_vm5, %v6832_v23, %v6833_v2  ;;  %v7479_v28 = vunpack.c.l.b16 %v6819_v39  ;;  %v6505_v58 = vld [vmem:[%s12889_s27 + $0x15c] sm:$0xee]  ;;  %v12629_v2 = vld [vmem:[%s12889_s27 + $0x188] sm:$0xf] }
 0x645   : > { %9079 = vmatmul.bf16.gmra.mxu1 %v7739_v35  ;;  %v7486_v59 = vunpack.c.l.b16 %v6831_v46  ;;  %v7487_v37 = vunpack.c.h.b16 %v6831_v46  ;;  %v7488_v13 = vunpack.c.l.b16 %v6834_v61  ;;  %v6849_v23 = vrot.slane %v12628_v62, 5  ;;  %v15355_v61 = vpop.f32.mrf.mxu3 }
 0x646   : > { %9168 = vmatmul.bf16.gmra.mxu2 %v7740_v26  ;;  %v7477_v26 = vunpack.c.l.b16 %v6815_v25  ;;  %v6506_v25 = vld [vmem:[%s12889_s27 + $0x164] sm:$0xe] }
 0x647   : > { %v7749_v45 = vpack.c.b16 %v7488_v13, %v7479_v28  ;;  %v6864_v46 = vrot.slane %v6849_v23, 4 }
 0x649   : > { %v8853_v55 = vpop.f32.mrf.mxu2  ;;  %v8677_v40 = vpop.f32.mrf.mxu0 }
 0x64a   : > { %v15338_v27 = vadd.f32 %v8853_v55, %v8765_v11  ;;  %v8766_v4 = vpop.f32.mrf.mxu1  ;;  %v8678_v35 = vadd.f32 %v8677_v40, %v14931_v54  ;;  %v7747_v11 = vpack.c.b16 %v7486_v59, %v7477_v26  ;;  %v7748_v54 = vpack.c.b16 %v7487_v37, %v7478_v24  ;;  %v12631_v59 = vld [vmem:[%s12889_s27 + $0x1ac] sm:$0x1] }
 0x64b   : > { %v6853_v55 = vrot.slane %v12629_v2, 5  ;;  %v11441_v26 = vrot.slane %v6506_v25, 9  ;;  %v6868_v24 = vrot.slane %v12631_v59, 5  ;;  %v12632_v59 = vld [vmem:[%s12889_s27 + $0x1ec] sm:$0xff] }
 0x64c   : > { %v8767_v21 = vadd.f32 %v8766_v4, %v8678_v35  ;;  %v11440_v4 = vrot.slane %v6505_v58, 9  ;;  %v12630_v35 = vld [vmem:[%s12889_s27 + $0x1a4] sm:$0x11] }
 0x64d   : > { %v6865_v39 = vrot.slane %v12630_v35, 5 }
 0x651   : > { %v8855_v63 = vpop.f32.mrf.mxu2  ;;  %v8680_v48 = vpop.f32.mrf.mxu0 }
 0x652   : > { %v15347_v22 = vadd.f32 %v8855_v63, %v8767_v21  ;;  %v8769_v33 = vpop.f32.mrf.mxu1  ;;  %v8681_v18 = vadd.f32 %v8680_v48, %v14950_v8  ;;  %v6867_v21 = vrot.slane %v6853_v55, 4  ;;  %v6850_v8 = vsel %vm14415_vm5, %v11440_v4, %v6849_v23 }
 0x653   : > { %v6854_v48 = vsel %vm14415_vm5, %v11441_v26, %v6853_v55  ;;  %v7496_v23 = vunpack.c.h.b16 %v6850_v8 }
 0x654   : > { %v8770_v40 = vadd.f32 %v8769_v33, %v8681_v18  ;;  %8995 = vmatmul.bf16.gmra.mxu0 %v7747_v11  ;;  %v6866_v11 = vsel %vm14415_vm5, %v6864_v46, %v6865_v39  ;;  %v6869_v33 = vsel %vm14415_vm5, %v6867_v21, %v6868_v24  ;;  %v7497_v2 = vunpack.c.l.b16 %v6854_v48  ;;  %v6510_v21 = vld [vmem:[%s12889_s27 + $0x1c8] sm:$0xee] }
 0x655   : > { %9084 = vmatmul.bf16.gmra.mxu1 %v7748_v54  ;;  %v7504_v62 = vunpack.c.l.b16 %v6866_v11  ;;  %v7505_v18 = vunpack.c.h.b16 %v6866_v11  ;;  %v7506_v25 = vunpack.c.l.b16 %v6869_v33  ;;  %v6884_v24 = vrot.slane %v12632_v59, 5  ;;  %v6511_v11 = vld [vmem:[%s12889_s27 + $0x1d0] sm:$0xe] }
 0x656   : > { %9173 = vmatmul.bf16.gmra.mxu2 %v7749_v45  ;;  %v7495_v45 = vunpack.c.l.b16 %v6850_v8  ;;  %v11445_v48 = vrot.slane %v6510_v21, 9 }
 0x657   : > { %v7757_v46 = vpack.c.b16 %v7505_v18, %v7496_v23  ;;  %v7758_v26 = vpack.c.b16 %v7506_v25, %v7497_v2  ;;  %v6899_v33 = vrot.slane %v6884_v24, 4  ;;  %v12635_v18 = vld [vmem:[%s12889_s27 + $0x218] sm:$0x1] }
 0x658   : > { %v7756_v4 = vpack.c.b16 %v7504_v62, %v7495_v45  ;;  %v12634_v45 = vld [vmem:[%s12889_s27 + $0x210] sm:$0x11]  ;;  %v11446_v62 = vrot.slane %v6511_v11, 9  ;;  %v6903_v2 = vrot.slane %v12635_v18, 5 }
 0x659   : > { %v8858_v37 = vpop.f32.mrf.mxu2  ;;  %v8682_v13 = vpop.f32.mrf.mxu0 }
 0x65a   : > { %v15360_v28 = vadd.f32 %v8858_v37, %v8770_v40  ;;  %v8771_v63 = vpop.f32.mrf.mxu1  ;;  %v8683_v54 = vadd.f32 %v8682_v13, %v14964_v16  ;;  %v15369_v40 = vpop.f32.mrf.mxu3  ;;  %v9345_v37 = vld [vmem:[%s16221_s3 + $0x8] sm:$0xff]  ;;  %v12633_v13 = vld [vmem:[%s12889_s27 + $0x1f4] sm:$0xf] }
 0x65b   : > { %9467 = vmatpush.msra.mxu3 %v9345_v37 }
 0x65c   : > { %v8772_v58 = vadd.f32 %v8771_v63, %v8683_v54  ;;  %v6888_v63 = vrot.slane %v12633_v13, 5 }
 0x65e   : > { %v6902_v23 = vrot.slane %v6888_v63, 4 }
 0x660   : > { %v6904_v21 = vsel %vm14415_vm5, %v6902_v23, %v6903_v2  ;;  %v6515_v23 = vld [vmem:[%s12889_s27 + $0x234] sm:$0xee] }
 0x661   : > { %v8860_v16 = vpop.f32.mrf.mxu2  ;;  %v8685_v35 = vpop.f32.mrf.mxu0  ;;  %v12636_v2 = vld [vmem:[%s12889_s27 + $0x258] sm:$0xff] }
 0x662   : > { %v15371_v55 = vadd.f32 %v8860_v16, %v8772_v58  ;;  %v8774_v39 = vpop.f32.mrf.mxu1  ;;  %v8686_v8 = vadd.f32 %v8685_v35, %v14977_v44  ;;  %v6900_v58 = vrot.slane %v12634_v45, 5  ;;  %v6885_v44 = vsel %vm14415_vm5, %v11445_v48, %v6884_v24 }
 0x663   : > { %v7513_v24 = vunpack.c.l.b16 %v6885_v44  ;;  %v7514_v13 = vunpack.c.h.b16 %v6885_v44  ;;  %v7524_v48 = vunpack.c.l.b16 %v6904_v21  ;;  %v12637_v44 = vld [vmem:[%s12889_s27 + $0x260] sm:$0xf]  ;;  %v11450_v21 = vrot.slane %v6515_v23, 9 }
 0x664   : > { %v8775_v54 = vadd.f32 %v8774_v39, %v8686_v8  ;;  %9000 = vmatmul.bf16.gmra.mxu0 %v7756_v4  ;;  %v6901_v4 = vsel %vm14415_vm5, %v6899_v33, %v6900_v58 }
 0x665   : > { %9089 = vmatmul.bf16.gmra.mxu1 %v7757_v46  ;;  %v15389_v46 = vpop.f32.mrf.mxu3  ;;  %v7522_v8 = vunpack.c.l.b16 %v6901_v4  ;;  %v7523_v11 = vunpack.c.h.b16 %v6901_v4  ;;  %v6516_v4 = vld [vmem:[%s12889_s27 + $0x23c] sm:$0xe] }
 0x666   : > { %9178 = vmatmul.bf16.gmra.mxu2 %v7758_v26  ;;  %v6889_v26 = vsel %vm14415_vm5, %v11446_v62, %v6888_v63 }
 0x667   : > { %v7765_v45 = vpack.c.b16 %v7522_v8, %v7513_v24 }
 0x669   : > { %v8863_v25 = vpop.f32.mrf.mxu2  ;;  %v8687_v35 = vpop.f32.mrf.mxu0 }
 0x66a   : > { %v15385_v16 = vadd.f32 %v8863_v25, %v8775_v54  ;;  %v8776_v59 = vpop.f32.mrf.mxu1  ;;  %v8688_v39 = vadd.f32 %v8687_v35, %v14988_v47  ;;  %v7515_v54 = vunpack.c.l.b16 %v6889_v26  ;;  %v7766_v47 = vpack.c.b16 %v7523_v11, %v7514_v13 }
 0x66b   : > { %v6919_v25 = vrot.slane %v12636_v2, 5  ;;  %v11451_v13 = vrot.slane %v6516_v4, 9 }
 0x66c   : > { %v8777_v37 = vadd.f32 %v8776_v59, %v8688_v39  ;;  %v7767_v18 = vpack.c.b16 %v7524_v48, %v7515_v54  ;;  %v6923_v59 = vrot.slane %v12637_v44, 5  ;;  %v12639_v54 = vld [vmem:[%s12889_s27 + $0x284] sm:$0x1] }
 0x66d   : > { %v15403_v39 = vpop.f32.mrf.mxu3  ;;  %v6934_v24 = vrot.slane %v6919_v25, 4  ;;  %v6938_v48 = vrot.slane %v12639_v54, 5 }
 0x66e   : > { %v6937_v11 = vrot.slane %v6923_v59, 4 }
 0x671   : > { %v8865_v33 = vpop.f32.mrf.mxu2  ;;  %v8690_v63 = vpop.f32.mrf.mxu0 }
 0x672   : > { %v15396_v58 = vadd.f32 %v8865_v33, %v8777_v37  ;;  %v8779_v62 = vpop.f32.mrf.mxu1  ;;  %v8691_v35 = vadd.f32 %v8690_v63, %v15007_v56  ;;  %v12638_v37 = vld [vmem:[%s12889_s27 + $0x27c] sm:$0x11]  ;;  %v6920_v56 = vsel %vm14415_vm5, %v11450_v21, %v6919_v25 }
 0x673   : > { %v6935_v8 = vrot.slane %v12638_v37, 5  ;;  %v7531_v23 = vunpack.c.l.b16 %v6920_v56  ;;  %v7532_v4 = vunpack.c.h.b16 %v6920_v56  ;;  %v9344_v56 = vld [vmem:[%s16221_s3] sm:$0xff] }
 0x674   : > { %v8780_v26 = vadd.f32 %v8779_v62, %v8691_v35  ;;  %9005 = vmatmul.bf16.gmra.mxu0 %v7765_v45  ;;  %v6924_v62 = vsel %vm14415_vm5, %v11451_v13, %v6923_v59  ;;  %9468 = vmatpush.msra.mxu3 %v9344_v56 }
 0x675   : > { %9094 = vmatmul.bf16.gmra.mxu1 %v7766_v47  ;;  %v6936_v45 = vsel %vm14415_vm5, %v6934_v24, %v6935_v8  ;;  %v7533_v21 = vunpack.c.l.b16 %v6924_v62  ;;  %v15418_v54 = vpop.f32.mrf.mxu3 }
 0x676   : > { %9183 = vmatmul.bf16.gmra.mxu2 %v7767_v18  ;;  %v6939_v18 = vsel %vm14415_vm5, %v6937_v11, %v6938_v48  ;;  %v7540_v25 = vunpack.c.l.b16 %v6936_v45 }
 0x677   : > { %v7542_v37 = vunpack.c.l.b16 %v6939_v18  ;;  %v6521_v18 = vld [vmem:[%s12889_s27 + $0x2a8] sm:$0xe] }
 0x678   : > { %v7774_v24 = vpack.c.b16 %v7540_v25, %v7531_v23 }
 0x679   : > { %v8868_v33 = vpop.f32.mrf.mxu2  ;;  %v8692_v2 = vpop.f32.mrf.mxu0  ;;  %v7776_v48 = vpack.c.b16 %v7542_v37, %v7533_v21  ;;  %v11456_v21 = vrot.slane %v6521_v18, 9 }
 0x67a   : > { %v15409_v63 = vadd.f32 %v8868_v33, %v8780_v26  ;;  %v8781_v44 = vpop.f32.mrf.mxu1  ;;  %v8693_v47 = vadd.f32 %v8692_v2, %v15021_v3  ;;  %v7541_v26 = vunpack.c.h.b16 %v6936_v45  ;;  %v6520_v33 = vld [vmem:[%s12889_s27 + $0x2a0] sm:$0xee] }
 0x67b   : > { %v12640_v2 = vld [vmem:[%s12889_s27 + $0x2c4] sm:$0xff] }
 0x67c   : > { %16267 = vst [vmem:[#allocation32_spill] sm:$0xff] %v15409_v63  ;;  %v8782_v35 = vadd.f32 %v8781_v44, %v8693_v47  ;;  %v7775_v8 = vpack.c.b16 %v7541_v26, %v7532_v4  ;;  %v6954_v44 = vrot.slane %v12640_v2, 5  ;;  %v12641_v47 = vld [vmem:[%s12889_s27 + $0x2cc] sm:$0xf] }
 0x67d   : > { %v6958_v62 = vrot.slane %v12641_v47, 5  ;;  %v12642_v4 = vld [vmem:[%s12889_s27 + $0x2e8] sm:$0x11] }
 0x67e   : > { %v6969_v25 = vrot.slane %v6954_v44, 4  ;;  %v6970_v26 = vrot.slane %v12642_v4, 5 }
 0x67f   : > { %v6972_v37 = vrot.slane %v6958_v62, 4 }
 0x681   : > { %v8870_v3 = vpop.f32.mrf.mxu2  ;;  %v8695_v13 = vpop.f32.mrf.mxu0 }
 0x682   : > { %v15420_v59 = vadd.f32 %v8870_v3, %v8782_v35  ;;  %v8784_v11 = vpop.f32.mrf.mxu1  ;;  %v8696_v45 = vadd.f32 %v8695_v13, %v15034_v9  ;;  %v11455_v35 = vrot.slane %v6520_v33, 9  ;;  %v12643_v3 = vld [vmem:[%s12889_s27 + $0x2f0] sm:$0x1]  ;;  %v6959_v33 = vsel %vm14415_vm5, %v11456_v21, %v6958_v62 }
 0x683   : > { %v6973_v2 = vrot.slane %v12643_v3, 5 }
 0x684   : > { %16268 = vst [vmem:[#allocation33_spill] sm:$0xff] %v15420_v59  ;;  %v8785_v23 = vadd.f32 %v8784_v11, %v8696_v45  ;;  %9010 = vmatmul.bf16.gmra.mxu0 %v7774_v24  ;;  %v15432_v59 = vpop.f32.mrf.mxu3  ;;  %v6955_v9 = vsel %vm14415_vm5, %v11455_v35, %v6954_v44 }
 0x685   : > { %9099 = vmatmul.bf16.gmra.mxu1 %v7775_v8  ;;  %v6971_v8 = vsel %vm14415_vm5, %v6969_v25, %v6970_v26  ;;  %v6974_v56 = vsel %vm14415_vm5, %v6972_v37, %v6973_v2  ;;  %v7549_v45 = vunpack.c.l.b16 %v6955_v9  ;;  %v6525_v37 = vld [vmem:[%s12889_s27 + $0x30c] sm:$0xee] }
 0x686   : > { %9188 = vmatmul.bf16.gmra.mxu2 %v7776_v48  ;;  %v7558_v44 = vunpack.c.l.b16 %v6971_v8  ;;  %v7559_v18 = vunpack.c.h.b16 %v6971_v8  ;;  %v7560_v35 = vunpack.c.l.b16 %v6974_v56  ;;  %v12644_v2 = vld [vmem:[%s12889_s27 + $0x330] sm:$0xff]  ;;  %v12645_v8 = vld [vmem:[%s12889_s27 + $0x338] sm:$0xf] }
 0x688   : > { %v7783_v4 = vpack.c.b16 %v7558_v44, %v7549_v45  ;;  %v11460_v45 = vrot.slane %v6525_v37, 9  ;;  %v12646_v44 = vld [vmem:[%s12889_s27 + $0x354] sm:$0x11] }
 0x689   : > { %v8873_v63 = vpop.f32.mrf.mxu2  ;;  %v8697_v11 = vpop.f32.mrf.mxu0 }
 0x68a   : > { %v15436_v13 = vadd.f32 %v8873_v63, %v8785_v23  ;;  %v8786_v24 = vpop.f32.mrf.mxu1  ;;  %v8698_v48 = vadd.f32 %v8697_v11, %v15045_v34  ;;  %v7550_v63 = vunpack.c.h.b16 %v6955_v9  ;;  %v7551_v23 = vunpack.c.l.b16 %v6959_v33  ;;  %v6526_v33 = vld [vmem:[%s12889_s27 + $0x314] sm:$0xe] }
 0x68b   : > { %v6989_v11 = vrot.slane %v12644_v2, 5 }
 0x68c   : > { %v8787_v47 = vadd.f32 %v8786_v24, %v8698_v48  ;;  %v7784_v34 = vpack.c.b16 %v7559_v18, %v7550_v63  ;;  %v7785_v3 = vpack.c.b16 %v7560_v35, %v7551_v23  ;;  %v15449_v24 = vpop.f32.mrf.mxu3  ;;  %v6993_v48 = vrot.slane %v12645_v8, 5  ;;  %v12647_v35 = vld [vmem:[%s12889_s27 + $0x35c] sm:$0x1] }
 0x68d   : > { %v7005_v63 = vrot.slane %v12646_v44, 5  ;;  %v11461_v18 = vrot.slane %v6526_v33, 9  ;;  %v8933_v49 = vadd.f32 %v15449_v24, %v15295_v38 }
 0x68e   : > { %v7007_v23 = vrot.slane %v6993_v48, 4 }
 0x691   : > { %v8875_v25 = vpop.f32.mrf.mxu2  ;;  %v8700_v62 = vpop.f32.mrf.mxu0 }
 0x692   : > { %v15445_v26 = vadd.f32 %v8875_v25, %v8787_v47  ;;  %v8789_v21 = vpop.f32.mrf.mxu1  ;;  %v8701_v9 = vadd.f32 %v8700_v62, %v15064_v42  ;;  %v7004_v47 = vrot.slane %v6989_v11, 4  ;;  %v7008_v25 = vrot.slane %v12647_v35, 5 }
 0x694   : > { %16269 = vst [vmem:[#allocation34_spill] sm:$0xff] %v15445_v26  ;;  %v8790_v56 = vadd.f32 %v8789_v21, %v8701_v9  ;;  %9015 = vmatmul.bf16.gmra.mxu0 %v7783_v4  ;;  %v6990_v26 = vsel %vm14415_vm5, %v11460_v45, %v6989_v11  ;;  %v7006_v4 = vsel %vm14415_vm5, %v7004_v47, %v7005_v63  ;;  %v15467_v9 = vpop.f32.mrf.mxu3 }
 0x695   : > { %9104 = vmatmul.bf16.gmra.mxu1 %v7784_v34  ;;  %v6994_v21 = vsel %vm14415_vm5, %v11461_v18, %v6993_v48  ;;  %v7567_v37 = vunpack.c.l.b16 %v6990_v26  ;;  %v7576_v33 = vunpack.c.l.b16 %v7006_v4  ;;  %v7577_v45 = vunpack.c.h.b16 %v7006_v4 }
 0x696   : > { %9193 = vmatmul.bf16.gmra.mxu2 %v7785_v3  ;;  %v7009_v3 = vsel %vm14415_vm5, %v7007_v23, %v7008_v25  ;;  %v7569_v47 = vunpack.c.l.b16 %v6994_v21  ;;  %v8935_v38 = vadd.f32 %v15467_v9, %v15304_v20 }
 0x697   : > { %v7578_v44 = vunpack.c.l.b16 %v7009_v3  ;;  %v7792_v63 = vpack.c.b16 %v7576_v33, %v7567_v37 }
 0x699   : > { %v8878_v2 = vpop.f32.mrf.mxu2  ;;  %v8702_v62 = vpop.f32.mrf.mxu0  ;;  %v7794_v25 = vpack.c.b16 %v7578_v44, %v7569_v47  ;;  %v12651_v44 = vld [vmem:[%s12889_s27 + $0x3c8] sm:$0x1] }
 0x69a   : > { %v15458_v42 = vadd.f32 %v8878_v2, %v8790_v56  ;;  %v8791_v8 = vpop.f32.mrf.mxu1  ;;  %v8703_v34 = vadd.f32 %v8702_v62, %v15078_v60  ;;  %v7568_v56 = vunpack.c.h.b16 %v6990_v26  ;;  %v6530_v2 = vld [vmem:[%s12889_s27 + $0x378] sm:$0xee]  ;;  %v12649_v26 = vld [vmem:[%s12889_s27 + $0x3a4] sm:$0xf] }
 0x69b   : > { %v12648_v62 = vld [vmem:[%s12889_s27 + $0x39c] sm:$0xff]  ;;  %v7028_v4 = vrot.slane %v12649_v26, 5  ;;  %v11465_v3 = vrot.slane %v6530_v2, 9 }
 0x69c   : > { %16270 = vst [vmem:[#allocation35_spill] sm:$0xff] %v15458_v42  ;;  %v8792_v11 = vadd.f32 %v8791_v8, %v8703_v34  ;;  %v7793_v35 = vpack.c.b16 %v7577_v45, %v7568_v56  ;;  %v7024_v42 = vrot.slane %v12648_v62, 5  ;;  %v6531_v34 = vld [vmem:[%s12889_s27 + $0x380] sm:$0xe]  ;;  %v15477_v56 = vpop.f32.mrf.mxu3 }
 0x69d   : > { %v11466_v45 = vrot.slane %v6531_v34, 9  ;;  %v7042_v47 = vrot.slane %v7028_v4, 4 }
 0x69e   : > { %v7039_v37 = vrot.slane %v7024_v42, 4 }
 0x69f   : > { %v7029_v2 = vsel %vm14415_vm5, %v11466_v45, %v7028_v4 }
 0x6a1   : > { %v8880_v60 = vpop.f32.mrf.mxu2  ;;  %v8705_v18 = vpop.f32.mrf.mxu0 }
 0x6a2   : > { %v15469_v48 = vadd.f32 %v8880_v60, %v8792_v11  ;;  %v8794_v23 = vpop.f32.mrf.mxu1  ;;  %v8706_v8 = vadd.f32 %v8705_v18, %v15094_v57  ;;  %v12650_v11 = vld [vmem:[%s12889_s27 + $0x3c0] sm:$0x11]  ;;  %v7043_v60 = vrot.slane %v12651_v44, 5  ;;  %v7025_v57 = vsel %vm14415_vm5, %v11465_v3, %v7024_v42 }
 0x6a3   : > { %v7040_v33 = vrot.slane %v12650_v11, 5  ;;  %v7585_v26 = vunpack.c.l.b16 %v7025_v57  ;;  %v7587_v11 = vunpack.c.l.b16 %v7029_v2 }
 0x6a4   : > { %v8795_v21 = vadd.f32 %v8794_v23, %v8706_v8  ;;  %9020 = vmatmul.bf16.gmra.mxu0 %v7792_v63  ;;  %v7044_v8 = vsel %vm14415_vm5, %v7042_v47, %v7043_v60 }
 0x6a5   : > { %9109 = vmatmul.bf16.gmra.mxu1 %v7793_v35  ;;  %v7041_v35 = vsel %vm14415_vm5, %v7039_v37, %v7040_v33  ;;  %v7596_v44 = vunpack.c.l.b16 %v7044_v8  ;;  %v15491_v37 = vpop.f32.mrf.mxu3  ;;  %v6536_v8 = vld [vmem:[%s12889_s27 + $0x3ec] sm:$0xe] }
 0x6a6   : > { %9198 = vmatmul.bf16.gmra.mxu2 %v7794_v25  ;;  %v7594_v42 = vunpack.c.l.b16 %v7041_v35  ;;  %v7595_v3 = vunpack.c.h.b16 %v7041_v35 }
 0x6a7   : > { %v7803_v60 = vpack.c.b16 %v7596_v44, %v7587_v11 }
 0x6a8   : > { %v7801_v33 = vpack.c.b16 %v7594_v42, %v7585_v26 }
 0x6a9   : > { %v8883_v62 = vpop.f32.mrf.mxu2  ;;  %v8707_v23 = vpop.f32.mrf.mxu0 }
 0x6aa   : > { %v15482_v18 = vadd.f32 %v8883_v62, %v8795_v21  ;;  %v8796_v63 = vpop.f32.mrf.mxu1  ;;  %v8708_v25 = vadd.f32 %v8707_v23, %v15105_v6  ;;  %v7586_v21 = vunpack.c.h.b16 %v7025_v57  ;;  %v12652_v23 = vld [vmem:[%s12889_s27 + $0x408] sm:$0xff]  ;;  %v12653_v57 = vld [vmem:[%s12889_s27 + $0x410] sm:$0xf] }
 0x6ab   : > { %v7063_v35 = vrot.slane %v12653_v57, 5  ;;  %v15505_v57 = vld [vmem:[%s16220_s2] ss:$0 sm:$0xff] }
 0x6ac   : > { %16271 = vst [vmem:[#allocation36_spill] sm:$0xff] %v15482_v18  ;;  %v8797_v34 = vadd.f32 %v8796_v63, %v8708_v25  ;;  %v7802_v62 = vpack.c.b16 %v7595_v3, %v7586_v21  ;;  %v7059_v63 = vrot.slane %v12652_v23, 5  ;;  %v6535_v25 = vld [vmem:[%s12889_s27 + $0x3e4] sm:$0xee]  ;;  %v11471_v3 = vrot.slane %v6536_v8, 9 }
 0x6ad   : > { %v11470_v26 = vrot.slane %v6535_v25, 9 }
 0x6ae   : > { %v7074_v42 = vrot.slane %v7059_v63, 4 }
 0x6b1   : > { %v8885_v6 = vpop.f32.mrf.mxu2  ;;  %v8986_v45 = vpop.f32.mrf.mxu0 }
 0x6b2   : > { %v15493_v4 = vadd.f32 %v8885_v6, %v8797_v34  ;;  %v9075_v47 = vpop.f32.mrf.mxu1  ;;  %v8987_v2 = vadd.f32 %v8986_v45, %v15132_v19  ;;  %v12654_v34 = vld [vmem:[%s12889_s27 + $0x42c] sm:$0x11]  ;;  %v7077_v6 = vrot.slane %v7063_v35, 4 }
 0x6b3   : > { %v7075_v21 = vrot.slane %v12654_v34, 5 }
 0x6b4   : > { %16272 = vst [vmem:[#allocation37_spill] sm:$0xff] %v15493_v4  ;;  %9025 = vmatmul.bf16.gmra.mxu0 %v7801_v33  ;;  %v12655_v4 = vld [vmem:[%s12889_s27 + $0x434] sm:$0x1]  ;;  %v9076_v44 = vadd.f32 %v9075_v47, %v8987_v2 }
 0x6b5   : > { %9114 = vmatmul.bf16.gmra.mxu1 %v7802_v62  ;;  %v7078_v11 = vrot.slane %v12655_v4, 5  ;;  %v7060_v62 = vsel %vm14415_vm5, %v11470_v26, %v7059_v63  ;;  %v7076_v45 = vsel %vm14415_vm5, %v7074_v42, %v7075_v21  ;;  %v7064_v4 = vsel %vm14415_vm5, %v11471_v3, %v7063_v35 }
 0x6b6   : > { %9203 = vmatmul.bf16.gmra.mxu2 %v7803_v60  ;;  %v15511_v60 = vpop.f32.mrf.mxu3  ;;  %v7603_v2 = vunpack.c.l.b16 %v7060_v62  ;;  %v7612_v8 = vunpack.c.l.b16 %v7076_v45  ;;  %v7604_v34 = vunpack.c.h.b16 %v7060_v62  ;;  %v7613_v63 = vunpack.c.h.b16 %v7076_v45  ;;  %v12656_v62 = vld [vmem:[%s12889_s27 + $0x474] sm:$0xff] }
 0x6b7   : > { %v7605_v42 = vunpack.c.l.b16 %v7064_v4  ;;  %v7094_v45 = vrot.slane %v12656_v62, 5  ;;  %v12657_v4 = vld [vmem:[%s12889_s27 + $0x47c] sm:$0xf] }
 0x6b9   : > { %v9164_v18 = vpop.f32.mrf.mxu2  ;;  %v8988_v19 = vpop.f32.mrf.mxu0 }
 0x6ba   : > { %v9165_v23 = vadd.f32 %v9164_v18, %v9076_v44  ;;  %v9077_v33 = vpop.f32.mrf.mxu1  ;;  %v7079_v18 = vsel %vm14415_vm5, %v7077_v6, %v7078_v11  ;;  %v8989_v25 = vadd.f32 %v8988_v19, %v15141_v7  ;;  %v7810_v11 = vpack.c.b16 %v7612_v8, %v7603_v2 }
 0x6bb   : > { %v7614_v21 = vunpack.c.l.b16 %v7079_v18  ;;  %v7098_v18 = vrot.slane %v12657_v4, 5 }
 0x6bc   : > { %v9244_v47 = vadd.f32 %v9165_v23, %v14645_v1  ;;  %v9078_v3 = vadd.f32 %v9077_v33, %v8989_v25  ;;  %v7811_v1 = vpack.c.b16 %v7613_v63, %v7604_v34  ;;  %v6541_v25 = vld [vmem:[%s12889_s27 + $0x458] sm:$0xe]  ;;  %v7109_v63 = vrot.slane %v7094_v45, 4 }
 0x6bd   : > { %v7812_v19 = vpack.c.b16 %v7614_v21, %v7605_v42  ;;  %v12658_v42 = vld [vmem:[%s12889_s27 + $0x498] sm:$0x11] }
 0x6be   : > { %v9280_v26 = vadd.f32 %v15505_v57, %v9244_v47  ;;  %v6540_v47 = vld [vmem:[%s12889_s27 + $0x450] sm:$0xee]  ;;  %v15527_v2 = vpop.f32.mrf.mxu3  ;;  %v7110_v21 = vrot.slane %v12658_v42, 5 }
 0x6bf   : > { %v11475_v34 = vrot.slane %v6540_v47, 9 }
 0x6c0   : > { %v9312_v35 = vmax.f32 %v9280_v26, 0.0 }
 0x6c1   : > { %v9166_v6 = vpop.f32.mrf.mxu2  ;;  %v8991_v7 = vpop.f32.mrf.mxu0 }
 0x6c2   : > { %v9167_v44 = vadd.f32 %v9166_v6, %v9078_v3  ;;  %11934 = vmatmul.msk.f32.vlgmr.msra.gmra.mxu3 %vm9356_vm6, %v9312_v35  ;;  %v9080_v23 = vpop.f32.mrf.mxu1  ;;  %v8992_v33 = vadd.f32 %v8991_v7, %v15155_v43  ;;  %v11476_v35 = vrot.slane %v6541_v25, 9  ;;  %v7112_v3 = vrot.slane %v7098_v18, 4  ;;  %v12659_v6 = vld [vmem:[%s12889_s27 + $0x4a0] sm:$0x1] }
 0x6c3   : > { %v7113_v62 = vrot.slane %v12659_v6, 5 }
 0x6c4   : > { %v9245_v26 = vadd.f32 %v9167_v44, %v14664_v31  ;;  %9030 = vmatmul.bf16.gmra.mxu0 %v7810_v11  ;;  %v9081_v31 = vadd.f32 %v9080_v23, %v8992_v33  ;;  %v7099_v47 = vsel %vm14415_vm5, %v11476_v35, %v7098_v18 }
 0x6c5   : > { %9119 = vmatmul.bf16.gmra.mxu1 %v7811_v1  ;;  %v7095_v1 = vsel %vm14415_vm5, %v11475_v34, %v7094_v45  ;;  %v7623_v34 = vunpack.c.l.b16 %v7099_v47 }
 0x6c6   : > { %v9281_v8 = vadd.f32 %v15505_v57, %v9245_v26  ;;  %9208 = vmatmul.bf16.gmra.mxu2 %v7812_v19  ;;  %v7111_v19 = vsel %vm14415_vm5, %v7109_v63, %v7110_v21  ;;  %v7114_v26 = vsel %vm14415_vm5, %v7112_v3, %v7113_v62  ;;  %v7621_v25 = vunpack.c.l.b16 %v7095_v1  ;;  %v15544_v21 = vpop.f32.mrf.mxu3 }
 0x6c7   : > { %v7622_v42 = vunpack.c.h.b16 %v7095_v1  ;;  %v7631_v6 = vunpack.c.h.b16 %v7111_v19  ;;  %v7632_v63 = vunpack.c.l.b16 %v7114_v26  ;;  %v6545_v1 = vld [vmem:[%s12889_s27 + $0x4bc] sm:$0xee] }
 0x6c8   : > { %v9313_v4 = vmax.f32 %v9281_v8, 0.0  ;;  %v7630_v8 = vunpack.c.l.b16 %v7111_v19  ;;  %v12661_v19 = vld [vmem:[%s12889_s27 + $0x4e8] sm:$0xf] }
 0x6c9   : > { %v9169_v44 = vpop.f32.mrf.mxu2  ;;  %v8993_v7 = vpop.f32.mrf.mxu0  ;;  %v7820_v62 = vpack.c.b16 %v7631_v6, %v7622_v42  ;;  %v7133_v47 = vrot.slane %v12661_v19, 5  ;;  %v12662_v42 = vld [vmem:[%s12889_s27 + $0x504] sm:$0x11] }
 0x6ca   : > { %v9170_v43 = vadd.f32 %v9169_v44, %v9081_v31  ;;  %11935 = vmatmul.msk.f32.gmra.mxu3 %vm9356_vm6, %v9313_v4  ;;  %v9082_v11 = vpop.f32.mrf.mxu1  ;;  %v8994_v33 = vadd.f32 %v8993_v7, %v15161_v0  ;;  %v7821_v44 = vpack.c.b16 %v7632_v63, %v7623_v34  ;;  %v7145_v6 = vrot.slane %v12662_v42, 5  ;;  %v12663_v63 = vld [vmem:[%s12889_s27 + $0x50c] sm:$0x1] }
 0x6cb   : > { %v7147_v34 = vrot.slane %v7133_v47, 4 }
 0x6cc   : > { %v9246_v23 = vadd.f32 %v9170_v43, %v14678_v53  ;;  %v9083_v35 = vadd.f32 %v9082_v11, %v8994_v33  ;;  %v7819_v53 = vpack.c.b16 %v7630_v8, %v7621_v25  ;;  %v12660_v43 = vld [vmem:[%s12889_s27 + $0x4e0] sm:$0xff]  ;;  %v11480_v25 = vrot.slane %v6545_v1, 9 }
 0x6cd   : > { %v7129_v7 = vrot.slane %v12660_v43, 5 }
 0x6ce   : > { %v9282_v45 = vadd.f32 %v15505_v57, %v9246_v23  ;;  %v6546_v23 = vld [vmem:[%s12889_s27 + $0x4c4] sm:$0xe]  ;;  %v15556_v43 = vpop.f32.mrf.mxu3 }
 0x6cf   : > { %v7144_v8 = vrot.slane %v7129_v7, 4 }
 0x6d0   : > { %v9314_v18 = vmax.f32 %v9282_v45, 0.0  ;;  %v11481_v45 = vrot.slane %v6546_v23, 9 }
 0x6d1   : > { %v9171_v3 = vpop.f32.mrf.mxu2  ;;  %v8996_v4 = vpop.f32.mrf.mxu0 }
 0x6d2   : > { %v9172_v0 = vadd.f32 %v9171_v3, %v9083_v35  ;;  %11936 = vmatmul.msk.f32.gmra.mxu3 %vm9356_vm6, %v9314_v18  ;;  %v9085_v31 = vpop.f32.mrf.mxu1  ;;  %v8997_v11 = vadd.f32 %v8996_v4, %v15184_v50  ;;  %v7148_v18 = vrot.slane %v12663_v63, 5  ;;  %v7146_v4 = vsel %vm14415_vm5, %v7144_v8, %v7145_v6 }
 0x6d4   : > { %v9247_v26 = vadd.f32 %v9172_v0, %v14688_v51  ;;  %9035 = vmatmul.bf16.gmra.mxu0 %v7819_v53  ;;  %v9086_v3 = vadd.f32 %v9085_v31, %v8997_v11  ;;  %v7130_v0 = vsel %vm14415_vm5, %v11480_v25, %v7129_v7  ;;  %v7149_v31 = vsel %vm14415_vm5, %v7147_v34, %v7148_v18 }
 0x6d5   : > { %9124 = vmatmul.bf16.gmra.mxu1 %v7820_v62  ;;  %v7648_v11 = vunpack.c.l.b16 %v7146_v4  ;;  %v7640_v23 = vunpack.c.h.b16 %v7130_v0  ;;  %v7650_v8 = vunpack.c.l.b16 %v7149_v31  ;;  %v6551_v31 = vld [vmem:[%s12889_s27 + $0x530] sm:$0xe] }
 0x6d6   : > { %v9283_v33 = vadd.f32 %v15505_v57, %v9247_v26  ;;  %9213 = vmatmul.bf16.gmra.mxu2 %v7821_v44  ;;  %v7134_v44 = vsel %vm14415_vm5, %v11481_v45, %v7133_v47  ;;  %v7639_v26 = vunpack.c.l.b16 %v7130_v0 }
 0x6d7   : > { %v7641_v25 = vunpack.c.l.b16 %v7134_v44 }
 0x6d8   : > { %v9315_v35 = vmax.f32 %v9283_v33, 0.0  ;;  %v7649_v33 = vunpack.c.h.b16 %v7146_v4  ;;  %v7828_v45 = vpack.c.b16 %v7648_v11, %v7639_v26  ;;  %v12666_v11 = vld [vmem:[%s12889_s27 + $0x570] sm:$0x11] }
 0x6d9   : > { %v9174_v51 = vpop.f32.mrf.mxu2  ;;  %v8998_v53 = vpop.f32.mrf.mxu0  ;;  %v7830_v18 = vpack.c.b16 %v7650_v8, %v7641_v25  ;;  %v12667_v25 = vld [vmem:[%s12889_s27 + $0x578] sm:$0x1] }
 0x6da   : > { %v9175_v50 = vadd.f32 %v9174_v51, %v9086_v3  ;;  %11937 = vmatmul.msk.f32.gmra.mxu3 %vm9356_vm6, %v9315_v35  ;;  %v9087_v62 = vpop.f32.mrf.mxu1  ;;  %v8999_v19 = vadd.f32 %v8998_v53, %v15193_v36  ;;  %v7829_v34 = vpack.c.b16 %v7649_v33, %v7640_v23  ;;  %v12664_v35 = vld [vmem:[%s12889_s27 + $0x54c] sm:$0xff]  ;;  %v15572_v51 = vpop.f32.mrf.mxu3  ;;  %v12665_v53 = vld [vmem:[%s12889_s27 + $0x554] sm:$0xf]  ;;  %v7180_v23 = vrot.slane %v12666_v11, 5 }
 0x6db   : > { %v7164_v3 = vrot.slane %v12664_v35, 5  ;;  %v7168_v0 = vrot.slane %v12665_v53, 5  ;;  %v11486_v33 = vrot.slane %v6551_v31, 9  ;;  %v7183_v8 = vrot.slane %v12667_v25, 5 }
 0x6dc   : > { %v9248_v1 = vadd.f32 %v9175_v50, %v14699_v15  ;;  %v9088_v47 = vadd.f32 %v9087_v62, %v8999_v19  ;;  %v6550_v50 = vld [vmem:[%s12889_s27 + $0x528] sm:$0xee]  ;;  %v16273_v62 = vld [vmem:[#allocation5_spill] sm:$0xff] }
 0x6dd   : > { %v11485_v19 = vrot.slane %v6550_v50, 9  ;;  %v7179_v26 = vrot.slane %v7164_v3, 4  ;;  %v16274_v50 = vld [vmem:[#allocation6_spill] sm:$0xff] }
 0x6de   : > { %v9284_v7 = vadd.f32 %v15505_v57, %v9248_v1 }
 0x6e0   : > { %v9316_v42 = vmax.f32 %v9284_v7, 0.0  ;;  %v7182_v7 = vrot.slane %v7168_v0, 4 }
 0x6e1   : > { %v9176_v6 = vpop.f32.mrf.mxu2  ;;  %v9001_v36 = vpop.f32.mrf.mxu0 }
 0x6e2   : > { %v9177_v15 = vadd.f32 %v9176_v6, %v9088_v47  ;;  %11938 = vmatmul.msk.f32.gmra.mxu3 %vm9356_vm6, %v9316_v42  ;;  %v9090_v63 = vpop.f32.mrf.mxu1  ;;  %v9002_v44 = vadd.f32 %v9001_v36, %v15207_v17  ;;  %v7181_v36 = vsel %vm14415_vm5, %v7179_v26, %v7180_v23  ;;  %v7184_v35 = vsel %vm14415_vm5, %v7182_v7, %v7183_v8 }
 0x6e4   : > { %v9249_v4 = vadd.f32 %v9177_v15, %v16273_v62  ;;  %9040 = vmatmul.bf16.gmra.mxu0 %v7828_v45  ;;  %v9091_v47 = vadd.f32 %v9090_v63, %v9002_v44  ;;  %v15593_v62 = vpop.f32.mrf.mxu3  ;;  %v7666_v44 = vunpack.c.l.b16 %v7181_v36 }
 0x6e5   : > { %9129 = vmatmul.bf16.gmra.mxu1 %v7829_v34  ;;  %v7165_v34 = vsel %vm14415_vm5, %v11485_v19, %v7164_v3  ;;  %v7667_v3 = vunpack.c.h.b16 %v7181_v36  ;;  %v16275_v36 = vld [vmem:[#allocation7_spill] sm:$0xff] }
 0x6e6   : > { %v9285_v1 = vadd.f32 %v15505_v57, %v9249_v4  ;;  %9218 = vmatmul.bf16.gmra.mxu2 %v7830_v18  ;;  %v7169_v18 = vsel %vm14415_vm5, %v11486_v33, %v7168_v0  ;;  %v7657_v4 = vunpack.c.l.b16 %v7165_v34  ;;  %v7658_v31 = vunpack.c.h.b16 %v7165_v34  ;;  %v12669_v34 = vld [vmem:[%s12889_s27 + $0x5c0] sm:$0xf] }
 0x6e7   : > { %v7659_v19 = vunpack.c.l.b16 %v7169_v18  ;;  %v7668_v0 = vunpack.c.l.b16 %v7184_v35 }
 0x6e8   : > { %v9317_v42 = vmax.f32 %v9285_v1, 0.0  ;;  %v7837_v33 = vpack.c.b16 %v7666_v44, %v7657_v4  ;;  %v7838_v7 = vpack.c.b16 %v7667_v3, %v7658_v31 }
 0x6e9   : > { %v9179_v6 = vpop.f32.mrf.mxu2  ;;  %v9003_v17 = vpop.f32.mrf.mxu0 }
 0x6ea   : > { %v9180_v15 = vadd.f32 %v9179_v6, %v9091_v47  ;;  %11939 = vmatmul.msk.f32.gmra.mxu3 %vm9356_vm6, %v9317_v42  ;;  %v9092_v45 = vpop.f32.mrf.mxu1  ;;  %v9004_v53 = vadd.f32 %v9003_v17, %v15213_v14  ;;  %v8918_v14 = vadd.f32 %v15355_v61, %v15226_v32  ;;  %v7839_v47 = vpack.c.b16 %v7668_v0, %v7659_v19  ;;  %v12668_v6 = vld [vmem:[%s12889_s27 + $0x5b8] sm:$0xff] }
 0x6eb   : > { %v6555_v17 = vld [vmem:[%s12889_s27 + $0x594] sm:$0xee] }
 0x6ec   : > { %v9250_v63 = vadd.f32 %v9180_v15, %v16274_v50  ;;  %v9093_v11 = vadd.f32 %v9092_v45, %v9004_v53  ;;  %v7199_v15 = vrot.slane %v12668_v6, 5  ;;  %v7203_v45 = vrot.slane %v12669_v34, 5  ;;  %v6556_v50 = vld [vmem:[%s12889_s27 + $0x59c] sm:$0xe]  ;;  %v12670_v53 = vld [vmem:[%s12889_s27 + $0x5dc] sm:$0x11]  ;;  %v15606_v44 = vpop.f32.mrf.mxu3 }
 0x6ed   : > { %v11490_v61 = vrot.slane %v6555_v17, 9  ;;  %v7215_v4 = vrot.slane %v12670_v53, 5  ;;  %v11491_v31 = vrot.slane %v6556_v50, 9  ;;  %v16276_v6 = vld [vmem:[#allocation8_spill] sm:$0xff] }
 0x6ee   : > { %v9286_v1 = vadd.f32 %v15505_v57, %v9250_v63  ;;  %v7214_v63 = vrot.slane %v7199_v15, 4  ;;  %v7217_v3 = vrot.slane %v7203_v45, 4 }
 0x6f0   : > { %v9318_v26 = vmax.f32 %v9286_v1, 0.0  ;;  %v12671_v1 = vld [vmem:[%s12889_s27 + $0x5e4] sm:$0x1] }
 0x6f1   : > { %v9181_v23 = vpop.f32.mrf.mxu2  ;;  %v9006_v8 = vpop.f32.mrf.mxu0  ;;  %v7218_v19 = vrot.slane %v12671_v1, 5 }
 0x6f2   : > { %v9182_v25 = vadd.f32 %v9181_v23, %v9093_v11  ;;  %11940 = vmatmul.msk.f32.gmra.mxu3 %vm9356_vm6, %v9318_v26  ;;  %v9095_v42 = vpop.f32.mrf.mxu1  ;;  %v9007_v35 = vadd.f32 %v9006_v8, %v8918_v14  ;;  %v8920_v23 = vadd.f32 %v15369_v40, %v15238_v5  ;;  %v7216_v8 = vsel %vm14415_vm5, %v7214_v63, %v7215_v4 }
 0x6f3   : > { %v7684_v34 = vunpack.c.l.b16 %v7216_v8 }
 0x6f4   : > { %v9251_v18 = vadd.f32 %v9182_v25, %v16275_v36  ;;  %9045 = vmatmul.bf16.gmra.mxu0 %v7837_v33  ;;  %v9096_v26 = vadd.f32 %v9095_v42, %v9007_v35  ;;  %v7200_v25 = vsel %vm14415_vm5, %v11490_v61, %v7199_v15  ;;  %v7219_v42 = vsel %vm14415_vm5, %v7217_v3, %v7218_v19 }
 0x6f5   : > { %9134 = vmatmul.bf16.gmra.mxu1 %v7838_v7  ;;  %v7675_v40 = vunpack.c.l.b16 %v7200_v25  ;;  %v7676_v36 = vunpack.c.h.b16 %v7200_v25  ;;  %v7686_v50 = vunpack.c.l.b16 %v7219_v42 }
 0x6f6   : > { %v9287_v32 = vadd.f32 %v15505_v57, %v9251_v18  ;;  %9223 = vmatmul.bf16.gmra.mxu2 %v7839_v47  ;;  %v7204_v47 = vsel %vm14415_vm5, %v11491_v31, %v7203_v45  ;;  %v7685_v18 = vunpack.c.h.b16 %v7216_v8  ;;  %v15622_v45 = vpop.f32.mrf.mxu3  ;;  %v8923_v31 = vadd.f32 %v15389_v46, %v15252_v41 }
 0x6f7   : > { %v7677_v15 = vunpack.c.l.b16 %v7204_v47  ;;  %v7846_v53 = vpack.c.b16 %v7684_v34, %v7675_v40  ;;  %v6561_v47 = vld [vmem:[%s12889_s27 + $0x608] sm:$0xe]  ;;  %v12675_v34 = vld [vmem:[%s12889_s27 + $0x650] sm:$0x1] }
 0x6f8   : > { %v9319_v0 = vmax.f32 %v9287_v32, 0.0  ;;  %v7847_v4 = vpack.c.b16 %v7685_v18, %v7676_v36  ;;  %v7253_v36 = vrot.slane %v12675_v34, 5  ;;  %v12676_v34 = vld [vmem:[%s12889_s27 + $0x690] sm:$0xff] }
 0x6f9   : > { %v9184_v11 = vpop.f32.mrf.mxu2  ;;  %v9008_v7 = vpop.f32.mrf.mxu0 }
 0x6fa   : > { %v9185_v33 = vadd.f32 %v9184_v11, %v9096_v26  ;;  %11941 = vmatmul.msk.f32.gmra.mxu3 %vm9356_vm6, %v9319_v0  ;;  %v9097_v14 = vpop.f32.mrf.mxu1  ;;  %v9009_v5 = vadd.f32 %v9008_v7, %v8920_v23  ;;  %v7848_v0 = vpack.c.b16 %v7686_v50, %v7677_v15  ;;  %v12672_v26 = vld [vmem:[%s12889_s27 + $0x624] sm:$0xff]  ;;  %v8925_v50 = vadd.f32 %v15403_v39, %v15261_v10 }
 0x6fb   : > { %v7234_v11 = vrot.slane %v12672_v26, 5  ;;  %v6560_v23 = vld [vmem:[%s12889_s27 + $0x600] sm:$0xee]  ;;  %v16278_v10 = vld [vmem:[#allocation10_spill] sm:$0xff] }
 0x6fc   : > { %v9252_v17 = vadd.f32 %v9185_v33, %v16276_v6  ;;  %v9098_v61 = vadd.f32 %v9097_v14, %v9009_v5  ;;  %v12673_v33 = vld [vmem:[%s12889_s27 + $0x62c] sm:$0xf]  ;;  %v16277_v14 = vld [vmem:[#allocation9_spill] sm:$0xff]  ;;  %v11495_v46 = vrot.slane %v6560_v23, 9  ;;  %v11496_v5 = vrot.slane %v6561_v47, 9 }
 0x6fd   : > { %v7238_v7 = vrot.slane %v12673_v33, 5  ;;  %v7249_v42 = vrot.slane %v7234_v11, 4  ;;  %v12674_v6 = vld [vmem:[%s12889_s27 + $0x648] sm:$0x11] }
 0x6fe   : > { %v9288_v35 = vadd.f32 %v15505_v57, %v9252_v17  ;;  %v7250_v17 = vrot.slane %v12674_v6, 5 }
 0x6ff   : > { %v7252_v40 = vrot.slane %v7238_v7, 4 }
 0x700   : > { %v9320_v32 = vmax.f32 %v9288_v35, 0.0 }
 0x701   : > { %v9186_v63 = vpop.f32.mrf.mxu2  ;;  %v9011_v1 = vpop.f32.mrf.mxu0 }
 0x702   : > { %v9187_v3 = vadd.f32 %v9186_v63, %v9098_v61  ;;  %11942 = vmatmul.msk.f32.gmra.mxu3 %vm9356_vm6, %v9320_v32  ;;  %v9100_v19 = vpop.f32.mrf.mxu1  ;;  %v9012_v8 = vadd.f32 %v9011_v1, %v8923_v31  ;;  %v15642_v31 = vpop.f32.mrf.mxu3  ;;  %v7254_v1 = vsel %vm14415_vm5, %v7252_v40, %v7253_v36  ;;  %v7269_v36 = vrot.slane %v12676_v34, 5 }
 0x704   : > { %v9253_v25 = vadd.f32 %v9187_v3, %v16277_v14  ;;  %9050 = vmatmul.bf16.gmra.mxu0 %v7846_v53  ;;  %v9101_v35 = vadd.f32 %v9100_v19, %v9012_v8  ;;  %v7235_v53 = vsel %vm14415_vm5, %v11495_v46, %v7234_v11  ;;  %v7239_v3 = vsel %vm14415_vm5, %v11496_v5, %v7238_v7 }
 0x705   : > { %9139 = vmatmul.bf16.gmra.mxu1 %v7847_v4  ;;  %v7251_v4 = vsel %vm14415_vm5, %v7249_v42, %v7250_v17  ;;  %v7694_v23 = vunpack.c.h.b16 %v7235_v53  ;;  %v7695_v14 = vunpack.c.l.b16 %v7239_v3  ;;  %v8928_v42 = vadd.f32 %v15418_v54, %v15272_v12  ;;  %v12678_v3 = vld [vmem:[%s12889_s27 + $0x6b4] sm:$0x11] }
 0x706   : > { %v9289_v41 = vadd.f32 %v15505_v57, %v9253_v25  ;;  %9228 = vmatmul.bf16.gmra.mxu2 %v7848_v0  ;;  %v7693_v0 = vunpack.c.l.b16 %v7235_v53  ;;  %v7702_v26 = vunpack.c.l.b16 %v7251_v4  ;;  %v7703_v33 = vunpack.c.h.b16 %v7251_v4 }
 0x707   : > { %v7704_v25 = vunpack.c.l.b16 %v7254_v1  ;;  %v7284_v4 = vrot.slane %v7269_v36, 4  ;;  %v7285_v1 = vrot.slane %v12678_v3, 5 }
 0x708   : > { %v9321_v18 = vmax.f32 %v9289_v41, 0.0  ;;  %v7855_v41 = vpack.c.b16 %v7702_v26, %v7693_v0  ;;  %v7856_v46 = vpack.c.b16 %v7703_v33, %v7694_v23 }
 0x709   : > { %v9189_v15 = vpop.f32.mrf.mxu2  ;;  %v9013_v61 = vpop.f32.mrf.mxu0  ;;  %v7857_v40 = vpack.c.b16 %v7704_v25, %v7695_v14 }
 0x70a   : > { %v9190_v32 = vadd.f32 %v9189_v15, %v9101_v35  ;;  %11943 = vmatmul.msk.f32.gmra.mxu3 %vm9356_vm6, %v9321_v18  ;;  %v9102_v63 = vpop.f32.mrf.mxu1  ;;  %v9014_v19 = vadd.f32 %v9013_v61, %v8925_v50  ;;  %v6565_v18 = vld [vmem:[%s12889_s27 + $0x66c] sm:$0xee]  ;;  %v12677_v35 = vld [vmem:[%s12889_s27 + $0x698] sm:$0xf]  ;;  %v15658_v53 = vpop.f32.mrf.mxu3 }
 0x70b   : > { %v7273_v15 = vrot.slane %v12677_v35, 5  ;;  %v16279_v50 = vld [vmem:[#allocation11_spill] sm:$0xff]  ;;  %v11500_v54 = vrot.slane %v6565_v18, 9 }
 0x70c   : > { %v9254_v39 = vadd.f32 %v9190_v32, %v16278_v10  ;;  %v9103_v47 = vadd.f32 %v9102_v63, %v9014_v19  ;;  %v6566_v63 = vld [vmem:[%s12889_s27 + $0x674] sm:$0xe]  ;;  %v12679_v19 = vld [vmem:[%s12889_s27 + $0x6bc] sm:$0x1]  ;;  %s12697_s27 = scalar_lea.hbm %s12696_s12, 32 }
 0x70d   : > { %v11501_v10 = vrot.slane %v6566_v63, 9  ;;  %v7288_v0 = vrot.slane %v12679_v19, 5  ;;  %p12698_p12 = scmp.ne.s32.totalorder %s12696_s12, %s12697_s27  ;;  %p12703_p2 = scmp.lt.s32.totalorder %s12701_s13, %s12697_s27 }
 0x70e   : > { %v9290_v11 = vadd.f32 %v15505_v57, %v9254_v39  ;;  %v7287_v39 = vrot.slane %v7273_v15, 4 }
 0x70f   : > { %p12699_p13 = pnand %p12698_p12, %p12833_p4  ;;  %p12704_p3 = por %p12703_p2, %p12702_p1 }
 0x710   : > { %v9322_v8 = vmax.f32 %v9290_v11, 0.0  ;;  %v8930_v11 = vadd.f32 %v15432_v59, %v15281_v30 }
 0x711   : > { %v9191_v7 = vpop.f32.mrf.mxu2  ;;  %v9016_v17 = vpop.f32.mrf.mxu0  ;;  %p12700_p0 = pneg %p12699_p13 }
 0x712   : > { %v9192_v6 = vadd.f32 %v9191_v7, %v9103_v47  ;;  %11944 = vmatmul.msk.f32.gmra.mxu3 %vm9356_vm6, %v9322_v8  ;;  %v9105_v5 = vpop.f32.mrf.mxu1  ;;  %v9017_v61 = vadd.f32 %v9016_v17, %v8928_v42  ;;  %v7270_v47 = vsel %vm14415_vm5, %v11500_v54, %v7269_v36  ;;  %v7286_v7 = vsel %vm14415_vm5, %v7284_v4, %v7285_v1  ;;  %v16280_v42 = vld [vmem:[#allocation12_spill] sm:$0xff]  ;;  %v15676_v35 = vpop.f32.mrf.mxu3  ;;  %v16281_v1 = vld [vmem:[#allocation13_spill] sm:$0xff] }
 0x713   : > { %v7711_v59 = vunpack.c.l.b16 %v7270_v47  ;;  %v7720_v17 = vunpack.c.l.b16 %v7286_v7  ;;  %p12705_p5 = pnand %p12704_p3, %p12700_p0 }
 0x714   : > { %v9255_v32 = vadd.f32 %v9192_v6, %v16279_v50  ;;  %9055 = vmatmul.bf16.gmra.mxu0 %v7855_v41  ;;  %v9106_v23 = vadd.f32 %v9105_v5, %v9017_v61  ;;  %v7274_v41 = vsel %vm14415_vm5, %v11501_v10, %v7273_v15  ;;  %v7712_v5 = vunpack.c.h.b16 %v7270_v47 }
 0x715   : > { %9144 = vmatmul.bf16.gmra.mxu1 %v7856_v46  ;;  %v7289_v46 = vsel %vm14415_vm5, %v7287_v39, %v7288_v0  ;;  %v7713_v18 = vunpack.c.l.b16 %v7274_v41  ;;  %v7864_v15 = vpack.c.b16 %v7720_v17, %v7711_v59  ;;  %v16283_v17 = vld [vmem:[#allocation15_spill] sm:$0xff] }
 0x716   : > { %v9291_v12 = vadd.f32 %v15505_v57, %v9255_v32  ;;  %9233 = vmatmul.bf16.gmra.mxu2 %v7857_v40  ;;  %v7721_v40 = vunpack.c.h.b16 %v7286_v7  ;;  %v7722_v36 = vunpack.c.l.b16 %v7289_v46 }
 0x718   : > { %v9323_v26 = vmax.f32 %v9291_v12, 0.0  ;;  %v7865_v63 = vpack.c.b16 %v7721_v40, %v7712_v5  ;;  %v7866_v3 = vpack.c.b16 %v7722_v36, %v7713_v18 }
 0x719   : > { %v9194_v33 = vpop.f32.mrf.mxu2  ;;  %v9018_v25 = vpop.f32.mrf.mxu0 }
 0x71a   : > { %v9195_v14 = vadd.f32 %v9194_v33, %v9106_v23  ;;  %11945 = vmatmul.msk.f32.gmra.mxu3 %vm9356_vm6, %v9323_v26  ;;  %v9107_v8 = vpop.f32.mrf.mxu1  ;;  %v9019_v30 = vadd.f32 %v9018_v25, %v8930_v11  ;;  %v15683_v23 = vpop.f32.mrf.mxu3  ;;  %v16282_v25 = vld [vmem:[#allocation14_spill] sm:$0xff] }
 0x71c   : > { %v9256_v6 = vadd.f32 %v9195_v14, %v16280_v42  ;;  %v9108_v32 = vadd.f32 %v9107_v8, %v9019_v30 }
 0x71e   : > { %v9292_v34 = vadd.f32 %v15505_v57, %v9256_v6  ;;  %v8938_v6 = vadd.f32 %v15477_v56, %v15315_v52 }
 0x720   : > { %v9324_v50 = vmax.f32 %v9292_v34, 0.0 }
 0x721   : > { %v9196_v61 = vpop.f32.mrf.mxu2  ;;  %v9021_v54 = vpop.f32.mrf.mxu0 }
 0x722   : > { %v9197_v12 = vadd.f32 %v9196_v61, %v9108_v32  ;;  %11946 = vmatmul.msk.f32.gmra.mxu3 %vm9356_vm6, %v9324_v50  ;;  %v9110_v4 = vpop.f32.mrf.mxu1  ;;  %v9022_v39 = vadd.f32 %v9021_v54, %v8933_v49  ;;  %v15693_v59 = vpop.f32.mrf.mxu3  ;;  %v8940_v32 = vadd.f32 %v15491_v37, %v15324_v29 }
 0x724   : > { %v9257_v10 = vadd.f32 %v9197_v12, %v16281_v1  ;;  %9060 = vmatmul.bf16.gmra.mxu0 %v7864_v15  ;;  %v9111_v26 = vadd.f32 %v9110_v4, %v9022_v39  ;;  %v16284_v15 = vld [vmem:[#allocation16_spill] sm:$0xff] }
 0x725   : > { %9149 = vmatmul.bf16.gmra.mxu1 %v7865_v63 }
 0x726   : > { %v9293_v19 = vadd.f32 %v15505_v57, %v9257_v10  ;;  %9238 = vmatmul.bf16.gmra.mxu2 %v7866_v3  ;;  %v8943_v10 = vadd.f32 %v15511_v60, %v15338_v27 }
 0x728   : > { %v9325_v0 = vmax.f32 %v9293_v19, 0.0  ;;  %v15710_v19 = vld [vmem:[%s16222_s4] ss:$0 sm:$0xff] }
 0x729   : > { %v9199_v33 = vpop.f32.mrf.mxu2  ;;  %v9023_v11 = vpop.f32.mrf.mxu0 }
 0x72a   : > { %v9200_v24 = vadd.f32 %v9199_v33, %v9111_v26  ;;  %11947 = vmatmul.msk.f32.gmra.mxu3 %vm9356_vm6, %v9325_v0  ;;  %v9112_v14 = vpop.f32.mrf.mxu1  ;;  %v9024_v47 = vadd.f32 %v9023_v11, %v8935_v38  ;;  %v15701_v12 = vpop.f32.mrf.mxu3  ;;  %v16285_v0 = vld [vmem:[#allocation17_spill] sm:$0xff] }
 0x72c   : > { %v9258_v8 = vadd.f32 %v9200_v24, %v16282_v25  ;;  %v9113_v46 = vadd.f32 %v9112_v14, %v9024_v47 }
 0x72e   : > { %v9294_v7 = vadd.f32 %v15505_v57, %v9258_v8  ;;  %v8945_v8 = vadd.f32 %v15527_v2, %v15347_v22  ;;  %v8948_v2 = vadd.f32 %v15544_v21, %v15360_v28  ;;  %v8950_v21 = vadd.f32 %v15556_v43, %v15371_v55 }
 0x72f   : > { %v8953_v43 = vadd.f32 %v15572_v51, %v15385_v16  ;;  %v8955_v51 = vadd.f32 %v15593_v62, %v15396_v58  ;;  %v16291_v62 = vld [vmem:[#allocation32_spill] sm:$0xff] }
 0x730   : > { %v9326_v41 = vmax.f32 %v9294_v7, 0.0 }
 0x731   : > { %v9201_v42 = vpop.f32.mrf.mxu2  ;;  %v9026_v20 = vpop.f32.mrf.mxu0 }
 0x732   : > { %v9202_v30 = vadd.f32 %v9201_v42, %v9113_v46  ;;  %11948 = vmatmul.msk.f32.gmra.mxu3 %vm9356_vm6, %v9326_v41  ;;  %v9115_v9 = vpop.f32.mrf.mxu1  ;;  %v9027_v40 = vadd.f32 %v9026_v20, %v8938_v6  ;;  %v16286_v46 = vld [vmem:[#allocation18_spill] sm:$0xff] }
 0x734   : > { %v9259_v5 = vadd.f32 %v9202_v30, %v16283_v17  ;;  %v9116_v36 = vadd.f32 %v9115_v9, %v9027_v40 }
 0x736   : > { %v9295_v34 = vadd.f32 %v15505_v57, %v9259_v5 }
 0x738   : > { %v9327_v18 = vmax.f32 %v9295_v34, 0.0 }
 0x739   : > { %v9204_v50 = vpop.f32.mrf.mxu2  ;;  %v9028_v52 = vpop.f32.mrf.mxu0 }
 0x73a   : > { %v9205_v61 = vadd.f32 %v9204_v50, %v9116_v36  ;;  %11949 = vmatmul.msk.f32.gmra.mxu3 %vm9356_vm6, %v9327_v18  ;;  %v9117_v56 = vpop.f32.mrf.mxu1  ;;  %v9029_v49 = vadd.f32 %v9028_v52, %v8940_v32  ;;  %v16287_v50 = vld [vmem:[#allocation19_spill] sm:$0xff] }
 0x73c   : > { %v9260_v63 = vadd.f32 %v9205_v61, %v16284_v15  ;;  %v9118_v3 = vadd.f32 %v9117_v56, %v9029_v49 }
 0x73e   : > { %v9296_v54 = vadd.f32 %v15505_v57, %v9260_v63 }
 0x740   : > { %v9328_v4 = vmax.f32 %v9296_v54, 0.0 }
 0x741   : > { %v9206_v1 = vpop.f32.mrf.mxu2  ;;  %v9031_v29 = vpop.f32.mrf.mxu0 }
 0x742   : > { %v9207_v39 = vadd.f32 %v9206_v1, %v9118_v3  ;;  %11950 = vmatmul.msk.f32.gmra.mxu3 %vm9356_vm6, %v9328_v4  ;;  %v9120_v37 = vpop.f32.mrf.mxu1  ;;  %v9032_v33 = vadd.f32 %v9031_v29, %v8943_v10  ;;  %v16288_v10 = vld [vmem:[#allocation20_spill] sm:$0xff] }
 0x744   : > { %v9261_v26 = vadd.f32 %v9207_v39, %v16285_v0  ;;  %v9121_v60 = vadd.f32 %v9120_v37, %v9032_v33 }
 0x745   : > { %v9470_v38 = vpop.f32.mrf.mxu3 }
 0x746   : > { %v9297_v24 = vadd.f32 %v15505_v57, %v9261_v26  ;;  %v15715_v11 = vadd.f32 %v15710_v19, %v9470_v38 }
 0x748   : > { %v9329_v27 = vmax.f32 %v9297_v24, 0.0  ;;  %v9567_v14 = vsel %vm9566_vm7, %v15715_v11, -inf }
 0x749   : > { %v9209_v25 = vpop.f32.mrf.mxu2  ;;  %9568 = vmax.xlane.f32.xlu0 %v9567_v14  ;;  %v9033_v7 = vpop.f32.mrf.mxu0 }
 0x74a   : > { %v9210_v47 = vadd.f32 %v9209_v25, %v9121_v60  ;;  %11951 = vmatmul.msk.f32.gmra.mxu3 %vm9356_vm6, %v9329_v27  ;;  %v9122_v41 = vpop.f32.mrf.mxu1  ;;  %v9034_v6 = vadd.f32 %v9033_v7, %v8945_v8  ;;  %v16289_v25 = vld [vmem:[#allocation21_spill] sm:$0xff] }
 0x74c   : > { %v9262_v42 = vadd.f32 %v9210_v47, %v16286_v46  ;;  %v9123_v5 = vadd.f32 %v9122_v41, %v9034_v6 }
 0x74d   : > { %v9473_v30 = vpop.f32.mrf.mxu3 }
 0x74e   : > { %v9298_v20 = vadd.f32 %v15505_v57, %v9262_v42  ;;  %v15725_v9 = vadd.f32 %v15710_v19, %v9473_v30 }
 0x750   : > { %v9330_v17 = vmax.f32 %v9298_v20, 0.0  ;;  %v9570_v40 = vsel %vm9566_vm7, %v15725_v9, -inf }
 0x751   : > { %v9211_v22 = vpop.f32.mrf.mxu2  ;;  %9571 = vmax.xlane.f32.xlu0 %v9570_v40  ;;  %v9036_v18 = vpop.f32.mrf.mxu0  ;;  %v16290_v40 = vld [vmem:[#allocation22_spill] sm:$0xff] }
 0x752   : > { %v9212_v34 = vadd.f32 %v9211_v22, %v9123_v5  ;;  %11952 = vmatmul.msk.f32.gmra.mxu3 %vm9356_vm6, %v9330_v17  ;;  %v9125_v36 = vpop.f32.mrf.mxu1  ;;  %v9037_v61 = vadd.f32 %v9036_v18, %v8948_v2 }
 0x754   : > { %v9263_v32 = vadd.f32 %v9212_v34, %v16287_v50  ;;  %v9126_v49 = vadd.f32 %v9125_v36, %v9037_v61 }
 0x755   : > { %v9476_v52 = vpop.f32.mrf.mxu3 }
 0x756   : > { %v9299_v56 = vadd.f32 %v15505_v57, %v9263_v32  ;;  %v15735_v15 = vadd.f32 %v15710_v19, %v9476_v52  ;;  %v8958_v52 = vadd.f32 %v15606_v44, %v16291_v62 }
 0x758   : > { %v9331_v63 = vmax.f32 %v9299_v56, 0.0  ;;  %v9573_v54 = vsel %vm9566_vm7, %v15735_v15, -inf }
 0x759   : > { %v9214_v28 = vpop.f32.mrf.mxu2  ;;  %9574 = vmax.xlane.f32.xlu1 %v9573_v54  ;;  %v9038_v3 = vpop.f32.mrf.mxu0  ;;  %v16292_v54 = vld [vmem:[#allocation23_spill] sm:$0xff] }
 0x75a   : > { %v9215_v4 = vadd.f32 %v9214_v28, %v9126_v49  ;;  %11953 = vmatmul.msk.f32.gmra.mxu3 %vm9356_vm6, %v9331_v63  ;;  %v9127_v1 = vpop.f32.mrf.mxu1  ;;  %v9039_v29 = vadd.f32 %v9038_v3, %v8950_v21 }
 0x75c   : > { %v9264_v39 = vadd.f32 %v9215_v4, %v16288_v10  ;;  %v9128_v38 = vadd.f32 %v9127_v1, %v9039_v29 }
 0x75d   : > { %v9479_v37 = vpop.f32.mrf.mxu3 }
 0x75e   : > { %v9300_v0 = vadd.f32 %v15505_v57, %v9264_v39  ;;  %v15745_v26 = vadd.f32 %v15710_v19, %v9479_v37  ;;  %v16293_v37 = vld [vmem:[#allocation33_spill] sm:$0xff] }
 0x760   : > { %v9332_v33 = vmax.f32 %v9300_v0, 0.0  ;;  %v9576_v24 = vsel %vm9566_vm7, %v15745_v26, -inf  ;;  %v8960_v0 = vadd.f32 %v15622_v45, %v16293_v37 }
 0x761   : > { %v9216_v55 = vpop.f32.mrf.mxu2  ;;  %9577 = vmax.xlane.f32.xlu1 %v9576_v24  ;;  %v9041_v60 = vpop.f32.mrf.mxu0 }
 0x762   : > { %v9217_v27 = vadd.f32 %v9216_v55, %v9128_v38  ;;  %11954 = vmatmul.msk.f32.gmra.mxu3 %vm9356_vm6, %v9332_v33  ;;  %v9130_v14 = vpop.f32.mrf.mxu1  ;;  %v9042_v47 = vadd.f32 %v9041_v60, %v8953_v43  ;;  %v16294_v55 = vld [vmem:[#allocation24_spill] sm:$0xff] }
 0x764   : > { %v9265_v8 = vadd.f32 %v9217_v27, %v16289_v25  ;;  %v9131_v6 = vadd.f32 %v9130_v14, %v9042_v47 }
 0x765   : > { %v9482_v7 = vpop.f32.mrf.mxu3 }
 0x766   : > { %v9301_v41 = vadd.f32 %v15505_v57, %v9265_v8  ;;  %v15755_v46 = vadd.f32 %v15710_v19, %v9482_v7 }
 0x768   : > { %v9333_v42 = vmax.f32 %v9301_v41, 0.0  ;;  %v9579_v30 = vsel %vm9566_vm7, %v15755_v46, -inf  ;;  %v8963_v41 = vadd.f32 %v15642_v31, %v15436_v13  ;;  %v16296_v31 = vld [vmem:[#allocation34_spill] sm:$0xff] }
 0x769   : > { %v9219_v16 = vpop.f32.mrf.mxu2  ;;  %9580 = vmax.xlane.f32.xlu2 %v9579_v30  ;;  %v9043_v17 = vpop.f32.mrf.mxu0 }
 0x76a   : > { %v9220_v20 = vadd.f32 %v9219_v16, %v9131_v6  ;;  %11955 = vmatmul.msk.f32.gmra.mxu3 %vm9356_vm6, %v9333_v42  ;;  %v9132_v5 = vpop.f32.mrf.mxu1  ;;  %v9044_v2 = vadd.f32 %v9043_v17, %v8955_v51  ;;  %v16295_v16 = vld [vmem:[#allocation25_spill] sm:$0xff] }
 0x76c   : > { %v9266_v22 = vadd.f32 %v9220_v20, %v16290_v40  ;;  %v9133_v32 = vadd.f32 %v9132_v5, %v9044_v2 }
 0x76d   : > { %v9485_v34 = vpop.f32.mrf.mxu3 }
 0x76e   : > { %v9302_v18 = vadd.f32 %v15505_v57, %v9266_v22  ;;  %v15765_v36 = vadd.f32 %v15710_v19, %v9485_v34 }
 0x770   : > { %v9334_v50 = vmax.f32 %v9302_v18, 0.0  ;;  %v9582_v61 = vsel %vm9566_vm7, %v15765_v36, -inf  ;;  %v8965_v18 = vadd.f32 %v15658_v53, %v16296_v31 }
 0x771   : > { %v9221_v58 = vpop.f32.mrf.mxu2  ;;  %9583 = vmax.xlane.f32.xlu2 %v9582_v61  ;;  %v9046_v63 = vpop.f32.mrf.mxu0 }
 0x772   : > { %v9222_v56 = vadd.f32 %v9221_v58, %v9133_v32  ;;  %11956 = vmatmul.msk.f32.gmra.mxu3 %vm9356_vm6, %v9334_v50  ;;  %v9135_v49 = vpop.f32.mrf.mxu1  ;;  %v9047_v21 = vadd.f32 %v9046_v63, %v8958_v52  ;;  %v16297_v58 = vld [vmem:[#allocation26_spill] sm:$0xff] }
 0x774   : > { %v9267_v28 = vadd.f32 %v9222_v56, %v16292_v54  ;;  %v9136_v39 = vadd.f32 %v9135_v49, %v9047_v21 }
 0x775   : > { %v9488_v4 = vpop.f32.mrf.mxu3 }
 0x776   : > { %v9303_v3 = vadd.f32 %v15505_v57, %v9267_v28  ;;  %v15775_v1 = vadd.f32 %v15710_v19, %v9488_v4  ;;  %v16298_v4 = vld [vmem:[#allocation35_spill] sm:$0xff] }
 0x778   : > { %v9335_v10 = vmax.f32 %v9303_v3, 0.0  ;;  %v9585_v29 = vsel %vm9566_vm7, %v15775_v1, -inf  ;;  %v8968_v3 = vadd.f32 %v15676_v35, %v16298_v4 }
 0x779   : > { %v9224_v44 = vpop.f32.mrf.mxu2  ;;  %9586 = vmax.xlane.f32.xlu0 %v9585_v29  ;;  %v9048_v38 = vpop.f32.mrf.mxu0 }
 0x77a   : > { %v9225_v33 = vadd.f32 %v9224_v44, %v9136_v39  ;;  %11957 = vmatmul.msk.f32.gmra.mxu3 %vm9356_vm6, %v9335_v10  ;;  %v9137_v24 = vpop.f32.mrf.mxu1  ;;  %v9049_v27 = vadd.f32 %v9048_v38, %v8960_v0  ;;  %v16299_v44 = vld [vmem:[#allocation27_spill] sm:$0xff] }
 0x77c   : > { %v9268_v43 = vadd.f32 %v9225_v33, %v16294_v55  ;;  %v9138_v47 = vadd.f32 %v9137_v24, %v9049_v27  ;;  %v12680_v33 = vld [vmem:[%s16220_s2] ss:$0 sm:$0xff] }
 0x77d   : > { %v9491_v60 = vpop.f32.mrf.mxu3 }
 0x77e   : > { %v9304_v14 = vadd.f32 %v15505_v57, %v9268_v43  ;;  %v15785_v25 = vadd.f32 %v15710_v19, %v9491_v60  ;;  %v8970_v60 = vadd.f32 %v15683_v23, %v15469_v48  ;;  %v16301_v48 = vld [vmem:[#allocation36_spill] sm:$0xff] }
 0x77f   : > { %v8973_v23 = vadd.f32 %v15693_v59, %v16301_v48  ;;  %v16303_v59 = vld [vmem:[#allocation37_spill] sm:$0xff] }
 0x780   : > { %v9336_v8 = vmax.f32 %v9304_v14, 0.0  ;;  %v9588_v7 = vsel %vm9566_vm7, %v15785_v25, -inf }
 0x781   : > { %v9226_v45 = vpop.f32.mrf.mxu2  ;;  %9589 = vmax.xlane.f32.xlu1 %v9588_v7  ;;  %v9051_v6 = vpop.f32.mrf.mxu0  ;;  %v16300_v7 = vld [vmem:[#allocation28_spill] sm:$0xff] }
 0x782   : > { %v9227_v42 = vadd.f32 %v9226_v45, %v9138_v47  ;;  %11958 = vmatmul.msk.f32.gmra.mxu3 %vm9356_vm6, %v9336_v8  ;;  %v9140_v30 = vpop.f32.mrf.mxu1  ;;  %v9052_v20 = vadd.f32 %v9051_v6, %v8963_v41 }
 0x784   : > { %v9269_v51 = vadd.f32 %v9227_v42, %v16295_v16  ;;  %v9141_v2 = vadd.f32 %v9140_v30, %v9052_v20 }
 0x785   : > { %v9494_v17 = vpop.f32.mrf.mxu3 }
 0x786   : > { %v9305_v5 = vadd.f32 %v15505_v57, %v9269_v51  ;;  %v15795_v40 = vadd.f32 %v15710_v19, %v9494_v17 }
 0x788   : > { %v9337_v22 = vmax.f32 %v9305_v5, 0.0  ;;  %v9591_v34 = vsel %vm9566_vm7, %v15795_v40, -inf }
 0x789   : > { %v9229_v13 = vpop.f32.mrf.mxu2  ;;  %9592 = vmax.xlane.f32.xlu2 %v9591_v34  ;;  %v9053_v32 = vpop.f32.mrf.mxu0  ;;  %v16302_v34 = vld [vmem:[#allocation29_spill] sm:$0xff] }
 0x78a   : > { %v9230_v50 = vadd.f32 %v9229_v13, %v9141_v2  ;;  %11959 = vmatmul.msk.f32.gmra.mxu3 %vm9356_vm6, %v9337_v22  ;;  %v9142_v61 = vpop.f32.mrf.mxu1  ;;  %v9054_v52 = vadd.f32 %v9053_v32, %v8965_v18 }
 0x78c   : > { %v9270_v62 = vadd.f32 %v9230_v50, %v16297_v58  ;;  %v9143_v28 = vadd.f32 %v9142_v61, %v9054_v52 }
 0x78d   : > { %v9497_v56 = vpop.f32.mrf.mxu3 }
 0x78e   : > { %v9306_v63 = vadd.f32 %v15505_v57, %v9270_v62  ;;  %v15805_v49 = vadd.f32 %v15710_v19, %v9497_v56  ;;  %v8975_v56 = vadd.f32 %v15701_v12, %v16303_v59 }
 0x790   : > { %v9338_v54 = vmax.f32 %v9306_v63, 0.0  ;;  %v9594_v21 = vsel %vm9566_vm7, %v15805_v49, -inf }
 0x791   : > { %v9231_v53 = vpop.f32.mrf.mxu2  ;;  %9595 = vmax.xlane.f32.xlu0 %v9594_v21  ;;  %v9056_v39 = vpop.f32.mrf.mxu0 }
 0x792   : > { %v9232_v10 = vadd.f32 %v9231_v53, %v9143_v28  ;;  %11960 = vmatmul.msk.f32.gmra.mxu3 %vm9356_vm6, %v9338_v54  ;;  %v9145_v29 = vpop.f32.mrf.mxu1  ;;  %v9057_v37 = vadd.f32 %v9056_v39, %v8968_v3  ;;  %v16304_v28 = vld [vmem:[#allocation30_spill] sm:$0xff] }
 0x794   : > { %v9271_v57 = vadd.f32 %v9232_v10, %v16299_v44  ;;  %v9146_v43 = vadd.f32 %v9145_v29, %v9057_v37 }
 0x795   : > { %v9500_v0 = vpop.f32.mrf.mxu3 }
 0x796   : > { %v9307_v38 = vadd.f32 %v12680_v33, %v9271_v57  ;;  %v15817_v24 = vadd.f32 %v15710_v19, %v9500_v0  ;;  %v16305_v0 = vld [vmem:[#allocation31_spill] sm:$0xff] }
 0x798   : > { %v9339_v55 = vmax.f32 %v9307_v38, 0.0  ;;  %v9597_v35 = vsel %vm9566_vm7, %v15817_v24, -inf }
 0x799   : > { %v9234_v27 = vpop.f32.mrf.mxu2  ;;  %9598 = vmax.xlane.f32.xlu1 %v9597_v35  ;;  %v9058_v8 = vpop.f32.mrf.mxu0 }
 0x79a   : > { %v9235_v14 = vadd.f32 %v9234_v27, %v9146_v43  ;;  %11961 = vmatmul.msk.f32.gmra.mxu3 %vm9356_vm6, %v9339_v55  ;;  %v9147_v47 = vpop.f32.mrf.mxu1  ;;  %v9059_v41 = vadd.f32 %v9058_v8, %v8970_v60 }
 0x79c   : > { %v9272_v45 = vadd.f32 %v9235_v14, %v16300_v7  ;;  %v9148_v51 = vadd.f32 %v9147_v47, %v9059_v41 }
 0x79d   : > { %v9503_v42 = vpop.f32.mrf.mxu3 }
 0x79e   : > { %v9308_v6 = vadd.f32 %v12680_v33, %v9272_v45  ;;  %v15826_v30 = vadd.f32 %v15710_v19, %v9503_v42 }
 0x7a0   : > { %v9340_v16 = vmax.f32 %v9308_v6, 0.0  ;;  %v9600_v20 = vsel %vm9566_vm7, %v15826_v30, -inf }
 0x7a1   : > { %v9236_v17 = vpop.f32.mrf.mxu2  ;;  %9601 = vmax.xlane.f32.xlu2 %v9600_v20  ;;  %v9061_v22 = vpop.f32.mrf.mxu0 }
 0x7a2   : > { %v9237_v5 = vadd.f32 %v9236_v17, %v9148_v51  ;;  %11962 = vmatmul.msk.f32.gmra.mxu3 %vm9356_vm6, %v9340_v16  ;;  %v9150_v2 = vpop.f32.mrf.mxu1  ;;  %v9062_v31 = vadd.f32 %v9061_v22, %v8973_v23 }
 0x7a4   : > { %v9273_v13 = vadd.f32 %v9237_v5, %v16302_v34  ;;  %v9151_v58 = vadd.f32 %v9150_v2, %v9062_v31 }
 0x7a5   : > { %v9506_v18 = vpop.f32.mrf.mxu3 }
 0x7a6   : > { %v9309_v50 = vadd.f32 %v12680_v33, %v9273_v13  ;;  %v15835_v32 = vadd.f32 %v15710_v19, %v9506_v18 }
 0x7a8   : > { %v9341_v61 = vmax.f32 %v9309_v50, 0.0  ;;  %v9603_v62 = vsel %vm9566_vm7, %v15835_v32, -inf }
 0x7a9   : > { %v9239_v52 = vpop.f32.mrf.mxu2  ;;  %9604 = vmax.xlane.f32.xlu0 %v9603_v62  ;;  %v9063_v54 = vpop.f32.mrf.mxu0 }
 0x7aa   : > { %v9240_v63 = vadd.f32 %v9239_v52, %v9151_v58  ;;  %11963 = vmatmul.msk.f32.gmra.mxu3 %vm9356_vm6, %v9341_v61  ;;  %v9064_v53 = vadd.f32 %v9063_v54, %v8975_v56  ;;  %v9152_v4 = vpop.f32.mrf.mxu1 }
 0x7ac   : > { %v9274_v21 = vadd.f32 %v9240_v63, %v16304_v28  ;;  %v9153_v44 = vadd.f32 %v9152_v4, %v9064_v53 }
 0x7ad   : > { %v9509_v3 = vpop.f32.mrf.mxu3 }
 0x7ae   : > { %v9310_v10 = vadd.f32 %v12680_v33, %v9274_v21  ;;  %v15844_v39 = vadd.f32 %v15710_v19, %v9509_v3 }
 0x7b0   : > { %v9342_v29 = vmax.f32 %v9310_v10, 0.0  ;;  %v9606_v57 = vsel %vm9566_vm7, %v15844_v39, -inf }
 0x7b1   : > { %v9241_v37 = vpop.f32.mrf.mxu2  ;;  %9607 = vmax.xlane.f32.xlu1 %v9606_v57 }
 0x7b2   : > { %v9242_v12 = vadd.f32 %v9241_v37, %v9153_v44  ;;  %11964 = vmatmul.msk.f32.gmra.mxu3 %vm9356_vm6, %v9342_v29 }
 0x7b4   : > { %v9275_v38 = vadd.f32 %v9242_v12, %v16305_v0 }
 0x7b5   : > { %v9512_v55 = vpop.f32.mrf.mxu3 }
 0x7b6   : > { %v9311_v43 = vadd.f32 %v12680_v33, %v9275_v38  ;;  %v15851_v35 = vadd.f32 %v15710_v19, %v9512_v55 }
 0x7b8   : > { %v9343_v27 = vmax.f32 %v9311_v43, 0.0  ;;  %v9609_v60 = vsel %vm9566_vm7, %v15851_v35, -inf }
 0x7b9   : > { %9610 = vmax.xlane.f32.xlu2 %v9609_v60 }
 0x7ba   : > { %11965 = vmatmul.msk.f32.gmra.mxu3 %vm9356_vm6, %v9343_v27 }
 0x7bc   : > { %v9569_v14 = vpop.xlane.xlu0 %9568 }
 0x7bd   : > { %v15857_v8 = vsub.f32 %v15715_v11, %v9569_v14  ;;  %v9515_v47 = vpop.f32.mrf.mxu3 }
 0x7be   : > { %v15860_v7 = vadd.f32 %v15710_v19, %v9515_v47 }
 0x7bf   : > { %v9695_v33 = vmul.f32 1.442695, %v15857_v8 }
 0x7c0   : > { %v9612_v45 = vsel %vm9566_vm7, %v15860_v7, -inf }
 0x7c1   : > { %12392 = vpow2.f32 %v9695_v33  ;;  %9613 = vmax.xlane.f32.xlu0 %v9612_v45 }
 0x7c4   : > { %v9572_v41 = vpop.xlane.xlu0 %9571 }
 0x7c5   : > { %v15866_v42 = vsub.f32 %v15725_v9, %v9572_v41  ;;  %v9518_v6 = vpop.f32.mrf.mxu3 }
 0x7c6   : > { %v15869_v16 = vadd.f32 %v15710_v19, %v9518_v6 }
 0x7c7   : > { %v12393_v11 = vpop.eup %12392  ;;  %v9697_v51 = vmul.f32 1.442695, %v15866_v42 }
 0x7c8   : > { %v9615_v20 = vsel %vm9566_vm7, %v15869_v16, -inf  ;;  %v9759_v17 = vsel %vm9566_vm7, %v12393_v11, 0.0 }
 0x7c9   : > { %12394 = vpow2.f32 %v9697_v51  ;;  %9616 = vmax.xlane.f32.xlu1 %v9615_v20  ;;  %9760 = vadd.xlane.f32.xlu2 %v9759_v17 }
 0x7cc   : > { %v9575_v48 = vpop.xlane.xlu1 %9574 }
 0x7cd   : > { %v15876_v23 = vsub.f32 %v15735_v15, %v9575_v48  ;;  %v9521_v9 = vpop.f32.mrf.mxu3 }
 0x7ce   : > { %v15879_v5 = vadd.f32 %v15710_v19, %v9521_v9 }
 0x7cf   : > { %v12395_v22 = vpop.eup %12394  ;;  %v9699_v2 = vmul.f32 1.442695, %v15876_v23 }
 0x7d0   : > { %v9618_v34 = vsel %vm9566_vm7, %v15879_v5, -inf  ;;  %v9762_v13 = vsel %vm9566_vm7, %v12395_v22, 0.0 }
 0x7d1   : > { %12396 = vpow2.f32 %v9699_v2  ;;  %9619 = vmax.xlane.f32.xlu2 %v9618_v34  ;;  %9763 = vadd.xlane.f32.xlu0 %v9762_v13 }
 0x7d4   : > { %v9578_v31 = vpop.xlane.xlu1 %9577 }
 0x7d5   : > { %v15886_v18 = vsub.f32 %v15745_v26, %v9578_v31  ;;  %v9524_v15 = vpop.f32.mrf.mxu3 }
 0x7d6   : > { %v15889_v50 = vadd.f32 %v15710_v19, %v9524_v15 }
 0x7d7   : > { %v12397_v61 = vpop.eup %12396  ;;  %v9701_v58 = vmul.f32 1.442695, %v15886_v18 }
 0x7d8   : > { %v9765_v62 = vsel %vm9566_vm7, %v12397_v61, 0.0  ;;  %v9621_v52 = vsel %vm9566_vm7, %v15889_v50, -inf }
 0x7d9   : > { %12398 = vpow2.f32 %v9701_v58  ;;  %9766 = vadd.xlane.f32.xlu1 %v9765_v62  ;;  %9622 = vmax.xlane.f32.xlu0 %v9621_v52 }
 0x7dc   : > { %v9581_v59 = vpop.xlane.xlu2 %9580 }
 0x7dd   : > { %v15896_v56 = vsub.f32 %v15755_v46, %v9581_v59  ;;  %v9527_v26 = vpop.f32.mrf.mxu3 }
 0x7de   : > { %v15899_v63 = vadd.f32 %v15710_v19, %v9527_v26 }
 0x7df   : > { %v12399_v54 = vpop.eup %12398  ;;  %v9703_v28 = vmul.f32 1.442695, %v15896_v56 }
 0x7e0   : > { %v9624_v21 = vsel %vm9566_vm7, %v15899_v63, -inf  ;;  %v9768_v53 = vsel %vm9566_vm7, %v12399_v54, 0.0 }
 0x7e1   : > { %12400 = vpow2.f32 %v9703_v28  ;;  %9625 = vmax.xlane.f32.xlu1 %v9624_v21  ;;  %9769 = vadd.xlane.f32.xlu2 %v9768_v53 }
 0x7e4   : > { %v9584_v4 = vpop.xlane.xlu2 %9583 }
 0x7e5   : > { %v15906_v3 = vsub.f32 %v15765_v36, %v9584_v4  ;;  %v9530_v46 = vpop.f32.mrf.mxu3 }
 0x7e6   : > { %v15909_v10 = vadd.f32 %v15710_v19, %v9530_v46 }
 0x7e7   : > { %v12401_v29 = vpop.eup %12400  ;;  %v9705_v44 = vmul.f32 1.442695, %v15906_v3 }
 0x7e8   : > { %v9627_v57 = vsel %vm9566_vm7, %v15909_v10, -inf  ;;  %v9771_v37 = vsel %vm9566_vm7, %v12401_v29, 0.0 }
 0x7e9   : > { %12402 = vpow2.f32 %v9705_v44  ;;  %9628 = vmax.xlane.f32.xlu2 %v9627_v57  ;;  %9772 = vadd.xlane.f32.xlu0 %v9771_v37 }
 0x7ec   : > { %v9587_v12 = vpop.xlane.xlu0 %9586 }
 0x7ed   : > { %v15916_v0 = vsub.f32 %v15775_v1, %v9587_v12  ;;  %v9533_v36 = vpop.f32.mrf.mxu3 }
 0x7ee   : > { %v15919_v38 = vadd.f32 %v15710_v19, %v9533_v36 }
 0x7ef   : > { %v12403_v55 = vpop.eup %12402  ;;  %v9707_v43 = vmul.f32 1.442695, %v15916_v0 }
 0x7f0   : > { %v9774_v27 = vsel %vm9566_vm7, %v12403_v55, 0.0  ;;  %v9630_v60 = vsel %vm9566_vm7, %v15919_v38, -inf }
 0x7f1   : > { %12404 = vpow2.f32 %v9707_v43  ;;  %9775 = vadd.xlane.f32.xlu1 %v9774_v27  ;;  %9631 = vmax.xlane.f32.xlu0 %v9630_v60 }
 0x7f4   : > { %v9590_v14 = vpop.xlane.xlu1 %9589 }
 0x7f5   : > { %v15926_v47 = vsub.f32 %v15785_v25, %v9590_v14  ;;  %v9536_v1 = vpop.f32.mrf.mxu3 }
 0x7f6   : > { %v15929_v33 = vadd.f32 %v15710_v19, %v9536_v1 }
 0x7f7   : > { %v12405_v45 = vpop.eup %12404  ;;  %v9709_v41 = vmul.f32 1.442695, %v15926_v47 }
 0x7f8   : > { %v9633_v6 = vsel %vm9566_vm7, %v15929_v33, -inf  ;;  %v9777_v11 = vsel %vm9566_vm7, %v12405_v45, 0.0 }
 0x7f9   : > { %12406 = vpow2.f32 %v9709_v41  ;;  %9634 = vmax.xlane.f32.xlu1 %v9633_v6  ;;  %9778 = vadd.xlane.f32.xlu2 %v9777_v11 }
 0x7fc   : > { %v9593_v51 = vpop.xlane.xlu2 %9592 }
 0x7fd   : > { %v15936_v20 = vsub.f32 %v15795_v40, %v9593_v51  ;;  %v9539_v25 = vpop.f32.mrf.mxu3 }
 0x7fe   : > { %v15939_v17 = vadd.f32 %v15710_v19, %v9539_v25 }
 0x7ff   : > { %v12407_v48 = vpop.eup %12406  ;;  %v9711_v9 = vmul.f32 1.442695, %v15936_v20 }
 0x800   : > { %v9780_v22 = vsel %vm9566_vm7, %v12407_v48, 0.0  ;;  %v9636_v2 = vsel %vm9566_vm7, %v15939_v17, -inf }
 0x801   : > { %12408 = vpow2.f32 %v9711_v9  ;;  %9781 = vadd.xlane.f32.xlu0 %v9780_v22  ;;  %9637 = vmax.xlane.f32.xlu2 %v9636_v2 }
 0x804   : > { %v9596_v34 = vpop.xlane.xlu0 %9595 }
 0x805   : > { %v15946_v13 = vsub.f32 %v15805_v49, %v9596_v34  ;;  %v9542_v40 = vpop.f32.mrf.mxu3 }
 0x806   : > { %v15949_v31 = vadd.f32 %v15710_v19, %v9542_v40 }
 0x807   : > { %v12409_v15 = vpop.eup %12408  ;;  %v9713_v61 = vmul.f32 1.442695, %v15946_v13 }
 0x808   : > { %v9783_v58 = vsel %vm9566_vm7, %v12409_v15, 0.0  ;;  %v9639_v62 = vsel %vm9566_vm7, %v15949_v31, -inf }
 0x809   : > { %12410 = vpow2.f32 %v9713_v61  ;;  %9784 = vadd.xlane.f32.xlu1 %v9783_v58  ;;  %9640 = vmax.xlane.f32.xlu0 %v9639_v62 }
 0x80c   : > { %v9599_v52 = vpop.xlane.xlu1 %9598 }
 0x80d   : > { %v15956_v59 = vsub.f32 %v15817_v24, %v9599_v52  ;;  %v9545_v49 = vpop.f32.mrf.mxu3 }
 0x80e   : > { %v15959_v26 = vadd.f32 %v15710_v19, %v9545_v49 }
 0x80f   : > { %v12411_v54 = vpop.eup %12410  ;;  %v9715_v28 = vmul.f32 1.442695, %v15956_v59 }
 0x810   : > { %v9642_v21 = vsel %vm9566_vm7, %v15959_v26, -inf  ;;  %v9786_v53 = vsel %vm9566_vm7, %v12411_v54, 0.0 }
 0x811   : > { %12412 = vpow2.f32 %v9715_v28  ;;  %9643 = vmax.xlane.f32.xlu1 %v9642_v21  ;;  %9787 = vadd.xlane.f32.xlu2 %v9786_v53 }
 0x814   : > { %v9602_v4 = vpop.xlane.xlu2 %9601 }
 0x815   : > { %v15966_v46 = vsub.f32 %v15826_v30, %v9602_v4  ;;  %v9548_v24 = vpop.f32.mrf.mxu3 }
 0x816   : > { %v15969_v29 = vadd.f32 %v15710_v19, %v9548_v24 }
 0x817   : > { %v12413_v44 = vpop.eup %12412  ;;  %v9717_v57 = vmul.f32 1.442695, %v15966_v46 }
 0x818   : > { %v9789_v37 = vsel %vm9566_vm7, %v12413_v44, 0.0  ;;  %v9645_v12 = vsel %vm9566_vm7, %v15969_v29, -inf }
 0x819   : > { %12414 = vpow2.f32 %v9717_v57  ;;  %9790 = vadd.xlane.f32.xlu0 %v9789_v37  ;;  %9646 = vmax.xlane.f32.xlu2 %v9645_v12 }
 0x81c   : > { %v9605_v36 = vpop.xlane.xlu0 %9604 }
 0x81d   : > { %v15976_v55 = vsub.f32 %v15835_v32, %v9605_v36  ;;  %v9551_v30 = vpop.f32.mrf.mxu3 }
 0x81e   : > { %v15979_v43 = vadd.f32 %v15710_v19, %v9551_v30 }
 0x81f   : > { %v12415_v27 = vpop.eup %12414  ;;  %v9719_v60 = vmul.f32 1.442695, %v15976_v55 }
 0x820   : > { %v9792_v14 = vsel %vm9566_vm7, %v12415_v27, 0.0  ;;  %v9648_v1 = vsel %vm9566_vm7, %v15979_v43, -inf }
 0x821   : > { %12416 = vpow2.f32 %v9719_v60  ;;  %9793 = vadd.xlane.f32.xlu1 %v9792_v14  ;;  %9649 = vmax.xlane.f32.xlu0 %v9648_v1 }
 0x824   : > { %v9608_v51 = vpop.xlane.xlu1 %9607 }
 0x825   : > { %v9554_v45 = vpop.f32.mrf.mxu3  ;;  %v15998_v2 = vsub.f32 %v15844_v39, %v9608_v51 }
 0x826   : > { %v15986_v41 = vadd.f32 %v15710_v19, %v9554_v45 }
 0x827   : > { %v12417_v32 = vpop.eup %12416  ;;  %v9721_v15 = vmul.f32 1.442695, %v15998_v2 }
 0x828   : > { %v9651_v6 = vsel %vm9566_vm7, %v15986_v41, -inf  ;;  %v9795_v11 = vsel %vm9566_vm7, %v12417_v32, 0.0 }
 0x829   : > { %9652 = vmax.xlane.f32.xlu1 %v9651_v6  ;;  %9796 = vadd.xlane.f32.xlu2 %v9795_v11 }
 0x82c   : > { %v9611_v25 = vpop.xlane.xlu2 %9610 }
 0x82d   : > { %v15992_v48 = vsub.f32 %v15851_v35, %v9611_v25  ;;  %v9557_v9 = vpop.f32.mrf.mxu3 }
 0x82e   : > { %v15995_v22 = vadd.f32 %v15710_v19, %v9557_v9 }
 0x82f   : > { %v9723_v34 = vmul.f32 1.442695, %v15992_v48 }
 0x830   : > { %v9654_v40 = vsel %vm9566_vm7, %v15995_v22, -inf }
 0x831   : > { %12418 = vpow2.f32 %v9723_v34  ;;  %9655 = vmax.xlane.f32.xlu2 %v9654_v40 }
 0x832   : > { %12420 = vpow2.f32 %v9721_v15 }
 0x834   : > { %v9614_v61 = vpop.xlane.xlu0 %9613 }
 0x835   : > { %v16005_v35 = vsub.f32 %v15860_v7, %v9614_v61  ;;  %v9560_v58 = vpop.f32.mrf.mxu3 }
 0x836   : > { %v16008_v62 = vadd.f32 %v15710_v19, %v9560_v58 }
 0x837   : > { %v12419_v52 = vpop.eup %12418  ;;  %v9725_v39 = vmul.f32 1.442695, %v16005_v35 }
 0x838   : > { %v9801_v49 = vsel %vm9566_vm7, %v12419_v52, 0.0  ;;  %v9657_v54 = vsel %vm9566_vm7, %v16008_v62, -inf  ;;  %v12421_v7 = vpop.eup %12420 }
 0x839   : > { %12422 = vpow2.f32 %v9725_v39  ;;  %9802 = vadd.xlane.f32.xlu1 %v9801_v49  ;;  %9658 = vmax.xlane.f32.xlu0 %v9657_v54  ;;  %v9798_v37 = vsel %vm9566_vm7, %v12421_v7, 0.0 }
 0x83c   : > { %v9617_v28 = vpop.xlane.xlu1 %9616  ;;  %v16014_v21 = vpop.xlane.xlu2 %9760 }
 0x83d   : > { %v16017_v53 = vsub.f32 %v15869_v16, %v9617_v28  ;;  %v9563_v4 = vpop.f32.mrf.mxu3 }
 0x83e   : > { %v16020_v24 = vadd.f32 %v15710_v19, %v9563_v4 }
 0x83f   : > { %v12423_v44 = vpop.eup %12422  ;;  %v9727_v57 = vmul.f32 1.442695, %v16017_v53 }
 0x840   : > { %v9804_v12 = vsel %vm9566_vm7, %v12423_v44, 0.0  ;;  %v9660_v36 = vsel %vm9566_vm7, %v16020_v24, -inf }
 0x841   : > { %12424 = vpow2.f32 %v9727_v57  ;;  %9799 = vadd.xlane.f32.xlu0 %v9798_v37  ;;  %9805 = vadd.xlane.f32.xlu2 %v9804_v12 }
 0x842   : > { %9661 = vmax.xlane.f32.xlu1 %v9660_v36 }
 0x844   : > { %v9620_v16 = vpop.xlane.xlu2 %9619  ;;  %v16027_v30 = vpop.xlane.xlu0 %9763 }
 0x845   : > { %v16030_v19 = vsub.f32 %v15879_v5, %v9620_v16 }
 0x847   : > { %v12425_v27 = vpop.eup %12424  ;;  %v9729_v60 = vmul.f32 1.442695, %v16030_v19 }
 0x848   : > { %v9807_v14 = vsel %vm9566_vm7, %v12425_v27, 0.0 }
 0x849   : > { %12426 = vpow2.f32 %v9729_v60  ;;  %9808 = vadd.xlane.f32.xlu0 %v9807_v14 }
 0x84c   : > { %v16034_v1 = vpop.xlane.xlu1 %9766  ;;  %v9623_v45 = vpop.xlane.xlu0 %9622 }
 0x84d   : > { %v16037_v32 = vsub.f32 %v15889_v50, %v9623_v45 }
 0x84f   : > { %v12427_v6 = vpop.eup %12426  ;;  %v9731_v11 = vmul.f32 1.442695, %v16037_v32 }
 0x850   : > { %v9810_v51 = vsel %vm9566_vm7, %v12427_v6, 0.0 }
 0x851   : > { %12428 = vpow2.f32 %v9731_v11  ;;  %9811 = vadd.xlane.f32.xlu1 %v9810_v51 }
 0x854   : > { %v9626_v5 = vpop.xlane.xlu1 %9625  ;;  %v16041_v25 = vpop.xlane.xlu2 %9769 }
 0x855   : > { %v16044_v9 = vsub.f32 %v15899_v63, %v9626_v5 }
 0x857   : > { %v12429_v34 = vpop.eup %12428  ;;  %v9733_v40 = vmul.f32 1.442695, %v16044_v9 }
 0x858   : > { %v9813_v15 = vsel %vm9566_vm7, %v12429_v34, 0.0 }
 0x859   : > { %12430 = vpow2.f32 %v9733_v40  ;;  %9814 = vadd.xlane.f32.xlu2 %v9813_v15 }
 0x85c   : > { %v9629_v50 = vpop.xlane.xlu2 %9628  ;;  %v16048_v61 = vpop.xlane.xlu0 %9772 }
 0x85d   : > { %v16051_v58 = vsub.f32 %v15909_v10, %v9629_v50 }
 0x85f   : > { %v12431_v52 = vpop.eup %12430  ;;  %v9735_v39 = vmul.f32 1.442695, %v16051_v58 }
 0x860   : > { %v9816_v49 = vsel %vm9566_vm7, %v12431_v52, 0.0 }
 0x861   : > { %12432 = vpow2.f32 %v9735_v39  ;;  %9817 = vadd.xlane.f32.xlu0 %v9816_v49 }
 0x864   : > { %v16055_v63 = vpop.xlane.xlu1 %9775  ;;  %v9632_v54 = vpop.xlane.xlu0 %9631 }
 0x865   : > { %v16058_v28 = vsub.f32 %v15919_v38, %v9632_v54 }
 0x867   : > { %v12433_v7 = vpop.eup %12432  ;;  %v9737_v4 = vmul.f32 1.442695, %v16058_v28 }
 0x868   : > { %v9819_v44 = vsel %vm9566_vm7, %v12433_v7, 0.0 }
 0x869   : > { %12434 = vpow2.f32 %v9737_v4  ;;  %9820 = vadd.xlane.f32.xlu1 %v9819_v44 }
 0x86c   : > { %v9635_v10 = vpop.xlane.xlu1 %9634  ;;  %v16062_v57 = vpop.xlane.xlu2 %9778 }
 0x86d   : > { %v16065_v37 = vsub.f32 %v15929_v33, %v9635_v10 }
 0x86f   : > { %v12435_v12 = vpop.eup %12434  ;;  %v9739_v36 = vmul.f32 1.442695, %v16065_v37 }
 0x870   : > { %v9822_v16 = vsel %vm9566_vm7, %v12435_v12, 0.0 }
 0x871   : > { %12436 = vpow2.f32 %v9739_v36  ;;  %9823 = vadd.xlane.f32.xlu2 %v9822_v16 }
 0x874   : > { %v9638_v38 = vpop.xlane.xlu2 %9637  ;;  %v16069_v27 = vpop.xlane.xlu0 %9781 }
 0x875   : > { %v16072_v60 = vsub.f32 %v15939_v17, %v9638_v38 }
 0x877   : > { %v12437_v14 = vpop.eup %12436  ;;  %v9741_v45 = vmul.f32 1.442695, %v16072_v60 }
 0x878   : > { %v9825_v6 = vsel %vm9566_vm7, %v12437_v14, 0.0 }
 0x879   : > { %12438 = vpow2.f32 %v9741_v45  ;;  %9826 = vadd.xlane.f32.xlu0 %v9825_v6 }
 0x87c   : > { %v16076_v33 = vpop.xlane.xlu1 %9784  ;;  %v9641_v11 = vpop.xlane.xlu0 %9640 }
 0x87d   : > { %v16079_v51 = vsub.f32 %v15949_v31, %v9641_v11 }
 0x87f   : > { %v12439_v5 = vpop.eup %12438  ;;  %v9743_v34 = vmul.f32 1.442695, %v16079_v51 }
 0x880   : > { %v9828_v40 = vsel %vm9566_vm7, %v12439_v5, 0.0 }
 0x881   : > { %12440 = vpow2.f32 %v9743_v34  ;;  %9829 = vadd.xlane.f32.xlu1 %v9828_v40 }
 0x884   : > { %v9644_v17 = vpop.xlane.xlu1 %9643  ;;  %v16083_v15 = vpop.xlane.xlu2 %9787 }
 0x885   : > { %v16086_v50 = vsub.f32 %v15959_v26, %v9644_v17 }
 0x887   : > { %v12441_v52 = vpop.eup %12440  ;;  %v9745_v39 = vmul.f32 1.442695, %v16086_v50 }
 0x888   : > { %v9831_v49 = vsel %vm9566_vm7, %v12441_v52, 0.0 }
 0x889   : > { %12442 = vpow2.f32 %v9745_v39  ;;  %9832 = vadd.xlane.f32.xlu2 %v9831_v49 }
 0x88c   : > { %v9647_v31 = vpop.xlane.xlu2 %9646  ;;  %v16090_v54 = vpop.xlane.xlu0 %9790 }
 0x88d   : > { %v16093_v7 = vsub.f32 %v15969_v29, %v9647_v31 }
 0x88f   : > { %v12443_v4 = vpop.eup %12442  ;;  %v9747_v44 = vmul.f32 1.442695, %v16093_v7 }
 0x890   : > { %v9834_v10 = vsel %vm9566_vm7, %v12443_v4, 0.0 }
 0x891   : > { %12444 = vpow2.f32 %v9747_v44  ;;  %9835 = vadd.xlane.f32.xlu0 %v9834_v10 }
 0x894   : > { %v16097_v26 = vpop.xlane.xlu1 %9793  ;;  %v9650_v12 = vpop.xlane.xlu0 %9649 }
 0x895   : > { %v16100_v36 = vsub.f32 %v15979_v43, %v9650_v12 }
 0x897   : > { %v12445_v16 = vpop.eup %12444  ;;  %v9749_v38 = vmul.f32 1.442695, %v16100_v36 }
 0x898   : > { %v9837_v14 = vsel %vm9566_vm7, %v12445_v16, 0.0 }
 0x899   : > { %12446 = vpow2.f32 %v9749_v38  ;;  %9838 = vadd.xlane.f32.xlu1 %v9837_v14 }
 0x89c   : > { %v9653_v29 = vpop.xlane.xlu1 %9652  ;;  %v16104_v45 = vpop.xlane.xlu2 %9796 }
 0x89d   : > { %v16107_v6 = vsub.f32 %v15986_v41, %v9653_v29 }
 0x89f   : > { %v12447_v11 = vpop.eup %12446  ;;  %v9751_v5 = vmul.f32 1.442695, %v16107_v6 }
 0x8a0   : > { %v9840_v34 = vsel %vm9566_vm7, %v12447_v11, 0.0 }
 0x8a1   : > { %12448 = vpow2.f32 %v9751_v5  ;;  %9841 = vadd.xlane.f32.xlu2 %v9840_v34 }
 0x8a4   : > { %v9656_v43 = vpop.xlane.xlu2 %9655 }
 0x8a5   : > { %v16112_v40 = vsub.f32 %v15995_v22, %v9656_v43 }
 0x8a7   : > { %v12449_v17 = vpop.eup %12448  ;;  %v9753_v52 = vmul.f32 1.442695, %v16112_v40 }
 0x8a8   : > { %v9843_v39 = vsel %vm9566_vm7, %v12449_v17, 0.0 }
 0x8a9   : > { %12450 = vpow2.f32 %v9753_v52  ;;  %9844 = vadd.xlane.f32.xlu0 %v9843_v39 }
 0x8ac   : > { %v16116_v41 = vpop.xlane.xlu1 %9802  ;;  %v9659_v49 = vpop.xlane.xlu0 %9658 }
 0x8ad   : > { %v16119_v31 = vsub.f32 %v16008_v62, %v9659_v49 }
 0x8af   : > { %v12451_v4 = vpop.eup %12450  ;;  %v9755_v44 = vmul.f32 1.442695, %v16119_v31 }
 0x8b0   : > { %v9846_v10 = vsel %vm9566_vm7, %v12451_v4, 0.0 }
 0x8b1   : > { %12452 = vpow2.f32 %v9755_v44  ;;  %9847 = vadd.xlane.f32.xlu1 %v9846_v10 }
 0x8b4   : > { %v16129_v11 = vpop.xlane.xlu0 %9799  ;;  %v16131_v34 = vpop.xlane.xlu2 %9805 }
 0x8b5   : > { %v9662_v22 = vpop.xlane.xlu1 %9661 }
 0x8b6   : > { %v16124_v12 = vsub.f32 %v16020_v24, %v9662_v22 }
 0x8b7   : > { %v12453_v16 = vpop.eup %12452 }
 0x8b8   : > { %v9757_v38 = vmul.f32 1.442695, %v16124_v12  ;;  %v9849_v14 = vsel %vm9566_vm7, %v12453_v16, 0.0 }
 0x8b9   : > { %9850 = vadd.xlane.f32.xlu2 %v9849_v14 }
 0x8ba   : > { %12454 = vpow2.f32 %v9757_v38 }
 0x8bc   : > { %v9809_v5 = vpop.xlane.xlu0 %9808 }
 0x8bd   : > { %12456 = vlog2.f32 %v9809_v5 }
 0x8c0   : > { %v12455_v62 = vpop.eup %12454 }
 0x8c1   : > { %v9852_v29 = vsel %vm9566_vm7, %v12455_v62, 0.0 }
 0x8c2   : > { %9853 = vadd.xlane.f32.xlu0 %v9852_v29 }
 0x8c3   : > { %v12457_v24 = vpop.eup %12456 }
 0x8c4   : > { %v9812_v43 = vpop.xlane.xlu1 %9811  ;;  %v9888_v17 = vmul.f32 0.6931472, %v12457_v24 }
 0x8c5   : > { %12458 = vlog2.f32 %v9812_v43 }
 0x8c6   : > { %12460 = vlog2.f32 %v16014_v21  ;;  %v9935_v39 = vsub.f32 %v16017_v53, %v9888_v17 }
 0x8cb   : > { %v12459_v49 = vpop.eup %12458 }
 0x8cc   : > { %v9815_v52 = vpop.xlane.xlu2 %9814  ;;  %v12461_v4 = vpop.eup %12460  ;;  %v9890_v44 = vmul.f32 0.6931472, %v12459_v49 }
 0x8cd   : > { %12462 = vlog2.f32 %v9815_v52  ;;  %v9856_v10 = vmul.f32 0.6931472, %v12461_v4 }
 0x8ce   : > { %12464 = vlog2.f32 %v16027_v30  ;;  %v9936_v16 = vsub.f32 %v16030_v19, %v9890_v44 }
 0x8cf   : > { %v9919_v14 = vsub.f32 %v15857_v8, %v9856_v10 }
 0x8d3   : > { %v12463_v38 = vpop.eup %12462 }
 0x8d4   : > { %v9818_v22 = vpop.xlane.xlu0 %9817  ;;  %v12465_v62 = vpop.eup %12464  ;;  %v9892_v21 = vmul.f32 0.6931472, %v12463_v38 }
 0x8d5   : > { %12466 = vlog2.f32 %v9818_v22  ;;  %v9858_v53 = vmul.f32 0.6931472, %v12465_v62 }
 0x8d6   : > { %12468 = vlog2.f32 %v16034_v1  ;;  %v9937_v5 = vsub.f32 %v16037_v32, %v9892_v21 }
 0x8d7   : > { %v9920_v43 = vsub.f32 %v15866_v42, %v9858_v53 }
 0x8db   : > { %v12467_v30 = vpop.eup %12466 }
 0x8dc   : > { %v9821_v29 = vpop.xlane.xlu1 %9820  ;;  %v12469_v24 = vpop.eup %12468  ;;  %v9894_v8 = vmul.f32 0.6931472, %v12467_v30 }
 0x8dd   : > { %12470 = vlog2.f32 %v9821_v29  ;;  %v9860_v19 = vmul.f32 0.6931472, %v12469_v24 }
 0x8de   : > { %12472 = vlog2.f32 %v16041_v25  ;;  %v9938_v52 = vsub.f32 %v16044_v9, %v9894_v8 }
 0x8e2   : > { %9983 = vxpose.xlu2.b32.start [1/16] (narrow) %v9935_v39, 16  ;;  %v9921_v39 = vsub.f32 %v15876_v23, %v9860_v19 }
 0x8e3   : > { %v12471_v1 = vpop.eup %12470 }
 0x8e4   : > { %v9824_v17 = vpop.xlane.xlu2 %9823  ;;  %v12473_v49 = vpop.eup %12472  ;;  %v9896_v42 = vmul.f32 0.6931472, %v12471_v1 }
 0x8e5   : > { %12474 = vlog2.f32 %v9824_v17  ;;  %v9862_v32 = vmul.f32 0.6931472, %v12473_v49 }
 0x8e6   : > { %12476 = vlog2.f32 %v16048_v61  ;;  %v9939_v44 = vsub.f32 %v16051_v58, %v9896_v42 }
 0x8e7   : > { %v9922_v10 = vsub.f32 %v15886_v18, %v9862_v32 }
 0x8ea   : > { %9984 = vxpose.xlu2.b32.cont [2/16] (narrow) %v9936_v16, 16 }
 0x8eb   : > { %9951 = vxpose.xlu1.b32.start [1/16] (narrow) %v9919_v14, 16  ;;  %v12475_v25 = vpop.eup %12474 }
 0x8ec   : > { %v9827_v4 = vpop.xlane.xlu0 %9826  ;;  %v12477_v22 = vpop.eup %12476  ;;  %v9898_v23 = vmul.f32 0.6931472, %v12475_v25 }
 0x8ed   : > { %12478 = vlog2.f32 %v9827_v4  ;;  %v9864_v9 = vmul.f32 0.6931472, %v12477_v22 }
 0x8ee   : > { %12480 = vlog2.f32 %v16055_v63  ;;  %v9940_v38 = vsub.f32 %v16058_v28, %v9898_v23 }
 0x8ef   : > { %v9923_v14 = vsub.f32 %v15896_v56, %v9864_v9 }
 0x8f2   : > { %9985 = vxpose.xlu2.b32.cont [3/16] (narrow) %v9937_v5, 16 }
 0x8f3   : > { %9952 = vxpose.xlu1.b32.cont [2/16] (narrow) %v9920_v43, 16  ;;  %v12479_v61 = vpop.eup %12478 }
 0x8f4   : > { %v9830_v16 = vpop.xlane.xlu1 %9829  ;;  %v12481_v62 = vpop.eup %12480  ;;  %v9900_v18 = vmul.f32 0.6931472, %v12479_v61 }
 0x8f5   : > { %12482 = vlog2.f32 %v9830_v16  ;;  %v9866_v58 = vmul.f32 0.6931472, %v12481_v62 }
 0x8f6   : > { %12484 = vlog2.f32 %v16062_v57  ;;  %v9941_v53 = vsub.f32 %v16065_v37, %v9900_v18 }
 0x8f7   : > { %v9924_v29 = vsub.f32 %v15906_v3, %v9866_v58 }
 0x8fa   : > { %9986 = vxpose.xlu2.b32.cont [4/16] (narrow) %v9938_v52, 16 }
 0x8fb   : > { %9953 = vxpose.xlu1.b32.cont [3/16] (narrow) %v9921_v39, 16  ;;  %v12483_v63 = vpop.eup %12482 }
 0x8fc   : > { %v9833_v21 = vpop.xlane.xlu2 %9832  ;;  %v12485_v5 = vpop.eup %12484  ;;  %v9902_v56 = vmul.f32 0.6931472, %v12483_v63 }
 0x8fd   : > { %12486 = vlog2.f32 %v9833_v21  ;;  %v9868_v28 = vmul.f32 0.6931472, %v12485_v5 }
 0x8fe   : > { %12488 = vlog2.f32 %v16069_v27  ;;  %v9942_v43 = vsub.f32 %v16072_v60, %v9902_v56 }
 0x8ff   : > { %v9925_v24 = vsub.f32 %v15916_v0, %v9868_v28 }
 0x902   : > { %9987 = vxpose.xlu2.b32.cont [5/16] (narrow) %v9939_v44, 16 }
 0x903   : > { %9954 = vxpose.xlu1.b32.cont [4/16] (narrow) %v9922_v10, 16  ;;  %v12487_v57 = vpop.eup %12486 }
 0x904   : > { %v9836_v30 = vpop.xlane.xlu0 %9835  ;;  %v12489_v8 = vpop.eup %12488  ;;  %v9904_v3 = vmul.f32 0.6931472, %v12487_v57 }
 0x905   : > { %12490 = vlog2.f32 %v9836_v30  ;;  %v9870_v37 = vmul.f32 0.6931472, %v12489_v8 }
 0x906   : > { %12492 = vlog2.f32 %v16076_v33  ;;  %v9943_v17 = vsub.f32 %v16079_v51, %v9904_v3 }
 0x907   : > { %v9926_v52 = vsub.f32 %v15926_v47, %v9870_v37 }
 0x90a   : > { %9988 = vxpose.xlu2.b32.cont [6/16] (narrow) %v9940_v38, 16 }
 0x90b   : > { %9955 = vxpose.xlu1.b32.cont [5/16] (narrow) %v9923_v14, 16  ;;  %v12491_v27 = vpop.eup %12490 }
 0x90c   : > { %v9839_v19 = vpop.xlane.xlu1 %9838  ;;  %v12493_v1 = vpop.eup %12492  ;;  %v9906_v0 = vmul.f32 0.6931472, %v12491_v27 }
 0x90d   : > { %12494 = vlog2.f32 %v9839_v19  ;;  %v9872_v60 = vmul.f32 0.6931472, %v12493_v1 }
 0x90e   : > { %12496 = vlog2.f32 %v16083_v15  ;;  %v9944_v49 = vsub.f32 %v16086_v50, %v9906_v0 }
 0x90f   : > { %v9927_v42 = vsub.f32 %v15936_v20, %v9872_v60 }
 0x912   : > { %9989 = vxpose.xlu2.b32.cont [7/16] (narrow) %v9941_v53, 16 }
 0x913   : > { %9956 = vxpose.xlu1.b32.cont [6/16] (narrow) %v9924_v29, 16  ;;  %v12495_v33 = vpop.eup %12494 }
 0x914   : > { %v9842_v39 = vpop.xlane.xlu2 %9841  ;;  %v12497_v32 = vpop.eup %12496  ;;  %v9908_v47 = vmul.f32 0.6931472, %v12495_v33 }
 0x915   : > { %12498 = vlog2.f32 %v9842_v39  ;;  %v9874_v51 = vmul.f32 0.6931472, %v12497_v32 }
 0x916   : > { %12500 = vlog2.f32 %v16090_v54  ;;  %v9945_v44 = vsub.f32 %v16093_v7, %v9908_v47 }
 0x917   : > { %v9928_v25 = vsub.f32 %v15946_v13, %v9874_v51 }
 0x91a   : > { %9990 = vxpose.xlu2.b32.cont [8/16] (narrow) %v9942_v43, 16 }
 0x91b   : > { %9957 = vxpose.xlu1.b32.cont [7/16] (narrow) %v9925_v24, 16  ;;  %v12499_v15 = vpop.eup %12498 }
 0x91c   : > { %v9845_v4 = vpop.xlane.xlu0 %9844  ;;  %v12501_v10 = vpop.eup %12500  ;;  %v9910_v20 = vmul.f32 0.6931472, %v12499_v15 }
 0x91d   : > { %12502 = vlog2.f32 %v9845_v4  ;;  %v9876_v50 = vmul.f32 0.6931472, %v12501_v10 }
 0x91e   : > { %12504 = vlog2.f32 %v16097_v26  ;;  %v9946_v23 = vsub.f32 %v16100_v36, %v9910_v20 }
 0x91f   : > { %v9929_v9 = vsub.f32 %v15956_v59, %v9876_v50 }
 0x922   : > { %9991 = vxpose.xlu2.b32.cont [9/16] (narrow) %v9943_v17, 16 }
 0x923   : > { %9958 = vxpose.xlu1.b32.cont [8/16] (narrow) %v9926_v52, 16  ;;  %v12503_v54 = vpop.eup %12502 }
 0x924   : > { %v9848_v22 = vpop.xlane.xlu1 %9847  ;;  %v12505_v16 = vpop.eup %12504  ;;  %v9912_v13 = vmul.f32 0.6931472, %v12503_v54 }
 0x925   : > { %12506 = vlog2.f32 %v9848_v22  ;;  %v9878_v7 = vmul.f32 0.6931472, %v12505_v16 }
 0x926   : > { %12508 = vlog2.f32 %v16104_v45  ;;  %v9947_v61 = vsub.f32 %v16107_v6, %v9912_v13 }
 0x927   : > { %v9930_v14 = vsub.f32 %v15966_v46, %v9878_v7 }
 0x92a   : > { %9992 = vxpose.xlu2.b32.cont [10/16] (narrow) %v9944_v49, 16 }
 0x92b   : > { %9959 = vxpose.xlu1.b32.cont [9/16] (narrow) %v9927_v42, 16  ;;  %v12507_v26 = vpop.eup %12506 }
 0x92c   : > { %v9851_v38 = vpop.xlane.xlu2 %9850  ;;  %v12509_v62 = vpop.eup %12508  ;;  %v9914_v59 = vmul.f32 0.6931472, %v12507_v26 }
 0x92d   : > { %12510 = vlog2.f32 %v9851_v38  ;;  %v9880_v36 = vmul.f32 0.6931472, %v12509_v62 }
 0x92e   : > { %12512 = vlog2.f32 %v16129_v11  ;;  %v9948_v58 = vsub.f32 %v16112_v40, %v9914_v59 }
 0x92f   : > { %v9931_v21 = vsub.f32 %v15976_v55, %v9880_v36 }
 0x932   : > { %9993 = vxpose.xlu2.b32.cont [11/16] (narrow) %v9945_v44, 16 }
 0x933   : > { %9960 = vxpose.xlu1.b32.cont [10/16] (narrow) %v9928_v25, 16  ;;  %v12511_v45 = vpop.eup %12510 }
 0x934   : > { %v12513_v53 = vpop.eup %12512  ;;  %v9916_v46 = vmul.f32 0.6931472, %v12511_v45 }
 0x935   : > { %v9854_v18 = vpop.xlane.xlu0 %9853  ;;  %v9882_v6 = vmul.f32 0.6931472, %v12513_v53 }
 0x936   : > { %12514 = vlog2.f32 %v9854_v18  ;;  %v9949_v63 = vsub.f32 %v16119_v31, %v9916_v46 }
 0x937   : > { %12516 = vlog2.f32 %v16116_v41  ;;  %v9932_v11 = vsub.f32 %v15998_v2, %v9882_v6 }
 0x938   : > { %12518 = vlog2.f32 %v16131_v34 }
 0x93a   : > { %9994 = vxpose.xlu2.b32.cont [12/16] (narrow) %v9946_v23, 16 }
 0x93b   : > { %9961 = vxpose.xlu1.b32.cont [11/16] (narrow) %v9929_v9, 16 }
 0x93c   : > { %v12515_v29 = vpop.eup %12514 }
 0x93d   : > { %v12517_v5 = vpop.eup %12516  ;;  %v9918_v55 = vmul.f32 0.6931472, %v12515_v29 }
 0x93e   : > { %v9884_v40 = vmul.f32 0.6931472, %v12517_v5  ;;  %v12519_v28 = vpop.eup %12518 }
 0x93f   : > { %v9950_v56 = vsub.f32 %v16124_v12, %v9918_v55  ;;  %v9886_v31 = vmul.f32 0.6931472, %v12519_v28 }
 0x940   : > { %v9933_v41 = vsub.f32 %v15992_v48, %v9884_v40 }
 0x941   : > { %v9934_v30 = vsub.f32 %v16005_v35, %v9886_v31 }
 0x942   : > { %9995 = vxpose.xlu2.b32.cont [13/16] (narrow) %v9947_v61, 16 }
 0x943   : > { %9962 = vxpose.xlu1.b32.cont [12/16] (narrow) %v9930_v14, 16 }
 0x94a   : > { %9996 = vxpose.xlu2.b32.cont [14/16] (narrow) %v9948_v58, 16 }
 0x94b   : > { %9963 = vxpose.xlu1.b32.cont [13/16] (narrow) %v9931_v21, 16 }
 0x952   : > { %9997 = vxpose.xlu2.b32.cont [15/16] (narrow) %v9949_v63, 16 }
 0x953   : > { %9964 = vxpose.xlu1.b32.cont [14/16] (narrow) %v9932_v11, 16 }
 0x95a   : > { %9998 = vxpose.xlu2.b32.end [16/16] (narrow) %v9950_v56, 16 }
 0x95b   : > { %9965 = vxpose.xlu1.b32.cont [15/16] (narrow) %v9933_v41, 16 }
 0x963   : > { %9966 = vxpose.xlu1.b32.end [16/16] (narrow) %v9934_v30, 16 }
 0x97b   : > { %v9999_v2 = vpop.trf.xlu2 }
 0x97c   : > { %10016 = vst [vmem:[%s244_s17 + $0x8] sm:$0xff] %v9999_v2 }
 0x983   : > { %v10000_v34 = vpop.trf.xlu2 }
 0x984   : > { %10018 = vst [vmem:[%s244_s17 + $0x18] sm:$0xff] %v10000_v34 }
 0x98f   : > { %v9967_v43 = vpop.trf.xlu1 }
 0x990   : > { %10015 = vst [vmem:[%s244_s17] sm:$0xff] %v9967_v43 }
 0x997   : > { %v9968_v48 = vpop.trf.xlu1 }
 0x998   : > { %10017 = vst [vmem:[%s244_s17 + $0x10] sm:$0xff] %v9968_v48 }
 0x999   : > { %12708 = shalt.err (!%p12705_p5)
}
 0x99a   : > { %s12761_s15 = smov 256   ;;  %s12762_s17 = smov 16  }
 0x99b   : > { %12333 = dma.vmem_to_hbm [thread:$0]  (%p12833_p4), %s10035_s8, 512, %s10037_s10, %s10020_s11, %s12761_s15, %s12761_s15, %s12762_s17  }
 0x99c PF: > { %p12339_p6 = scmp.ge.s32.totalorder %s12759_s23, 2  ;;  %s10051_s24 = sand.u32 1, %s12739_s18  }
 0x99d   : > { %s10052_s25 = scalar_lea.sflag [#allocation3], %s10051_s24 }
 0x99e   : > { %p12336_p7 = pnand %p12339_p6, %p12840_p8 }
 0x9a0   : > { %p12337_p9 = pneg %p12336_p7 }
 0x9a2   : > { %12734 = dma.done.wait (%p12337_p9), %s10052_s25, 512  }
 0x9a3   : > { %12736 = vsyncadd (%p12337_p9), %s10052_s25, 4294966784  ;;  %s18_s23 = sadd.s32 1, %s12759_s23   ;;  %s16306_s18 = smov %s12743_s19 }
 0x9a4   : > { %p15_p10 = scmp.ge.s32.totalorder %s18_s23, 4   ;;  %s16307_s19 = smov %s12747_s20 }
 0x9a5   : > { %s16308_s20 = smov %s12846_s6  ;;  %s16309_s21 = smov %s12755_s22 }
 0x9a6   : > { %s16310_s22 = smov %s16312_s26  ;;  %17 = sbr.rel (!%p15_p10) target bundleno = 4 (0x4), region = 77 }
 0x9ab   :  { %10058 = vsyncpa [#allocation3], 1 }
 0x9ac   :  { %10060 = vsyncpa [#allocation3 + $0x1], 1 }

</bundles_post_ra>
